<compile_context>
chip_gen: v7x
topology: tpu7x:2x2x1
jax: 0.10.0
libtpu: 0.0.40
codegen_flags: <defaults>
</compile_context>

<pallas_src>
import functools

import jax
import jax.numpy as jnp
from jax.experimental import pallas as pl
from jax.experimental.pallas import tpu as pltpu


# --------------------------- Pallas kernels ---------------------------------

def _make_conv3x3_kernel(nin, H, W, cins, cout):
    """Conv3x3 (stride 1, pad 1) + bias, fused im2col via 9-tap reduction,
    with BN partial statistics in the epilogue.  Supports `nin` input tensors
    whose channels are (virtually) concatenated (concat-free conv)."""

    def kernel(*refs):
        x_refs = refs[:nin]                 # each: (1, H+2, W+2, cin) haloed tile
        w_refs = refs[nin:2 * nin]          # each: (9, cin, cout)
        b_ref = refs[2 * nin]               # (1, cout)
        o_ref = refs[2 * nin + 1]           # (1, H, W, cout)
        s_ref = refs[2 * nin + 2]           # (1, 2, cout)   per-step BN stats

        acc = jnp.zeros((H * W, cout), jnp.float32)
        for x_ref, w_ref, cin in zip(x_refs, w_refs, cins):
            xp = x_ref[0]                   # (H+2, W+2, cin), lives in VMEM
            w = w_ref[...]                  # (9, cin, cout)
            for t in range(9):              # fused im2col: 9 taps, K = cin each
                dh, dw = divmod(t, 3)
                win = xp[dh:dh + H, dw:dw + W, :].reshape(H * W, cin)
                acc = acc + jnp.dot(win, w[t],
                                    preferred_element_type=jnp.float32)

        y = acc + b_ref[...]                                  # (H*W, cout)
        o_ref[0] = y.reshape(H, W, cout).astype(o_ref.dtype)
        # BN partial stats for this grid step; tiny cross-step reduction is
        # done outside (no extra HBM pass over the activation).
        s_ref[0, 0:1, :] = jnp.sum(y, axis=0, keepdims=True)
        s_ref[0, 1:2, :] = jnp.sum(y * y, axis=0, keepdims=True)

    return kernel


def _make_upconv2x2_kernel(H, W, cin, cout):
    """ConvTranspose2d(k=2, s=2): kernel==stride -> pure matmul per pixel.
    The 2x2 spatial interleave is done in-kernel; the output layout
    (H, 2, W, 2*cout) reshapes for free (row-major) to (2H, 2W, cout)."""

    def kernel(x_ref, w_ref, b_ref, o_ref):
        x2d = x_ref[0].reshape(H * W, cin)
        y = jnp.dot(x2d, w_ref[...],
                    preferred_element_type=jnp.float32) + b_ref[...]
        # y: (H*W, 4*cout), columns ordered (kh, kw, c)
        t0 = y[:, :2 * cout].reshape(H, W, 2 * cout)   # kh = 0 -> even rows
        t1 = y[:, 2 * cout:].reshape(H, W, 2 * cout)   # kh = 1 -> odd rows
        o_ref[0, :, 0, :, :] = t0.astype(o_ref.dtype)
        o_ref[0, :, 1, :, :] = t1.astype(o_ref.dtype)

    return kernel


def _scale_shift_relu_kernel(x_ref, sc_ref, sh_ref, o_ref):
    o_ref[...] = jnp.maximum(
        x_ref[...] * sc_ref[...] + sh_ref[...], 0.0).astype(o_ref.dtype)


# --------------------------- kernel wrappers ---------------------------------

def upconv2x2(x_nhwc, wmat, bias4):
    """x: (N, H, W, cin); wmat: (cin, 4*cout) ordered (kh, kw, c); bias4: (4*cout,).
    Returns (N, H, 2, W, 2*cout) which reshapes (metadata-only) to (N,2H,2W,cout)."""
    N, H, W, cin = x_nhwc.shape
    c4 = wmat.shape[1]
    cout = c4 // 4
    kernel = _make_upconv2x2_kernel(H, W, cin, cout)
    return pl.pallas_call(
        kernel,
        out_shape=jax.ShapeDtypeStruct((N, H, 2, W, 2 * cout), jnp.float32),
        grid_spec=pltpu.PrefetchScalarGridSpec(
            num_scalar_prefetch=0,
            grid=(N,),
            in_specs=[
                pl.BlockSpec((1, H, W, cin), lambda n: (n, 0, 0, 0)),
                pl.BlockSpec((cin, c4), lambda n: (0, 0)),
                pl.BlockSpec((1, c4), lambda n: (0, 0)),
            ],
            out_specs=pl.BlockSpec((1, H, 2, W, 2 * cout),
                                   lambda n: (n, 0, 0, 0, 0)),
        ),
        compiler_params=pltpu.CompilerParams(
            dimension_semantics=("parallel",)),
    )(x_nhwc, wmat, bias4.reshape(1, c4))


def conv3x3_bias_stats(x_pads, w_taps, bias):
    """Fused conv3x3(+bias) over (virtually concatenated) inputs + BN partial stats.

    x_pads: list of (N, H+2, W+2, cin_i) halo-padded NHWC inputs.
    w_taps: list of (9, cin_i, cout) per-tap weights.
    Returns (y, stats): y (N, H, W, cout), stats (N, 2, cout) = [sum, sumsq]."""
    N, Hp, Wp, _ = x_pads[0].shape
    H, W = Hp - 2, Wp - 2
    cout = int(bias.shape[0])
    cins = tuple(int(x.shape[-1]) for x in x_pads)
    nin = len(x_pads)
    kernel = _make_conv3x3_kernel(nin, H, W, cins, cout)

    in_specs = (
        [pl.BlockSpec((1, Hp, Wp, c), lambda n: (n, 0, 0, 0)) for c in cins]
        + [pl.BlockSpec(tuple(w.shape), lambda n: (0, 0, 0)) for w in w_taps]
        + [pl.BlockSpec((1, cout), lambda n: (0, 0))]
    )
    out_specs = [
        pl.BlockSpec((1, H, W, cout), lambda n: (n, 0, 0, 0)),
        pl.BlockSpec((1, 2, cout), lambda n: (n, 0, 0)),
    ]
    out_shape = (
        jax.ShapeDtypeStruct((N, H, W, cout), jnp.float32),
        jax.ShapeDtypeStruct((N, 2, cout), jnp.float32),
    )
    # TODO(synk): for large spatial dims, additionally tile H with a +1-halo
    # (pl.Element-indexed rows) so one block never exceeds v7x's 64 MiB VMEM.
    y, stats = pl.pallas_call(
        kernel,
        out_shape=out_shape,
        grid_spec=pltpu.PrefetchScalarGridSpec(
            num_scalar_prefetch=0,
            grid=(N,),
            in_specs=in_specs,
            out_specs=out_specs,
        ),
        compiler_params=pltpu.CompilerParams(
            dimension_semantics=("parallel",)),
    )(*x_pads, *w_taps, bias.reshape(1, cout))
    return y, stats


def _pick_row_tile(m, cap=512):
    """Full M if it fits, else the largest divisor of M that is a multiple of 8
    and <= cap (respects the (8,128) block constraint, big tiles for few steps)."""
    if m <= cap:
        return m
    for t in range(cap, 7, -1):
        if m % t == 0 and t % 8 == 0:
            return t
    return m


def scale_shift_relu(x, scale_row, shift_row):
    """Tiled elementwise y = relu(x*scale + shift) on a lane-dense (M, L) slab."""
    M, L = x.shape
    tm = _pick_row_tile(M)
    return pl.pallas_call(
        _scale_shift_relu_kernel,
        out_shape=jax.ShapeDtypeStruct((M, L), jnp.float32),
        grid_spec=pltpu.PrefetchScalarGridSpec(
            num_scalar_prefetch=0,
            grid=(M // tm,),
            in_specs=[
                pl.BlockSpec((tm, L), lambda i: (i, 0)),
                pl.BlockSpec((1, L), lambda i: (0, 0)),
                pl.BlockSpec((1, L), lambda i: (0, 0)),
            ],
            out_specs=pl.BlockSpec((tm, L), lambda i: (i, 0)),
        ),
        compiler_params=pltpu.CompilerParams(
            dimension_semantics=("parallel",)),
    )(x, scale_row.reshape(1, L), shift_row.reshape(1, L))


def _bn_scale_shift(stats, count, gamma, beta, eps=1e-5):
    """Training-mode BatchNorm scale/shift from accumulated [sum, sumsq] stats."""
    s = jnp.sum(stats, axis=0)              # (2, C)
    mean = s[0] / count
    var = s[1] / count - mean * mean        # biased variance (torch BN, training)
    scale = gamma * jax.lax.rsqrt(var + eps)
    shift = beta - mean * scale
    return scale, shift


# --------------------------- convUp forward ---------------------------------

def conv_up_forward(prepped, input1_nchw, input2_nchw):
    # input1: (N, in_planes//2, H, W) coarse map; input2: (N, in_planes//2, 2H, 2W) skip.
    x1 = jnp.transpose(input1_nchw, (0, 2, 3, 1))    # -> NHWC
    x2 = jnp.transpose(input2_nchw, (0, 2, 3, 1))
    N, H, W, half = x1.shape
    Sh, Sw = 2 * H, 2 * W
    cout = int(prepped["b1"].shape[0])

    # ConvTranspose2d(half, half, 2, stride=2); interleave done in-kernel,
    # the reshape below is metadata-only (no HBM pass).
    up = upconv2x2(x1, prepped["up_wmat"], prepped["up_bias4"])
    up = up.reshape(N, Sh, Sw, half)

    # Conv #1: concat-free (two inputs, two weight halves), BN stats fused.
    x2_pad = jnp.pad(x2, ((0, 0), (1, 1), (1, 1), (0, 0)))
    up_pad = jnp.pad(up, ((0, 0), (1, 1), (1, 1), (0, 0)))
    y1, st1 = conv3x3_bias_stats([x2_pad, up_pad],
                                 [prepped["w1a"], prepped["w1b"]],
                                 prepped["b1"])
    sc1, sh1 = _bn_scale_shift(st1, N * Sh * Sw, prepped["g1"], prepped["be1"])
    y1 = scale_shift_relu(y1.reshape(N * Sh, Sw * cout),
                          jnp.tile(sc1, Sw), jnp.tile(sh1, Sw))
    y1 = y1.reshape(N, Sh, Sw, cout)

    # Conv #2 + BN + ReLU.
    y1_pad = jnp.pad(y1, ((0, 0), (1, 1), (1, 1), (0, 0)))
    y2, st2 = conv3x3_bias_stats([y1_pad], [prepped["w2"]], prepped["b2"])
    sc2, sh2 = _bn_scale_shift(st2, N * Sh * Sw, prepped["g2"], prepped["be2"])
    y2 = scale_shift_relu(y2.reshape(N * Sh, Sw * cout),
                          jnp.tile(sc2, Sw), jnp.tile(sh2, Sw))
    y2 = y2.reshape(N, Sh, Sw, cout)

    return jnp.transpose(y2, (0, 3, 1, 2))           # back to NCHW


# --------------------------- parameters -------------------------------------

def init_params(key, in_planes, out_planes):
    half = in_planes // 2
    ks = jax.random.split(key, 10)

    def nrm(k, shape, scale=0.1):
        return scale * jax.random.normal(k, shape, dtype=jnp.float32)

    return dict(
        up_w=nrm(ks[0], (half, half, 2, 2)),                 # ConvTranspose2d weight
        up_b=nrm(ks[1], (half,)),
        w1=nrm(ks[2], (out_planes, in_planes, 3, 3)),        # Conv2d #1 weight
        b1=nrm(ks[3], (out_planes,)),
        g1=1.0 + nrm(ks[4], (out_planes,)),                  # BN #1 gamma
        be1=nrm(ks[5], (out_planes,)),                       # BN #1 beta
        w2=nrm(ks[6], (out_planes, out_planes, 3, 3)),       # Conv2d #2 weight
        b2=nrm(ks[7], (out_planes,)),
        g2=1.0 + nrm(ks[8], (out_planes,)),
        be2=nrm(ks[9], (out_planes,)),
    )


def prepare_params(params, in_planes, out_planes):
    """One-time weight-side prep (hoisted out of the per-call path)."""
    half = in_planes // 2

    def conv_taps(w):  # (Cout, Cin, 3, 3) -> (9, Cin, Cout), tap index = kh*3+kw
        return jnp.transpose(w, (2, 3, 1, 0)).reshape(9, w.shape[1], w.shape[0])

    w1 = params["w1"]
    return dict(
        # ConvTranspose weight (Cin, Cout, 2, 2) -> (Cin, 4*Cout), cols (kh, kw, c)
        up_wmat=jnp.transpose(params["up_w"], (0, 2, 3, 1)).reshape(half, 4 * half),
        up_bias4=jnp.tile(params["up_b"], 4),
        # split conv1 weight to make the concat implicit: [:half]=skip, [half:]=upsampled
        w1a=conv_taps(w1[:, :half]),
        w1b=conv_taps(w1[:, half:]),
        b1=params["b1"], g1=params["g1"], be1=params["be1"],
        w2=conv_taps(params["w2"]),
        b2=params["b2"], g2=params["g2"], be2=params["be2"],
    )


# --------------------------- pure-JAX reference ------------------------------

def _im2col_3x3(x_nhwc):  # reference only
    N, H, W, C = x_nhwc.shape
    xp = jnp.pad(x_nhwc, ((0, 0), (1, 1), (1, 1), (0, 0)))
    cols = [xp[:, dh:dh + H, dw:dw + W, :] for dh in range(3) for dw in range(3)]
    patches = jnp.stack(cols, axis=3)          # (N, H, W, 9, C)
    return patches.reshape(N * H * W, 9 * C)


def _ref_forward(params, input1_nchw, input2_nchw):
    def conv3(x, w, b):
        N, H, W, C = x.shape
        cols = _im2col_3x3(x)
        wmat = jnp.transpose(w, (2, 3, 1, 0)).reshape(9 * C, -1)
        return (cols @ wmat + b).reshape(N, H, W, -1)

    def bn(x, g, be):
        m = jnp.mean(x, axis=(0, 1, 2), keepdims=True)
        v = jnp.mean(jnp.square(x - m), axis=(0, 1, 2), keepdims=True)
        return jnp.maximum((x - m) / jnp.sqrt(v + 1e-5) * g + be, 0.0)

    x1 = jnp.transpose(input1_nchw, (0, 2, 3, 1))
    x2 = jnp.transpose(input2_nchw, (0, 2, 3, 1))
    N, H, W, Cin = x1.shape
    up = x1.reshape(-1, Cin) @ params["up_w"].reshape(Cin, -1) + jnp.repeat(params["up_b"], 4)
    up = up.reshape(N, H, W, -1, 2, 2).transpose(0, 1, 4, 2, 5, 3).reshape(N, 2 * H, 2 * W, -1)
    x = jnp.concatenate([x2, up], axis=-1)
    y = bn(conv3(x, params["w1"], params["b1"]), params["g1"], params["be1"])
    y = bn(conv3(y, params["w2"], params["b2"]), params["g2"], params["be2"])
    return jnp.transpose(y, (0, 3, 1, 2))


# --------------------------- main -------------------------------------------

if __name__ == "__main__":
    in_planes, out_planes = 4, 4        # convUp(in_planes=4, out_planes=4)
    key = jax.random.PRNGKey(0)
    kp, k1, k2 = jax.random.split(key, 3)
    params = init_params(kp, in_planes, out_planes)
    prepped = prepare_params(params, in_planes, out_planes)

    # input1 is the coarse feature map (2x upsampled); input2 is the skip connection.
    input1 = jax.random.normal(k1, (2, in_planes // 2, 8, 8), dtype=jnp.float32)
    input2 = jax.random.normal(k2, (2, in_planes // 2, 16, 16), dtype=jnp.float32)

    fwd = jax.jit(functools.partial(conv_up_forward, prepped))
    out = jax.block_until_ready(fwd(input1, input2))
    assert out.shape == (2, out_planes, 16, 16), out.shape

    ref = _ref_forward(params, input1, input2)
    max_err = float(jnp.max(jnp.abs(out - ref)))
    assert jnp.allclose(out, ref, atol=2e-4, rtol=2e-4), max_err

    print("KERNEL_OK")
</pallas_src>

<mosaic_0001>
module attributes {stable_mosaic.version = 11 : i64} {
  func.func @kernel(%arg0: i32, %arg1: memref<1x8x8x2xf32, #tpu.memory_space<vmem>>, %arg2: memref<2x8xf32, #tpu.memory_space<vmem>>, %arg3: memref<1x8xf32, #tpu.memory_space<vmem>>, %arg4: memref<1x8x2x8x4xf32, #tpu.memory_space<vmem>>) attributes {dimension_semantics = [#tpu.dimension_semantics<parallel>], iteration_bounds = array<i64: 2>, scalar_prefetch = 0 : i64, scratch_operands = 0 : i64, tpu.core_type = #tpu.core_type<tc>, window_params = [{transform_indices = @transform_0, window_bounds = array<i64: 1, 8, 8, 2>}, {pipeline_mode = #tpu.pipeline_mode<synchronous>, transform_indices = @transform_1, window_bounds = array<i64: 2, 8>}, {pipeline_mode = #tpu.pipeline_mode<synchronous>, transform_indices = @transform_2, window_bounds = array<i64: 1, 8>}, {transform_indices = @transform_3, window_bounds = array<i64: 1, 8, 2, 8, 4>}]} {
    %c0 = arith.constant 0 : index
    %c0_0 = arith.constant 0 : index
    %c0_1 = arith.constant 0 : index
    %c0_2 = arith.constant 0 : index
    %0 = vector.load %arg1[%c0, %c0_0, %c0_1, %c0_2] : memref<1x8x8x2xf32, #tpu.memory_space<vmem>>, vector<1x8x8x2xf32>
    %1 = vector.shape_cast %0 : vector<1x8x8x2xf32> to vector<8x8x2xf32>
    %2 = vector.shape_cast %1 : vector<8x8x2xf32> to vector<64x2xf32>
    %c0_3 = arith.constant 0 : index
    %c0_4 = arith.constant 0 : index
    %3 = vector.load %arg2[%c0_3, %c0_4] : memref<2x8xf32, #tpu.memory_space<vmem>>, vector<2x8xf32>
    %cst = arith.constant dense<0.000000e+00> : vector<64x8xf32>
    %4 = tpu.matmul %2, %3, %cst {dimension_numbers = #tpu.dot_dimension_numbers<[1], [0], [0], [1], [0, 0, 1, 1], [], []>} : vector<64x2xf32>, vector<2x8xf32>, vector<64x8xf32> -> vector<64x8xf32>
    %c0_5 = arith.constant 0 : index
    %c0_6 = arith.constant 0 : index
    %5 = vector.load %arg3[%c0_5, %c0_6] : memref<1x8xf32, #tpu.memory_space<vmem>>, vector<1x8xf32>
    %6 = vector.broadcast %5 : vector<1x8xf32> to vector<64x8xf32>
    %7 = arith.addf %4, %6 : vector<64x8xf32>
    %8 = vector.extract_strided_slice %7 {offsets = [0, 0], sizes = [64, 4], strides = [1, 1]} : vector<64x8xf32> to vector<64x4xf32>
    %9 = vector.shape_cast %8 : vector<64x4xf32> to vector<8x8x4xf32>
    %10 = vector.extract_strided_slice %7 {offsets = [0, 4], sizes = [64, 4], strides = [1, 1]} : vector<64x8xf32> to vector<64x4xf32>
    %11 = vector.shape_cast %10 : vector<64x4xf32> to vector<8x8x4xf32>
    %c0_7 = arith.constant 0 : index
    %c0_8 = arith.constant 0 : index
    %c0_9 = arith.constant 0 : index
    %c0_10 = arith.constant 0 : index
    %c0_11 = arith.constant 0 : index
    %12 = vector.load %arg4[%c0_7, %c0_8, %c0_9, %c0_10, %c0_11] : memref<1x8x2x8x4xf32, #tpu.memory_space<vmem>>, vector<1x8x1x8x4xf32>
    %13 = vector.shape_cast %12 : vector<1x8x1x8x4xf32> to vector<8x8x4xf32>
    %14 = vector.shape_cast %9 : vector<8x8x4xf32> to vector<1x8x1x8x4xf32>
    tpu.vector_store %arg4[%c0_7, %c0_8, %c0_9, %c0_10, %c0_11], %14 {strides = array<i32>} : memref<1x8x2x8x4xf32, #tpu.memory_space<vmem>>, vector<1x8x1x8x4xf32>,
    %c0_12 = arith.constant 0 : index
    %c0_13 = arith.constant 0 : index
    %c1 = arith.constant 1 : index
    %c0_14 = arith.constant 0 : index
    %c0_15 = arith.constant 0 : index
    %15 = vector.load %arg4[%c0_12, %c0_13, %c1, %c0_14, %c0_15] : memref<1x8x2x8x4xf32, #tpu.memory_space<vmem>>, vector<1x8x1x8x4xf32>
    %16 = vector.shape_cast %15 : vector<1x8x1x8x4xf32> to vector<8x8x4xf32>
    %17 = vector.shape_cast %11 : vector<8x8x4xf32> to vector<1x8x1x8x4xf32>
    tpu.vector_store %arg4[%c0_12, %c0_13, %c1, %c0_14, %c0_15], %17 {strides = array<i32>} : memref<1x8x2x8x4xf32, #tpu.memory_space<vmem>>, vector<1x8x1x8x4xf32>,
    return
  }
  func.func @transform_0(%arg0: i32) -> (i32, i32, i32, i32) {
    %c0_i32 = arith.constant 0 : i32
    %c0_i32_0 = arith.constant 0 : i32
    %c0_i32_1 = arith.constant 0 : i32
    %c0_i32_2 = arith.constant 0 : i32
    return %arg0, %c0_i32, %c0_i32_0, %c0_i32_1 : i32, i32, i32, i32
  }
  func.func @transform_1(%arg0: i32) -> (i32, i32) {
    %c0_i32 = arith.constant 0 : i32
    %c0_i32_0 = arith.constant 0 : i32
    %c0_i32_1 = arith.constant 0 : i32
    return %c0_i32, %c0_i32_0 : i32, i32
  }
  func.func @transform_2(%arg0: i32) -> (i32, i32) {
    %c0_i32 = arith.constant 0 : i32
    %c0_i32_0 = arith.constant 0 : i32
    %c0_i32_1 = arith.constant 0 : i32
    return %c0_i32, %c0_i32_0 : i32, i32
  }
  func.func @transform_3(%arg0: i32) -> (i32, i32, i32, i32, i32) {
    %c0_i32 = arith.constant 0 : i32
    %c0_i32_0 = arith.constant 0 : i32
    %c0_i32_1 = arith.constant 0 : i32
    %c0_i32_2 = arith.constant 0 : i32
    %c0_i32_3 = arith.constant 0 : i32
    return %arg0, %c0_i32, %c0_i32_0, %c0_i32_1, %c0_i32_2 : i32, i32, i32, i32, i32
  }
}

module attributes {stable_mosaic.version = 11 : i64} {
  func.func @kernel(%arg0: i32, %arg1: memref<1x18x18x2xf32, #tpu.memory_space<vmem>>, %arg2: memref<1x18x18x2xf32, #tpu.memory_space<vmem>>, %arg3: memref<9x2x4xf32, #tpu.memory_space<vmem>>, %arg4: memref<9x2x4xf32, #tpu.memory_space<vmem>>, %arg5: memref<1x4xf32, #tpu.memory_space<vmem>>, %arg6: memref<1x16x16x4xf32, #tpu.memory_space<vmem>>, %arg7: memref<1x2x4xf32, #tpu.memory_space<vmem>>) attributes {dimension_semantics = [#tpu.dimension_semantics<parallel>], iteration_bounds = array<i64: 2>, scalar_prefetch = 0 : i64, scratch_operands = 0 : i64, tpu.core_type = #tpu.core_type<tc>, window_params = [{transform_indices = @transform_0, window_bounds = array<i64: 1, 18, 18, 2>}, {transform_indices = @transform_1, window_bounds = array<i64: 1, 18, 18, 2>}, {pipeline_mode = #tpu.pipeline_mode<synchronous>, transform_indices = @transform_2, window_bounds = array<i64: 9, 2, 4>}, {pipeline_mode = #tpu.pipeline_mode<synchronous>, transform_indices = @transform_3, window_bounds = array<i64: 9, 2, 4>}, {pipeline_mode = #tpu.pipeline_mode<synchronous>, transform_indices = @transform_4, window_bounds = array<i64: 1, 4>}, {transform_indices = @transform_5, window_bounds = array<i64: 1, 16, 16, 4>}, {transform_indices = @transform_6, window_bounds = array<i64: 1, 2, 4>}]} {
    %cst = arith.constant 0.000000e+00 : f32
    %0 = vector.broadcast %cst : f32 to vector<256x4xf32>
    %c0 = arith.constant 0 : index
    %c0_0 = arith.constant 0 : index
    %c0_1 = arith.constant 0 : index
    %c0_2 = arith.constant 0 : index
    %1 = vector.load %arg1[%c0, %c0_0, %c0_1, %c0_2] : memref<1x18x18x2xf32, #tpu.memory_space<vmem>>, vector<1x18x18x2xf32>
    %2 = vector.shape_cast %1 : vector<1x18x18x2xf32> to vector<18x18x2xf32>
    %c0_3 = arith.constant 0 : index
    %c0_4 = arith.constant 0 : index
    %c0_5 = arith.constant 0 : index
    %3 = vector.load %arg3[%c0_3, %c0_4, %c0_5] : memref<9x2x4xf32, #tpu.memory_space<vmem>>, vector<9x2x4xf32>
    %4 = vector.extract_strided_slice %2 {offsets = [0, 0, 0], sizes = [16, 16, 2], strides = [1, 1, 1]} : vector<18x18x2xf32> to vector<16x16x2xf32>
    %5 = vector.shape_cast %4 : vector<16x16x2xf32> to vector<256x2xf32>
    %6 = vector.extract_strided_slice %3 {offsets = [0, 0, 0], sizes = [1, 2, 4], strides = [1, 1, 1]} : vector<9x2x4xf32> to vector<1x2x4xf32>
    %7 = vector.shape_cast %6 : vector<1x2x4xf32> to vector<2x4xf32>
    %cst_6 = arith.constant dense<0.000000e+00> : vector<256x4xf32>
    %8 = tpu.matmul %5, %7, %cst_6 {dimension_numbers = #tpu.dot_dimension_numbers<[1], [0], [0], [1], [0, 0, 1, 1], [], []>} : vector<256x2xf32>, vector<2x4xf32>, vector<256x4xf32> -> vector<256x4xf32>
    %9 = arith.addf %0, %8 : vector<256x4xf32>
    %10 = vector.extract_strided_slice %2 {offsets = [0, 1, 0], sizes = [16, 16, 2], strides = [1, 1, 1]} : vector<18x18x2xf32> to vector<16x16x2xf32>
    %11 = vector.shape_cast %10 : vector<16x16x2xf32> to vector<256x2xf32>
    %12 = vector.extract_strided_slice %3 {offsets = [1, 0, 0], sizes = [1, 2, 4], strides = [1, 1, 1]} : vector<9x2x4xf32> to vector<1x2x4xf32>
    %13 = vector.shape_cast %12 : vector<1x2x4xf32> to vector<2x4xf32>
    %cst_7 = arith.constant dense<0.000000e+00> : vector<256x4xf32>
    %14 = tpu.matmul %11, %13, %cst_7 {dimension_numbers = #tpu.dot_dimension_numbers<[1], [0], [0], [1], [0, 0, 1, 1], [], []>} : vector<256x2xf32>, vector<2x4xf32>, vector<256x4xf32> -> vector<256x4xf32>
    %15 = arith.addf %9, %14 : vector<256x4xf32>
    %16 = vector.extract_strided_slice %2 {offsets = [0, 2, 0], sizes = [16, 16, 2], strides = [1, 1, 1]} : vector<18x18x2xf32> to vector<16x16x2xf32>
    %17 = vector.shape_cast %16 : vector<16x16x2xf32> to vector<256x2xf32>
    %18 = vector.extract_strided_slice %3 {offsets = [2, 0, 0], sizes = [1, 2, 4], strides = [1, 1, 1]} : vector<9x2x4xf32> to vector<1x2x4xf32>
    %19 = vector.shape_cast %18 : vector<1x2x4xf32> to vector<2x4xf32>
    %cst_8 = arith.constant dense<0.000000e+00> : vector<256x4xf32>
    %20 = tpu.matmul %17, %19, %cst_8 {dimension_numbers = #tpu.dot_dimension_numbers<[1], [0], [0], [1], [0, 0, 1, 1], [], []>} : vector<256x2xf32>, vector<2x4xf32>, vector<256x4xf32> -> vector<256x4xf32>
    %21 = arith.addf %15, %20 : vector<256x4xf32>
    %22 = vector.extract_strided_slice %2 {offsets = [1, 0, 0], sizes = [16, 16, 2], strides = [1, 1, 1]} : vector<18x18x2xf32> to vector<16x16x2xf32>
    %23 = vector.shape_cast %22 : vector<16x16x2xf32> to vector<256x2xf32>
    %24 = vector.extract_strided_slice %3 {offsets = [3, 0, 0], sizes = [1, 2, 4], strides = [1, 1, 1]} : vector<9x2x4xf32> to vector<1x2x4xf32>
    %25 = vector.shape_cast %24 : vector<1x2x4xf32> to vector<2x4xf32>
    %cst_9 = arith.constant dense<0.000000e+00> : vector<256x4xf32>
    %26 = tpu.matmul %23, %25, %cst_9 {dimension_numbers = #tpu.dot_dimension_numbers<[1], [0], [0], [1], [0, 0, 1, 1], [], []>} : vector<256x2xf32>, vector<2x4xf32>, vector<256x4xf32> -> vector<256x4xf32>
    %27 = arith.addf %21, %26 : vector<256x4xf32>
    %28 = vector.extract_strided_slice %2 {offsets = [1, 1, 0], sizes = [16, 16, 2], strides = [1, 1, 1]} : vector<18x18x2xf32> to vector<16x16x2xf32>
    %29 = vector.shape_cast %28 : vector<16x16x2xf32> to vector<256x2xf32>
    %30 = vector.extract_strided_slice %3 {offsets = [4, 0, 0], sizes = [1, 2, 4], strides = [1, 1, 1]} : vector<9x2x4xf32> to vector<1x2x4xf32>
    %31 = vector.shape_cast %30 : vector<1x2x4xf32> to vector<2x4xf32>
    %cst_10 = arith.constant dense<0.000000e+00> : vector<256x4xf32>
    %32 = tpu.matmul %29, %31, %cst_10 {dimension_numbers = #tpu.dot_dimension_numbers<[1], [0], [0], [1], [0, 0, 1, 1], [], []>} : vector<256x2xf32>, vector<2x4xf32>, vector<256x4xf32> -> vector<256x4xf32>
    %33 = arith.addf %27, %32 : vector<256x4xf32>
    %34 = vector.extract_strided_slice %2 {offsets = [1, 2, 0], sizes = [16, 16, 2], strides = [1, 1, 1]} : vector<18x18x2xf32> to vector<16x16x2xf32>
    %35 = vector.shape_cast %34 : vector<16x16x2xf32> to vector<256x2xf32>
    %36 = vector.extract_strided_slice %3 {offsets = [5, 0, 0], sizes = [1, 2, 4], strides = [1, 1, 1]} : vector<9x2x4xf32> to vector<1x2x4xf32>
    %37 = vector.shape_cast %36 : vector<1x2x4xf32> to vector<2x4xf32>
    %cst_11 = arith.constant dense<0.000000e+00> : vector<256x4xf32>
    %38 = tpu.matmul %35, %37, %cst_11 {dimension_numbers = #tpu.dot_dimension_numbers<[1], [0], [0], [1], [0, 0, 1, 1], [], []>} : vector<256x2xf32>, vector<2x4xf32>, vector<256x4xf32> -> vector<256x4xf32>
    %39 = arith.addf %33, %38 : vector<256x4xf32>
    %40 = vector.extract_strided_slice %2 {offsets = [2, 0, 0], sizes = [16, 16, 2], strides = [1, 1, 1]} : vector<18x18x2xf32> to vector<16x16x2xf32>
    %41 = vector.shape_cast %40 : vector<16x16x2xf32> to vector<256x2xf32>
    %42 = vector.extract_strided_slice %3 {offsets = [6, 0, 0], sizes = [1, 2, 4], strides = [1, 1, 1]} : vector<9x2x4xf32> to vector<1x2x4xf32>
    %43 = vector.shape_cast %42 : vector<1x2x4xf32> to vector<2x4xf32>
    %cst_12 = arith.constant dense<0.000000e+00> : vector<256x4xf32>
    %44 = tpu.matmul %41, %43, %cst_12 {dimension_numbers = #tpu.dot_dimension_numbers<[1], [0], [0], [1], [0, 0, 1, 1], [], []>} : vector<256x2xf32>, vector<2x4xf32>, vector<256x4xf32> -> vector<256x4xf32>
    %45 = arith.addf %39, %44 : vector<256x4xf32>
    %46 = vector.extract_strided_slice %2 {offsets = [2, 1, 0], sizes = [16, 16, 2], strides = [1, 1, 1]} : vector<18x18x2xf32> to vector<16x16x2xf32>
    %47 = vector.shape_cast %46 : vector<16x16x2xf32> to vector<256x2xf32>
    %48 = vector.extract_strided_slice %3 {offsets = [7, 0, 0], sizes = [1, 2, 4], strides = [1, 1, 1]} : vector<9x2x4xf32> to vector<1x2x4xf32>
    %49 = vector.shape_cast %48 : vector<1x2x4xf32> to vector<2x4xf32>
    %cst_13 = arith.constant dense<0.000000e+00> : vector<256x4xf32>
    %50 = tpu.matmul %47, %49, %cst_13 {dimension_numbers = #tpu.dot_dimension_numbers<[1], [0], [0], [1], [0, 0, 1, 1], [], []>} : vector<256x2xf32>, vector<2x4xf32>, vector<256x4xf32> -> vector<256x4xf32>
    %51 = arith.addf %45, %50 : vector<256x4xf32>
    %52 = vector.extract_strided_slice %2 {offsets = [2, 2, 0], sizes = [16, 16, 2], strides = [1, 1, 1]} : vector<18x18x2xf32> to vector<16x16x2xf32>
    %53 = vector.shape_cast %52 : vector<16x16x2xf32> to vector<256x2xf32>
    %54 = vector.extract_strided_slice %3 {offsets = [8, 0, 0], sizes = [1, 2, 4], strides = [1, 1, 1]} : vector<9x2x4xf32> to vector<1x2x4xf32>
    %55 = vector.shape_cast %54 : vector<1x2x4xf32> to vector<2x4xf32>
    %cst_14 = arith.constant dense<0.000000e+00> : vector<256x4xf32>
    %56 = tpu.matmul %53, %55, %cst_14 {dimension_numbers = #tpu.dot_dimension_numbers<[1], [0], [0], [1], [0, 0, 1, 1], [], []>} : vector<256x2xf32>, vector<2x4xf32>, vector<256x4xf32> -> vector<256x4xf32>
    %57 = arith.addf %51, %56 : vector<256x4xf32>
    %c0_15 = arith.constant 0 : index
    %c0_16 = arith.constant 0 : index
    %c0_17 = arith.constant 0 : index
    %c0_18 = arith.constant 0 : index
    %58 = vector.load %arg2[%c0_15, %c0_16, %c0_17, %c0_18] : memref<1x18x18x2xf32, #tpu.memory_space<vmem>>, vector<1x18x18x2xf32>
    %59 = vector.shape_cast %58 : vector<1x18x18x2xf32> to vector<18x18x2xf32>
    %c0_19 = arith.constant 0 : index
    %c0_20 = arith.constant 0 : index
    %c0_21 = arith.constant 0 : index
    %60 = vector.load %arg4[%c0_19, %c0_20, %c0_21] : memref<9x2x4xf32, #tpu.memory_space<vmem>>, vector<9x2x4xf32>
    %61 = vector.extract_strided_slice %59 {offsets = [0, 0, 0], sizes = [16, 16, 2], strides = [1, 1, 1]} : vector<18x18x2xf32> to vector<16x16x2xf32>
    %62 = vector.shape_cast %61 : vector<16x16x2xf32> to vector<256x2xf32>
    %63 = vector.extract_strided_slice %60 {offsets = [0, 0, 0], sizes = [1, 2, 4], strides = [1, 1, 1]} : vector<9x2x4xf32> to vector<1x2x4xf32>
    %64 = vector.shape_cast %63 : vector<1x2x4xf32> to vector<2x4xf32>
    %cst_22 = arith.constant dense<0.000000e+00> : vector<256x4xf32>
    %65 = tpu.matmul %62, %64, %cst_22 {dimension_numbers = #tpu.dot_dimension_numbers<[1], [0], [0], [1], [0, 0, 1, 1], [], []>} : vector<256x2xf32>, vector<2x4xf32>, vector<256x4xf32> -> vector<256x4xf32>
    %66 = arith.addf %57, %65 : vector<256x4xf32>
    %67 = vector.extract_strided_slice %59 {offsets = [0, 1, 0], sizes = [16, 16, 2], strides = [1, 1, 1]} : vector<18x18x2xf32> to vector<16x16x2xf32>
    %68 = vector.shape_cast %67 : vector<16x16x2xf32> to vector<256x2xf32>
    %69 = vector.extract_strided_slice %60 {offsets = [1, 0, 0], sizes = [1, 2, 4], strides = [1, 1, 1]} : vector<9x2x4xf32> to vector<1x2x4xf32>
    %70 = vector.shape_cast %69 : vector<1x2x4xf32> to vector<2x4xf32>
    %cst_23 = arith.constant dense<0.000000e+00> : vector<256x4xf32>
    %71 = tpu.matmul %68, %70, %cst_23 {dimension_numbers = #tpu.dot_dimension_numbers<[1], [0], [0], [1], [0, 0, 1, 1], [], []>} : vector<256x2xf32>, vector<2x4xf32>, vector<256x4xf32> -> vector<256x4xf32>
    %72 = arith.addf %66, %71 : vector<256x4xf32>
    %73 = vector.extract_strided_slice %59 {offsets = [0, 2, 0], sizes = [16, 16, 2], strides = [1, 1, 1]} : vector<18x18x2xf32> to vector<16x16x2xf32>
    %74 = vector.shape_cast %73 : vector<16x16x2xf32> to vector<256x2xf32>
    %75 = vector.extract_strided_slice %60 {offsets = [2, 0, 0], sizes = [1, 2, 4], strides = [1, 1, 1]} : vector<9x2x4xf32> to vector<1x2x4xf32>
    %76 = vector.shape_cast %75 : vector<1x2x4xf32> to vector<2x4xf32>
    %cst_24 = arith.constant dense<0.000000e+00> : vector<256x4xf32>
    %77 = tpu.matmul %74, %76, %cst_24 {dimension_numbers = #tpu.dot_dimension_numbers<[1], [0], [0], [1], [0, 0, 1, 1], [], []>} : vector<256x2xf32>, vector<2x4xf32>, vector<256x4xf32> -> vector<256x4xf32>
    %78 = arith.addf %72, %77 : vector<256x4xf32>
    %79 = vector.extract_strided_slice %59 {offsets = [1, 0, 0], sizes = [16, 16, 2], strides = [1, 1, 1]} : vector<18x18x2xf32> to vector<16x16x2xf32>
    %80 = vector.shape_cast %79 : vector<16x16x2xf32> to vector<256x2xf32>
    %81 = vector.extract_strided_slice %60 {offsets = [3, 0, 0], sizes = [1, 2, 4], strides = [1, 1, 1]} : vector<9x2x4xf32> to vector<1x2x4xf32>
    %82 = vector.shape_cast %81 : vector<1x2x4xf32> to vector<2x4xf32>
    %cst_25 = arith.constant dense<0.000000e+00> : vector<256x4xf32>
    %83 = tpu.matmul %80, %82, %cst_25 {dimension_numbers = #tpu.dot_dimension_numbers<[1], [0], [0], [1], [0, 0, 1, 1], [], []>} : vector<256x2xf32>, vector<2x4xf32>, vector<256x4xf32> -> vector<256x4xf32>
    %84 = arith.addf %78, %83 : vector<256x4xf32>
    %85 = vector.extract_strided_slice %59 {offsets = [1, 1, 0], sizes = [16, 16, 2], strides = [1, 1, 1]} : vector<18x18x2xf32> to vector<16x16x2xf32>
    %86 = vector.shape_cast %85 : vector<16x16x2xf32> to vector<256x2xf32>
    %87 = vector.extract_strided_slice %60 {offsets = [4, 0, 0], sizes = [1, 2, 4], strides = [1, 1, 1]} : vector<9x2x4xf32> to vector<1x2x4xf32>
    %88 = vector.shape_cast %87 : vector<1x2x4xf32> to vector<2x4xf32>
    %cst_26 = arith.constant dense<0.000000e+00> : vector<256x4xf32>
    %89 = tpu.matmul %86, %88, %cst_26 {dimension_numbers = #tpu.dot_dimension_numbers<[1], [0], [0], [1], [0, 0, 1, 1], [], []>} : vector<256x2xf32>, vector<2x4xf32>, vector<256x4xf32> -> vector<256x4xf32>
    %90 = arith.addf %84, %89 : vector<256x4xf32>
    %91 = vector.extract_strided_slice %59 {offsets = [1, 2, 0], sizes = [16, 16, 2], strides = [1, 1, 1]} : vector<18x18x2xf32> to vector<16x16x2xf32>
    %92 = vector.shape_cast %91 : vector<16x16x2xf32> to vector<256x2xf32>
    %93 = vector.extract_strided_slice %60 {offsets = [5, 0, 0], sizes = [1, 2, 4], strides = [1, 1, 1]} : vector<9x2x4xf32> to vector<1x2x4xf32>
    %94 = vector.shape_cast %93 : vector<1x2x4xf32> to vector<2x4xf32>
    %cst_27 = arith.constant dense<0.000000e+00> : vector<256x4xf32>
    %95 = tpu.matmul %92, %94, %cst_27 {dimension_numbers = #tpu.dot_dimension_numbers<[1], [0], [0], [1], [0, 0, 1, 1], [], []>} : vector<256x2xf32>, vector<2x4xf32>, vector<256x4xf32> -> vector<256x4xf32>
    %96 = arith.addf %90, %95 : vector<256x4xf32>
    %97 = vector.extract_strided_slice %59 {offsets = [2, 0, 0], sizes = [16, 16, 2], strides = [1, 1, 1]} : vector<18x18x2xf32> to vector<16x16x2xf32>
    %98 = vector.shape_cast %97 : vector<16x16x2xf32> to vector<256x2xf32>
    %99 = vector.extract_strided_slice %60 {offsets = [6, 0, 0], sizes = [1, 2, 4], strides = [1, 1, 1]} : vector<9x2x4xf32> to vector<1x2x4xf32>
    %100 = vector.shape_cast %99 : vector<1x2x4xf32> to vector<2x4xf32>
    %cst_28 = arith.constant dense<0.000000e+00> : vector<256x4xf32>
    %101 = tpu.matmul %98, %100, %cst_28 {dimension_numbers = #tpu.dot_dimension_numbers<[1], [0], [0], [1], [0, 0, 1, 1], [], []>} : vector<256x2xf32>, vector<2x4xf32>, vector<256x4xf32> -> vector<256x4xf32>
    %102 = arith.addf %96, %101 : vector<256x4xf32>
    %103 = vector.extract_strided_slice %59 {offsets = [2, 1, 0], sizes = [16, 16, 2], strides = [1, 1, 1]} : vector<18x18x2xf32> to vector<16x16x2xf32>
    %104 = vector.shape_cast %103 : vector<16x16x2xf32> to vector<256x2xf32>
    %105 = vector.extract_strided_slice %60 {offsets = [7, 0, 0], sizes = [1, 2, 4], strides = [1, 1, 1]} : vector<9x2x4xf32> to vector<1x2x4xf32>
    %106 = vector.shape_cast %105 : vector<1x2x4xf32> to vector<2x4xf32>
    %cst_29 = arith.constant dense<0.000000e+00> : vector<256x4xf32>
    %107 = tpu.matmul %104, %106, %cst_29 {dimension_numbers = #tpu.dot_dimension_numbers<[1], [0], [0], [1], [0, 0, 1, 1], [], []>} : vector<256x2xf32>, vector<2x4xf32>, vector<256x4xf32> -> vector<256x4xf32>
    %108 = arith.addf %102, %107 : vector<256x4xf32>
    %109 = vector.extract_strided_slice %59 {offsets = [2, 2, 0], sizes = [16, 16, 2], strides = [1, 1, 1]} : vector<18x18x2xf32> to vector<16x16x2xf32>
    %110 = vector.shape_cast %109 : vector<16x16x2xf32> to vector<256x2xf32>
    %111 = vector.extract_strided_slice %60 {offsets = [8, 0, 0], sizes = [1, 2, 4], strides = [1, 1, 1]} : vector<9x2x4xf32> to vector<1x2x4xf32>
    %112 = vector.shape_cast %111 : vector<1x2x4xf32> to vector<2x4xf32>
    %cst_30 = arith.constant dense<0.000000e+00> : vector<256x4xf32>
    %113 = tpu.matmul %110, %112, %cst_30 {dimension_numbers = #tpu.dot_dimension_numbers<[1], [0], [0], [1], [0, 0, 1, 1], [], []>} : vector<256x2xf32>, vector<2x4xf32>, vector<256x4xf32> -> vector<256x4xf32>
    %114 = arith.addf %108, %113 : vector<256x4xf32>
    %c0_31 = arith.constant 0 : index
    %c0_32 = arith.constant 0 : index
    %115 = vector.load %arg5[%c0_31, %c0_32] : memref<1x4xf32, #tpu.memory_space<vmem>>, vector<1x4xf32>
    %116 = vector.broadcast %115 : vector<1x4xf32> to vector<256x4xf32>
    %117 = arith.addf %114, %116 : vector<256x4xf32>
    %118 = vector.shape_cast %117 : vector<256x4xf32> to vector<16x16x4xf32>
    %c0_33 = arith.constant 0 : index
    %c0_34 = arith.constant 0 : index
    %c0_35 = arith.constant 0 : index
    %c0_36 = arith.constant 0 : index
    %119 = vector.load %arg6[%c0_33, %c0_34, %c0_35, %c0_36] : memref<1x16x16x4xf32, #tpu.memory_space<vmem>>, vector<1x16x16x4xf32>
    %120 = vector.shape_cast %119 : vector<1x16x16x4xf32> to vector<16x16x4xf32>
    %121 = vector.shape_cast %118 : vector<16x16x4xf32> to vector<1x16x16x4xf32>
    tpu.vector_store %arg6[%c0_33, %c0_34, %c0_35, %c0_36], %121 {strides = array<i32>} : memref<1x16x16x4xf32, #tpu.memory_space<vmem>>, vector<1x16x16x4xf32>,
    %cst_37 = arith.constant dense<0.000000e+00> : vector<4xf32>
    %122 = vector.multi_reduction <add>, %117, %cst_37 [0] : vector<256x4xf32> to vector<4xf32>
    %123 = vector.shape_cast %122 : vector<4xf32> to vector<1x4xf32>
    %c0_38 = arith.constant 0 : index
    %c0_39 = arith.constant 0 : index
    %c0_40 = arith.constant 0 : index
    %124 = vector.load %arg7[%c0_38, %c0_39, %c0_40] : memref<1x2x4xf32, #tpu.memory_space<vmem>>, vector<1x1x4xf32>
    %125 = vector.shape_cast %124 : vector<1x1x4xf32> to vector<1x4xf32>
    %126 = vector.shape_cast %123 : vector<1x4xf32> to vector<1x1x4xf32>
    tpu.vector_store %arg7[%c0_38, %c0_39, %c0_40], %126 {strides = array<i32>} : memref<1x2x4xf32, #tpu.memory_space<vmem>>, vector<1x1x4xf32>,
    %127 = arith.mulf %117, %117 : vector<256x4xf32>
    %cst_41 = arith.constant dense<0.000000e+00> : vector<4xf32>
    %128 = vector.multi_reduction <add>, %127, %cst_41 [0] : vector<256x4xf32> to vector<4xf32>
    %129 = vector.shape_cast %128 : vector<4xf32> to vector<1x4xf32>
    %c0_42 = arith.constant 0 : index
    %c1 = arith.constant 1 : index
    %c0_43 = arith.constant 0 : index
    %130 = vector.load %arg7[%c0_42, %c1, %c0_43] : memref<1x2x4xf32, #tpu.memory_space<vmem>>, vector<1x1x4xf32>
    %131 = vector.shape_cast %130 : vector<1x1x4xf32> to vector<1x4xf32>
    %132 = vector.shape_cast %129 : vector<1x4xf32> to vector<1x1x4xf32>
    tpu.vector_store %arg7[%c0_42, %c1, %c0_43], %132 {strides = array<i32>} : memref<1x2x4xf32, #tpu.memory_space<vmem>>, vector<1x1x4xf32>,
    return
  }
  func.func @transform_0(%arg0: i32) -> (i32, i32, i32, i32) {
    %c0_i32 = arith.constant 0 : i32
    %c0_i32_0 = arith.constant 0 : i32
    %c0_i32_1 = arith.constant 0 : i32
    %c0_i32_2 = arith.constant 0 : i32
    return %arg0, %c0_i32, %c0_i32_0, %c0_i32_1 : i32, i32, i32, i32
  }
  func.func @transform_1(%arg0: i32) -> (i32, i32, i32, i32) {
    %c0_i32 = arith.constant 0 : i32
    %c0_i32_0 = arith.constant 0 : i32
    %c0_i32_1 = arith.constant 0 : i32
    %c0_i32_2 = arith.constant 0 : i32
    return %arg0, %c0_i32, %c0_i32_0, %c0_i32_1 : i32, i32, i32, i32
  }
  func.func @transform_2(%arg0: i32) -> (i32, i32, i32) {
    %c0_i32 = arith.constant 0 : i32
    %c0_i32_0 = arith.constant 0 : i32
    %c0_i32_1 = arith.constant 0 : i32
    %c0_i32_2 = arith.constant 0 : i32
    return %c0_i32, %c0_i32_0, %c0_i32_1 : i32, i32, i32
  }
  func.func @transform_3(%arg0: i32) -> (i32, i32, i32) {
    %c0_i32 = arith.constant 0 : i32
    %c0_i32_0 = arith.constant 0 : i32
    %c0_i32_1 = arith.constant 0 : i32
    %c0_i32_2 = arith.constant 0 : i32
    return %c0_i32, %c0_i32_0, %c0_i32_1 : i32, i32, i32
  }
  func.func @transform_4(%arg0: i32) -> (i32, i32) {
    %c0_i32 = arith.constant 0 : i32
    %c0_i32_0 = arith.constant 0 : i32
    %c0_i32_1 = arith.constant 0 : i32
    return %c0_i32, %c0_i32_0 : i32, i32
  }
  func.func @transform_5(%arg0: i32) -> (i32, i32, i32, i32) {
    %c0_i32 = arith.constant 0 : i32
    %c0_i32_0 = arith.constant 0 : i32
    %c0_i32_1 = arith.constant 0 : i32
    %c0_i32_2 = arith.constant 0 : i32
    return %arg0, %c0_i32, %c0_i32_0, %c0_i32_1 : i32, i32, i32, i32
  }
  func.func @transform_6(%arg0: i32) -> (i32, i32, i32) {
    %c0_i32 = arith.constant 0 : i32
    %c0_i32_0 = arith.constant 0 : i32
    %c0_i32_1 = arith.constant 0 : i32
    return %arg0, %c0_i32, %c0_i32_0 : i32, i32, i32
  }
}

module attributes {stable_mosaic.version = 11 : i64} {
  func.func @_scale_shift_relu_kernel(%arg0: i32, %arg1: memref<32x64xf32, #tpu.memory_space<vmem>>, %arg2: memref<1x64xf32, #tpu.memory_space<vmem>>, %arg3: memref<1x64xf32, #tpu.memory_space<vmem>>, %arg4: memref<32x64xf32, #tpu.memory_space<vmem>>) attributes {dimension_semantics = [#tpu.dimension_semantics<parallel>], iteration_bounds = array<i64: 1>, scalar_prefetch = 0 : i64, scratch_operands = 0 : i64, tpu.core_type = #tpu.core_type<tc>, window_params = [{transform_indices = @transform_0, window_bounds = array<i64: 32, 64>}, {pipeline_mode = #tpu.pipeline_mode<synchronous>, transform_indices = @transform_1, window_bounds = array<i64: 1, 64>}, {pipeline_mode = #tpu.pipeline_mode<synchronous>, transform_indices = @transform_2, window_bounds = array<i64: 1, 64>}, {transform_indices = @transform_3, window_bounds = array<i64: 32, 64>}]} {
    %c0 = arith.constant 0 : index
    %c0_0 = arith.constant 0 : index
    %0 = vector.load %arg1[%c0, %c0_0] : memref<32x64xf32, #tpu.memory_space<vmem>>, vector<32x64xf32>
    %c0_1 = arith.constant 0 : index
    %c0_2 = arith.constant 0 : index
    %1 = vector.load %arg2[%c0_1, %c0_2] : memref<1x64xf32, #tpu.memory_space<vmem>>, vector<1x64xf32>
    %2 = vector.broadcast %1 : vector<1x64xf32> to vector<32x64xf32>
    %3 = arith.mulf %0, %2 : vector<32x64xf32>
    %c0_3 = arith.constant 0 : index
    %c0_4 = arith.constant 0 : index
    %4 = vector.load %arg3[%c0_3, %c0_4] : memref<1x64xf32, #tpu.memory_space<vmem>>, vector<1x64xf32>
    %5 = vector.broadcast %4 : vector<1x64xf32> to vector<32x64xf32>
    %6 = arith.addf %3, %5 : vector<32x64xf32>
    %cst = arith.constant 0.000000e+00 : f32
    %7 = vector.broadcast %cst : f32 to vector<32x64xf32>
    %8 = arith.maximumf %6, %7 : vector<32x64xf32>
    %c0_5 = arith.constant 0 : index
    %c0_6 = arith.constant 0 : index
    %9 = vector.load %arg4[%c0_5, %c0_6] : memref<32x64xf32, #tpu.memory_space<vmem>>, vector<32x64xf32>
    tpu.vector_store %arg4[%c0_5, %c0_6], %8 {strides = array<i32>} : memref<32x64xf32, #tpu.memory_space<vmem>>, vector<32x64xf32>,
    return
  }
  func.func @transform_0(%arg0: i32) -> (i32, i32) {
    %c0_i32 = arith.constant 0 : i32
    %c0_i32_0 = arith.constant 0 : i32
    return %arg0, %c0_i32 : i32, i32
  }
  func.func @transform_1(%arg0: i32) -> (i32, i32) {
    %c0_i32 = arith.constant 0 : i32
    %c0_i32_0 = arith.constant 0 : i32
    %c0_i32_1 = arith.constant 0 : i32
    return %c0_i32, %c0_i32_0 : i32, i32
  }
  func.func @transform_2(%arg0: i32) -> (i32, i32) {
    %c0_i32 = arith.constant 0 : i32
    %c0_i32_0 = arith.constant 0 : i32
    %c0_i32_1 = arith.constant 0 : i32
    return %c0_i32, %c0_i32_0 : i32, i32
  }
  func.func @transform_3(%arg0: i32) -> (i32, i32) {
    %c0_i32 = arith.constant 0 : i32
    %c0_i32_0 = arith.constant 0 : i32
    return %arg0, %c0_i32 : i32, i32
  }
}

module attributes {stable_mosaic.version = 11 : i64} {
  func.func @kernel(%arg0: i32, %arg1: memref<1x18x18x4xf32, #tpu.memory_space<vmem>>, %arg2: memref<9x4x4xf32, #tpu.memory_space<vmem>>, %arg3: memref<1x4xf32, #tpu.memory_space<vmem>>, %arg4: memref<1x16x16x4xf32, #tpu.memory_space<vmem>>, %arg5: memref<1x2x4xf32, #tpu.memory_space<vmem>>) attributes {dimension_semantics = [#tpu.dimension_semantics<parallel>], iteration_bounds = array<i64: 2>, scalar_prefetch = 0 : i64, scratch_operands = 0 : i64, tpu.core_type = #tpu.core_type<tc>, window_params = [{transform_indices = @transform_0, window_bounds = array<i64: 1, 18, 18, 4>}, {pipeline_mode = #tpu.pipeline_mode<synchronous>, transform_indices = @transform_1, window_bounds = array<i64: 9, 4, 4>}, {pipeline_mode = #tpu.pipeline_mode<synchronous>, transform_indices = @transform_2, window_bounds = array<i64: 1, 4>}, {transform_indices = @transform_3, window_bounds = array<i64: 1, 16, 16, 4>}, {transform_indices = @transform_4, window_bounds = array<i64: 1, 2, 4>}]} {
    %cst = arith.constant 0.000000e+00 : f32
    %0 = vector.broadcast %cst : f32 to vector<256x4xf32>
    %c0 = arith.constant 0 : index
    %c0_0 = arith.constant 0 : index
    %c0_1 = arith.constant 0 : index
    %c0_2 = arith.constant 0 : index
    %1 = vector.load %arg1[%c0, %c0_0, %c0_1, %c0_2] : memref<1x18x18x4xf32, #tpu.memory_space<vmem>>, vector<1x18x18x4xf32>
    %2 = vector.shape_cast %1 : vector<1x18x18x4xf32> to vector<18x18x4xf32>
    %c0_3 = arith.constant 0 : index
    %c0_4 = arith.constant 0 : index
    %c0_5 = arith.constant 0 : index
    %3 = vector.load %arg2[%c0_3, %c0_4, %c0_5] : memref<9x4x4xf32, #tpu.memory_space<vmem>>, vector<9x4x4xf32>
    %4 = vector.extract_strided_slice %2 {offsets = [0, 0, 0], sizes = [16, 16, 4], strides = [1, 1, 1]} : vector<18x18x4xf32> to vector<16x16x4xf32>
    %5 = vector.shape_cast %4 : vector<16x16x4xf32> to vector<256x4xf32>
    %6 = vector.extract_strided_slice %3 {offsets = [0, 0, 0], sizes = [1, 4, 4], strides = [1, 1, 1]} : vector<9x4x4xf32> to vector<1x4x4xf32>
    %7 = vector.shape_cast %6 : vector<1x4x4xf32> to vector<4x4xf32>
    %cst_6 = arith.constant dense<0.000000e+00> : vector<256x4xf32>
    %8 = tpu.matmul %5, %7, %cst_6 {dimension_numbers = #tpu.dot_dimension_numbers<[1], [0], [0], [1], [0, 0, 1, 1], [], []>} : vector<256x4xf32>, vector<4x4xf32>, vector<256x4xf32> -> vector<256x4xf32>
    %9 = arith.addf %0, %8 : vector<256x4xf32>
    %10 = vector.extract_strided_slice %2 {offsets = [0, 1, 0], sizes = [16, 16, 4], strides = [1, 1, 1]} : vector<18x18x4xf32> to vector<16x16x4xf32>
    %11 = vector.shape_cast %10 : vector<16x16x4xf32> to vector<256x4xf32>
    %12 = vector.extract_strided_slice %3 {offsets = [1, 0, 0], sizes = [1, 4, 4], strides = [1, 1, 1]} : vector<9x4x4xf32> to vector<1x4x4xf32>
    %13 = vector.shape_cast %12 : vector<1x4x4xf32> to vector<4x4xf32>
    %cst_7 = arith.constant dense<0.000000e+00> : vector<256x4xf32>
    %14 = tpu.matmul %11, %13, %cst_7 {dimension_numbers = #tpu.dot_dimension_numbers<[1], [0], [0], [1], [0, 0, 1, 1], [], []>} : vector<256x4xf32>, vector<4x4xf32>, vector<256x4xf32> -> vector<256x4xf32>
    %15 = arith.addf %9, %14 : vector<256x4xf32>
    %16 = vector.extract_strided_slice %2 {offsets = [0, 2, 0], sizes = [16, 16, 4], strides = [1, 1, 1]} : vector<18x18x4xf32> to vector<16x16x4xf32>
    %17 = vector.shape_cast %16 : vector<16x16x4xf32> to vector<256x4xf32>
    %18 = vector.extract_strided_slice %3 {offsets = [2, 0, 0], sizes = [1, 4, 4], strides = [1, 1, 1]} : vector<9x4x4xf32> to vector<1x4x4xf32>
    %19 = vector.shape_cast %18 : vector<1x4x4xf32> to vector<4x4xf32>
    %cst_8 = arith.constant dense<0.000000e+00> : vector<256x4xf32>
    %20 = tpu.matmul %17, %19, %cst_8 {dimension_numbers = #tpu.dot_dimension_numbers<[1], [0], [0], [1], [0, 0, 1, 1], [], []>} : vector<256x4xf32>, vector<4x4xf32>, vector<256x4xf32> -> vector<256x4xf32>
    %21 = arith.addf %15, %20 : vector<256x4xf32>
    %22 = vector.extract_strided_slice %2 {offsets = [1, 0, 0], sizes = [16, 16, 4], strides = [1, 1, 1]} : vector<18x18x4xf32> to vector<16x16x4xf32>
    %23 = vector.shape_cast %22 : vector<16x16x4xf32> to vector<256x4xf32>
    %24 = vector.extract_strided_slice %3 {offsets = [3, 0, 0], sizes = [1, 4, 4], strides = [1, 1, 1]} : vector<9x4x4xf32> to vector<1x4x4xf32>
    %25 = vector.shape_cast %24 : vector<1x4x4xf32> to vector<4x4xf32>
    %cst_9 = arith.constant dense<0.000000e+00> : vector<256x4xf32>
    %26 = tpu.matmul %23, %25, %cst_9 {dimension_numbers = #tpu.dot_dimension_numbers<[1], [0], [0], [1], [0, 0, 1, 1], [], []>} : vector<256x4xf32>, vector<4x4xf32>, vector<256x4xf32> -> vector<256x4xf32>
    %27 = arith.addf %21, %26 : vector<256x4xf32>
    %28 = vector.extract_strided_slice %2 {offsets = [1, 1, 0], sizes = [16, 16, 4], strides = [1, 1, 1]} : vector<18x18x4xf32> to vector<16x16x4xf32>
    %29 = vector.shape_cast %28 : vector<16x16x4xf32> to vector<256x4xf32>
    %30 = vector.extract_strided_slice %3 {offsets = [4, 0, 0], sizes = [1, 4, 4], strides = [1, 1, 1]} : vector<9x4x4xf32> to vector<1x4x4xf32>
    %31 = vector.shape_cast %30 : vector<1x4x4xf32> to vector<4x4xf32>
    %cst_10 = arith.constant dense<0.000000e+00> : vector<256x4xf32>
    %32 = tpu.matmul %29, %31, %cst_10 {dimension_numbers = #tpu.dot_dimension_numbers<[1], [0], [0], [1], [0, 0, 1, 1], [], []>} : vector<256x4xf32>, vector<4x4xf32>, vector<256x4xf32> -> vector<256x4xf32>
    %33 = arith.addf %27, %32 : vector<256x4xf32>
    %34 = vector.extract_strided_slice %2 {offsets = [1, 2, 0], sizes = [16, 16, 4], strides = [1, 1, 1]} : vector<18x18x4xf32> to vector<16x16x4xf32>
    %35 = vector.shape_cast %34 : vector<16x16x4xf32> to vector<256x4xf32>
    %36 = vector.extract_strided_slice %3 {offsets = [5, 0, 0], sizes = [1, 4, 4], strides = [1, 1, 1]} : vector<9x4x4xf32> to vector<1x4x4xf32>
    %37 = vector.shape_cast %36 : vector<1x4x4xf32> to vector<4x4xf32>
    %cst_11 = arith.constant dense<0.000000e+00> : vector<256x4xf32>
    %38 = tpu.matmul %35, %37, %cst_11 {dimension_numbers = #tpu.dot_dimension_numbers<[1], [0], [0], [1], [0, 0, 1, 1], [], []>} : vector<256x4xf32>, vector<4x4xf32>, vector<256x4xf32> -> vector<256x4xf32>
    %39 = arith.addf %33, %38 : vector<256x4xf32>
    %40 = vector.extract_strided_slice %2 {offsets = [2, 0, 0], sizes = [16, 16, 4], strides = [1, 1, 1]} : vector<18x18x4xf32> to vector<16x16x4xf32>
    %41 = vector.shape_cast %40 : vector<16x16x4xf32> to vector<256x4xf32>
    %42 = vector.extract_strided_slice %3 {offsets = [6, 0, 0], sizes = [1, 4, 4], strides = [1, 1, 1]} : vector<9x4x4xf32> to vector<1x4x4xf32>
    %43 = vector.shape_cast %42 : vector<1x4x4xf32> to vector<4x4xf32>
    %cst_12 = arith.constant dense<0.000000e+00> : vector<256x4xf32>
    %44 = tpu.matmul %41, %43, %cst_12 {dimension_numbers = #tpu.dot_dimension_numbers<[1], [0], [0], [1], [0, 0, 1, 1], [], []>} : vector<256x4xf32>, vector<4x4xf32>, vector<256x4xf32> -> vector<256x4xf32>
    %45 = arith.addf %39, %44 : vector<256x4xf32>
    %46 = vector.extract_strided_slice %2 {offsets = [2, 1, 0], sizes = [16, 16, 4], strides = [1, 1, 1]} : vector<18x18x4xf32> to vector<16x16x4xf32>
    %47 = vector.shape_cast %46 : vector<16x16x4xf32> to vector<256x4xf32>
    %48 = vector.extract_strided_slice %3 {offsets = [7, 0, 0], sizes = [1, 4, 4], strides = [1, 1, 1]} : vector<9x4x4xf32> to vector<1x4x4xf32>
    %49 = vector.shape_cast %48 : vector<1x4x4xf32> to vector<4x4xf32>
    %cst_13 = arith.constant dense<0.000000e+00> : vector<256x4xf32>
    %50 = tpu.matmul %47, %49, %cst_13 {dimension_numbers = #tpu.dot_dimension_numbers<[1], [0], [0], [1], [0, 0, 1, 1], [], []>} : vector<256x4xf32>, vector<4x4xf32>, vector<256x4xf32> -> vector<256x4xf32>
    %51 = arith.addf %45, %50 : vector<256x4xf32>
    %52 = vector.extract_strided_slice %2 {offsets = [2, 2, 0], sizes = [16, 16, 4], strides = [1, 1, 1]} : vector<18x18x4xf32> to vector<16x16x4xf32>
    %53 = vector.shape_cast %52 : vector<16x16x4xf32> to vector<256x4xf32>
    %54 = vector.extract_strided_slice %3 {offsets = [8, 0, 0], sizes = [1, 4, 4], strides = [1, 1, 1]} : vector<9x4x4xf32> to vector<1x4x4xf32>
    %55 = vector.shape_cast %54 : vector<1x4x4xf32> to vector<4x4xf32>
    %cst_14 = arith.constant dense<0.000000e+00> : vector<256x4xf32>
    %56 = tpu.matmul %53, %55, %cst_14 {dimension_numbers = #tpu.dot_dimension_numbers<[1], [0], [0], [1], [0, 0, 1, 1], [], []>} : vector<256x4xf32>, vector<4x4xf32>, vector<256x4xf32> -> vector<256x4xf32>
    %57 = arith.addf %51, %56 : vector<256x4xf32>
    %c0_15 = arith.constant 0 : index
    %c0_16 = arith.constant 0 : index
    %58 = vector.load %arg3[%c0_15, %c0_16] : memref<1x4xf32, #tpu.memory_space<vmem>>, vector<1x4xf32>
    %59 = vector.broadcast %58 : vector<1x4xf32> to vector<256x4xf32>
    %60 = arith.addf %57, %59 : vector<256x4xf32>
    %61 = vector.shape_cast %60 : vector<256x4xf32> to vector<16x16x4xf32>
    %c0_17 = arith.constant 0 : index
    %c0_18 = arith.constant 0 : index
    %c0_19 = arith.constant 0 : index
    %c0_20 = arith.constant 0 : index
    %62 = vector.load %arg4[%c0_17, %c0_18, %c0_19, %c0_20] : memref<1x16x16x4xf32, #tpu.memory_space<vmem>>, vector<1x16x16x4xf32>
    %63 = vector.shape_cast %62 : vector<1x16x16x4xf32> to vector<16x16x4xf32>
    %64 = vector.shape_cast %61 : vector<16x16x4xf32> to vector<1x16x16x4xf32>
    tpu.vector_store %arg4[%c0_17, %c0_18, %c0_19, %c0_20], %64 {strides = array<i32>} : memref<1x16x16x4xf32, #tpu.memory_space<vmem>>, vector<1x16x16x4xf32>,
    %cst_21 = arith.constant dense<0.000000e+00> : vector<4xf32>
    %65 = vector.multi_reduction <add>, %60, %cst_21 [0] : vector<256x4xf32> to vector<4xf32>
    %66 = vector.shape_cast %65 : vector<4xf32> to vector<1x4xf32>
    %c0_22 = arith.constant 0 : index
    %c0_23 = arith.constant 0 : index
    %c0_24 = arith.constant 0 : index
    %67 = vector.load %arg5[%c0_22, %c0_23, %c0_24] : memref<1x2x4xf32, #tpu.memory_space<vmem>>, vector<1x1x4xf32>
    %68 = vector.shape_cast %67 : vector<1x1x4xf32> to vector<1x4xf32>
    %69 = vector.shape_cast %66 : vector<1x4xf32> to vector<1x1x4xf32>
    tpu.vector_store %arg5[%c0_22, %c0_23, %c0_24], %69 {strides = array<i32>} : memref<1x2x4xf32, #tpu.memory_space<vmem>>, vector<1x1x4xf32>,
    %70 = arith.mulf %60, %60 : vector<256x4xf32>
    %cst_25 = arith.constant dense<0.000000e+00> : vector<4xf32>
    %71 = vector.multi_reduction <add>, %70, %cst_25 [0] : vector<256x4xf32> to vector<4xf32>
    %72 = vector.shape_cast %71 : vector<4xf32> to vector<1x4xf32>
    %c0_26 = arith.constant 0 : index
    %c1 = arith.constant 1 : index
    %c0_27 = arith.constant 0 : index
    %73 = vector.load %arg5[%c0_26, %c1, %c0_27] : memref<1x2x4xf32, #tpu.memory_space<vmem>>, vector<1x1x4xf32>
    %74 = vector.shape_cast %73 : vector<1x1x4xf32> to vector<1x4xf32>
    %75 = vector.shape_cast %72 : vector<1x4xf32> to vector<1x1x4xf32>
    tpu.vector_store %arg5[%c0_26, %c1, %c0_27], %75 {strides = array<i32>} : memref<1x2x4xf32, #tpu.memory_space<vmem>>, vector<1x1x4xf32>,
    return
  }
  func.func @transform_0(%arg0: i32) -> (i32, i32, i32, i32) {
    %c0_i32 = arith.constant 0 : i32
    %c0_i32_0 = arith.constant 0 : i32
    %c0_i32_1 = arith.constant 0 : i32
    %c0_i32_2 = arith.constant 0 : i32
    return %arg0, %c0_i32, %c0_i32_0, %c0_i32_1 : i32, i32, i32, i32
  }
  func.func @transform_1(%arg0: i32) -> (i32, i32, i32) {
    %c0_i32 = arith.constant 0 : i32
    %c0_i32_0 = arith.constant 0 : i32
    %c0_i32_1 = arith.constant 0 : i32
    %c0_i32_2 = arith.constant 0 : i32
    return %c0_i32, %c0_i32_0, %c0_i32_1 : i32, i32, i32
  }
  func.func @transform_2(%arg0: i32) -> (i32, i32) {
    %c0_i32 = arith.constant 0 : i32
    %c0_i32_0 = arith.constant 0 : i32
    %c0_i32_1 = arith.constant 0 : i32
    return %c0_i32, %c0_i32_0 : i32, i32
  }
  func.func @transform_3(%arg0: i32) -> (i32, i32, i32, i32) {
    %c0_i32 = arith.constant 0 : i32
    %c0_i32_0 = arith.constant 0 : i32
    %c0_i32_1 = arith.constant 0 : i32
    %c0_i32_2 = arith.constant 0 : i32
    return %arg0, %c0_i32, %c0_i32_0, %c0_i32_1 : i32, i32, i32, i32
  }
  func.func @transform_4(%arg0: i32) -> (i32, i32, i32) {
    %c0_i32 = arith.constant 0 : i32
    %c0_i32_0 = arith.constant 0 : i32
    %c0_i32_1 = arith.constant 0 : i32
    return %arg0, %c0_i32, %c0_i32_0 : i32, i32, i32
  }
}

</mosaic_0001>

<bundles_post_ra>
// kernel: conv_up_forward.5
= control target key start
LH: loop header
LB: loop body
LE: loop exit
PB: predicated region body
PF: predicated region fallthrough
CT: control target
= control target key end

     0   :  { %s520_s12 = smov 0   ;;  %s585_s0 = inlined_call_operand.vmem [shape: f32[2,8,8,2], index: 0, kind: input, shape index: {}]   ;;  %s586_s1 = inlined_call_operand.vmem [shape: f32[2,8], index: 1, kind: input, shape index: {}]   ;;  %s587_s2 = inlined_call_operand.vmem [shape: f32[1,8], index: 2, kind: input, shape index: {}]   ;;  %s588_s3 = inlined_call_operand.vmem [shape: f32[2,8,2,8,4], index: 3, kind: output, shape index: {}]  }
   0x1 LB: > { %s426_s13 = sadd.s32 4294967295, %s497_s12   ;;  %p430_p0 = scmp.ge.s32.totalorder %s497_s12, 1  ;;  %s497_s12 = sphi %s520_s12, %s13_s12  }
   0x2   : > { %p137_p1 = scmp.lt.s32.totalorder %s497_s12, 3 }
   0x4   : > { %p138_p2 = pnand %p430_p0, %p137_p1 }
   0x5   : > { %v179_v0 = vld [vmem:[%s586_s1] sm:$0x3] (!%p138_p2)  ;;  %vm212_vm0 = vcmask (!%p138_p2), 1041408   ;;  %p161_p3 = scmp.lt.s32.totalorder (!%p138_p2), %s426_s13, 1  ;;  %vm187_vm1 = vcmask (!%p138_p2), 15360   ;;  %vm321_vm2 = vcmask (!%p138_p2), 31744  }
   0x6   : > { %141 = sbr.rel (%p138_p2) target bundleno = 361 (0x169), region = 32  ;;  %466 = vmatprep.subr.msk.mxu0 (!%p138_p2), %vm212_vm0, %v179_v0  ;;  %480 = vmatprep.subr.msk.mxu1 (!%p138_p2), %vm212_vm0, %v179_v0  ;;  %v435_v9 = vld [vmem:[%s587_s2] ss:$0 sm:$0xff] (!%p138_p2)  ;;  %s499_s26 = smov (!%p138_p2), 124  }
   0x7   : > { %467 = vmatpush3.msk.msra.mxu0 (!%p138_p2), %vm212_vm0, %v179_v0  ;;  %481 = vmatpush3.msk.msra.mxu1 (!%p138_p2), %vm212_vm0, %v179_v0 }
   0xd   : > { %s590_s13 = smov (!%p161_p3, %s426_s13), 1 }
   0xe   : > { %s455_s16 = sshll.u32 %s590_s13, 6  ;;  %s456_s20 = sshll.u32 %s590_s13, 7 }
   0xf   : > { %s165_s19 = scalar_lea.vmem %s585_s0, %s455_s16  ;;  %s548_s25 = scalar_lea.vmem %s588_s3, %s456_s20 }
  0x10   : > { %v171_v1 = vld [vmem:[%s165_s19] sm:$0xff]  ;;  %v172_v3 = vld [vmem:[%s165_s19 + $0x8] sm:$0xff]  ;;  %v173_v5 = vld [vmem:[%s165_s19 + $0x10] sm:$0xff] }
  0x11   : > { %v175_v2 = vld [vmem:[%s165_s19 + $0x20] sm:$0xff]  ;;  %468 = vmatprep.mubr.msk.f32.mxu0 %vm187_vm1, %v171_v1  ;;  %v176_v4 = vld [vmem:[%s165_s19 + $0x28] sm:$0xff]  ;;  %v177_v6 = vld [vmem:[%s165_s19 + $0x30] sm:$0xff] }
  0x12   : > { %474 = vmatprep.mubr.msk.f32.mxu1 %vm187_vm1, %v175_v2  ;;  %469 = vmatmul.mubr.msk.f32.vlgmr.msra.gmra.mrb[0].mxu0 %vm187_vm1, %v172_v3  ;;  %v174_v7 = vld [vmem:[%s165_s19 + $0x18] sm:$0xff] }
  0x13   : > { %475 = vmatmul.mubr.msk.f32.vlgmr.msra.gmra.mrb[0].mxu1 %vm187_vm1, %v176_v4  ;;  %471 = vmatprep.mubr.msk.f32.mxu0 %vm187_vm1, %v173_v5  ;;  %v178_v8 = vld [vmem:[%s165_s19 + $0x38] sm:$0xff] }
  0x14   : > { %477 = vmatprep.mubr.msk.f32.mxu1 %vm187_vm1, %v177_v6 }
  0x16   : > { %472 = vmatmul.mubr.msk.f32.gmra.mrb[2].mxu0 %vm187_vm1, %v174_v7 }
  0x17   : > { %478 = vmatmul.mubr.msk.f32.gmra.mrb[2].mxu1 %vm187_vm1, %v178_v8 }
  0xe5   : > { %v470_v10 = vpop.f32.mrb[0].mxu0 }
  0xe6   : > { %v476_v11 = vpop.f32.mrb[0].mxu1  ;;  %v288_v12 = vadd.f32 %v470_v10, %v435_v9  ;;  %v282_v14 = vpop.f32.mrb[1].mxu0 }
  0xe7   : > { %v308_v13 = vadd.f32 %v476_v11, %v435_v9  ;;  %v302_v15 = vpop.f32.mrb[1].mxu1  ;;  %v283_v16 = vadd.f32 %v435_v9, %v282_v14 }
  0xe8   : > { %v303_v17 = vadd.f32 %v435_v9, %v302_v15  ;;  %323 = vst.msk [vmem:[%s548_s25 + $0x10] sm:$0xff] %vm321_vm2, %v288_v12  ;;  %340 = vrot.lane.b32.xlu0 %v288_v12, %s499_s26 }
  0xe9   : > { %327 = vst.msk [vmem:[%s548_s25 + $0x50] sm:$0xff] %vm321_vm2, %v308_v13  ;;  %348 = vrot.lane.b32.xlu1 %v308_v13, %s499_s26  ;;  %322 = vst.msk [vmem:[%s548_s25] sm:$0xff] %vm321_vm2, %v283_v16  ;;  %v473_v18 = vpop.f32.mrb[2].mxu0 }
  0xea   : > { %326 = vst.msk [vmem:[%s548_s25 + $0x40] sm:$0xff] %vm321_vm2, %v303_v17  ;;  %v479_v19 = vpop.f32.mrb[2].mxu1  ;;  %v298_v20 = vadd.f32 %v473_v18, %v435_v9  ;;  %v292_v21 = vpop.f32.mrb[3].mxu0 }
  0xeb   : > { %v318_v22 = vadd.f32 %v479_v19, %v435_v9  ;;  %v312_v23 = vpop.f32.mrb[3].mxu1  ;;  %v293_v24 = vadd.f32 %v435_v9, %v292_v21 }
  0xec   : > { %v313_v25 = vadd.f32 %v435_v9, %v312_v23  ;;  %325 = vst.msk [vmem:[%s548_s25 + $0x30] sm:$0xff] %vm321_vm2, %v298_v20  ;;  %338 = vrot.lane.b32.xlu0 %v283_v16, %s499_s26 }
  0xed   : > { %344 = vrot.lane.b32.xlu1 %v298_v20, %s499_s26  ;;  %329 = vst.msk [vmem:[%s548_s25 + $0x70] sm:$0xff] %vm321_vm2, %v318_v22  ;;  %324 = vst.msk [vmem:[%s548_s25 + $0x20] sm:$0xff] %vm321_vm2, %v293_v24 }
  0xee   : > { %328 = vst.msk [vmem:[%s548_s25 + $0x60] sm:$0xff] %vm321_vm2, %v313_v25 }
  0xf0   : > { %346 = vrot.lane.b32.xlu0 %v303_v17, %s499_s26 }
  0xf1   : > { %342 = vrot.lane.b32.xlu1 %v293_v24, %s499_s26 }
  0xf4   : > { %350 = vrot.lane.b32.xlu0 %v313_v25, %s499_s26 }
  0xf5   : > { %352 = vrot.lane.b32.xlu1 %v318_v22, %s499_s26 }
 0x15a   : > { %v341_v27 = vpop.permute.xlu0 %340 }
 0x15b   : > { %v349_v26 = vpop.permute.xlu1 %348  ;;  %446 = vst.msk [vmem:[%s548_s25 + $0x18] sm:$0xff] %vm321_vm2, %v341_v27 }
 0x15c   : > { %450 = vst.msk [vmem:[%s548_s25 + $0x58] sm:$0xff] %vm321_vm2, %v349_v26 }
 0x15e   : > { %v339_v29 = vpop.permute.xlu0 %338 }
 0x15f   : > { %v345_v28 = vpop.permute.xlu1 %344  ;;  %445 = vst.msk [vmem:[%s548_s25 + $0x8] sm:$0xff] %vm321_vm2, %v339_v29 }
 0x160   : > { %448 = vst.msk [vmem:[%s548_s25 + $0x38] sm:$0xff] %vm321_vm2, %v345_v28 }
 0x162   : > { %v347_v31 = vpop.permute.xlu0 %346 }
 0x163   : > { %v343_v30 = vpop.permute.xlu1 %342  ;;  %449 = vst.msk [vmem:[%s548_s25 + $0x48] sm:$0xff] %vm321_vm2, %v347_v31 }
 0x164   : > { %447 = vst.msk [vmem:[%s548_s25 + $0x28] sm:$0xff] %vm321_vm2, %v343_v30 }
 0x166   : > { %v351_v33 = vpop.permute.xlu0 %350 }
 0x167   : > { %v353_v32 = vpop.permute.xlu1 %352  ;;  %451 = vst.msk [vmem:[%s548_s25 + $0x68] sm:$0xff] %vm321_vm2, %v351_v33 }
 0x168   : > { %452 = vst.msk [vmem:[%s548_s25 + $0x78] sm:$0xff] %vm321_vm2, %v353_v32 }
 0x169 PF: > { %s13_s12 = sadd.s32 1, %s497_s12  }
 0x16a   : > { %p10_p4 = scmp.ge.s32.totalorder %s13_s12, 4  }
 0x16c   :  { %12 = sbr.rel (!%p10_p4) target bundleno = 1 (0x1), region = 63 }

// kernel: tile.23
= control target key start
LH: loop header
LB: loop body
LE: loop exit
PB: predicated region body
PF: predicated region fallthrough
CT: control target
= control target key end

     0   :  { %s28_s0 = inlined_call_operand.vmem [shape: f32[4], index: 0, kind: input, shape index: {}]   ;;  %s29_s1 = inlined_call_operand.vmem [shape: f32[16,4], index: 1, kind: output, shape index: {}]  }
   0x1   :  { %v4_v0 = vld [vmem:[%s28_s0] ss:$0 sm:$0xff] }
   0x2   :  { %5 = vst [vmem:[%s29_s1] sm:$0xff] %v4_v0  ;;  %8 = vst [vmem:[%s29_s1 + $0x8] sm:$0xff] %v4_v0 }

// kernel: tile.28
= control target key start
LH: loop header
LB: loop body
LE: loop exit
PB: predicated region body
PF: predicated region fallthrough
CT: control target
= control target key end

     0   :  { %s131_s10 = smov 60   ;;  %s132_s11 = smov 52   ;;  %vm3_vm0 = vcmask 31744   ;;  %vm9_vm1 = vcmask 523744   ;;  %vm15_vm2 = vcmask 490944   ;;  %vm21_vm3 = vcmask 458144   ;;  %s207_s0 = inlined_call_operand.vmem [shape: f32[16,4], index: 0, kind: input, shape index: {}]   ;;  %s208_s1 = inlined_call_operand.vmem [shape: f32[1,64], index: 1, kind: output, shape index: {}]  }
   0x1   :  { %v101_v0 = vld [vmem:[%s207_s0 + $0xf] sm:$0x1]   ;;  %v103_v1 = vld [vmem:[%s207_s0 + $0xd] sm:$0x1]   ;;  %v102_v2 = vld [vmem:[%s207_s0 + $0xe] sm:$0x1]  }
   0x2   :  { %7 = vrot.lane.b32.xlu0 %v101_v0, %s131_s10  ;;  %19 = vrot.lane.b32.xlu1 %v103_v1, %s132_s11  ;;  %v104_v3 = vld [vmem:[%s207_s0 + $0xc] sm:$0x1]   ;;  %s133_s16 = smov 56   ;;  %s134_s17 = smov 48   ;;  %v105_v4 = vld [vmem:[%s207_s0 + $0xb] sm:$0x1]  }
   0x3   :  { %v106_v5 = vld [vmem:[%s207_s0 + $0xa] sm:$0x1]   ;;  %v2_v6 = vld [vmem:[%s207_s0] sm:$0x1]   ;;  %s135_s24 = smov 44   ;;  %s136_s25 = smov 40  }
   0x4   :  { %4 = vst.msk [vmem:[#allocation0] sm:$0x1] %vm3_vm0, %v2_v6   ;;  %v107_v7 = vld [vmem:[%s207_s0 + $0x9] sm:$0x1]   ;;  %v108_v8 = vld [vmem:[%s207_s0 + $0x8] sm:$0x1]  }
   0x5   :  { %s137_s30 = smov 36   ;;  %s138_s2 = smov 32   ;;  %v109_v9 = vld [vmem:[%s207_s0 + $0x7] sm:$0x1]   ;;  %v110_v10 = vld [vmem:[%s207_s0 + $0x6] sm:$0x1]  }
   0x6   :  { %13 = vrot.lane.b32.xlu0 %v102_v2, %s133_s16  ;;  %25 = vrot.lane.b32.xlu1 %v104_v3, %s134_s17  ;;  %s139_s7 = smov 28   ;;  %s140_s8 = smov 24   ;;  %v111_v11 = vld [vmem:[%s207_s0 + $0x5] sm:$0x1]   ;;  %v112_v12 = vld [vmem:[%s207_s0 + $0x4] sm:$0x1]  }
   0x7   :  { %s141_s13 = smov 20   ;;  %s142_s14 = smov 16   ;;  %v113_v13 = vld [vmem:[%s207_s0 + $0x3] sm:$0x1]   ;;  %v114_v14 = vld [vmem:[%s207_s0 + $0x2] sm:$0x1]  }
   0x8   :  { %s143_s19 = smov 12   ;;  %s144_s20 = smov 8   ;;  %v115_v15 = vld [vmem:[%s207_s0 + $0x1] sm:$0x1]   ;;  %vm27_vm4 = vcmask 425344   ;;  %vm33_vm5 = vcmask 392544  }
   0x9   :  { %s145_s0 = smov 4   ;;  %vm39_vm6 = vcmask 359744   ;;  %vm45_vm7 = vcmask 326944   ;;  %vm51_vm8 = vcmask 294144   ;;  %vm57_vm9 = vcmask 261344  }
   0xa   :  { %31 = vrot.lane.b32.xlu0 %v105_v4, %s135_s24  ;;  %37 = vrot.lane.b32.xlu1 %v106_v5, %s136_s25  ;;  %vm63_vm10 = vcmask 228544   ;;  %vm69_vm11 = vcmask 195744   ;;  %vm75_vm12 = vcmask 162944   ;;  %vm81_vm13 = vcmask 130144  }
   0xb   :  { %vm87_vm14 = vcmask 97344   ;;  %vm93_vm15 = vcmask 64544  }
   0xe   :  { %43 = vrot.lane.b32.xlu0 %v107_v7, %s137_s30  ;;  %49 = vrot.lane.b32.xlu1 %v108_v8, %s138_s2 }
  0x12   :  { %55 = vrot.lane.b32.xlu0 %v109_v9, %s139_s7  ;;  %61 = vrot.lane.b32.xlu1 %v110_v10, %s140_s8 }
  0x16   :  { %67 = vrot.lane.b32.xlu0 %v111_v11, %s141_s13  ;;  %73 = vrot.lane.b32.xlu1 %v112_v12, %s142_s14 }
  0x1a   :  { %79 = vrot.lane.b32.xlu0 %v113_v13, %s143_s19  ;;  %85 = vrot.lane.b32.xlu1 %v114_v14, %s144_s20 }
  0x1e   :  { %91 = vrot.lane.b32.xlu0 %v115_v15, %s145_s0 }
  0x74   :  { %v8_v16 = vpop.permute.xlu0 %7   ;;  %v20_v17 = vpop.permute.xlu1 %19  }
  0x75   :  { %10 = vst.msk [vmem:[#allocation0] sm:$0x1] %vm9_vm1, %v8_v16  }
  0x78   :  { %v14_v18 = vpop.permute.xlu0 %13   ;;  %v26_v19 = vpop.permute.xlu1 %25  }
  0x79   :  { %16 = vst.msk [vmem:[#allocation0] sm:$0x1] %vm15_vm2, %v14_v18  }
  0x7a   :  { %22 = vst.msk [vmem:[#allocation0] sm:$0x1] %vm21_vm3, %v20_v17  }
  0x7b   :  { %28 = vst.msk [vmem:[#allocation0] sm:$0x1] %vm27_vm4, %v26_v19  }
  0x7c   :  { %v32_v20 = vpop.permute.xlu0 %31   ;;  %v38_v21 = vpop.permute.xlu1 %37  }
  0x7d   :  { %34 = vst.msk [vmem:[#allocation0] sm:$0x1] %vm33_vm5, %v32_v20  }
  0x7e   :  { %40 = vst.msk [vmem:[#allocation0] sm:$0x1] %vm39_vm6, %v38_v21  }
  0x80   :  { %v44_v22 = vpop.permute.xlu0 %43   ;;  %v50_v23 = vpop.permute.xlu1 %49  }
  0x81   :  { %46 = vst.msk [vmem:[#allocation0] sm:$0x1] %vm45_vm7, %v44_v22  }
  0x82   :  { %52 = vst.msk [vmem:[#allocation0] sm:$0x1] %vm51_vm8, %v50_v23  }
  0x84   :  { %v56_v24 = vpop.permute.xlu0 %55   ;;  %v62_v25 = vpop.permute.xlu1 %61  }
  0x85   :  { %58 = vst.msk [vmem:[#allocation0] sm:$0x1] %vm57_vm9, %v56_v24  }
  0x86   :  { %64 = vst.msk [vmem:[#allocation0] sm:$0x1] %vm63_vm10, %v62_v25  }
  0x88   :  { %v68_v26 = vpop.permute.xlu0 %67   ;;  %v74_v27 = vpop.permute.xlu1 %73  }
  0x89   :  { %70 = vst.msk [vmem:[#allocation0] sm:$0x1] %vm69_vm11, %v68_v26  }
  0x8a   :  { %76 = vst.msk [vmem:[#allocation0] sm:$0x1] %vm75_vm12, %v74_v27  }
  0x8c   :  { %v80_v28 = vpop.permute.xlu0 %79   ;;  %v86_v29 = vpop.permute.xlu1 %85  }
  0x8d   :  { %82 = vst.msk [vmem:[#allocation0] sm:$0x1] %vm81_vm13, %v80_v28  }
  0x8e   :  { %88 = vst.msk [vmem:[#allocation0] sm:$0x1] %vm87_vm14, %v86_v29  }
  0x90   :  { %v92_v30 = vpop.permute.xlu0 %91  }
  0x91   :  { %94 = vst.msk [vmem:[#allocation0] sm:$0x1] %vm93_vm15, %v92_v30  }
  0x98   :  { %v98_v31 = vld [vmem:[#allocation0] sm:$0x1] }
  0x99   :  { %100 = vst [vmem:[%s208_s1] sm:$0x1] %v98_v31 }

// kernel: conv_up_forward.7
= control target key start
LH: loop header
LB: loop body
LE: loop exit
PB: predicated region body
PF: predicated region fallthrough
CT: control target
= control target key end

     0   :  { %vm44_vm0 = vcmask 523264   ;;  %s105_s0 = inlined_call_operand.vmem [shape: f32[32,64], index: 0, kind: input, shape index: {}]   ;;  %s106_s1 = inlined_call_operand.vmem [shape: f32[1,64], index: 1, kind: input, shape index: {}]   ;;  %s107_s2 = inlined_call_operand.vmem [shape: f32[1,64], index: 2, kind: input, shape index: {}]   ;;  %s108_s3 = inlined_call_operand.vmem [shape: f32[32,64], index: 3, kind: output, shape index: {}]  }
   0x1   :  { %v14_v0 = vld [vmem:[%s105_s0] sm:$0xff]  ;;  %v15_v4 = vld [vmem:[%s105_s0 + $0x8] sm:$0xff]  ;;  %v16_v5 = vld [vmem:[%s105_s0 + $0x10] sm:$0xff] }
   0x2   :  { %v53_v1 = vld [vmem:[%s106_s1] ss:$0 sm:$0xff]  ;;  %v17_v6 = vld [vmem:[%s105_s0 + $0x18] sm:$0xff] }
   0x3   :  { %v54_v2 = vld [vmem:[%s107_s2] ss:$0 sm:$0xff]  ;;  %v25_v3 = vmul.f32 %v53_v1, %v14_v0  ;;  %v26_v7 = vmul.f32 %v53_v1, %v15_v4  ;;  %v27_v8 = vmul.f32 %v53_v1, %v16_v5  ;;  %v28_v9 = vmul.f32 %v53_v1, %v17_v6 }
   0x5   :  { %v36_v10 = vadd.f32 %v54_v2, %v25_v3  ;;  %v37_v11 = vadd.f32 %v54_v2, %v26_v7  ;;  %v38_v12 = vadd.f32 %v54_v2, %v27_v8  ;;  %v39_v13 = vadd.f32 %v54_v2, %v28_v9 }
   0x7   :  { %v40_v14 = vmax.f32 %v36_v10, 0.0  ;;  %v41_v15 = vmax.f32 %v37_v11, 0.0  ;;  %v42_v16 = vmax.f32 %v38_v12, 0.0  ;;  %v43_v17 = vmax.f32 %v39_v13, 0.0 }
   0x9   :  { %45 = vst.msk [vmem:[%s108_s3] sm:$0xff] %vm44_vm0, %v40_v14  ;;  %46 = vst.msk [vmem:[%s108_s3 + $0x8] sm:$0xff] %vm44_vm0, %v41_v15 }
   0xa   :  { %47 = vst.msk [vmem:[%s108_s3 + $0x10] sm:$0xff] %vm44_vm0, %v42_v16  ;;  %48 = vst.msk [vmem:[%s108_s3 + $0x18] sm:$0xff] %vm44_vm0, %v43_v17 }

// kernel: conv_up_forward.8
= control target key start
LH: loop header
LB: loop body
LE: loop exit
PB: predicated region body
PF: predicated region fallthrough
CT: control target
= control target key end

     0   :  { %s4689_s15 = smov 0   ;;  %s6010_s0 = inlined_call_operand.vmem [shape: f32[2,18,18,4], index: 0, kind: input, shape index: {}]   ;;  %s6011_s1 = inlined_call_operand.vmem [shape: f32[9,4,4], index: 1, kind: input, shape index: {}]   ;;  %s6012_s2 = inlined_call_operand.vmem [shape: f32[1,4], index: 2, kind: input, shape index: {}]   ;;  %s6013_s3 = inlined_call_operand.vmem [shape: f32[2,16,16,4], index: 3, kind: output, shape index: {0}]   ;;  %s6014_s4 = inlined_call_operand.vmem [shape: f32[2,2,4], index: 4, kind: output, shape index: {1}]  }
   0x1 LB: > { %s3332_s16 = sadd.s32 4294967295, %s4662_s15   ;;  %p3336_p0 = scmp.ge.s32.totalorder %s4662_s15, 1  ;;  %s4662_s15 = sphi %s4689_s15, %s15_s15  }
   0x2   : > { %p165_p1 = scmp.lt.s32.totalorder %s4662_s15, 3 }
   0x4   : > { %p166_p2 = pnand %p3336_p0, %p165_p1 }
   0x6   : > { %169 = sbr.rel (%p166_p2) target bundleno = 546 (0x222), region = 32 }
   0xd   : > { %v264_v0 = vld [vmem:[%s6011_s1 + $0x4] sm:$0xf]  ;;  %vm466_vm0 = vcmask 1043456   ;;  %v4703_v1 = vld [vmem:[%s6011_s1 + $0x10] sm:$0xf]  ;;  %p195_p3 = scmp.lt.s32.totalorder %s3332_s16, 1 }
   0xe   : > { %3939 = vmatprep.subr.msk.mxu1 %vm466_vm0, %v264_v0  ;;  %4139 = vmatprep.subr.msk.mxu0 %vm466_vm0, %v4703_v1  ;;  %v263_v2 = vld [vmem:[%s6011_s1] sm:$0xf]  ;;  %v268_v3 = vld [vmem:[%s6011_s1 + $0x14] sm:$0xf]  ;;  %vm320_vm1 = vcmask 1046528   ;;  %vm401_vm2 = vcmask 31744  }
   0xf   : > { %3940 = vmatpush3.msk.msra.mxu1 %vm466_vm0, %v264_v0  ;;  %4140 = vmatpush3.msk.msra.mxu0 %vm466_vm0, %v4703_v1  ;;  %s6190_s16 = smov (!%p195_p3, %s3332_s16), 1  ;;  %v4790_v33 = vld [vmem:[%s6011_s1 + $0x18] sm:$0xf]  ;;  %v4800_v35 = vld [vmem:[%s6011_s1 + $0x8] sm:$0xf]  ;;  %vm987_vm3 = vcmask 1045504  }
  0x10   : > { %3989 = vmatprep.subr.msk.mxu1 %vm466_vm0, %v263_v2  ;;  %4189 = vmatprep.subr.msk.mxu0 %vm466_vm0, %v268_v3  ;;  %s4647_s25 = smul.u32 432, %s6190_s16  ;;  %s3641_s13 = sshll.u32 %s6190_s16, 8  ;;  %vm3142_vm4 = vcmask 24576  }
  0x11   : > { %s5833_s20 = scalar_lea.vmem %s6013_s3, %s3641_s13  ;;  %s3340_s21 = sshll.u32 %s6190_s16, 1 }
  0x12   : > { %s4725_s28 = scalar_lea.vmem %s6010_s0, %s4647_s25  ;;  %s208_s24 = scalar_lea.vmem %s6014_s4, %s3340_s21 }
  0x13   : > { %v4728_v4 = vld [vmem:[%s4725_s28] sm:$0xff]  ;;  %v4731_v5 = vld [vmem:[%s4725_s28 + $0x8] sm:$0xff]  ;;  %v4734_v6 = vld [vmem:[%s4725_s28 + $0x18] sm:$0xff] }
  0x14   : > { %6088 = vst [vmem:[#allocation2_spill] sm:$0xff] %v4734_v6  ;;  %v321_v7 = vrot.slane %v4728_v4, 1  ;;  %v322_v8 = vrot.slane %v4731_v5, 1  ;;  %v4739_v9 = vld [vmem:[%s4725_s28 + $0x20] sm:$0xff]  ;;  %v326_v10 = vrot.slane %v4734_v6, 1  ;;  %v4751_v15 = vld [vmem:[%s4725_s28 + $0x30] sm:$0xff] }
  0x15   : > { %6089 = vst [vmem:[#allocation3_spill] sm:$0xff] %v4739_v9  ;;  %v4743_v11 = vld [vmem:[%s4725_s28 + $0x10] sm:$0x3]  ;;  %v327_v12 = vrot.slane %v4739_v9, 1  ;;  %v4748_v14 = vld [vmem:[%s4725_s28 + $0x28] sm:$0x3] }
  0x16   : > { %v324_v13 = vrot.slane %v4743_v11, 1  ;;  %v323_v16 = vsel %vm320_vm1, %v321_v7, %v322_v8  ;;  %v329_v17 = vrot.slane %v4748_v14, 1  ;;  %v4756_v18 = vld [vmem:[%s4725_s28 + $0x38] sm:$0xff]  ;;  %v331_v19 = vrot.slane %v4751_v15, 1  ;;  %v4760_v20 = vld [vmem:[%s4725_s28 + $0x40] sm:$0x3] }
  0x17   : > { %3941 = vmatprep.mubr.msk.f32.mxu1 %vm401_vm2, %v323_v16  ;;  %v328_v21 = vsel %vm320_vm1, %v326_v10, %v327_v12  ;;  %v332_v23 = vrot.slane %v4756_v18, 1  ;;  %v334_v24 = vrot.slane %v4760_v20, 1  ;;  %v4768_v25 = vld [vmem:[%s4725_s28 + $0x48] sm:$0xff]  ;;  %v4771_v26 = vld [vmem:[%s4725_s28 + $0x50] sm:$0xff]  ;;  %v4774_v27 = vld [vmem:[%s4725_s28 + $0x58] sm:$0x3] }
  0x18   : > { %v325_v22 = vsel %vm320_vm1, %v322_v8, %v324_v13  ;;  %4141 = vmatprep.mubr.msk.f32.mxu0 %vm401_vm2, %v328_v21  ;;  %v330_v28 = vsel %vm320_vm1, %v327_v12, %v329_v17  ;;  %v336_v29 = vrot.slane %v4768_v25, 1  ;;  %v337_v30 = vrot.slane %v4771_v26, 1  ;;  %v4782_v31 = vld [vmem:[%s4725_s28 + $0x60] sm:$0xff]  ;;  %v4785_v32 = vld [vmem:[%s4725_s28 + $0x68] sm:$0xff]  ;;  %v4816_v41 = vld [vmem:[%s4725_s28 + $0x70] sm:$0x3] }
  0x19   : > { %3942 = vmatmul.mubr.msk.f32.vlgmr.msra.gmra.mrb[0].mxu1 %vm401_vm2, %v325_v22  ;;  %4142 = vmatmul.mubr.msk.f32.vlgmr.msra.gmra.mrb[0].mxu0 %vm401_vm2, %v330_v28  ;;  %v4795_v34 = vsel %vm320_vm1, %v331_v19, %v332_v23  ;;  %v4805_v36 = vsel %vm320_vm1, %v332_v23, %v334_v24  ;;  %v339_v37 = vrot.slane %v4774_v27, 1  ;;  %v341_v39 = vrot.slane %v4782_v31, 1  ;;  %v4822_v42 = vld [vmem:[%s4725_s28 + $0x78] sm:$0xff]  ;;  %v4825_v43 = vld [vmem:[%s4725_s28 + $0x80] sm:$0xff]  ;;  %v4845_v49 = vld [vmem:[%s4725_s28 + $0x88] sm:$0x3] }
  0x1a   : > { %3990 = vmatpush3.msk.msra.mxu1 %vm466_vm0, %v263_v2  ;;  %6090 = vst [vmem:[#allocation4_spill] sm:$0xff] %v4795_v34  ;;  %4190 = vmatpush3.msk.msra.mxu0 %vm466_vm0, %v268_v3  ;;  %6091 = vst [vmem:[#allocation5_spill] sm:$0xff] %v4805_v36  ;;  %v4811_v38 = vsel %vm320_vm1, %v336_v29, %v337_v30  ;;  %v342_v40 = vrot.slane %v4785_v32, 1  ;;  %v344_v45 = vrot.slane %v4816_v41, 1  ;;  %v346_v47 = vrot.slane %v4822_v42, 1  ;;  %v4850_v50 = vld [vmem:[%s4725_s28 + $0x90] sm:$0xff] }
  0x1b   : > { %3944 = vmatprep.mubr.msk.f32.mxu1 %vm401_vm2, %v328_v21  ;;  %4144 = vmatprep.mubr.msk.f32.mxu0 %vm401_vm2, %v4795_v34  ;;  %6092 = vst [vmem:[#allocation6_spill] sm:$0xff] %v4811_v38  ;;  %v4836_v44 = vsel %vm320_vm1, %v337_v30, %v339_v37  ;;  %v347_v48 = vrot.slane %v4825_v43, 1  ;;  %v4853_v51 = vld [vmem:[%s4725_s28 + $0x98] sm:$0xff]  ;;  %v349_v53 = vrot.slane %v4845_v49, 1  ;;  %v351_v55 = vrot.slane %v4850_v50, 1  ;;  %v4876_v58 = vld [vmem:[%s4725_s28 + $0xa8] sm:$0xff] }
  0x1c   : > { %4239 = vmatprep.subr.msk.mxu0 %vm466_vm0, %v4790_v33  ;;  %4039 = vmatprep.subr.msk.mxu1 %vm466_vm0, %v4800_v35  ;;  %6093 = vst [vmem:[#allocation7_spill] sm:$0xff] %v4836_v44  ;;  %v4840_v46 = vsel %vm320_vm1, %v341_v39, %v342_v40  ;;  %v4862_v52 = vsel %vm320_vm1, %v342_v40, %v344_v45  ;;  %v352_v56 = vrot.slane %v4853_v51, 1  ;;  %v4871_v57 = vld [vmem:[%s4725_s28 + $0xa0] sm:$0x3]  ;;  %v4879_v59 = vld [vmem:[%s4725_s28 + $0xb0] sm:$0xff]  ;;  %v356_v63 = vrot.slane %v4876_v58, 1 }
  0x1d   : > { %3945 = vmatmul.mubr.msk.f32.gmra.mrb[2].mxu1 %vm401_vm2, %v330_v28  ;;  %4145 = vmatmul.mubr.msk.f32.gmra.mrb[2].mxu0 %vm401_vm2, %v4805_v36  ;;  %6094 = vst [vmem:[#allocation8_spill] sm:$0xff] %v4840_v46  ;;  %6095 = vst [vmem:[#allocation9_spill] sm:$0xff] %v4862_v52  ;;  %v4866_v54 = vsel %vm320_vm1, %v346_v47, %v347_v48  ;;  %v4888_v60 = vsel %vm320_vm1, %v347_v48, %v349_v53  ;;  %v354_v61 = vrot.slane %v4871_v57, 1  ;;  %v4897_v2 = vld [vmem:[%s4725_s28 + $0xb8] sm:$0x3]  ;;  %v4902_v3 = vld [vmem:[%s4725_s28 + $0xc0] sm:$0xff] }
  0x1e   : > { %3947 = vmatprep.mubr.msk.f32.mxu1 %vm401_vm2, %v4795_v34  ;;  %4147 = vmatprep.mubr.msk.f32.mxu0 %vm401_vm2, %v4811_v38  ;;  %6096 = vst [vmem:[#allocation10_spill] sm:$0xff] %v4866_v54  ;;  %6097 = vst [vmem:[#allocation11_spill] sm:$0xff] %v4888_v60  ;;  %v4892_v62 = vsel %vm320_vm1, %v351_v55, %v352_v56  ;;  %v357_v0 = vrot.slane %v4879_v59, 1  ;;  %v4905_v7 = vld [vmem:[%s4725_s28 + $0xc8] sm:$0xff]  ;;  %v359_v10 = vrot.slane %v4897_v2, 1  ;;  %v361_v13 = vrot.slane %v4902_v3, 1 }
  0x1f   : > { %6098 = vst [vmem:[#allocation12_spill] sm:$0xff] %v4892_v62  ;;  %v4914_v8 = vsel %vm320_vm1, %v352_v56, %v354_v61  ;;  %v362_v16 = vrot.slane %v4905_v7, 1  ;;  %v4923_v17 = vld [vmem:[%s4725_s28 + $0xd0] sm:$0x3]  ;;  %v993_v23 = vrot.slane %v4734_v6, 2  ;;  %v994_v24 = vrot.slane %v4739_v9, 2 }
  0x20   : > { %6099 = vst [vmem:[#allocation13_spill] sm:$0xff] %v4914_v8  ;;  %v4918_v12 = vsel %vm320_vm1, %v356_v63, %v357_v0  ;;  %v4934_v19 = vsel %vm320_vm1, %v357_v0, %v359_v10  ;;  %v364_v21 = vrot.slane %v4923_v17, 1  ;;  %v4943_v28 = vld [vmem:[%s4725_s28 + $0xd8] sm:$0xff]  ;;  %v4946_v29 = vld [vmem:[%s4725_s28 + $0xe0] sm:$0xff]  ;;  %v996_v30 = vrot.slane %v4748_v14, 2  ;;  %v4971_v53 = vld [vmem:[%s4725_s28 + $0xf0] sm:$0xff] }
  0x21   : > { %3948 = vmatmul.mubr.msk.f32.gmra.mrb[4].mxu1 %vm401_vm2, %v4805_v36  ;;  %4148 = vmatmul.mubr.msk.f32.gmra.mrb[4].mxu0 %vm401_vm2, %v4836_v44  ;;  %6100 = vst [vmem:[#allocation14_spill] sm:$0xff] %v4918_v12  ;;  %6101 = vst [vmem:[#allocation15_spill] sm:$0xff] %v4934_v19  ;;  %v4938_v22 = vsel %vm320_vm1, %v361_v13, %v362_v16  ;;  %v366_v39 = vrot.slane %v4943_v28, 1  ;;  %v367_v40 = vrot.slane %v4946_v29, 1  ;;  %v4963_v45 = vld [vmem:[%s4725_s28 + $0xe8] sm:$0x3] }
  0x22   : > { %3950 = vmatprep.mubr.msk.f32.mxu1 %vm401_vm2, %v4811_v38  ;;  %4150 = vmatprep.mubr.msk.f32.mxu0 %vm401_vm2, %v4840_v46  ;;  %6102 = vst [vmem:[#allocation16_spill] sm:$0xff] %v4938_v22  ;;  %v4958_v37 = vsel %vm320_vm1, %v362_v16, %v364_v21  ;;  %v4966_v47 = vsel %vm987_vm3, %v993_v23, %v994_v24  ;;  %v998_v48 = vrot.slane %v4751_v15, 2  ;;  %v999_v14 = vrot.slane %v4756_v18, 2  ;;  %v4974_v55 = vld [vmem:[%s4725_s28 + $0xf8] sm:$0xff]  ;;  %v4995_v16 = vld [vmem:[%s4725_s28 + $0x100] sm:$0x3] }
  0x23   : > { %6103 = vst [vmem:[#allocation17_spill] sm:$0xff] %v4958_v37  ;;  %v369_v56 = vrot.slane %v4963_v45, 1  ;;  %v1001_v61 = vrot.slane %v4760_v20, 2  ;;  %v4987_v63 = vsel %vm987_vm3, %v994_v24, %v996_v30  ;;  %v4990_v0 = vsel %vm320_vm1, %v366_v39, %v367_v40  ;;  %v5006_v24 = vld [vmem:[%s4725_s28 + $0x110] sm:$0xff]  ;;  %v5013_v30 = vld [vmem:[%s6011_s1 + $0x1c] sm:$0xf] }
  0x24   : > { %6104 = vst [vmem:[#allocation18_spill] sm:$0xff] %v4990_v0  ;;  %v371_v10 = vrot.slane %v4971_v53, 1  ;;  %v372_v13 = vrot.slane %v4974_v55, 1  ;;  %v4998_v21 = vsel %vm987_vm3, %v998_v48, %v999_v14  ;;  %v1003_v20 = vrot.slane %v4768_v25, 2  ;;  %v5109_v36 = vld [vmem:[%s4725_s28 + $0x148] sm:$0x3] }
  0x25   : > { %3951 = vmatmul.mubr.msk.f32.gmra.mrb[6].mxu1 %vm401_vm2, %v4836_v44  ;;  %4151 = vmatmul.mubr.msk.f32.gmra.mrb[6].mxu0 %vm401_vm2, %v4862_v52  ;;  %v1004_v23 = vrot.slane %v4771_v26, 2  ;;  %v5020_v39 = vsel %vm320_vm1, %v367_v40, %v369_v56  ;;  %v5023_v48 = vsel %vm987_vm3, %v999_v14, %v1001_v61  ;;  %v377_v40 = vrot.slane %v5006_v24, 1  ;;  %v5037_v56 = vld [vmem:[%s4725_s28 + $0x118] sm:$0x3] }
  0x26   : > { %3953 = vmatprep.mubr.msk.f32.mxu1 %vm401_vm2, %v4840_v46  ;;  %4153 = vmatprep.mubr.msk.f32.mxu0 %vm401_vm2, %v4866_v54  ;;  %6105 = vst [vmem:[#allocation19_spill] sm:$0xff] %v5020_v39  ;;  %6106 = vst [vmem:[#allocation20_spill] sm:$0xff] %v5023_v48  ;;  %v1008_v61 = vrot.slane %v4782_v31, 2  ;;  %v5082_v46 = vld [vmem:[%s4725_s28 + $0x138] sm:$0xff]  ;;  %v1016_v44 = vrot.slane %v4845_v49, 2  ;;  %v1021_v34 = vrot.slane %v4871_v57, 2 }
  0x27   : > { %v5040_v14 = vsel %vm987_vm3, %v1003_v20, %v1004_v23  ;;  %v379_v20 = vrot.slane %v5037_v56, 1  ;;  %v386_v38 = vrot.slane %v5082_v46, 1  ;;  %v1023_v57 = vrot.slane %v4876_v58, 2 }
  0x28   : > { %6108 = vst [vmem:[#allocation22_spill] sm:$0xff] %v5040_v14 }
  0x29   : > { %3954 = vmatmul.mubr.msk.f32.gmra.mrb[8].mxu1 %vm401_vm2, %v4862_v52  ;;  %4154 = vmatmul.mubr.msk.f32.gmra.mrb[8].mxu0 %vm401_vm2, %v4888_v60  ;;  %v5074_v52 = vld [vmem:[%s4725_s28 + $0x130] sm:$0x3] }
  0x2a   : > { %3956 = vmatprep.mubr.msk.f32.mxu1 %vm401_vm2, %v4866_v54  ;;  %4156 = vmatprep.mubr.msk.f32.mxu0 %vm401_vm2, %v4892_v62 }
  0x2d   : > { %3957 = vmatmul.mubr.msk.f32.gmra.mrb[10].mxu1 %vm401_vm2, %v4888_v60  ;;  %4157 = vmatmul.mubr.msk.f32.gmra.mrb[10].mxu0 %vm401_vm2, %v4914_v8 }
  0x2e   : > { %3959 = vmatprep.mubr.msk.f32.mxu1 %vm401_vm2, %v4892_v62  ;;  %4159 = vmatprep.mubr.msk.f32.mxu0 %vm401_vm2, %v4918_v12  ;;  %v1011_v62 = vrot.slane %v4816_v41, 2  ;;  %v1013_v41 = vrot.slane %v4822_v42, 2 }
  0x31   : > { %3960 = vmatmul.mubr.msk.f32.gmra.mrb[12].mxu1 %vm401_vm2, %v4914_v8  ;;  %4160 = vmatmul.mubr.msk.f32.gmra.mrb[12].mxu0 %vm401_vm2, %v4934_v19  ;;  %v5045_v8 = vld [vmem:[%s4725_s28 + $0x120] sm:$0xff] }
  0x32   : > { %3962 = vmatprep.mubr.msk.f32.mxu1 %vm401_vm2, %v4918_v12  ;;  %4162 = vmatprep.mubr.msk.f32.mxu0 %vm401_vm2, %v4938_v22  ;;  %v1006_v12 = vrot.slane %v4774_v27, 2  ;;  %v381_v54 = vrot.slane %v5045_v8, 1 }
  0x34   : > { %v5066_v60 = vsel %vm987_vm3, %v1004_v23, %v1006_v12  ;;  %v5085_v12 = vld [vmem:[%s4725_s28 + $0x140] sm:$0xff] }
  0x35   : > { %3963 = vmatmul.mubr.msk.f32.gmra.mrb[14].mxu1 %vm401_vm2, %v4934_v19  ;;  %4163 = vmatmul.mubr.msk.f32.gmra.mrb[14].mxu0 %vm401_vm2, %v4958_v37  ;;  %v5031_v19 = vsel %vm320_vm1, %v371_v10, %v372_v13  ;;  %v5048_v10 = vld [vmem:[%s4725_s28 + $0x128] sm:$0xff]  ;;  %6110 = vst [vmem:[#allocation24_spill] sm:$0xff] %v5066_v60 }
  0x36   : > { %3965 = vmatprep.mubr.msk.f32.mxu1 %vm401_vm2, %v4938_v22  ;;  %4191 = vmatprep.mubr.msk.f32.mxu0 %vm401_vm2, %v4966_v47  ;;  %v5003_v22 = vld [vmem:[%s4725_s28 + $0x108] sm:$0xff]  ;;  %6107 = vst [vmem:[#allocation21_spill] sm:$0xff] %v5031_v19 }
  0x39   : > { %3966 = vmatmul.mubr.msk.f32.gmra.mrb[16].mxu1 %vm401_vm2, %v4958_v37  ;;  %4192 = vmatmul.mubr.msk.f32.vlgmr.msra.gmra.mrb[0].mxu0 %vm401_vm2, %v4987_v63  ;;  %v374_v37 = vrot.slane %v4995_v16, 1 }
  0x3a   : > { %3968 = vmatprep.mubr.msk.f32.mxu1 %vm401_vm2, %v4990_v0  ;;  %4240 = vmatpush3.msk.msra.mxu0 %vm466_vm0, %v4790_v33  ;;  %v376_v0 = vrot.slane %v5003_v22, 1  ;;  %v1009_v33 = vrot.slane %v4785_v32, 2 }
  0x3b   : > { %4194 = vmatprep.mubr.msk.f32.mxu0 %vm401_vm2, %v4998_v21  ;;  %4289 = vmatprep.subr.msk.mxu0 %vm466_vm0, %v5013_v30  ;;  %v5059_v27 = vsel %vm320_vm1, %v372_v13, %v374_v37  ;;  %v1014_v13 = vrot.slane %v4825_v43, 2 }
  0x3c   : > { %6109 = vst [vmem:[#allocation23_spill] sm:$0xff] %v5059_v27  ;;  %v5077_v37 = vsel %vm987_vm3, %v1008_v61, %v1009_v33  ;;  %v5097_v23 = vsel %vm987_vm3, %v1009_v33, %v1011_v62  ;;  %v384_v61 = vrot.slane %v5074_v52, 1  ;;  %v1018_v62 = vrot.slane %v4850_v50, 2 }
  0x3d   : > { %3969 = vmatmul.mubr.msk.f32.gmra.mrb[18].mxu1 %vm401_vm2, %v5020_v39  ;;  %4195 = vmatmul.mubr.msk.f32.gmra.mrb[2].mxu0 %vm401_vm2, %v5023_v48  ;;  %v5069_v39 = vsel %vm320_vm1, %v376_v0, %v377_v40  ;;  %6112 = vst [vmem:[#allocation26_spill] sm:$0xff] %v5077_v37  ;;  %v5094_v0 = vsel %vm320_vm1, %v377_v40, %v379_v20  ;;  %6114 = vst [vmem:[#allocation28_spill] sm:$0xff] %v5097_v23  ;;  %v1019_v33 = vrot.slane %v4853_v51, 2  ;;  %v5117_v20 = vld [vmem:[%s4725_s28 + $0x150] sm:$0xff]  ;;  %v5179_v48 = vld [vmem:[%s4725_s28 + $0x178] sm:$0x3] }
  0x3e   : > { %3971 = vmatprep.mubr.msk.f32.mxu1 %vm401_vm2, %v5031_v19  ;;  %4197 = vmatprep.mubr.msk.f32.mxu0 %vm401_vm2, %v5040_v14  ;;  %6111 = vst [vmem:[#allocation25_spill] sm:$0xff] %v5069_v39  ;;  %v382_v19 = vrot.slane %v5048_v10, 1  ;;  %6113 = vst [vmem:[#allocation27_spill] sm:$0xff] %v5094_v0  ;;  %v5112_v40 = vsel %vm987_vm3, %v1013_v41, %v1014_v13  ;;  %v389_v41 = vrot.slane %v5109_v36, 1 }
  0x3f   : > { %6116 = vst [vmem:[#allocation30_spill] sm:$0xff] %v5112_v40 }
  0x40   : > { %v5129_v49 = vsel %vm320_vm1, %v382_v19, %v384_v61  ;;  %v1024_v61 = vrot.slane %v4879_v59, 2 }
  0x41   : > { %3972 = vmatmul.mubr.msk.f32.gmra.mrb[20].mxu1 %vm401_vm2, %v5059_v27  ;;  %4198 = vmatmul.mubr.msk.f32.gmra.mrb[4].mxu0 %vm401_vm2, %v5066_v60  ;;  %v5103_v27 = vsel %vm320_vm1, %v381_v54, %v382_v19  ;;  %v5120_v54 = vld [vmem:[%s4725_s28 + $0x158] sm:$0xff]  ;;  %6117 = vst [vmem:[#allocation31_spill] sm:$0xff] %v5129_v49  ;;  %v5144_v60 = vld [vmem:[%s4725_s28 + $0x160] sm:$0x3]  ;;  %v5147_v19 = vsel %vm987_vm3, %v1018_v62, %v1019_v33 }
  0x42   : > { %3974 = vmatprep.mubr.msk.f32.mxu1 %vm401_vm2, %v5069_v39  ;;  %4200 = vmatprep.mubr.msk.f32.mxu0 %vm401_vm2, %v5077_v37  ;;  %6115 = vst [vmem:[#allocation29_spill] sm:$0xff] %v5103_v27  ;;  %v387_v39 = vrot.slane %v5085_v12, 1  ;;  %v5136_v37 = vsel %vm987_vm3, %v1014_v13, %v1016_v44  ;;  %v5155_v44 = vld [vmem:[%s4725_s28 + $0x170] sm:$0xff]  ;;  %v5167_v13 = vsel %vm987_vm3, %v1019_v33, %v1021_v34  ;;  %v394_v62 = vrot.slane %v5144_v60, 1 }
  0x43   : > { %6118 = vst [vmem:[#allocation32_spill] sm:$0xff] %v5136_v37  ;;  %6120 = vst [vmem:[#allocation34_spill] sm:$0xff] %v5155_v44  ;;  %v1028_v34 = vrot.slane %v4902_v3, 2  ;;  %v1029_v33 = vrot.slane %v4905_v7, 2 }
  0x44   : > { %6122 = vst [vmem:[#allocation36_spill] sm:$0xff] %v5167_v13 }
  0x45   : > { %3975 = vmatmul.mubr.msk.f32.gmra.mrb[22].mxu1 %vm401_vm2, %v5094_v0  ;;  %4201 = vmatmul.mubr.msk.f32.gmra.mrb[6].mxu0 %vm401_vm2, %v5097_v23  ;;  %v5139_v0 = vsel %vm320_vm1, %v386_v38, %v387_v39  ;;  %v391_v23 = vrot.slane %v5117_v20, 1  ;;  %v5164_v38 = vsel %vm320_vm1, %v387_v39, %v389_v41  ;;  %v5182_v39 = vsel %vm987_vm3, %v1023_v57, %v1024_v61 }
  0x46   : > { %3977 = vmatprep.mubr.msk.f32.mxu1 %vm401_vm2, %v5103_v27  ;;  %4203 = vmatprep.mubr.msk.f32.mxu0 %vm401_vm2, %v5112_v40  ;;  %6119 = vst [vmem:[#allocation33_spill] sm:$0xff] %v5139_v0  ;;  %v392_v27 = vrot.slane %v5120_v54, 1  ;;  %v5152_v40 = vld [vmem:[%s4725_s28 + $0x168] sm:$0xff]  ;;  %6121 = vst [vmem:[#allocation35_spill] sm:$0xff] %v5164_v38 }
  0x48   : > { %v5173_v14 = vsel %vm320_vm1, %v391_v23, %v392_v27  ;;  %v399_v23 = vrot.slane %v5179_v48, 1 }
  0x49   : > { %3978 = vmatmul.mubr.msk.f32.gmra.mrb[24].mxu1 %vm401_vm2, %v5129_v49  ;;  %4204 = vmatmul.mubr.msk.f32.gmra.mrb[8].mxu0 %vm401_vm2, %v5136_v37  ;;  %6123 = vst [vmem:[#allocation37_spill] sm:$0xff] %v5173_v14  ;;  %v1026_v49 = vrot.slane %v4897_v2, 2  ;;  %v396_v37 = vrot.slane %v5152_v40, 1  ;;  %v5193_v2 = vsel %vm320_vm1, %v392_v27, %v394_v62  ;;  %v1034_v27 = vrot.slane %v4946_v29, 2 }
  0x4a   : > { %3980 = vmatprep.mubr.msk.f32.mxu1 %vm401_vm2, %v5139_v0  ;;  %4206 = vmatprep.mubr.msk.f32.mxu0 %vm401_vm2, %v5147_v19  ;;  %v397_v0 = vrot.slane %v5155_v44, 1  ;;  %6124 = vst [vmem:[#allocation38_spill] sm:$0xff] %v5193_v2  ;;  %v1038_v62 = vrot.slane %v4971_v53, 2 }
  0x4b   : > { %v5199_v41 = vsel %vm987_vm3, %v1024_v61, %v1026_v49  ;;  %v1036_v49 = vrot.slane %v4963_v45, 2 }
  0x4c   : > { %v5202_v57 = vsel %vm320_vm1, %v396_v37, %v397_v0  ;;  %v5217_v37 = vsel %vm320_vm1, %v397_v0, %v399_v23  ;;  %v5252_v23 = vld [vmem:[%s6011_s1 + $0xc] sm:$0xf] }
  0x4d   : > { %3981 = vmatmul.mubr.msk.f32.gmra.mrb[26].mxu1 %vm401_vm2, %v5164_v38  ;;  %4207 = vmatmul.mubr.msk.f32.gmra.mrb[10].mxu0 %vm401_vm2, %v5167_v13  ;;  %6125 = vst [vmem:[#allocation39_spill] sm:$0xff] %v5202_v57  ;;  %v1031_v38 = vrot.slane %v4923_v17, 2  ;;  %v5206_v13 = vsel %vm987_vm3, %v1028_v34, %v1029_v33  ;;  %6126 = vst [vmem:[#allocation40_spill] sm:$0xff] %v5217_v37  ;;  %v1039_v34 = vrot.slane %v4974_v55, 2 }
  0x4e   : > { %3983 = vmatprep.mubr.msk.f32.mxu1 %vm401_vm2, %v5173_v14  ;;  %4209 = vmatprep.mubr.msk.f32.mxu0 %vm401_vm2, %v5182_v39  ;;  %v1033_v14 = vrot.slane %v4943_v28, 2  ;;  %v5239_v45 = vsel %vm987_vm3, %v1034_v27, %v1036_v49 }
  0x4f   : > { %v5222_v17 = vsel %vm987_vm3, %v1029_v33, %v1031_v38  ;;  %v5243_v0 = vsel %vm987_vm3, %v1038_v62, %v1039_v34  ;;  %v1043_v38 = vrot.slane %v5003_v22, 2  ;;  %v1044_v33 = vrot.slane %v5006_v24, 2 }
  0x50   : > { %v5226_v61 = vsel %vm987_vm3, %v1033_v14, %v1034_v27  ;;  %v1041_v14 = vrot.slane %v4995_v16, 2  ;;  %v1046_v27 = vrot.slane %v5037_v56, 2  ;;  %v1048_v62 = vrot.slane %v5045_v8, 2 }
  0x51   : > { %3984 = vmatmul.mubr.msk.f32.gmra.mrb[28].mxu1 %vm401_vm2, %v5193_v2  ;;  %4210 = vmatmul.mubr.msk.f32.gmra.mrb[12].mxu0 %vm401_vm2, %v5199_v41  ;;  %v5267_v49 = vsel %vm987_vm3, %v1043_v38, %v1044_v33  ;;  %v1053_v38 = vrot.slane %v5082_v46, 2  ;;  %v1064_v2 = vrot.slane %v5155_v44, 2 }
  0x52   : > { %3986 = vmatprep.mubr.msk.f32.mxu1 %vm401_vm2, %v5202_v57  ;;  %4212 = vmatprep.mubr.msk.f32.mxu0 %vm401_vm2, %v5206_v13  ;;  %v5263_v16 = vsel %vm987_vm3, %v1039_v34, %v1041_v14  ;;  %6127 = vst [vmem:[#allocation41_spill] sm:$0xff] %v5267_v49  ;;  %v5282_v56 = vsel %vm987_vm3, %v1044_v33, %v1046_v27  ;;  %v1051_v34 = vrot.slane %v5074_v52, 2  ;;  %v1056_v33 = vrot.slane %v5109_v36, 2 }
  0x53   : > { %v1059_v57 = vrot.slane %v5120_v54, 2 }
  0x55   : > { %3987 = vmatmul.mubr.msk.f32.gmra.mrb[30].mxu1 %vm401_vm2, %v5217_v37  ;;  %4213 = vmatmul.mubr.msk.f32.gmra.mrb[14].mxu0 %vm401_vm2, %v5222_v17  ;;  %v1054_v37 = vrot.slane %v5085_v12, 2 }
  0x56   : > { %3991 = vmatprep.mubr.msk.f32.mxu1 %vm401_vm2, %v4728_v4  ;;  %4215 = vmatprep.mubr.msk.f32.mxu0 %vm401_vm2, %v5226_v61 }
  0x57   : > { %v5303_v27 = vsel %vm987_vm3, %v1053_v38, %v1054_v37  ;;  %v5316_v36 = vsel %vm987_vm3, %v1054_v37, %v1056_v33  ;;  %v1063_v38 = vrot.slane %v5152_v40, 2  ;;  %v1066_v37 = vrot.slane %v5179_v48, 2 }
  0x58   : > { %6129 = vst [vmem:[#allocation43_spill] sm:$0xff] %v5303_v27  ;;  %6130 = vst [vmem:[#allocation44_spill] sm:$0xff] %v5316_v36 }
  0x59   : > { %3992 = vmatmul.mubr.msk.f32.vlgmr.msra.gmra.mrb[0].mxu1 %vm401_vm2, %v4731_v5  ;;  %4216 = vmatmul.mubr.msk.f32.gmra.mrb[16].mxu0 %vm401_vm2, %v5239_v45  ;;  %v5343_v33 = vsel %vm987_vm3, %v1063_v38, %v1064_v2  ;;  %v5359_v48 = vsel %vm987_vm3, %v1064_v2, %v1066_v37  ;;  %v989_v38 = vrot.slane %v4731_v5, 2  ;;  %v991_v37 = vrot.slane %v4743_v11, 2  ;;  %v6137_v5 = vld [vmem:[#allocation20_spill] sm:$0xff]  ;;  %v6138_v11 = vld [vmem:[#allocation22_spill] sm:$0xff] }
  0x5a   : > { %4040 = vmatpush3.msk.msra.mxu1 %vm466_vm0, %v4800_v35  ;;  %3994 = vmatprep.mubr.msk.f32.mxu1 %vm401_vm2, %v4734_v6  ;;  %v1049_v35 = vrot.slane %v5048_v10, 2  ;;  %v5330_v6 = vld [vmem:[%s4725_s28 + $0x188] sm:$0xff]  ;;  %6133 = vst [vmem:[#allocation47_spill] sm:$0xff] %v5343_v33  ;;  %6134 = vst [vmem:[#allocation48_spill] sm:$0xff] %v5359_v48 }
  0x5b   : > { %4218 = vmatprep.mubr.msk.f32.mxu0 %vm401_vm2, %v5243_v0  ;;  %4089 = vmatprep.subr.msk.mxu1 %vm466_vm0, %v5252_v23 }
  0x5c   : > { %v5286_v14 = vsel %vm987_vm3, %v1048_v62, %v1049_v35  ;;  %v5299_v52 = vsel %vm987_vm3, %v1049_v35, %v1051_v34  ;;  %v1058_v62 = vrot.slane %v5117_v20, 2  ;;  %v1061_v35 = vrot.slane %v5144_v60, 2 }
  0x5d   : > { %3995 = vmatmul.mubr.msk.f32.gmra.mrb[2].mxu1 %vm401_vm2, %v4739_v9  ;;  %4219 = vmatmul.mubr.msk.f32.gmra.mrb[18].mxu0 %vm401_vm2, %v5263_v16  ;;  %6128 = vst [vmem:[#allocation42_spill] sm:$0xff] %v5299_v52  ;;  %v5327_v9 = vld [vmem:[%s4725_s28 + $0x180] sm:$0xff] }
  0x5e   : > { %3997 = vmatprep.mubr.msk.f32.mxu1 %vm401_vm2, %v4751_v15  ;;  %4221 = vmatprep.mubr.msk.f32.mxu0 %vm401_vm2, %v5267_v49  ;;  %v5320_v34 = vsel %vm987_vm3, %v1058_v62, %v1059_v57  ;;  %v5339_v60 = vsel %vm987_vm3, %v1059_v57, %v1061_v35  ;;  %v1928_v62 = vrot.slane %v5327_v9, 2 }
  0x5f   : > { %6131 = vst [vmem:[#allocation45_spill] sm:$0xff] %v5320_v34  ;;  %6132 = vst [vmem:[#allocation46_spill] sm:$0xff] %v5339_v60 }
  0x61   : > { %3998 = vmatmul.mubr.msk.f32.gmra.mrb[4].mxu1 %vm401_vm2, %v4756_v18  ;;  %4222 = vmatmul.mubr.msk.f32.gmra.mrb[20].mxu0 %vm401_vm2, %v5282_v56 }
  0x62   : > { %4000 = vmatprep.mubr.msk.f32.mxu1 %vm401_vm2, %v4768_v25  ;;  %4224 = vmatprep.mubr.msk.f32.mxu0 %vm401_vm2, %v5286_v14 }
  0x65   : > { %4001 = vmatmul.mubr.msk.f32.gmra.mrb[6].mxu1 %vm401_vm2, %v4771_v26  ;;  %4225 = vmatmul.mubr.msk.f32.gmra.mrb[22].mxu0 %vm401_vm2, %v5299_v52  ;;  %v5348_v52 = vld [vmem:[%s4725_s28 + $0x190] sm:$0x3] }
  0x66   : > { %4003 = vmatprep.mubr.msk.f32.mxu1 %vm401_vm2, %v4782_v31  ;;  %4227 = vmatprep.mubr.msk.f32.mxu0 %vm401_vm2, %v5303_v27  ;;  %v1929_v27 = vrot.slane %v5330_v6, 2  ;;  %v1931_v57 = vrot.slane %v5348_v52, 2 }
  0x68   : > { %v5363_v35 = vsel %vm987_vm3, %v1928_v62, %v1929_v27  ;;  %v5374_v2 = vsel %vm987_vm3, %v1929_v27, %v1931_v57  ;;  %v5389_v27 = vld [vmem:[%s6011_s1 + $0x20] sm:$0xf] }
  0x69   : > { %4004 = vmatmul.mubr.msk.f32.gmra.mrb[8].mxu1 %vm401_vm2, %v4785_v32  ;;  %4228 = vmatmul.mubr.msk.f32.gmra.mrb[24].mxu0 %vm401_vm2, %v5316_v36  ;;  %6135 = vst [vmem:[#allocation49_spill] sm:$0xff] %v5363_v35  ;;  %6136 = vst [vmem:[#allocation50_spill] sm:$0xff] %v5374_v2  ;;  %v6142_v57 = vld [vmem:[#allocation30_spill] sm:$0xff] }
  0x6a   : > { %4006 = vmatprep.mubr.msk.f32.mxu1 %vm401_vm2, %v4822_v42  ;;  %4230 = vmatprep.mubr.msk.f32.mxu0 %vm401_vm2, %v5320_v34 }
  0x6d   : > { %4007 = vmatmul.mubr.msk.f32.gmra.mrb[10].mxu1 %vm401_vm2, %v4825_v43  ;;  %4231 = vmatmul.mubr.msk.f32.gmra.mrb[26].mxu0 %vm401_vm2, %v5339_v60 }
  0x6e   : > { %4009 = vmatprep.mubr.msk.f32.mxu1 %vm401_vm2, %v4850_v50  ;;  %4233 = vmatprep.mubr.msk.f32.mxu0 %vm401_vm2, %v5343_v33 }
  0x71   : > { %4010 = vmatmul.mubr.msk.f32.gmra.mrb[12].mxu1 %vm401_vm2, %v4853_v51  ;;  %4234 = vmatmul.mubr.msk.f32.gmra.mrb[28].mxu0 %vm401_vm2, %v5359_v48 }
  0x72   : > { %4012 = vmatprep.mubr.msk.f32.mxu1 %vm401_vm2, %v4876_v58  ;;  %4236 = vmatprep.mubr.msk.f32.mxu0 %vm401_vm2, %v5363_v35  ;;  %v6147_v35 = vld [vmem:[#allocation6_spill] sm:$0xff] }
  0x75   : > { %4013 = vmatmul.mubr.msk.f32.gmra.mrb[14].mxu1 %vm401_vm2, %v4879_v59  ;;  %4237 = vmatmul.mubr.msk.f32.gmra.mrb[30].mxu0 %vm401_vm2, %v5374_v2  ;;  %v6146_v2 = vld [vmem:[#allocation5_spill] sm:$0xff] }
  0x76   : > { %4015 = vmatprep.mubr.msk.f32.mxu1 %vm401_vm2, %v4902_v3  ;;  %4241 = vmatprep.mubr.msk.f32.mxu0 %vm401_vm2, %v4751_v15 }
  0x79   : > { %4016 = vmatmul.mubr.msk.f32.gmra.mrb[16].mxu1 %vm401_vm2, %v4905_v7  ;;  %4242 = vmatmul.mubr.msk.f32.vlgmr.msra.gmra.mrb[0].mxu0 %vm401_vm2, %v4756_v18 }
  0x7a   : > { %4018 = vmatprep.mubr.msk.f32.mxu1 %vm401_vm2, %v4943_v28  ;;  %4290 = vmatpush3.msk.msra.mxu0 %vm466_vm0, %v5013_v30  ;;  %v988_v30 = vrot.slane %v4728_v4, 2  ;;  %v992_v4 = vsel %vm987_vm3, %v989_v38, %v991_v37  ;;  %v6144_v37 = vld [vmem:[#allocation36_spill] sm:$0xff] }
  0x7b   : > { %4244 = vmatprep.mubr.msk.f32.mxu0 %vm401_vm2, %v4768_v25  ;;  %4339 = vmatprep.subr.msk.mxu0 %vm466_vm0, %v5389_v27 }
  0x7c   : > { %v990_v62 = vsel %vm987_vm3, %v988_v30, %v989_v38  ;;  %v6143_v30 = vld [vmem:[#allocation32_spill] sm:$0xff]  ;;  %v5513_v38 = vld [vmem:[%s4725_s28 + $0x198] sm:$0xff] }
  0x7d   : > { %4019 = vmatmul.mubr.msk.f32.gmra.mrb[18].mxu1 %vm401_vm2, %v4946_v29  ;;  %4245 = vmatmul.mubr.msk.f32.gmra.mrb[2].mxu0 %vm401_vm2, %v4771_v26 }
  0x7e   : > { %4021 = vmatprep.mubr.msk.f32.mxu1 %vm401_vm2, %v4971_v53  ;;  %4247 = vmatprep.mubr.msk.f32.mxu0 %vm401_vm2, %v4782_v31 }
  0x81   : > { %4022 = vmatmul.mubr.msk.f32.gmra.mrb[20].mxu1 %vm401_vm2, %v4974_v55  ;;  %4248 = vmatmul.mubr.msk.f32.gmra.mrb[4].mxu0 %vm401_vm2, %v4785_v32 }
  0x82   : > { %4024 = vmatprep.mubr.msk.f32.mxu1 %vm401_vm2, %v5003_v22  ;;  %4250 = vmatprep.mubr.msk.f32.mxu0 %vm401_vm2, %v4822_v42 }
  0x85   : > { %4025 = vmatmul.mubr.msk.f32.gmra.mrb[22].mxu1 %vm401_vm2, %v5006_v24  ;;  %4251 = vmatmul.mubr.msk.f32.gmra.mrb[6].mxu0 %vm401_vm2, %v4825_v43 }
  0x86   : > { %4027 = vmatprep.mubr.msk.f32.mxu1 %vm401_vm2, %v5045_v8  ;;  %4253 = vmatprep.mubr.msk.f32.mxu0 %vm401_vm2, %v4850_v50 }
  0x89   : > { %4028 = vmatmul.mubr.msk.f32.gmra.mrb[24].mxu1 %vm401_vm2, %v5048_v10  ;;  %4254 = vmatmul.mubr.msk.f32.gmra.mrb[8].mxu0 %vm401_vm2, %v4853_v51 }
  0x8a   : > { %4030 = vmatprep.mubr.msk.f32.mxu1 %vm401_vm2, %v5082_v46  ;;  %4256 = vmatprep.mubr.msk.f32.mxu0 %vm401_vm2, %v4876_v58 }
  0x8d   : > { %4031 = vmatmul.mubr.msk.f32.gmra.mrb[26].mxu1 %vm401_vm2, %v5085_v12  ;;  %4257 = vmatmul.mubr.msk.f32.gmra.mrb[10].mxu0 %vm401_vm2, %v4879_v59 }
  0x8e   : > { %4033 = vmatprep.mubr.msk.f32.mxu1 %vm401_vm2, %v5117_v20  ;;  %4259 = vmatprep.mubr.msk.f32.mxu0 %vm401_vm2, %v4902_v3 }
  0x91   : > { %4034 = vmatmul.mubr.msk.f32.gmra.mrb[28].mxu1 %vm401_vm2, %v5120_v54  ;;  %4260 = vmatmul.mubr.msk.f32.gmra.mrb[12].mxu0 %vm401_vm2, %v4905_v7 }
  0x92   : > { %4036 = vmatprep.mubr.msk.f32.mxu1 %vm401_vm2, %v5152_v40  ;;  %4262 = vmatprep.mubr.msk.f32.mxu0 %vm401_vm2, %v4943_v28 }
  0x95   : > { %4037 = vmatmul.mubr.msk.f32.gmra.mrb[30].mxu1 %vm401_vm2, %v5155_v44  ;;  %4263 = vmatmul.mubr.msk.f32.gmra.mrb[14].mxu0 %vm401_vm2, %v4946_v29 }
  0x96   : > { %4041 = vmatprep.mubr.msk.f32.mxu1 %vm401_vm2, %v990_v62  ;;  %4265 = vmatprep.mubr.msk.f32.mxu0 %vm401_vm2, %v4971_v53  ;;  %v5524_v62 = vld [vmem:[%s4725_s28 + $0x1a0] sm:$0xff] }
  0x99   : > { %4042 = vmatmul.mubr.msk.f32.vlgmr.msra.gmra.mrb[0].mxu1 %vm401_vm2, %v992_v4  ;;  %4266 = vmatmul.mubr.msk.f32.gmra.mrb[16].mxu0 %vm401_vm2, %v4974_v55  ;;  %v6145_v4 = vld [vmem:[#allocation4_spill] sm:$0xff] }
  0x9a   : > { %4090 = vmatpush3.msk.msra.mxu1 %vm466_vm0, %v5252_v23  ;;  %4044 = vmatprep.mubr.msk.f32.mxu1 %vm401_vm2, %v4966_v47  ;;  %v6139_v47 = vld [vmem:[#allocation24_spill] sm:$0xff] }
  0x9b   : > { %4268 = vmatprep.mubr.msk.f32.mxu0 %vm401_vm2, %v5003_v22  ;;  %4389 = vmatprep.subr.msk.mxu1 %vm466_vm0, %v4703_v1  ;;  %v6141_v23 = vld [vmem:[#allocation28_spill] sm:$0xff] }
  0x9d   : > { %4045 = vmatmul.mubr.msk.f32.gmra.mrb[2].mxu1 %vm401_vm2, %v4987_v63  ;;  %4269 = vmatmul.mubr.msk.f32.gmra.mrb[18].mxu0 %vm401_vm2, %v5006_v24  ;;  %v6140_v63 = vld [vmem:[#allocation26_spill] sm:$0xff] }
  0x9e   : > { %4047 = vmatprep.mubr.msk.f32.mxu1 %vm401_vm2, %v4998_v21  ;;  %4271 = vmatprep.mubr.msk.f32.mxu0 %vm401_vm2, %v5045_v8 }
  0xa1   : > { %4048 = vmatmul.mubr.msk.f32.gmra.mrb[4].mxu1 %vm401_vm2, %v6137_v5  ;;  %4272 = vmatmul.mubr.msk.f32.gmra.mrb[20].mxu0 %vm401_vm2, %v5048_v10 }
  0xa2   : > { %4050 = vmatprep.mubr.msk.f32.mxu1 %vm401_vm2, %v6138_v11  ;;  %4274 = vmatprep.mubr.msk.f32.mxu0 %vm401_vm2, %v5082_v46 }
  0xa5   : > { %4051 = vmatmul.mubr.msk.f32.gmra.mrb[6].mxu1 %vm401_vm2, %v6139_v47  ;;  %4275 = vmatmul.mubr.msk.f32.gmra.mrb[22].mxu0 %vm401_vm2, %v5085_v12 }
  0xa6   : > { %4053 = vmatprep.mubr.msk.f32.mxu1 %vm401_vm2, %v6140_v63  ;;  %4277 = vmatprep.mubr.msk.f32.mxu0 %vm401_vm2, %v5117_v20 }
  0xa9   : > { %4054 = vmatmul.mubr.msk.f32.gmra.mrb[8].mxu1 %vm401_vm2, %v6141_v23  ;;  %4278 = vmatmul.mubr.msk.f32.gmra.mrb[24].mxu0 %vm401_vm2, %v5120_v54 }
  0xaa   : > { %4056 = vmatprep.mubr.msk.f32.mxu1 %vm401_vm2, %v6142_v57  ;;  %4280 = vmatprep.mubr.msk.f32.mxu0 %vm401_vm2, %v5152_v40 }
  0xad   : > { %4057 = vmatmul.mubr.msk.f32.gmra.mrb[10].mxu1 %vm401_vm2, %v6143_v30  ;;  %4281 = vmatmul.mubr.msk.f32.gmra.mrb[26].mxu0 %vm401_vm2, %v5155_v44  ;;  %v6148_v44 = vld [vmem:[#allocation7_spill] sm:$0xff] }
  0xae   : > { %4059 = vmatprep.mubr.msk.f32.mxu1 %vm401_vm2, %v5147_v19  ;;  %4283 = vmatprep.mubr.msk.f32.mxu0 %vm401_vm2, %v5327_v9 }
  0xb1   : > { %4060 = vmatmul.mubr.msk.f32.gmra.mrb[12].mxu1 %vm401_vm2, %v6144_v37  ;;  %4284 = vmatmul.mubr.msk.f32.gmra.mrb[28].mxu0 %vm401_vm2, %v5330_v6 }
  0xb2   : > { %4062 = vmatprep.mubr.msk.f32.mxu1 %vm401_vm2, %v5182_v39  ;;  %4286 = vmatprep.mubr.msk.f32.mxu0 %vm401_vm2, %v5513_v38 }
  0xb5   : > { %4063 = vmatmul.mubr.msk.f32.gmra.mrb[14].mxu1 %vm401_vm2, %v5199_v41  ;;  %4287 = vmatmul.mubr.msk.f32.gmra.mrb[30].mxu0 %vm401_vm2, %v5524_v62 }
  0xb6   : > { %4065 = vmatprep.mubr.msk.f32.mxu1 %vm401_vm2, %v5206_v13  ;;  %4291 = vmatprep.mubr.msk.f32.mxu0 %vm401_vm2, %v6145_v4  ;;  %v6149_v4 = vld [vmem:[#allocation8_spill] sm:$0xff] }
  0xb9   : > { %4066 = vmatmul.mubr.msk.f32.gmra.mrb[16].mxu1 %vm401_vm2, %v5222_v17  ;;  %4292 = vmatmul.mubr.msk.f32.vlgmr.msra.gmra.mrb[0].mxu0 %vm401_vm2, %v6146_v2  ;;  %v6150_v2 = vld [vmem:[#allocation9_spill] sm:$0xff] }
  0xba   : > { %4068 = vmatprep.mubr.msk.f32.mxu1 %vm401_vm2, %v5226_v61  ;;  %4340 = vmatpush3.msk.msra.mxu0 %vm466_vm0, %v5389_v27  ;;  %v6153_v27 = vld [vmem:[#allocation12_spill] sm:$0xff] }
  0xbb   : > { %4294 = vmatprep.mubr.msk.f32.mxu0 %vm401_vm2, %v6147_v35  ;;  %v6151_v35 = vld [vmem:[#allocation10_spill] sm:$0xff] }
  0xbd   : > { %4069 = vmatmul.mubr.msk.f32.gmra.mrb[18].mxu1 %vm401_vm2, %v5239_v45  ;;  %4295 = vmatmul.mubr.msk.f32.gmra.mrb[2].mxu0 %vm401_vm2, %v6148_v44  ;;  %v6152_v44 = vld [vmem:[#allocation11_spill] sm:$0xff] }
  0xbe   : > { %4071 = vmatprep.mubr.msk.f32.mxu1 %vm401_vm2, %v5243_v0  ;;  %4297 = vmatprep.mubr.msk.f32.mxu0 %vm401_vm2, %v6149_v4  ;;  %v6154_v4 = vld [vmem:[#allocation42_spill] sm:$0xff] }
  0xc1   : > { %4072 = vmatmul.mubr.msk.f32.gmra.mrb[20].mxu1 %vm401_vm2, %v5263_v16  ;;  %4298 = vmatmul.mubr.msk.f32.gmra.mrb[4].mxu0 %vm401_vm2, %v6150_v2  ;;  %v6155_v2 = vld [vmem:[#allocation13_spill] sm:$0xff] }
  0xc2   : > { %4074 = vmatprep.mubr.msk.f32.mxu1 %vm401_vm2, %v5267_v49  ;;  %4300 = vmatprep.mubr.msk.f32.mxu0 %vm401_vm2, %v6151_v35  ;;  %v6156_v49 = vld [vmem:[#allocation43_spill] sm:$0xff]  ;;  %v6157_v35 = vld [vmem:[#allocation14_spill] sm:$0xff] }
  0xc5   : > { %4075 = vmatmul.mubr.msk.f32.gmra.mrb[22].mxu1 %vm401_vm2, %v5282_v56  ;;  %4301 = vmatmul.mubr.msk.f32.gmra.mrb[6].mxu0 %vm401_vm2, %v6152_v44  ;;  %v6158_v44 = vld [vmem:[#allocation15_spill] sm:$0xff] }
  0xc6   : > { %4077 = vmatprep.mubr.msk.f32.mxu1 %vm401_vm2, %v5286_v14  ;;  %4303 = vmatprep.mubr.msk.f32.mxu0 %vm401_vm2, %v6153_v27  ;;  %v6159_v27 = vld [vmem:[#allocation16_spill] sm:$0xff] }
  0xc9   : > { %4078 = vmatmul.mubr.msk.f32.gmra.mrb[24].mxu1 %vm401_vm2, %v6154_v4  ;;  %4304 = vmatmul.mubr.msk.f32.gmra.mrb[8].mxu0 %vm401_vm2, %v6155_v2  ;;  %v6160_v2 = vld [vmem:[#allocation17_spill] sm:$0xff] }
  0xca   : > { %4080 = vmatprep.mubr.msk.f32.mxu1 %vm401_vm2, %v6156_v49  ;;  %4306 = vmatprep.mubr.msk.f32.mxu0 %vm401_vm2, %v6157_v35  ;;  %v6161_v35 = vld [vmem:[#allocation18_spill] sm:$0xff] }
  0xcd   : > { %4081 = vmatmul.mubr.msk.f32.gmra.mrb[26].mxu1 %vm401_vm2, %v5316_v36  ;;  %4307 = vmatmul.mubr.msk.f32.gmra.mrb[10].mxu0 %vm401_vm2, %v6158_v44  ;;  %v6162_v44 = vld [vmem:[#allocation19_spill] sm:$0xff] }
  0xce   : > { %4083 = vmatprep.mubr.msk.f32.mxu1 %vm401_vm2, %v5320_v34  ;;  %4309 = vmatprep.mubr.msk.f32.mxu0 %vm401_vm2, %v6159_v27  ;;  %v6163_v34 = vld [vmem:[#allocation2_spill] sm:$0xff]  ;;  %v6164_v27 = vld [vmem:[#allocation21_spill] sm:$0xff]  ;;  %v5651_v36 = vld [vmem:[%s4725_s28 + $0x1a8] sm:$0x3] }
  0xd1   : > { %4084 = vmatmul.mubr.msk.f32.gmra.mrb[28].mxu1 %vm401_vm2, %v5339_v60  ;;  %4310 = vmatmul.mubr.msk.f32.gmra.mrb[12].mxu0 %vm401_vm2, %v6160_v2  ;;  %v6165_v60 = vld [vmem:[#allocation3_spill] sm:$0xff] }
  0xd2   : > { %4086 = vmatprep.mubr.msk.f32.mxu1 %vm401_vm2, %v5343_v33  ;;  %4312 = vmatprep.mubr.msk.f32.mxu0 %vm401_vm2, %v6161_v35  ;;  %v6166_v2 = vld [vmem:[#allocation23_spill] sm:$0xff]  ;;  %v6174_v33 = vld [vmem:[#allocation38_spill] sm:$0xff] }
  0xd5   : > { %4087 = vmatmul.mubr.msk.f32.gmra.mrb[30].mxu1 %vm401_vm2, %v5359_v48  ;;  %4313 = vmatmul.mubr.msk.f32.gmra.mrb[14].mxu0 %vm401_vm2, %v6162_v44  ;;  %v6167_v48 = vld [vmem:[#allocation25_spill] sm:$0xff] }
  0xd6   : > { %4091 = vmatprep.mubr.msk.f32.mxu1 %vm401_vm2, %v6163_v34  ;;  %4315 = vmatprep.mubr.msk.f32.mxu0 %vm401_vm2, %v6164_v27  ;;  %v6168_v34 = vld [vmem:[#allocation27_spill] sm:$0xff] }
  0xd9   : > { %4092 = vmatmul.mubr.msk.f32.vlgmr.msra.gmra.mrb[0].mxu1 %vm401_vm2, %v6165_v60  ;;  %4316 = vmatmul.mubr.msk.f32.gmra.mrb[16].mxu0 %vm401_vm2, %v6166_v2  ;;  %v6169_v60 = vld [vmem:[#allocation29_spill] sm:$0xff] }
  0xda   : > { %4390 = vmatpush3.msk.msra.mxu1 %vm466_vm0, %v4703_v1  ;;  %4094 = vmatprep.mubr.msk.f32.mxu1 %vm401_vm2, %v4751_v15  ;;  %v6170_v1 = vld [vmem:[#allocation31_spill] sm:$0xff]  ;;  %v6171_v15 = vld [vmem:[#allocation33_spill] sm:$0xff] }
  0xdb   : > { %4318 = vmatprep.mubr.msk.f32.mxu0 %vm401_vm2, %v6167_v48 }
  0xdd   : > { %4095 = vmatmul.mubr.msk.f32.gmra.mrb[2].mxu1 %vm401_vm2, %v4756_v18  ;;  %4319 = vmatmul.mubr.msk.f32.gmra.mrb[18].mxu0 %vm401_vm2, %v6168_v34  ;;  %v6172_v18 = vld [vmem:[#allocation35_spill] sm:$0xff] }
  0xde   : > { %4097 = vmatprep.mubr.msk.f32.mxu1 %vm401_vm2, %v4768_v25  ;;  %4321 = vmatprep.mubr.msk.f32.mxu0 %vm401_vm2, %v6169_v60  ;;  %v6173_v25 = vld [vmem:[#allocation37_spill] sm:$0xff] }
  0xe1   : > { %4098 = vmatmul.mubr.msk.f32.gmra.mrb[4].mxu1 %vm401_vm2, %v4771_v26  ;;  %4322 = vmatmul.mubr.msk.f32.gmra.mrb[20].mxu0 %vm401_vm2, %v6170_v1  ;;  %v1659_v26 = vrot.slane %v5327_v9, 1 }
  0xe2   : > { %4100 = vmatprep.mubr.msk.f32.mxu1 %vm401_vm2, %v4782_v31  ;;  %4324 = vmatprep.mubr.msk.f32.mxu0 %vm401_vm2, %v6171_v15  ;;  %v1660_v31 = vrot.slane %v5330_v6, 1 }
  0xe4   : > { %v5648_v15 = vsel %vm320_vm1, %v1659_v26, %v1660_v31 }
  0xe5   : > { %4101 = vmatmul.mubr.msk.f32.gmra.mrb[6].mxu1 %vm401_vm2, %v4785_v32  ;;  %4325 = vmatmul.mubr.msk.f32.gmra.mrb[22].mxu0 %vm401_vm2, %v6172_v18  ;;  %v6175_v32 = vld [vmem:[#allocation39_spill] sm:$0xff]  ;;  %v2465_v18 = vrot.slane %v5524_v62, 1 }
  0xe6   : > { %4103 = vmatprep.mubr.msk.f32.mxu1 %vm401_vm2, %v4822_v42  ;;  %4327 = vmatprep.mubr.msk.f32.mxu0 %vm401_vm2, %v6173_v25  ;;  %v1662_v42 = vrot.slane %v5348_v52, 1  ;;  %v2464_v25 = vrot.slane %v5513_v38, 1  ;;  %v2467_v52 = vrot.slane %v5651_v36, 1 }
  0xe8   : > { %v2466_v26 = vsel %vm320_vm1, %v2464_v25, %v2465_v18 }
  0xe9   : > { %4104 = vmatmul.mubr.msk.f32.gmra.mrb[8].mxu1 %vm401_vm2, %v4825_v43  ;;  %4328 = vmatmul.mubr.msk.f32.gmra.mrb[24].mxu0 %vm401_vm2, %v6174_v33  ;;  %v6176_v43 = vld [vmem:[#allocation40_spill] sm:$0xff] }
  0xea   : > { %4106 = vmatprep.mubr.msk.f32.mxu1 %vm401_vm2, %v4850_v50  ;;  %4330 = vmatprep.mubr.msk.f32.mxu0 %vm401_vm2, %v6175_v32  ;;  %v5662_v50 = vsel %vm320_vm1, %v1660_v31, %v1662_v42 }
  0xed   : > { %4107 = vmatmul.mubr.msk.f32.gmra.mrb[10].mxu1 %vm401_vm2, %v4853_v51  ;;  %4331 = vmatmul.mubr.msk.f32.gmra.mrb[26].mxu0 %vm401_vm2, %v6176_v43  ;;  %v2468_v51 = vsel %vm320_vm1, %v2465_v18, %v2467_v52 }
  0xee   : > { %4109 = vmatprep.mubr.msk.f32.mxu1 %vm401_vm2, %v4876_v58  ;;  %4333 = vmatprep.mubr.msk.f32.mxu0 %vm401_vm2, %v5648_v15  ;;  %v6180_v58 = vld [vmem:[#allocation33_spill] sm:$0xff] }
  0xf1   : > { %4110 = vmatmul.mubr.msk.f32.gmra.mrb[12].mxu1 %vm401_vm2, %v4879_v59  ;;  %4334 = vmatmul.mubr.msk.f32.gmra.mrb[28].mxu0 %vm401_vm2, %v5662_v50  ;;  %v6181_v59 = vld [vmem:[#allocation45_spill] sm:$0xff] }
  0xf2   : > { %4112 = vmatprep.mubr.msk.f32.mxu1 %vm401_vm2, %v4902_v3  ;;  %4336 = vmatprep.mubr.msk.f32.mxu0 %vm401_vm2, %v2466_v26  ;;  %v6182_v3 = vld [vmem:[#allocation35_spill] sm:$0xff] }
  0xf5   : > { %4113 = vmatmul.mubr.msk.f32.gmra.mrb[14].mxu1 %vm401_vm2, %v4905_v7  ;;  %4337 = vmatmul.mubr.msk.f32.gmra.mrb[30].mxu0 %vm401_vm2, %v2468_v51  ;;  %v6183_v7 = vld [vmem:[#allocation46_spill] sm:$0xff] }
  0xf6   : > { %4115 = vmatprep.mubr.msk.f32.mxu1 %vm401_vm2, %v4943_v28  ;;  %4341 = vmatprep.mubr.msk.f32.mxu0 %vm401_vm2, %v4998_v21  ;;  %v2733_v28 = vrot.slane %v5513_v38, 2  ;;  %v2736_v21 = vrot.slane %v5651_v36, 2 }
  0xf9   : > { %4116 = vmatmul.mubr.msk.f32.gmra.mrb[16].mxu1 %vm401_vm2, %v4946_v29  ;;  %4342 = vmatmul.mubr.msk.f32.vlgmr.msra.gmra.mrb[0].mxu0 %vm401_vm2, %v6137_v5  ;;  %v2734_v29 = vrot.slane %v5524_v62, 2 }
  0xfa   : > { %4118 = vmatprep.mubr.msk.f32.mxu1 %vm401_vm2, %v4971_v53  ;;  %4344 = vmatprep.mubr.msk.f32.mxu0 %vm401_vm2, %v6138_v11  ;;  %v6186_v53 = vld [vmem:[#allocation48_spill] sm:$0xff] }
  0xfd   : > { %4119 = vmatmul.mubr.msk.f32.gmra.mrb[18].mxu1 %vm401_vm2, %v4974_v55  ;;  %4345 = vmatmul.mubr.msk.f32.gmra.mrb[2].mxu0 %vm401_vm2, %v6139_v47  ;;  %v6187_v55 = vld [vmem:[#allocation49_spill] sm:$0xff] }
  0xfe   : > { %4121 = vmatprep.mubr.msk.f32.mxu1 %vm401_vm2, %v5003_v22  ;;  %4347 = vmatprep.mubr.msk.f32.mxu0 %vm401_vm2, %v6140_v63  ;;  %v6185_v22 = vld [vmem:[#allocation47_spill] sm:$0xff] }
 0x101   : > { %4122 = vmatmul.mubr.msk.f32.gmra.mrb[20].mxu1 %vm401_vm2, %v5006_v24  ;;  %4348 = vmatmul.mubr.msk.f32.gmra.mrb[4].mxu0 %vm401_vm2, %v6141_v23  ;;  %v2735_v24 = vsel %vm987_vm3, %v2733_v28, %v2734_v29 }
 0x102   : > { %4124 = vmatprep.mubr.msk.f32.mxu1 %vm401_vm2, %v5045_v8  ;;  %4350 = vmatprep.mubr.msk.f32.mxu0 %vm401_vm2, %v6142_v57  ;;  %v6184_v8 = vld [vmem:[#allocation37_spill] sm:$0xff] }
 0x105   : > { %4125 = vmatmul.mubr.msk.f32.gmra.mrb[22].mxu1 %vm401_vm2, %v5048_v10  ;;  %4351 = vmatmul.mubr.msk.f32.gmra.mrb[6].mxu0 %vm401_vm2, %v6143_v30  ;;  %v6188_v10 = vld [vmem:[#allocation50_spill] sm:$0xff] }
 0x106   : > { %4127 = vmatprep.mubr.msk.f32.mxu1 %vm401_vm2, %v5082_v46  ;;  %4353 = vmatprep.mubr.msk.f32.mxu0 %vm401_vm2, %v5147_v19  ;;  %v6177_v46 = vld [vmem:[#allocation34_spill] sm:$0xff] }
 0x109   : > { %4128 = vmatmul.mubr.msk.f32.gmra.mrb[24].mxu1 %vm401_vm2, %v5085_v12  ;;  %4354 = vmatmul.mubr.msk.f32.gmra.mrb[8].mxu0 %vm401_vm2, %v6144_v37  ;;  %v2737_v12 = vsel %vm987_vm3, %v2734_v29, %v2736_v21 }
 0x10a   : > { %4130 = vmatprep.mubr.msk.f32.mxu1 %vm401_vm2, %v5117_v20  ;;  %4356 = vmatprep.mubr.msk.f32.mxu0 %vm401_vm2, %v5182_v39 }
 0x10d   : > { %4131 = vmatmul.mubr.msk.f32.gmra.mrb[26].mxu1 %vm401_vm2, %v5120_v54  ;;  %4357 = vmatmul.mubr.msk.f32.gmra.mrb[10].mxu0 %vm401_vm2, %v5199_v41 }
 0x10e   : > { %4133 = vmatprep.mubr.msk.f32.mxu1 %vm401_vm2, %v5152_v40  ;;  %4359 = vmatprep.mubr.msk.f32.mxu0 %vm401_vm2, %v5206_v13 }
 0x111   : > { %4134 = vmatmul.mubr.msk.f32.gmra.mrb[28].mxu1 %vm401_vm2, %v6177_v46  ;;  %4360 = vmatmul.mubr.msk.f32.gmra.mrb[12].mxu0 %vm401_vm2, %v5222_v17 }
 0x112   : > { %4136 = vmatprep.mubr.msk.f32.mxu1 %vm401_vm2, %v5327_v9  ;;  %4362 = vmatprep.mubr.msk.f32.mxu0 %vm401_vm2, %v5226_v61  ;;  %v6178_v9 = vld [vmem:[#allocation41_spill] sm:$0xff] }
 0x115   : > { %4137 = vmatmul.mubr.msk.f32.gmra.mrb[30].mxu1 %vm401_vm2, %v5330_v6  ;;  %4363 = vmatmul.mubr.msk.f32.gmra.mrb[14].mxu0 %vm401_vm2, %v5239_v45  ;;  %v6179_v6 = vld [vmem:[#allocation44_spill] sm:$0xff] }
 0x116   : > { %4165 = vmatprep.mubr.msk.f32.mxu1 %vm401_vm2, %v6161_v35  ;;  %4365 = vmatprep.mubr.msk.f32.mxu0 %vm401_vm2, %v5243_v0 }
 0x119   : > { %4166 = vmatmul.mubr.msk.f32.vlgmr.msra.gmra.mrb[16].mxu1 %vm401_vm2, %v6162_v44  ;;  %4366 = vmatmul.mubr.msk.f32.gmra.mrb[16].mxu0 %vm401_vm2, %v5263_v16 }
 0x11a   : > { %4168 = vmatprep.mubr.msk.f32.mxu1 %vm401_vm2, %v6164_v27  ;;  %4368 = vmatprep.mubr.msk.f32.mxu0 %vm401_vm2, %v6178_v9 }
 0x11d   : > { %4169 = vmatmul.mubr.msk.f32.gmra.mrb[18].mxu1 %vm401_vm2, %v6166_v2  ;;  %4369 = vmatmul.mubr.msk.f32.gmra.mrb[18].mxu0 %vm401_vm2, %v5282_v56 }
 0x11e   : > { %4171 = vmatprep.mubr.msk.f32.mxu1 %vm401_vm2, %v6167_v48  ;;  %4371 = vmatprep.mubr.msk.f32.mxu0 %vm401_vm2, %v5286_v14  ;;  %v5828_v48 = vld [vmem:[%s6012_s2] ss:$0 sm:$0xff] }
 0x121   : > { %4172 = vmatmul.mubr.msk.f32.gmra.mrb[20].mxu1 %vm401_vm2, %v6168_v34  ;;  %4372 = vmatmul.mubr.msk.f32.gmra.mrb[20].mxu0 %vm401_vm2, %v6154_v4 }
 0x122   : > { %4174 = vmatprep.mubr.msk.f32.mxu1 %vm401_vm2, %v6169_v60  ;;  %4374 = vmatprep.mubr.msk.f32.mxu0 %vm401_vm2, %v6156_v49 }
 0x125   : > { %4175 = vmatmul.mubr.msk.f32.gmra.mrb[22].mxu1 %vm401_vm2, %v6170_v1  ;;  %4375 = vmatmul.mubr.msk.f32.gmra.mrb[22].mxu0 %vm401_vm2, %v6179_v6 }
 0x126   : > { %4177 = vmatprep.mubr.msk.f32.mxu1 %vm401_vm2, %v6180_v58  ;;  %4377 = vmatprep.mubr.msk.f32.mxu0 %vm401_vm2, %v6181_v59 }
 0x129   : > { %4178 = vmatmul.mubr.msk.f32.gmra.mrb[24].mxu1 %vm401_vm2, %v6182_v3  ;;  %4378 = vmatmul.mubr.msk.f32.gmra.mrb[24].mxu0 %vm401_vm2, %v6183_v7 }
 0x12a   : > { %4180 = vmatprep.mubr.msk.f32.mxu1 %vm401_vm2, %v6184_v8  ;;  %4380 = vmatprep.mubr.msk.f32.mxu0 %vm401_vm2, %v6185_v22 }
 0x12d   : > { %4181 = vmatmul.mubr.msk.f32.gmra.mrb[26].mxu1 %vm401_vm2, %v6174_v33  ;;  %4381 = vmatmul.mubr.msk.f32.gmra.mrb[26].mxu0 %vm401_vm2, %v6186_v53 }
 0x12e   : > { %4183 = vmatprep.mubr.msk.f32.mxu1 %vm401_vm2, %v6175_v32  ;;  %4383 = vmatprep.mubr.msk.f32.mxu0 %vm401_vm2, %v6187_v55 }
 0x131   : > { %4184 = vmatmul.mubr.msk.f32.gmra.mrb[28].mxu1 %vm401_vm2, %v6176_v43  ;;  %4384 = vmatmul.mubr.msk.f32.gmra.mrb[28].mxu0 %vm401_vm2, %v6188_v10 }
 0x132   : > { %4186 = vmatprep.mubr.msk.f32.mxu1 %vm401_vm2, %v5648_v15  ;;  %4386 = vmatprep.mubr.msk.f32.mxu0 %vm401_vm2, %v2735_v24 }
 0x135   : > { %4187 = vmatmul.mubr.msk.f32.gmra.mrb[30].mxu1 %vm401_vm2, %v5662_v50  ;;  %4387 = vmatmul.mubr.msk.f32.gmra.mrb[30].mxu0 %vm401_vm2, %v2737_v12 }
 0x1ac   : > { %v4093_v40 = vpop.f32.mrb[0].mxu1 }
 0x1ad   : > { %v1467_v20 = vpop.f32.mrb[1].mxu1 }
 0x1b0   : > { %v4096_v54 = vpop.f32.mrb[2].mxu1 }
 0x1b1   : > { %v1477_v19 = vpop.f32.mrb[3].mxu1 }
 0x1b4   : > { %v4099_v13 = vpop.f32.mrb[4].mxu1 }
 0x1b5   : > { %v1487_v39 = vpop.f32.mrb[5].mxu1 }
 0x1b8   : > { %v4102_v41 = vpop.f32.mrb[6].mxu1 }
 0x1b9   : > { %v1497_v17 = vpop.f32.mrb[7].mxu1 }
 0x1bc   : > { %v5808_v61 = vpop.f32.mrb[8].mxu1 }
 0x1bd   : > { %v5810_v45 = vpop.f32.mrb[9].mxu1 }
 0x1c0   : > { %v5812_v0 = vpop.f32.mrb[10].mxu1 }
 0x1c1   : > { %v5814_v16 = vpop.f32.mrb[11].mxu1 }
 0x1c4   : > { %v5816_v49 = vpop.f32.mrb[12].mxu1 }
 0x1c5   : > { %v5818_v56 = vpop.f32.mrb[13].mxu1 }
 0x1c8   : > { %v5820_v14 = vpop.f32.mrb[14].mxu1 }
 0x1c9   : > { %v5822_v36 = vpop.f32.mrb[15].mxu1 }
 0x1cc   : > { %v4343_v33 = vpop.f32.mrb[0].mxu0 }
 0x1cd   : > { %v4391_v5 = vadd.f32 %v4343_v33, %v4093_v40  ;;  %v2811_v11 = vpop.f32.mrb[1].mxu0 }
 0x1ce   : > { %v4392_v47 = vadd.f32 %v2811_v11, %v1467_v20 }
 0x1cf   : > { %v3010_v63 = vadd.f32 %v4391_v5, %v5828_v48 }
 0x1d0   : > { %v3009_v23 = vadd.f32 %v4392_v47, %v5828_v48  ;;  %v4346_v57 = vpop.f32.mrb[2].mxu0 }
 0x1d1   : > { %3042 = vst.msk [vmem:[%s5833_s20 + $0x8] sm:$0xff] %vm401_vm2, %v3010_v63  ;;  %v3074_v30 = vsel %vm401_vm2, %v3010_v63, 0.0  ;;  %v3145_v38 = vmul.f32 %v3010_v63, %v3010_v63  ;;  %v4393_v37 = vadd.f32 %v4346_v57, %v4096_v54  ;;  %v2821_v62 = vpop.f32.mrb[3].mxu0 }
 0x1d2   : > { %3041 = vst.msk [vmem:[%s5833_s20] sm:$0xff] %vm401_vm2, %v3009_v23  ;;  %v3073_v4 = vsel %vm401_vm2, %v3009_v23, 0.0  ;;  %v3144_v35 = vmul.f32 %v3009_v23, %v3009_v23  ;;  %v4394_v44 = vadd.f32 %v2821_v62, %v1477_v19 }
 0x1d3   : > { %v3177_v27 = vsel %vm401_vm2, %v3145_v38, 0.0  ;;  %v3075_v2 = vadd.f32 %v3074_v30, %v3073_v4  ;;  %v3012_v34 = vadd.f32 %v4393_v37, %v5828_v48 }
 0x1d4   : > { %v3176_v60 = vsel %vm401_vm2, %v3144_v35, 0.0  ;;  %v3011_v1 = vadd.f32 %v4394_v44, %v5828_v48  ;;  %v4349_v15 = vpop.f32.mrb[4].mxu0 }
 0x1d5   : > { %v3178_v18 = vadd.f32 %v3177_v27, %v3176_v60  ;;  %3044 = vst.msk [vmem:[%s5833_s20 + $0x18] sm:$0xff] %vm401_vm2, %v3012_v34  ;;  %v3147_v25 = vmul.f32 %v3012_v34, %v3012_v34  ;;  %v4395_v31 = vadd.f32 %v4349_v15, %v4099_v13  ;;  %v2831_v32 = vpop.f32.mrb[5].mxu0  ;;  %v3078_v51 = vsel %vm401_vm2, %v3012_v34, 0.0 }
 0x1d6   : > { %3043 = vst.msk [vmem:[%s5833_s20 + $0x10] sm:$0xff] %vm401_vm2, %v3011_v1  ;;  %v3076_v42 = vsel %vm401_vm2, %v3011_v1, 0.0  ;;  %v3146_v43 = vmul.f32 %v3011_v1, %v3011_v1  ;;  %v4396_v50 = vadd.f32 %v2831_v32, %v1487_v39 }
 0x1d7   : > { %v3077_v52 = vadd.f32 %v3076_v42, %v3075_v2  ;;  %v3014_v26 = vadd.f32 %v4395_v31, %v5828_v48  ;;  %v3181_v58 = vsel %vm401_vm2, %v3147_v25, 0.0 }
 0x1d8   : > { %v3179_v46 = vsel %vm401_vm2, %v3146_v43, 0.0  ;;  %v3013_v9 = vadd.f32 %v4396_v50, %v5828_v48  ;;  %v4352_v6 = vpop.f32.mrb[6].mxu0 }
 0x1d9   : > { %v3180_v59 = vadd.f32 %v3179_v46, %v3178_v18  ;;  %3046 = vst.msk [vmem:[%s5833_s20 + $0x28] sm:$0xff] %vm401_vm2, %v3014_v26  ;;  %v3149_v3 = vmul.f32 %v3014_v26, %v3014_v26  ;;  %v3079_v7 = vadd.f32 %v3078_v51, %v3077_v52  ;;  %v2841_v8 = vpop.f32.mrb[7].mxu0  ;;  %v4397_v29 = vadd.f32 %v4352_v6, %v4102_v41 }
 0x1da   : > { %3045 = vst.msk [vmem:[%s5833_s20 + $0x20] sm:$0xff] %vm401_vm2, %v3013_v9  ;;  %v3080_v22 = vsel %vm401_vm2, %v3013_v9, 0.0  ;;  %v3148_v28 = vmul.f32 %v3013_v9, %v3013_v9  ;;  %v4398_v53 = vadd.f32 %v2841_v8, %v1497_v17  ;;  %v3082_v24 = vsel %vm401_vm2, %v3014_v26, 0.0 }
 0x1db   : > { %v3081_v55 = vadd.f32 %v3080_v22, %v3079_v7  ;;  %v3182_v21 = vadd.f32 %v3181_v58, %v3180_v59  ;;  %v3016_v12 = vadd.f32 %v4397_v29, %v5828_v48  ;;  %v3185_v41 = vsel %vm401_vm2, %v3149_v3, 0.0 }
 0x1dc   : > { %v3183_v10 = vsel %vm401_vm2, %v3148_v28, 0.0  ;;  %v3015_v40 = vadd.f32 %v4398_v53, %v5828_v48  ;;  %v4355_v20 = vpop.f32.mrb[8].mxu0 }
 0x1dd   : > { %v3184_v54 = vadd.f32 %v3183_v10, %v3182_v21  ;;  %v3083_v19 = vadd.f32 %v3082_v24, %v3081_v55  ;;  %v4399_v13 = vadd.f32 %v4355_v20, %v5808_v61  ;;  %v2851_v39 = vpop.f32.mrb[9].mxu0  ;;  %3048 = vst.msk [vmem:[%s5833_s20 + $0x38] sm:$0xff] %vm401_vm2, %v3016_v12  ;;  %v3151_v17 = vmul.f32 %v3016_v12, %v3016_v12 }
 0x1de   : > { %3047 = vst.msk [vmem:[%s5833_s20 + $0x30] sm:$0xff] %vm401_vm2, %v3015_v40  ;;  %v3084_v33 = vsel %vm401_vm2, %v3015_v40, 0.0  ;;  %v3150_v5 = vmul.f32 %v3015_v40, %v3015_v40  ;;  %v4400_v23 = vadd.f32 %v2851_v39, %v5810_v45  ;;  %v3086_v30 = vsel %vm401_vm2, %v3016_v12, 0.0 }
 0x1df   : > { %v3085_v11 = vadd.f32 %v3084_v33, %v3083_v19  ;;  %v3186_v47 = vadd.f32 %v3185_v41, %v3184_v54  ;;  %v3018_v63 = vadd.f32 %v4399_v13, %v5828_v48  ;;  %v3189_v38 = vsel %vm401_vm2, %v3151_v17, 0.0 }
 0x1e0   : > { %v3187_v61 = vsel %vm401_vm2, %v3150_v5, 0.0  ;;  %v4358_v57 = vpop.f32.mrb[10].mxu0  ;;  %v3017_v62 = vadd.f32 %v4400_v23, %v5828_v48 }
 0x1e1   : > { %v3188_v37 = vadd.f32 %v3187_v61, %v3186_v47  ;;  %3050 = vst.msk [vmem:[%s5833_s20 + $0x48] sm:$0xff] %vm401_vm2, %v3018_v63  ;;  %v2861_v4 = vpop.f32.mrb[11].mxu0  ;;  %v3153_v35 = vmul.f32 %v3018_v63, %v3018_v63  ;;  %v3087_v44 = vadd.f32 %v3086_v30, %v3085_v11  ;;  %v4401_v27 = vadd.f32 %v4358_v57, %v5812_v0 }
 0x1e2   : > { %v4402_v45 = vadd.f32 %v2861_v4, %v5814_v16  ;;  %3049 = vst.msk [vmem:[%s5833_s20 + $0x40] sm:$0xff] %vm401_vm2, %v3017_v62  ;;  %v3088_v2 = vsel %vm401_vm2, %v3017_v62, 0.0  ;;  %v3152_v34 = vmul.f32 %v3017_v62, %v3017_v62  ;;  %v3090_v31 = vsel %vm401_vm2, %v3018_v63, 0.0 }
 0x1e3   : > { %v3190_v60 = vadd.f32 %v3189_v38, %v3188_v37  ;;  %v3089_v1 = vadd.f32 %v3088_v2, %v3087_v44  ;;  %v3020_v15 = vadd.f32 %v4401_v27, %v5828_v48  ;;  %v3193_v42 = vsel %vm401_vm2, %v3153_v35, 0.0 }
 0x1e4   : > { %v3019_v18 = vadd.f32 %v4402_v45, %v5828_v48  ;;  %v4361_v25 = vpop.f32.mrb[12].mxu0  ;;  %v3191_v0 = vsel %vm401_vm2, %v3152_v34, 0.0 }
 0x1e5   : > { %v4403_v32 = vadd.f32 %v4361_v25, %v5816_v49  ;;  %v2871_v16 = vpop.f32.mrb[13].mxu0  ;;  %v3192_v43 = vadd.f32 %v3191_v0, %v3190_v60  ;;  %3052 = vst.msk [vmem:[%s5833_s20 + $0x58] sm:$0xff] %vm401_vm2, %v3020_v15  ;;  %v3155_v50 = vmul.f32 %v3020_v15, %v3020_v15  ;;  %v3091_v52 = vadd.f32 %v3090_v31, %v3089_v1 }
 0x1e6   : > { %3051 = vst.msk [vmem:[%s5833_s20 + $0x50] sm:$0xff] %vm401_vm2, %v3019_v18  ;;  %v3092_v26 = vsel %vm401_vm2, %v3019_v18, 0.0  ;;  %v3154_v51 = vmul.f32 %v3019_v18, %v3019_v18  ;;  %v4404_v9 = vadd.f32 %v2871_v16, %v5818_v56  ;;  %v3094_v59 = vsel %vm401_vm2, %v3020_v15, 0.0 }
 0x1e7   : > { %v3022_v46 = vadd.f32 %v4403_v32, %v5828_v48  ;;  %v3093_v49 = vadd.f32 %v3092_v26, %v3091_v52  ;;  %v3194_v6 = vadd.f32 %v3193_v42, %v3192_v43  ;;  %v3197_v56 = vsel %vm401_vm2, %v3155_v50, 0.0 }
 0x1e8   : > { %v4364_v58 = vpop.f32.mrb[14].mxu0  ;;  %v3195_v3 = vsel %vm401_vm2, %v3154_v51, 0.0  ;;  %v3021_v8 = vadd.f32 %v4404_v9, %v5828_v48 }
 0x1e9   : > { %3054 = vst.msk [vmem:[%s5833_s20 + $0x68] sm:$0xff] %vm401_vm2, %v3022_v46  ;;  %v3157_v7 = vmul.f32 %v3022_v46, %v3022_v46  ;;  %v2881_v22 = vpop.f32.mrb[15].mxu0  ;;  %v3196_v28 = vadd.f32 %v3195_v3, %v3194_v6  ;;  %v3095_v29 = vadd.f32 %v3094_v59, %v3093_v49  ;;  %v4405_v53 = vadd.f32 %v4364_v58, %v5820_v14 }
 0x1ea   : > { %v4406_v55 = vadd.f32 %v2881_v22, %v5822_v36  ;;  %3053 = vst.msk [vmem:[%s5833_s20 + $0x60] sm:$0xff] %vm401_vm2, %v3021_v8  ;;  %v3096_v21 = vsel %vm401_vm2, %v3021_v8, 0.0  ;;  %v3156_v24 = vmul.f32 %v3021_v8, %v3021_v8  ;;  %v3098_v36 = vsel %vm401_vm2, %v3022_v46, 0.0 }
 0x1eb   : > { %v3097_v12 = vadd.f32 %v3096_v21, %v3095_v29  ;;  %v3198_v40 = vadd.f32 %v3197_v56, %v3196_v28  ;;  %v3024_v20 = vadd.f32 %v4405_v53, %v5828_v48  ;;  %v3201_v17 = vsel %vm401_vm2, %v3157_v7, 0.0 }
 0x1ec   : > { %v4167_v10 = vpop.f32.mrb[16].mxu1  ;;  %v3023_v54 = vadd.f32 %v4406_v55, %v5828_v48  ;;  %v4367_v19 = vpop.f32.mrb[16].mxu0  ;;  %v3199_v13 = vsel %vm401_vm2, %v3156_v24, 0.0 }
 0x1ed   : > { %v1817_v14 = vpop.f32.mrb[17].mxu1  ;;  %v4407_v39 = vadd.f32 %v4367_v19, %v4167_v10  ;;  %v2891_v41 = vpop.f32.mrb[17].mxu0  ;;  %v3200_v33 = vadd.f32 %v3199_v13, %v3198_v40  ;;  %3056 = vst.msk [vmem:[%s5833_s20 + $0x78] sm:$0xff] %vm401_vm2, %v3024_v20  ;;  %v3159_v5 = vmul.f32 %v3024_v20, %v3024_v20  ;;  %v3099_v11 = vadd.f32 %v3098_v36, %v3097_v12 }
 0x1ee   : > { %3055 = vst.msk [vmem:[%s5833_s20 + $0x70] sm:$0xff] %vm401_vm2, %v3023_v54  ;;  %v3100_v47 = vsel %vm401_vm2, %v3023_v54, 0.0  ;;  %v3158_v63 = vmul.f32 %v3023_v54, %v3023_v54  ;;  %v4408_v61 = vadd.f32 %v2891_v41, %v1817_v14  ;;  %v3102_v4 = vsel %vm401_vm2, %v3024_v20, 0.0 }
 0x1ef   : > { %v3026_v23 = vadd.f32 %v4407_v39, %v5828_v48  ;;  %v3101_v30 = vadd.f32 %v3100_v47, %v3099_v11  ;;  %v3202_v38 = vadd.f32 %v3201_v17, %v3200_v33  ;;  %v3205_v15 = vsel %vm401_vm2, %v3159_v5, 0.0 }
 0x1f0   : > { %v4170_v57 = vpop.f32.mrb[18].mxu1  ;;  %v4370_v37 = vpop.f32.mrb[18].mxu0  ;;  %v3203_v35 = vsel %vm401_vm2, %v3158_v63, 0.0  ;;  %v3025_v27 = vadd.f32 %v4408_v61, %v5828_v48 }
 0x1f1   : > { %v1827_v62 = vpop.f32.mrb[19].mxu1  ;;  %3058 = vst.msk [vmem:[%s5833_s20 + $0x88] sm:$0xff] %vm401_vm2, %v3026_v23  ;;  %v3161_v44 = vmul.f32 %v3026_v23, %v3026_v23  ;;  %v2901_v45 = vpop.f32.mrb[19].mxu0  ;;  %v3204_v2 = vadd.f32 %v3203_v35, %v3202_v38  ;;  %v3103_v34 = vadd.f32 %v3102_v4, %v3101_v30  ;;  %v4409_v60 = vadd.f32 %v4370_v37, %v4170_v57 }
 0x1f2   : > { %v4410_v1 = vadd.f32 %v2901_v45, %v1827_v62  ;;  %3057 = vst.msk [vmem:[%s5833_s20 + $0x80] sm:$0xff] %vm401_vm2, %v3025_v27  ;;  %v3104_v18 = vsel %vm401_vm2, %v3025_v27, 0.0  ;;  %v3160_v25 = vmul.f32 %v3025_v27, %v3025_v27  ;;  %v3106_v52 = vsel %vm401_vm2, %v3026_v23, 0.0 }
 0x1f3   : > { %v3105_v0 = vadd.f32 %v3104_v18, %v3103_v34  ;;  %v3206_v32 = vadd.f32 %v3205_v15, %v3204_v2  ;;  %v3028_v16 = vadd.f32 %v4409_v60, %v5828_v48  ;;  %v3209_v9 = vsel %vm401_vm2, %v3161_v44, 0.0 }
 0x1f4   : > { %v4173_v31 = vpop.f32.mrb[20].mxu1  ;;  %v3027_v42 = vadd.f32 %v4410_v1, %v5828_v48  ;;  %v4373_v43 = vpop.f32.mrb[20].mxu0  ;;  %v3207_v26 = vsel %vm401_vm2, %v3160_v25, 0.0 }
 0x1f5   : > { %v1837_v50 = vpop.f32.mrb[21].mxu1  ;;  %v4411_v51 = vadd.f32 %v4373_v43, %v4173_v31  ;;  %v2911_v46 = vpop.f32.mrb[21].mxu0  ;;  %v3208_v49 = vadd.f32 %v3207_v26, %v3206_v32  ;;  %3060 = vst.msk [vmem:[%s5833_s20 + $0x98] sm:$0xff] %vm401_vm2, %v3028_v16  ;;  %v3163_v6 = vmul.f32 %v3028_v16, %v3028_v16  ;;  %v3107_v58 = vadd.f32 %v3106_v52, %v3105_v0 }
 0x1f6   : > { %3059 = vst.msk [vmem:[%s5833_s20 + $0x90] sm:$0xff] %vm401_vm2, %v3027_v42  ;;  %v3108_v59 = vsel %vm401_vm2, %v3027_v42, 0.0  ;;  %v3162_v3 = vmul.f32 %v3027_v42, %v3027_v42  ;;  %v4412_v8 = vadd.f32 %v2911_v46, %v1837_v50  ;;  %v3110_v56 = vsel %vm401_vm2, %v3028_v16, 0.0 }
 0x1f7   : > { %v3030_v7 = vadd.f32 %v4411_v51, %v5828_v48  ;;  %v3109_v28 = vadd.f32 %v3108_v59, %v3107_v58  ;;  %v3210_v29 = vadd.f32 %v3209_v9, %v3208_v49  ;;  %v3213_v14 = vsel %vm401_vm2, %v3163_v6, 0.0 }
 0x1f8   : > { %v4176_v22 = vpop.f32.mrb[22].mxu1  ;;  %v4376_v53 = vpop.f32.mrb[22].mxu0  ;;  %v3211_v21 = vsel %vm401_vm2, %v3162_v3, 0.0  ;;  %v3029_v10 = vadd.f32 %v4412_v8, %v5828_v48 }
 0x1f9   : > { %v1847_v55 = vpop.f32.mrb[23].mxu1  ;;  %3062 = vst.msk [vmem:[%s5833_s20 + $0xa8] sm:$0xff] %vm401_vm2, %v3030_v7  ;;  %v3165_v24 = vmul.f32 %v3030_v7, %v3030_v7  ;;  %v2921_v12 = vpop.f32.mrb[23].mxu0  ;;  %v3212_v40 = vadd.f32 %v3211_v21, %v3210_v29  ;;  %v3111_v20 = vadd.f32 %v3110_v56, %v3109_v28  ;;  %v4413_v54 = vadd.f32 %v4376_v53, %v4176_v22 }
 0x1fa   : > { %v4414_v19 = vadd.f32 %v2921_v12, %v1847_v55  ;;  %3061 = vst.msk [vmem:[%s5833_s20 + $0xa0] sm:$0xff] %vm401_vm2, %v3029_v10  ;;  %v3112_v36 = vsel %vm401_vm2, %v3029_v10, 0.0  ;;  %v3164_v13 = vmul.f32 %v3029_v10, %v3029_v10  ;;  %v3114_v63 = vsel %vm401_vm2, %v3030_v7, 0.0 }
 0x1fb   : > { %v3113_v41 = vadd.f32 %v3112_v36, %v3111_v20  ;;  %v3214_v17 = vadd.f32 %v3213_v14, %v3212_v40  ;;  %v3032_v33 = vadd.f32 %v4413_v54, %v5828_v48  ;;  %v3217_v30 = vsel %vm401_vm2, %v3165_v24, 0.0 }
 0x1fc   : > { %v4179_v39 = vpop.f32.mrb[24].mxu1  ;;  %v3031_v5 = vadd.f32 %v4414_v19, %v5828_v48  ;;  %v4379_v11 = vpop.f32.mrb[24].mxu0  ;;  %v3215_v23 = vsel %vm401_vm2, %v3164_v13, 0.0 }
 0x1fd   : > { %v1857_v47 = vpop.f32.mrb[25].mxu1  ;;  %v4415_v61 = vadd.f32 %v4379_v11, %v4179_v39  ;;  %v2931_v57 = vpop.f32.mrb[25].mxu0  ;;  %v3216_v38 = vadd.f32 %v3215_v23, %v3214_v17  ;;  %3064 = vst.msk [vmem:[%s5833_s20 + $0xb8] sm:$0xff] %vm401_vm2, %v3032_v33  ;;  %v3167_v37 = vmul.f32 %v3032_v33, %v3032_v33  ;;  %v3115_v62 = vadd.f32 %v3114_v63, %v3113_v41 }
 0x1fe   : > { %3063 = vst.msk [vmem:[%s5833_s20 + $0xb0] sm:$0xff] %vm401_vm2, %v3031_v5  ;;  %v3116_v4 = vsel %vm401_vm2, %v3031_v5, 0.0  ;;  %v3166_v35 = vmul.f32 %v3031_v5, %v3031_v5  ;;  %v4416_v27 = vadd.f32 %v2931_v57, %v1857_v47  ;;  %v3118_v15 = vsel %vm401_vm2, %v3032_v33, 0.0 }
 0x1ff   : > { %v3034_v44 = vadd.f32 %v4415_v61, %v5828_v48  ;;  %v3117_v2 = vadd.f32 %v3116_v4, %v3115_v62  ;;  %v3218_v34 = vadd.f32 %v3217_v30, %v3216_v38  ;;  %v3221_v50 = vsel %vm401_vm2, %v3167_v37, 0.0 }
 0x200   : > { %v4182_v45 = vpop.f32.mrb[26].mxu1  ;;  %v4382_v60 = vpop.f32.mrb[26].mxu0  ;;  %v3219_v18 = vsel %vm401_vm2, %v3166_v35, 0.0  ;;  %v3033_v31 = vadd.f32 %v4416_v27, %v5828_v48 }
 0x201   : > { %v1867_v1 = vpop.f32.mrb[27].mxu1  ;;  %3066 = vst.msk [vmem:[%s5833_s20 + $0xc8] sm:$0xff] %vm401_vm2, %v3034_v44  ;;  %v3169_v25 = vmul.f32 %v3034_v44, %v3034_v44  ;;  %v2941_v0 = vpop.f32.mrb[27].mxu0  ;;  %v3220_v32 = vadd.f32 %v3219_v18, %v3218_v34  ;;  %v3119_v16 = vadd.f32 %v3118_v15, %v3117_v2  ;;  %v4417_v42 = vadd.f32 %v4382_v60, %v4182_v45 }
 0x202   : > { %v4418_v43 = vadd.f32 %v2941_v0, %v1867_v1  ;;  %3065 = vst.msk [vmem:[%s5833_s20 + $0xc0] sm:$0xff] %vm401_vm2, %v3033_v31  ;;  %v3120_v52 = vsel %vm401_vm2, %v3033_v31, 0.0  ;;  %v3168_v26 = vmul.f32 %v3033_v31, %v3033_v31  ;;  %v3122_v3 = vsel %vm401_vm2, %v3034_v44, 0.0 }
 0x203   : > { %v3121_v46 = vadd.f32 %v3120_v52, %v3119_v16  ;;  %v3222_v9 = vadd.f32 %v3221_v50, %v3220_v32  ;;  %v3036_v49 = vadd.f32 %v4417_v42, %v5828_v48  ;;  %v3225_v28 = vsel %vm401_vm2, %v3169_v25, 0.0 }
 0x204   : > { %v4185_v51 = vpop.f32.mrb[28].mxu1  ;;  %v3035_v6 = vadd.f32 %v4418_v43, %v5828_v48  ;;  %v4385_v58 = vpop.f32.mrb[28].mxu0  ;;  %v3223_v7 = vsel %vm401_vm2, %v3168_v26, 0.0 }
 0x205   : > { %v1877_v59 = vpop.f32.mrb[29].mxu1  ;;  %v4419_v8 = vadd.f32 %v4385_v58, %v4185_v51  ;;  %v2951_v22 = vpop.f32.mrb[29].mxu0  ;;  %v3224_v29 = vadd.f32 %v3223_v7, %v3222_v9  ;;  %3068 = vst.msk [vmem:[%s5833_s20 + $0xd8] sm:$0xff] %vm401_vm2, %v3036_v49  ;;  %v3171_v53 = vmul.f32 %v3036_v49, %v3036_v49  ;;  %v3123_v55 = vadd.f32 %v3122_v3, %v3121_v46 }
 0x206   : > { %3067 = vst.msk [vmem:[%s5833_s20 + $0xd0] sm:$0xff] %vm401_vm2, %v3035_v6  ;;  %v3124_v56 = vsel %vm401_vm2, %v3035_v6, 0.0  ;;  %v3170_v21 = vmul.f32 %v3035_v6, %v3035_v6  ;;  %v4420_v10 = vadd.f32 %v2951_v22, %v1877_v59  ;;  %v3126_v14 = vsel %vm401_vm2, %v3036_v49, 0.0 }
 0x207   : > { %v3038_v24 = vadd.f32 %v4419_v8, %v5828_v48  ;;  %v3125_v40 = vadd.f32 %v3124_v56, %v3123_v55  ;;  %v3226_v20 = vadd.f32 %v3225_v28, %v3224_v29  ;;  %v3229_v11 = vsel %vm401_vm2, %v3171_v53, 0.0 }
 0x208   : > { %v4188_v12 = vpop.f32.mrb[30].mxu1  ;;  %v4388_v54 = vpop.f32.mrb[30].mxu0  ;;  %v3227_v36 = vsel %vm401_vm2, %v3170_v21, 0.0  ;;  %v3037_v13 = vadd.f32 %v4420_v10, %v5828_v48 }
 0x209   : > { %v1887_v19 = vpop.f32.mrb[31].mxu1  ;;  %3070 = vst.msk [vmem:[%s5833_s20 + $0xe8] sm:$0xff] %vm401_vm2, %v3038_v24  ;;  %v2961_v39 = vpop.f32.mrb[31].mxu0  ;;  %v3228_v41 = vadd.f32 %v3227_v36, %v3226_v20  ;;  %v3127_v17 = vadd.f32 %v3126_v14, %v3125_v40  ;;  %v4421_v33 = vadd.f32 %v4388_v54, %v4188_v12  ;;  %v3173_v47 = vmul.f32 %v3038_v24, %v3038_v24 }
 0x20a   : > { %v4422_v5 = vadd.f32 %v2961_v39, %v1887_v19  ;;  %3069 = vst.msk [vmem:[%s5833_s20 + $0xe0] sm:$0xff] %vm401_vm2, %v3037_v13  ;;  %v3128_v63 = vsel %vm401_vm2, %v3037_v13, 0.0  ;;  %v3172_v23 = vmul.f32 %v3037_v13, %v3037_v13  ;;  %v3130_v37 = vsel %vm401_vm2, %v3038_v24, 0.0 }
 0x20b   : > { %v3129_v61 = vadd.f32 %v3128_v63, %v3127_v17  ;;  %v3230_v57 = vadd.f32 %v3229_v11, %v3228_v41  ;;  %v3040_v30 = vadd.f32 %v4421_v33, %v5828_v48  ;;  %v3233_v44 = vsel %vm401_vm2, %v3173_v47, 0.0 }
 0x20c   : > { %v3039_v38 = vadd.f32 %v4422_v5, %v5828_v48  ;;  %v3231_v62 = vsel %vm401_vm2, %v3172_v23, 0.0 }
 0x20d   : > { %v3232_v4 = vadd.f32 %v3231_v62, %v3230_v57  ;;  %3072 = vst.msk [vmem:[%s5833_s20 + $0xf8] sm:$0xff] %vm401_vm2, %v3040_v30  ;;  %v3131_v35 = vadd.f32 %v3130_v37, %v3129_v61  ;;  %v3175_v27 = vmul.f32 %v3040_v30, %v3040_v30  ;;  %v3134_v48 = vsel %vm401_vm2, %v3040_v30, 0.0 }
 0x20e   : > { %3071 = vst.msk [vmem:[%s5833_s20 + $0xf0] sm:$0xff] %vm401_vm2, %v3039_v38  ;;  %v3132_v45 = vsel %vm401_vm2, %v3039_v38, 0.0  ;;  %v3174_v2 = vmul.f32 %v3039_v38, %v3039_v38 }
 0x20f   : > { %v3133_v34 = vadd.f32 %v3132_v45, %v3131_v35  ;;  %v3234_v60 = vadd.f32 %v3233_v44, %v3232_v4  ;;  %v3237_v25 = vsel %vm401_vm2, %v3175_v27, 0.0 }
 0x210   : > { %v3235_v1 = vsel %vm401_vm2, %v3174_v2, 0.0 }
 0x211   : > { %v3135_v15 = vadd.f32 %v3134_v48, %v3133_v34  ;;  %v3236_v18 = vadd.f32 %v3235_v1, %v3234_v60 }
 0x213   : > { %v3136_v31 = vrot.slane %v3135_v15, 4  ;;  %v3238_v0 = vadd.f32 %v3237_v25, %v3236_v18 }
 0x215   : > { %v3137_v32 = vadd.f32 %v3136_v31, %v3135_v15  ;;  %v3239_v16 = vrot.slane %v3238_v0, 4 }
 0x217   : > { %v3138_v42 = vrot.slane %v3137_v32, 2  ;;  %v3240_v43 = vadd.f32 %v3239_v16, %v3238_v0 }
 0x219   : > { %v3139_v50 = vadd.f32 %v3138_v42, %v3137_v32  ;;  %v3241_v52 = vrot.slane %v3240_v43, 2 }
 0x21b   : > { %v3140_v26 = vrot.slane %v3139_v50, 1  ;;  %v3242_v51 = vadd.f32 %v3241_v52, %v3240_v43 }
 0x21d   : > { %v3141_v46 = vadd.f32 %v3140_v26, %v3139_v50  ;;  %v3243_v9 = vrot.slane %v3242_v51, 1 }
 0x21f   : > { %3143 = vst.msk [vmem:[%s208_s24] sm:$0x1] %vm3142_vm4, %v3141_v46  ;;  %v3244_v49 = vadd.f32 %v3243_v9, %v3242_v51 }
 0x221   : > { %3245 = vst.msk [vmem:[%s208_s24 + $0x1] sm:$0x1] %vm3142_vm4, %v3244_v49 }
 0x222 PF: > { %s15_s15 = sadd.s32 1, %s4662_s15  }
 0x223   : > { %p12_p4 = scmp.ge.s32.totalorder %s15_s15, 4  }
 0x225   :  { %14 = sbr.rel (!%p12_p4) target bundleno = 1 (0x1), region = 74 }

// kernel: conv_up_forward.6
= control target key start
LH: loop header
LB: loop body
LE: loop exit
PB: predicated region body
PF: predicated region fallthrough
CT: control target
= control target key end

     0   :  { %s9030_s21 = smov 0   ;;  %s11581_s0 = inlined_call_operand.vmem [shape: f32[2,18,18,2], index: 0, kind: input, shape index: {}]   ;;  %s11582_s1 = inlined_call_operand.vmem [shape: f32[2,18,18,2], index: 1, kind: input, shape index: {}]   ;;  %s11583_s2 = inlined_call_operand.vmem [shape: f32[9,2,4], index: 2, kind: input, shape index: {}]   ;;  %s11584_s3 = inlined_call_operand.vmem [shape: f32[9,2,4], index: 3, kind: input, shape index: {}]   ;;  %s11585_s4 = inlined_call_operand.vmem [shape: f32[1,4], index: 4, kind: input, shape index: {}]   ;;  %s11586_s5 = inlined_call_operand.vmem [shape: f32[2,16,16,4], index: 5, kind: output, shape index: {0}]   ;;  %s11587_s6 = inlined_call_operand.vmem [shape: f32[2,2,4], index: 6, kind: output, shape index: {1}]  }
   0x1 LB: > { %s6272_s22 = sadd.s32 4294967295, %s8993_s21   ;;  %p6276_p0 = scmp.ge.s32.totalorder %s8993_s21, 1  ;;  %s8993_s21 = sphi %s9030_s21, %s17_s21  }
   0x2   : > { %p225_p1 = scmp.lt.s32.totalorder %s8993_s21, 3 }
   0x4   : > { %p226_p2 = pnand %p6276_p0, %p225_p1 }
   0x6   : > { %229 = sbr.rel (%p226_p2) target bundleno = 834 (0x342), region = 40 }
   0xd   : > { %vm540_vm0 = vcmask 1041408   ;;  %v3130_v0 = vld [vmem:[%s11584_s3] sm:$0x3]  ;;  %p264_p3 = scmp.lt.s32.totalorder %s6272_s22, 1  ;;  %v338_v1 = vld [vmem:[%s11583_s2 + $0x2] sm:$0x3] }
   0xe   : > { %7924 = vmatprep.subr.msk.mxu0 %vm540_vm0, %v3130_v0  ;;  %v337_v2 = vld [vmem:[%s11583_s2] sm:$0x3]  ;;  %v3131_v3 = vld [vmem:[%s11584_s3 + $0x2] sm:$0x3]  ;;  %7474 = vmatprep.subr.msk.mxu1 %vm540_vm0, %v338_v1  ;;  %vm475_vm1 = vcmask 15360   ;;  %vm394_vm2 = vcmask 1046528  }
   0xf   : > { %7925 = vmatpush3.msk.msra.mxu0 %vm540_vm0, %v3130_v0  ;;  %s12280_s22 = smov (!%p264_p3, %s6272_s22), 1  ;;  %7475 = vmatpush3.msk.msra.mxu1 %vm540_vm0, %v338_v1  ;;  %vm1061_vm3 = vcmask 1045504   ;;  %v9091_v11 = vld [vmem:[%s11584_s3 + $0x4] sm:$0x3]  ;;  %vm5968_vm4 = vcmask 31744   ;;  %vm6070_vm5 = vcmask 24576  }
  0x10   : > { %7974 = vmatprep.subr.msk.mxu0 %vm540_vm0, %v3131_v3  ;;  %s8918_s7 = smul.u32 432, %s12280_s22  ;;  %7524 = vmatprep.subr.msk.mxu1 %vm540_vm0, %v337_v2  ;;  %v9141_v29 = vld [vmem:[%s11583_s2 + $0x4] sm:$0x3]  ;;  %s6281_s28 = sshll.u32 %s12280_s22, 1 }
  0x12   : > { %s9062_s10 = scalar_lea.vmem %s11581_s0, %s8918_s7  ;;  %s9067_s13 = scalar_lea.vmem %s11582_s1, %s8918_s7 }
  0x13   : > { %v9070_v4 = vld [vmem:[%s9067_s13] sm:$0xff]  ;;  %v9073_v5 = vld [vmem:[%s9067_s13 + $0x8] sm:$0xff]  ;;  %v9086_v10 = vld [vmem:[%s9067_s13 + $0x18] sm:$0xff]  ;;  %s282_s7 = scalar_lea.vmem %s11587_s6, %s6281_s28 }
  0x14   : > { %v9076_v6 = vld [vmem:[%s9062_s10] sm:$0xff]  ;;  %7926 = vmatprep.mubr.msk.f32.mxu0 %vm475_vm1, %v9070_v4  ;;  %v3915_v7 = vrot.slane %v9070_v4, 2  ;;  %v11588_v8 = vrot.slane %v9073_v5, 2  ;;  %v9083_v9 = vld [vmem:[%s9062_s10 + $0x8] sm:$0xff]  ;;  %v9098_v14 = vld [vmem:[%s9062_s10 + $0x10] sm:$0x3] }
  0x15   : > { %7927 = vmatmul.mubr.msk.f32.vlgmr.msra.gmra.mrb[0].mxu0 %vm475_vm1, %v9073_v5  ;;  %v395_v12 = vrot.slane %v9076_v6, 1  ;;  %v396_v13 = vrot.slane %v9083_v9, 1  ;;  %11858 = vst [vmem:[#allocation2_spill] sm:$0xff] %v9098_v14  ;;  %v398_v15 = vrot.slane %v9098_v14, 1  ;;  %v9105_v16 = vld [vmem:[%s9067_s13 + $0x20] sm:$0xff]  ;;  %v9108_v17 = vld [vmem:[%s9062_s10 + $0x18] sm:$0xff] }
  0x16   : > { %7929 = vmatprep.mubr.msk.f32.mxu0 %vm475_vm1, %v9086_v10  ;;  %7975 = vmatpush3.msk.msra.mxu0 %vm540_vm0, %v3131_v3  ;;  %11859 = vst [vmem:[#allocation3_spill] sm:$0xff] %v9105_v16  ;;  %v9111_v18 = vld [vmem:[%s9062_s10 + $0x20] sm:$0xff]  ;;  %v9116_v19 = vsel %vm1061_vm3, %v3915_v7, %v11588_v8  ;;  %v400_v21 = vrot.slane %v9108_v17, 1  ;;  %v9121_v22 = vld [vmem:[%s9062_s10 + $0x28] sm:$0x3]  ;;  %v9124_v23 = vld [vmem:[%s9067_s13 + $0x30] sm:$0xff] }
  0x17   : > { %11860 = vst [vmem:[#allocation4_spill] sm:$0xff] %v9116_v19  ;;  %v397_v20 = vsel %vm394_vm2, %v395_v12, %v396_v13  ;;  %11861 = vst [vmem:[#allocation5_spill] sm:$0xff] %v9121_v22  ;;  %8024 = vmatprep.subr.msk.mxu0 %vm540_vm0, %v9091_v11  ;;  %v399_v24 = vsel %vm394_vm2, %v396_v13, %v398_v15  ;;  %v401_v25 = vrot.slane %v9111_v18, 1  ;;  %v403_v26 = vrot.slane %v9121_v22, 1  ;;  %v9133_v27 = vld [vmem:[%s9062_s10 + $0x30] sm:$0xff]  ;;  %v9136_v28 = vld [vmem:[%s9062_s10 + $0x38] sm:$0xff] }
  0x18   : > { %7476 = vmatprep.mubr.msk.f32.mxu1 %vm475_vm1, %v397_v20  ;;  %v405_v30 = vrot.slane %v9133_v27, 1  ;;  %v406_v31 = vrot.slane %v9136_v28, 1  ;;  %v9149_v32 = vld [vmem:[%s9062_s10 + $0x40] sm:$0x3]  ;;  %v9161_v35 = vld [vmem:[%s9067_s13 + $0x38] sm:$0xff]  ;;  %v9165_v37 = vld [vmem:[%s9062_s10 + $0x48] sm:$0xff] }
  0x19   : > { %7477 = vmatmul.mubr.msk.f32.vlgmr.msra.gmra.mrb[0].mxu1 %vm475_vm1, %v399_v24  ;;  %7930 = vmatmul.mubr.msk.f32.gmra.mrb[2].mxu0 %vm475_vm1, %v9105_v16  ;;  %11862 = vst [vmem:[#allocation6_spill] sm:$0xff] %v9149_v32  ;;  %v9153_v33 = vsel %vm394_vm2, %v400_v21, %v401_v25  ;;  %v9156_v34 = vsel %vm394_vm2, %v401_v25, %v403_v26  ;;  %v408_v36 = vrot.slane %v9149_v32, 1  ;;  %v9168_v38 = vld [vmem:[%s9062_s10 + $0x50] sm:$0xff]  ;;  %v9176_v40 = vld [vmem:[%s9067_s13 + $0x48] sm:$0xff]  ;;  %v410_v41 = vrot.slane %v9165_v37, 1  ;;  %v9186_v44 = vld [vmem:[%s9062_s10 + $0x60] sm:$0xff] }
  0x1a   : > { %7525 = vmatpush3.msk.msra.mxu1 %vm540_vm0, %v337_v2  ;;  %11863 = vst [vmem:[#allocation7_spill] sm:$0xff] %v9153_v33  ;;  %11864 = vst [vmem:[#allocation8_spill] sm:$0xff] %v9156_v34  ;;  %7932 = vmatprep.mubr.msk.f32.mxu0 %vm475_vm1, %v9124_v23  ;;  %v9173_v39 = vsel %vm394_vm2, %v405_v30, %v406_v31  ;;  %v411_v42 = vrot.slane %v9168_v38, 1  ;;  %v9181_v43 = vld [vmem:[%s9062_s10 + $0x58] sm:$0x3]  ;;  %v9189_v45 = vld [vmem:[%s9062_s10 + $0x68] sm:$0xff] }
  0x1b   : > { %7479 = vmatprep.mubr.msk.f32.mxu1 %vm475_vm1, %v9153_v33  ;;  %11865 = vst [vmem:[#allocation9_spill] sm:$0xff] %v9173_v39  ;;  %11866 = vst [vmem:[#allocation10_spill] sm:$0xff] %v9181_v43  ;;  %7574 = vmatprep.subr.msk.mxu1 %vm540_vm0, %v9141_v29  ;;  %v9198_v46 = vsel %vm394_vm2, %v406_v31, %v408_v36  ;;  %v9203_v47 = vld [vmem:[%s9067_s13 + $0x50] sm:$0xff]  ;;  %v413_v48 = vrot.slane %v9181_v43, 1  ;;  %v9210_v50 = vld [vmem:[%s9067_s13 + $0x60] sm:$0xff]  ;;  %v415_v51 = vrot.slane %v9186_v44, 1 }
  0x1c   : > { %11867 = vst [vmem:[#allocation11_spill] sm:$0xff] %v9198_v46  ;;  %v9207_v49 = vsel %vm394_vm2, %v410_v41, %v411_v42  ;;  %v416_v52 = vrot.slane %v9189_v45, 1  ;;  %v9215_v53 = vld [vmem:[%s9062_s10 + $0x70] sm:$0x3]  ;;  %v9218_v54 = vld [vmem:[%s9062_s10 + $0x78] sm:$0xff]  ;;  %v9221_v55 = vld [vmem:[%s9062_s10 + $0x80] sm:$0xff] }
  0x1d   : > { %7480 = vmatmul.mubr.msk.f32.gmra.mrb[2].mxu1 %vm475_vm1, %v9156_v34  ;;  %7933 = vmatmul.mubr.msk.f32.gmra.mrb[4].mxu0 %vm475_vm1, %v9161_v35  ;;  %11868 = vst [vmem:[#allocation12_spill] sm:$0xff] %v9207_v49  ;;  %11869 = vst [vmem:[#allocation13_spill] sm:$0xff] %v9215_v53  ;;  %v9230_v56 = vsel %vm394_vm2, %v411_v42, %v413_v48  ;;  %v9235_v57 = vld [vmem:[%s9067_s13 + $0x68] sm:$0xff]  ;;  %v418_v58 = vrot.slane %v9215_v53, 1  ;;  %v9242_v60 = vld [vmem:[%s9067_s13 + $0x78] sm:$0xff]  ;;  %v420_v61 = vrot.slane %v9218_v54, 1 }
  0x1e   : > { %7482 = vmatprep.mubr.msk.f32.mxu1 %vm475_vm1, %v9173_v39  ;;  %7935 = vmatprep.mubr.msk.f32.mxu0 %vm475_vm1, %v9176_v40  ;;  %11870 = vst [vmem:[#allocation14_spill] sm:$0xff] %v9230_v56  ;;  %v9239_v59 = vsel %vm394_vm2, %v415_v51, %v416_v52  ;;  %v421_v62 = vrot.slane %v9221_v55, 1  ;;  %v9247_v63 = vld [vmem:[%s9062_s10 + $0x88] sm:$0x3]  ;;  %v9250_v0 = vld [vmem:[%s9062_s10 + $0x90] sm:$0xff]  ;;  %v9253_v1 = vld [vmem:[%s9062_s10 + $0x98] sm:$0xff] }
  0x1f   : > { %11871 = vst [vmem:[#allocation15_spill] sm:$0xff] %v9239_v59  ;;  %11872 = vst [vmem:[#allocation16_spill] sm:$0xff] %v9247_v63  ;;  %v9262_v2 = vsel %vm394_vm2, %v416_v52, %v418_v58  ;;  %v9267_v3 = vld [vmem:[%s9067_s13 + $0x80] sm:$0xff]  ;;  %v423_v7 = vrot.slane %v9247_v63, 1  ;;  %v9274_v13 = vld [vmem:[%s9067_s13 + $0x90] sm:$0xff]  ;;  %v425_v15 = vrot.slane %v9250_v0, 1 }
  0x20   : > { %11873 = vst [vmem:[#allocation17_spill] sm:$0xff] %v9262_v2  ;;  %v9271_v12 = vsel %vm394_vm2, %v420_v61, %v421_v62  ;;  %v426_v20 = vrot.slane %v9253_v1, 1  ;;  %v9279_v21 = vld [vmem:[%s9062_s10 + $0xa0] sm:$0x3]  ;;  %v9282_v24 = vld [vmem:[%s9062_s10 + $0xa8] sm:$0xff]  ;;  %v9285_v25 = vld [vmem:[%s9062_s10 + $0xb0] sm:$0xff] }
  0x21   : > { %7483 = vmatmul.mubr.msk.f32.gmra.mrb[4].mxu1 %vm475_vm1, %v9198_v46  ;;  %7936 = vmatmul.mubr.msk.f32.gmra.mrb[6].mxu0 %vm475_vm1, %v9203_v47  ;;  %11874 = vst [vmem:[#allocation18_spill] sm:$0xff] %v9271_v12  ;;  %11875 = vst [vmem:[#allocation19_spill] sm:$0xff] %v9279_v21  ;;  %v9294_v26 = vsel %vm394_vm2, %v421_v62, %v423_v7  ;;  %v9299_v30 = vld [vmem:[%s9067_s13 + $0x98] sm:$0xff]  ;;  %v428_v31 = vrot.slane %v9279_v21, 1  ;;  %v9306_v41 = vld [vmem:[%s9067_s13 + $0xa8] sm:$0xff]  ;;  %v430_v42 = vrot.slane %v9282_v24, 1 }
  0x22   : > { %7485 = vmatprep.mubr.msk.f32.mxu1 %vm475_vm1, %v9207_v49  ;;  %7938 = vmatprep.mubr.msk.f32.mxu0 %vm475_vm1, %v9210_v50  ;;  %11876 = vst [vmem:[#allocation20_spill] sm:$0xff] %v9294_v26  ;;  %11877 = vst [vmem:[#allocation21_spill] sm:$0xff] %v9299_v30  ;;  %v9303_v36 = vsel %vm394_vm2, %v425_v15, %v426_v20  ;;  %v431_v48 = vrot.slane %v9285_v25, 1  ;;  %v9311_v51 = vld [vmem:[%s9062_s10 + $0xb8] sm:$0x3]  ;;  %v9314_v52 = vld [vmem:[%s9062_s10 + $0xc0] sm:$0xff] }
  0x23   : > { %11878 = vst [vmem:[#allocation22_spill] sm:$0xff] %v9303_v36  ;;  %11879 = vst [vmem:[#allocation23_spill] sm:$0xff] %v9311_v51  ;;  %v9317_v58 = vld [vmem:[%s9062_s10 + $0xc8] sm:$0xff]  ;;  %v9326_v61 = vsel %vm394_vm2, %v426_v20, %v428_v31  ;;  %v9331_v62 = vld [vmem:[%s9067_s13 + $0xb0] sm:$0xff]  ;;  %v433_v7 = vrot.slane %v9311_v51, 1 }
  0x24   : > { %11880 = vst [vmem:[#allocation24_spill] sm:$0xff] %v9326_v61  ;;  %11881 = vst [vmem:[#allocation25_spill] sm:$0xff] %v9331_v62  ;;  %v9335_v15 = vsel %vm394_vm2, %v430_v42, %v431_v48  ;;  %v9338_v8 = vld [vmem:[%s9067_s13 + $0xc0] sm:$0xff]  ;;  %v436_v20 = vrot.slane %v9317_v58, 1  ;;  %v9343_v31 = vld [vmem:[%s9062_s10 + $0xd0] sm:$0x3] }
  0x25   : > { %7486 = vmatmul.mubr.msk.f32.gmra.mrb[6].mxu1 %vm475_vm1, %v9230_v56  ;;  %7939 = vmatmul.mubr.msk.f32.gmra.mrb[8].mxu0 %vm475_vm1, %v9235_v57  ;;  %11882 = vst [vmem:[#allocation26_spill] sm:$0xff] %v9335_v15  ;;  %11883 = vst [vmem:[#allocation27_spill] sm:$0xff] %v9343_v31  ;;  %v9358_v42 = vsel %vm394_vm2, %v431_v48, %v433_v7  ;;  %v9370_v56 = vld [vmem:[%s9067_s13 + $0xd8] sm:$0xff]  ;;  %v9375_v7 = vld [vmem:[%s9062_s10 + $0xe8] sm:$0x3] }
  0x26   : > { %7488 = vmatprep.mubr.msk.f32.mxu1 %vm475_vm1, %v9239_v59  ;;  %7941 = vmatprep.mubr.msk.f32.mxu0 %vm475_vm1, %v9242_v60  ;;  %11884 = vst [vmem:[#allocation28_spill] sm:$0xff] %v9358_v42  ;;  %v438_v59 = vrot.slane %v9343_v31, 1  ;;  %11887 = vst [vmem:[#allocation31_spill] sm:$0xff] %v9375_v7  ;;  %v9381_v46 = vld [vmem:[%s9062_s10 + $0xf8] sm:$0xff]  ;;  %v9395_v39 = vld [vmem:[%s9067_s13 + $0xe0] sm:$0xff]  ;;  %v443_v34 = vrot.slane %v9375_v7, 1 }
  0x27   : > { %11889 = vst [vmem:[#allocation33_spill] sm:$0xff] %v9381_v46  ;;  %11891 = vst [vmem:[#allocation35_spill] sm:$0xff] %v9395_v39  ;;  %v9402_v33 = vld [vmem:[%s9067_s13 + $0xf0] sm:$0xff]  ;;  %v9427_v7 = vld [vmem:[%s9067_s13 + $0xf8] sm:$0xff] }
  0x28   : > { %v9413_v51 = vld [vmem:[%s9062_s10 + $0x110] sm:$0xff]  ;;  %11897 = vst [vmem:[#allocation41_spill] sm:$0xff] %v9427_v7  ;;  %v9434_v63 = vld [vmem:[%s9067_s13 + $0x108] sm:$0xff]  ;;  %v9442_v53 = vld [vmem:[%s9062_s10 + $0x120] sm:$0xff] }
  0x29   : > { %7489 = vmatmul.mubr.msk.f32.gmra.mrb[8].mxu1 %vm475_vm1, %v9262_v2  ;;  %7942 = vmatmul.mubr.msk.f32.gmra.mrb[10].mxu0 %vm475_vm1, %v9267_v3  ;;  %v9363_v2 = vld [vmem:[%s9067_s13 + $0xc8] sm:$0xff]  ;;  %11895 = vst [vmem:[#allocation39_spill] sm:$0xff] %v9413_v51  ;;  %11899 = vst [vmem:[#allocation43_spill] sm:$0xff] %v9434_v63  ;;  %v9463_v22 = vld [vmem:[%s9067_s13 + $0x10] sm:$0x3] }
  0x2a   : > { %7491 = vmatprep.mubr.msk.f32.mxu1 %vm475_vm1, %v9271_v12  ;;  %7944 = vmatprep.mubr.msk.f32.mxu0 %vm475_vm1, %v9274_v13  ;;  %v9349_v12 = vld [vmem:[%s9062_s10 + $0xe0] sm:$0xff]  ;;  %11885 = vst [vmem:[#allocation29_spill] sm:$0xff] %v9363_v2  ;;  %11901 = vst [vmem:[#allocation45_spill] sm:$0xff] %v9442_v53  ;;  %v9445_v43 = vld [vmem:[%s9062_s10 + $0x128] sm:$0xff]  ;;  %v3918_v14 = vrot.slane %v9463_v22, 2 }
  0x2b   : > { %v441_v48 = vrot.slane %v9349_v12, 1  ;;  %11902 = vst [vmem:[#allocation46_spill] sm:$0xff] %v9445_v43  ;;  %v9469_v19 = vld [vmem:[%s9067_s13 + $0x120] sm:$0xff] }
  0x2c   : > { %11906 = vst [vmem:[#allocation50_spill] sm:$0xff] %v9469_v19 }
  0x2d   : > { %7492 = vmatmul.mubr.msk.f32.gmra.mrb[10].mxu1 %vm475_vm1, %v9294_v26  ;;  %7945 = vmatmul.mubr.msk.f32.gmra.mrb[12].mxu0 %vm475_vm1, %v9299_v30  ;;  %v435_v26 = vrot.slane %v9314_v52, 1 }
  0x2e   : > { %7494 = vmatprep.mubr.msk.f32.mxu1 %vm475_vm1, %v9303_v36  ;;  %7947 = vmatprep.mubr.msk.f32.mxu0 %vm475_vm1, %v9306_v41  ;;  %v9346_v36 = vld [vmem:[%s9062_s10 + $0xd8] sm:$0xff] }
  0x2f   : > { %v440_v49 = vrot.slane %v9346_v36, 1 }
  0x31   : > { %7495 = vmatmul.mubr.msk.f32.gmra.mrb[12].mxu1 %vm475_vm1, %v9326_v61  ;;  %7948 = vmatmul.mubr.msk.f32.gmra.mrb[14].mxu0 %vm475_vm1, %v9331_v62  ;;  %v9367_v61 = vsel %vm394_vm2, %v435_v26, %v436_v20  ;;  %v9390_v26 = vsel %vm394_vm2, %v436_v20, %v438_v59  ;;  %v446_v59 = vrot.slane %v9381_v46, 1  ;;  %v9407_v20 = vld [vmem:[%s9062_s10 + $0x100] sm:$0x3] }
  0x32   : > { %7497 = vmatprep.mubr.msk.f32.mxu1 %vm475_vm1, %v9335_v15  ;;  %7950 = vmatprep.mubr.msk.f32.mxu0 %vm475_vm1, %v9338_v8  ;;  %11886 = vst [vmem:[#allocation30_spill] sm:$0xff] %v9367_v61  ;;  %v9378_v15 = vld [vmem:[%s9062_s10 + $0xf0] sm:$0xff]  ;;  %11890 = vst [vmem:[#allocation34_spill] sm:$0xff] %v9390_v26  ;;  %v448_v21 = vrot.slane %v9407_v20, 1 }
  0x33   : > { %11888 = vst [vmem:[#allocation32_spill] sm:$0xff] %v9378_v15  ;;  %v445_v31 = vrot.slane %v9378_v15, 1  ;;  %11893 = vst [vmem:[#allocation37_spill] sm:$0xff] %v9407_v20  ;;  %v9459_v20 = vld [vmem:[%s9067_s13 + $0x110] sm:$0xff] }
  0x34   : > { %11904 = vst [vmem:[#allocation48_spill] sm:$0xff] %v9459_v20 }
  0x35   : > { %7498 = vmatmul.mubr.msk.f32.gmra.mrb[14].mxu1 %vm475_vm1, %v9358_v42  ;;  %7951 = vmatmul.mubr.msk.f32.gmra.mrb[16].mxu0 %vm475_vm1, %v9363_v2  ;;  %v9399_v42 = vsel %vm394_vm2, %v440_v49, %v441_v48  ;;  %v9422_v49 = vsel %vm394_vm2, %v441_v48, %v443_v34  ;;  %v451_v34 = vrot.slane %v9413_v51, 1  ;;  %v9439_v48 = vld [vmem:[%s9062_s10 + $0x118] sm:$0x3]  ;;  %v9481_v51 = vld [vmem:[%s9062_s10 + $0x140] sm:$0xff] }
  0x36   : > { %7500 = vmatprep.mubr.msk.f32.mxu1 %vm475_vm1, %v9367_v61  ;;  %7953 = vmatprep.mubr.msk.f32.mxu0 %vm475_vm1, %v9370_v56  ;;  %11892 = vst [vmem:[#allocation36_spill] sm:$0xff] %v9399_v42  ;;  %v9410_v61 = vld [vmem:[%s9062_s10 + $0x108] sm:$0xff]  ;;  %11896 = vst [vmem:[#allocation40_spill] sm:$0xff] %v9422_v49  ;;  %v453_v32 = vrot.slane %v9439_v48, 1 }
  0x37   : > { %11894 = vst [vmem:[#allocation38_spill] sm:$0xff] %v9410_v61  ;;  %11900 = vst [vmem:[#allocation44_spill] sm:$0xff] %v9439_v48  ;;  %v9478_v48 = vld [vmem:[%s9062_s10 + $0x138] sm:$0xff] }
  0x38   : > { %11908 = vst [vmem:[#allocation52_spill] sm:$0xff] %v9478_v48  ;;  %11909 = vst [vmem:[#allocation53_spill] sm:$0xff] %v9481_v51 }
  0x39   : > { %7501 = vmatmul.mubr.msk.f32.gmra.mrb[16].mxu1 %vm475_vm1, %v9390_v26  ;;  %7954 = vmatmul.mubr.msk.f32.gmra.mrb[18].mxu0 %vm475_vm1, %v9395_v39  ;;  %v9431_v26 = vsel %vm394_vm2, %v445_v31, %v446_v59  ;;  %v9454_v31 = vsel %vm394_vm2, %v446_v59, %v448_v21  ;;  %v456_v21 = vrot.slane %v9445_v43, 1  ;;  %v9474_v59 = vld [vmem:[%s9062_s10 + $0x130] sm:$0x3] }
  0x3a   : > { %7503 = vmatprep.mubr.msk.f32.mxu1 %vm475_vm1, %v9399_v42  ;;  %7956 = vmatprep.mubr.msk.f32.mxu0 %vm475_vm1, %v9402_v33  ;;  %11898 = vst [vmem:[#allocation42_spill] sm:$0xff] %v9431_v26  ;;  %v450_v42 = vrot.slane %v9410_v61, 1  ;;  %11903 = vst [vmem:[#allocation47_spill] sm:$0xff] %v9454_v31  ;;  %v9500_v61 = vld [vmem:[%s9067_s13 + $0x128] sm:$0xff] }
  0x3b   : > { %11907 = vst [vmem:[#allocation51_spill] sm:$0xff] %v9474_v59  ;;  %11913 = vst [vmem:[#allocation56_spill] sm:$0xff] %v9500_v61 }
  0x3d   : > { %7504 = vmatmul.mubr.msk.f32.gmra.mrb[18].mxu1 %vm475_vm1, %v9422_v49  ;;  %7957 = vmatmul.mubr.msk.f32.gmra.mrb[20].mxu0 %vm475_vm1, %v9427_v7  ;;  %v9466_v49 = vsel %vm394_vm2, %v450_v42, %v451_v34  ;;  %v11910_v42 = vrot.slane %v9073_v5, 2 }
  0x3e   : > { %7506 = vmatprep.mubr.msk.f32.mxu1 %vm475_vm1, %v9431_v26  ;;  %7959 = vmatprep.mubr.msk.f32.mxu0 %vm475_vm1, %v9434_v63  ;;  %11905 = vst [vmem:[#allocation49_spill] sm:$0xff] %v9466_v49  ;;  %v455_v26 = vrot.slane %v9442_v53, 1  ;;  %v9495_v53 = vsel %vm394_vm2, %v451_v34, %v453_v32  ;;  %v461_v32 = vrot.slane %v9481_v51, 1  ;;  %v9512_v34 = vld [vmem:[%s9062_s10 + $0x148] sm:$0x3] }
  0x3f   : > { %v9490_v43 = vsel %vm1061_vm3, %v11910_v42, %v3918_v14  ;;  %11912 = vst [vmem:[#allocation55_spill] sm:$0xff] %v9495_v53  ;;  %v9507_v14 = vld [vmem:[%s9067_s13 + $0x138] sm:$0xff]  ;;  %v460_v42 = vrot.slane %v9478_v48, 1  ;;  %11916 = vst [vmem:[#allocation59_spill] sm:$0xff] %v9512_v34  ;;  %v463_v51 = vrot.slane %v9512_v34, 1 }
  0x40   : > { %11911 = vst [vmem:[#allocation54_spill] sm:$0xff] %v9490_v43  ;;  %v9504_v46 = vsel %vm394_vm2, %v455_v26, %v456_v21  ;;  %11915 = vst [vmem:[#allocation58_spill] sm:$0xff] %v9507_v14  ;;  %v9518_v43 = vld [vmem:[%s9062_s10 + $0x158] sm:$0xff] }
  0x41   : > { %7507 = vmatmul.mubr.msk.f32.gmra.mrb[20].mxu1 %vm475_vm1, %v9454_v31  ;;  %7960 = vmatmul.mubr.msk.f32.gmra.mrb[22].mxu0 %vm475_vm1, %v9459_v20  ;;  %v458_v31 = vrot.slane %v9474_v59, 1  ;;  %11914 = vst [vmem:[#allocation57_spill] sm:$0xff] %v9504_v46  ;;  %11918 = vst [vmem:[#allocation61_spill] sm:$0xff] %v9518_v43  ;;  %v9532_v59 = vld [vmem:[%s9067_s13 + $0x140] sm:$0xff]  ;;  %v9536_v48 = vsel %vm394_vm2, %v460_v42, %v461_v32  ;;  %v3511_v42 = vrot.slane %v9070_v4, 1  ;;  %v9573_v4 = vld [vmem:[%s9067_s13 + $0x168] sm:$0xff] }
  0x42   : > { %7509 = vmatprep.mubr.msk.f32.mxu1 %vm475_vm1, %v9466_v49  ;;  %7962 = vmatprep.mubr.msk.f32.mxu0 %vm475_vm1, %v9469_v19  ;;  %v9515_v49 = vld [vmem:[%s9062_s10 + $0x150] sm:$0xff]  ;;  %11920 = vst [vmem:[#allocation63_spill] sm:$0xff] %v9532_v59  ;;  %11921 = vst [vmem:[#allocation64_spill] sm:$0xff] %v9536_v48  ;;  %v9560_v34 = vsel %vm394_vm2, %v461_v32, %v463_v51  ;;  %v9578_v32 = vld [vmem:[%s9062_s10 + $0x178] sm:$0x3] }
  0x43   : > { %11917 = vst [vmem:[#allocation60_spill] sm:$0xff] %v9515_v49  ;;  %v9527_v26 = vsel %vm394_vm2, %v456_v21, %v458_v31  ;;  %v465_v15 = vrot.slane %v9515_v49, 1  ;;  %v9544_v31 = vld [vmem:[%s9062_s10 + $0x160] sm:$0x3]  ;;  %v9547_v21 = vld [vmem:[%s9062_s10 + $0x168] sm:$0xff]  ;;  %11926 = vst [vmem:[#allocation69_spill] sm:$0xff] %v9560_v34 }
  0x44   : > { %11919 = vst [vmem:[#allocation62_spill] sm:$0xff] %v9527_v26  ;;  %11923 = vst [vmem:[#allocation66_spill] sm:$0xff] %v9544_v31  ;;  %v468_v49 = vrot.slane %v9544_v31, 1  ;;  %v473_v31 = vrot.slane %v9578_v32, 1 }
  0x45   : > { %7510 = vmatmul.mubr.msk.f32.gmra.mrb[22].mxu1 %vm475_vm1, %v9495_v53  ;;  %7963 = vmatmul.mubr.msk.f32.gmra.mrb[24].mxu0 %vm475_vm1, %v9500_v61  ;;  %v9539_v53 = vld [vmem:[%s9067_s13 + $0x150] sm:$0xff]  ;;  %11924 = vst [vmem:[#allocation67_spill] sm:$0xff] %v9547_v21  ;;  %11929 = vst [vmem:[#allocation72_spill] sm:$0xff] %v9573_v4 }
  0x46   : > { %7512 = vmatprep.mubr.msk.f32.mxu1 %vm475_vm1, %v9504_v46  ;;  %7965 = vmatprep.mubr.msk.f32.mxu0 %vm475_vm1, %v9507_v14  ;;  %11922 = vst [vmem:[#allocation65_spill] sm:$0xff] %v9539_v53  ;;  %v466_v46 = vrot.slane %v9518_v43, 1  ;;  %v9550_v14 = vld [vmem:[%s9062_s10 + $0x170] sm:$0xff]  ;;  %v9565_v43 = vld [vmem:[%s9067_s13 + $0x158] sm:$0xff]  ;;  %11930 = vst [vmem:[#allocation73_spill] sm:$0xff] %v9578_v32  ;;  %v3521_v32 = vrot.slane %v9124_v23, 1 }
  0x47   : > { %11925 = vst [vmem:[#allocation68_spill] sm:$0xff] %v9550_v14  ;;  %11927 = vst [vmem:[#allocation70_spill] sm:$0xff] %v9565_v43  ;;  %v471_v51 = vrot.slane %v9550_v14, 1  ;;  %v3514_v14 = vrot.slane %v9463_v22, 1 }
  0x49   : > { %7513 = vmatmul.mubr.msk.f32.gmra.mrb[24].mxu1 %vm475_vm1, %v9527_v26  ;;  %7966 = vmatmul.mubr.msk.f32.gmra.mrb[26].mxu0 %vm475_vm1, %v9532_v59  ;;  %v3512_v26 = vrot.slane %v9073_v5, 1  ;;  %v9570_v59 = vsel %vm394_vm2, %v465_v15, %v466_v46  ;;  %v9587_v5 = vsel %vm394_vm2, %v466_v46, %v468_v49  ;;  %v9592_v15 = vld [vmem:[%s9067_s13 + $0x170] sm:$0xff]  ;;  %v9603_v49 = vld [vmem:[%s9067_s13 + $0x28] sm:$0x3]  ;;  %v9612_v22 = vsel %vm394_vm2, %v471_v51, %v473_v31 }
  0x4a   : > { %7515 = vmatprep.mubr.msk.f32.mxu1 %vm475_vm1, %v9536_v48  ;;  %7968 = vmatprep.mubr.msk.f32.mxu0 %vm475_vm1, %v9539_v53  ;;  %11928 = vst [vmem:[#allocation71_spill] sm:$0xff] %v9570_v59  ;;  %v470_v48 = vrot.slane %v9547_v21, 1  ;;  %11931 = vst [vmem:[#allocation74_spill] sm:$0xff] %v9587_v5  ;;  %v3517_v21 = vrot.slane %v9105_v16, 1  ;;  %v3522_v16 = vrot.slane %v9161_v35, 1  ;;  %v3526_v31 = vrot.slane %v9176_v40, 1 }
  0x4b   : > { %11932 = vst [vmem:[#allocation75_spill] sm:$0xff] %v9592_v15  ;;  %v3513_v46 = vsel %vm394_vm2, %v3511_v42, %v3512_v26  ;;  %11934 = vst [vmem:[#allocation77_spill] sm:$0xff] %v9612_v22  ;;  %v3519_v42 = vrot.slane %v9603_v49, 1 }
  0x4d   : > { %7516 = vmatmul.mubr.msk.f32.gmra.mrb[26].mxu1 %vm475_vm1, %v9560_v34  ;;  %7969 = vmatmul.mubr.msk.f32.gmra.mrb[28].mxu0 %vm475_vm1, %v9565_v43  ;;  %v3516_v34 = vrot.slane %v9086_v10, 1  ;;  %v9599_v43 = vsel %vm394_vm2, %v470_v48, %v471_v51  ;;  %v3515_v48 = vsel %vm394_vm2, %v3512_v26, %v3514_v14  ;;  %v9631_v14 = vld [vmem:[%s11584_s3 + $0x6] sm:$0x3]  ;;  %v3527_v51 = vrot.slane %v9203_v47, 1 }
  0x4e   : > { %7518 = vmatprep.mubr.msk.f32.mxu1 %vm475_vm1, %v9570_v59  ;;  %7971 = vmatprep.mubr.msk.f32.mxu0 %vm475_vm1, %v9573_v4  ;;  %11933 = vst [vmem:[#allocation76_spill] sm:$0xff] %v9599_v43 }
  0x4f   : > { %v9618_v59 = vsel %vm394_vm2, %v3516_v34, %v3517_v21  ;;  %v9638_v34 = vsel %vm394_vm2, %v3517_v21, %v3519_v42  ;;  %v9654_v21 = vld [vmem:[%s11583_s2 + $0x6] sm:$0x3]  ;;  %v9673_v42 = vsel %vm394_vm2, %v3526_v31, %v3527_v51 }
  0x50   : > { %11935 = vst [vmem:[#allocation78_spill] sm:$0xff] %v9618_v59  ;;  %11936 = vst [vmem:[#allocation79_spill] sm:$0xff] %v9638_v34 }
  0x51   : > { %7519 = vmatmul.mubr.msk.f32.gmra.mrb[28].mxu1 %vm475_vm1, %v9587_v5  ;;  %7972 = vmatmul.mubr.msk.f32.gmra.mrb[30].mxu0 %vm475_vm1, %v9592_v15  ;;  %v9621_v5 = vld [vmem:[%s9067_s13 + $0x40] sm:$0x3]  ;;  %11939 = vst [vmem:[#allocation82_spill] sm:$0xff] %v9673_v42 }
  0x52   : > { %7521 = vmatprep.mubr.msk.f32.mxu1 %vm475_vm1, %v9599_v43  ;;  %7976 = vmatprep.mubr.msk.f32.mxu0 %vm475_vm1, %v3513_v46  ;;  %v3524_v26 = vrot.slane %v9621_v5, 1  ;;  %v9646_v46 = vld [vmem:[%s9067_s13 + $0x58] sm:$0x3]  ;;  %v3532_v43 = vrot.slane %v9235_v57, 1 }
  0x55   : > { %7522 = vmatmul.mubr.msk.f32.gmra.mrb[30].mxu1 %vm475_vm1, %v9612_v22  ;;  %7977 = vmatmul.mubr.msk.f32.vlgmr.msra.gmra.mrb[0].mxu0 %vm475_vm1, %v3515_v48  ;;  %v9649_v48 = vsel %vm394_vm2, %v3521_v32, %v3522_v16  ;;  %v3529_v32 = vrot.slane %v9646_v46, 1  ;;  %v3531_v22 = vrot.slane %v9210_v50, 1 }
  0x56   : > { %7526 = vmatprep.mubr.msk.f32.mxu1 %vm475_vm1, %v9076_v6  ;;  %7979 = vmatprep.mubr.msk.f32.mxu0 %vm475_vm1, %v9618_v59  ;;  %11937 = vst [vmem:[#allocation80_spill] sm:$0xff] %v9649_v48  ;;  %v3542_v59 = vrot.slane %v9299_v30, 1  ;;  %v3547_v30 = vrot.slane %v9331_v62, 1  ;;  %v3552_v62 = vrot.slane %v9363_v2, 1  ;;  %v3557_v2 = vrot.slane %v9395_v39, 1 }
  0x57   : > { %8025 = vmatpush3.msk.msra.mxu0 %vm540_vm0, %v9091_v11  ;;  %v9667_v11 = vsel %vm394_vm2, %v3522_v16, %v3524_v26  ;;  %v9691_v16 = vsel %vm394_vm2, %v3527_v51, %v3529_v32  ;;  %v9695_v31 = vsel %vm394_vm2, %v3531_v22, %v3532_v43  ;;  %v3562_v39 = vrot.slane %v9427_v7, 1 }
  0x58   : > { %8074 = vmatprep.subr.msk.mxu0 %vm540_vm0, %v9631_v14  ;;  %11938 = vst [vmem:[#allocation81_spill] sm:$0xff] %v9667_v11  ;;  %11940 = vst [vmem:[#allocation83_spill] sm:$0xff] %v9691_v16  ;;  %v3567_v7 = vrot.slane %v9459_v20, 1  ;;  %v3572_v20 = vrot.slane %v9500_v61, 1  ;;  %v11962_v61 = vld [vmem:[#allocation58_spill] sm:$0xff] }
  0x59   : > { %7527 = vmatmul.mubr.msk.f32.vlgmr.msra.gmra.mrb[0].mxu1 %vm475_vm1, %v9083_v9  ;;  %7980 = vmatmul.mubr.msk.f32.gmra.mrb[2].mxu0 %vm475_vm1, %v9638_v34  ;;  %11941 = vst [vmem:[#allocation84_spill] sm:$0xff] %v9695_v31  ;;  %v3537_v34 = vrot.slane %v9267_v3, 1 }
  0x5a   : > { %7575 = vmatpush3.msk.msra.mxu1 %vm540_vm0, %v9141_v29  ;;  %7529 = vmatprep.mubr.msk.f32.mxu1 %vm475_vm1, %v9108_v17  ;;  %v9678_v29 = vld [vmem:[%s9067_s13 + $0x70] sm:$0x3] }
  0x5b   : > { %7982 = vmatprep.mubr.msk.f32.mxu0 %vm475_vm1, %v9649_v48  ;;  %7624 = vmatprep.subr.msk.mxu1 %vm540_vm0, %v9654_v21  ;;  %v3534_v26 = vrot.slane %v9678_v29, 1  ;;  %v3536_v48 = vrot.slane %v9242_v60, 1 }
  0x5d   : > { %7530 = vmatmul.mubr.msk.f32.gmra.mrb[2].mxu1 %vm475_vm1, %v9111_v18  ;;  %7983 = vmatmul.mubr.msk.f32.gmra.mrb[4].mxu0 %vm475_vm1, %v9667_v11  ;;  %v9700_v11 = vld [vmem:[%s9067_s13 + $0x88] sm:$0x3]  ;;  %v9711_v22 = vsel %vm394_vm2, %v3532_v43, %v3534_v26  ;;  %v9715_v32 = vsel %vm394_vm2, %v3536_v48, %v3537_v34 }
  0x5e   : > { %7532 = vmatprep.mubr.msk.f32.mxu1 %vm475_vm1, %v9133_v27  ;;  %7985 = vmatprep.mubr.msk.f32.mxu0 %vm475_vm1, %v9673_v42  ;;  %11942 = vst [vmem:[#allocation85_spill] sm:$0xff] %v9711_v22  ;;  %v3539_v51 = vrot.slane %v9700_v11, 1  ;;  %11943 = vst [vmem:[#allocation86_spill] sm:$0xff] %v9715_v32  ;;  %v3541_v42 = vrot.slane %v9274_v13, 1 }
  0x60   : > { %v9731_v43 = vsel %vm394_vm2, %v3537_v34, %v3539_v51  ;;  %v9735_v26 = vsel %vm394_vm2, %v3541_v42, %v3542_v59 }
  0x61   : > { %7533 = vmatmul.mubr.msk.f32.gmra.mrb[4].mxu1 %vm475_vm1, %v9136_v28  ;;  %7986 = vmatmul.mubr.msk.f32.gmra.mrb[6].mxu0 %vm475_vm1, %v9691_v16  ;;  %v9720_v16 = vld [vmem:[%s9067_s13 + $0xa0] sm:$0x3]  ;;  %11944 = vst [vmem:[#allocation87_spill] sm:$0xff] %v9731_v43  ;;  %11945 = vst [vmem:[#allocation88_spill] sm:$0xff] %v9735_v26 }
  0x62   : > { %7535 = vmatprep.mubr.msk.f32.mxu1 %vm475_vm1, %v9165_v37  ;;  %7988 = vmatprep.mubr.msk.f32.mxu0 %vm475_vm1, %v9695_v31  ;;  %v3544_v48 = vrot.slane %v9720_v16, 1  ;;  %v3546_v31 = vrot.slane %v9306_v41, 1 }
  0x64   : > { %v9751_v34 = vsel %vm394_vm2, %v3542_v59, %v3544_v48  ;;  %v9755_v51 = vsel %vm394_vm2, %v3546_v31, %v3547_v30 }
  0x65   : > { %7536 = vmatmul.mubr.msk.f32.gmra.mrb[6].mxu1 %vm475_vm1, %v9168_v38  ;;  %7989 = vmatmul.mubr.msk.f32.gmra.mrb[8].mxu0 %vm475_vm1, %v9711_v22  ;;  %v9740_v22 = vld [vmem:[%s9067_s13 + $0xb8] sm:$0x3]  ;;  %11946 = vst [vmem:[#allocation89_spill] sm:$0xff] %v9751_v34  ;;  %11947 = vst [vmem:[#allocation90_spill] sm:$0xff] %v9755_v51 }
  0x66   : > { %7538 = vmatprep.mubr.msk.f32.mxu1 %vm475_vm1, %v9186_v44  ;;  %7991 = vmatprep.mubr.msk.f32.mxu0 %vm475_vm1, %v9715_v32  ;;  %v3549_v42 = vrot.slane %v9740_v22, 1  ;;  %v3551_v32 = vrot.slane %v9338_v8, 1 }
  0x68   : > { %v9771_v59 = vsel %vm394_vm2, %v3547_v30, %v3549_v42  ;;  %v9775_v48 = vsel %vm394_vm2, %v3551_v32, %v3552_v62 }
  0x69   : > { %7539 = vmatmul.mubr.msk.f32.gmra.mrb[8].mxu1 %vm475_vm1, %v9189_v45  ;;  %7992 = vmatmul.mubr.msk.f32.gmra.mrb[10].mxu0 %vm475_vm1, %v9731_v43  ;;  %v9760_v43 = vld [vmem:[%s9067_s13 + $0xd0] sm:$0x3]  ;;  %11948 = vst [vmem:[#allocation91_spill] sm:$0xff] %v9771_v59  ;;  %11949 = vst [vmem:[#allocation92_spill] sm:$0xff] %v9775_v48 }
  0x6a   : > { %7541 = vmatprep.mubr.msk.f32.mxu1 %vm475_vm1, %v9218_v54  ;;  %7994 = vmatprep.mubr.msk.f32.mxu0 %vm475_vm1, %v9735_v26  ;;  %v3554_v31 = vrot.slane %v9760_v43, 1  ;;  %v3556_v26 = vrot.slane %v9370_v56, 1 }
  0x6c   : > { %v9791_v30 = vsel %vm394_vm2, %v3552_v62, %v3554_v31  ;;  %v9795_v42 = vsel %vm394_vm2, %v3556_v26, %v3557_v2 }
  0x6d   : > { %7542 = vmatmul.mubr.msk.f32.gmra.mrb[10].mxu1 %vm475_vm1, %v9221_v55  ;;  %7995 = vmatmul.mubr.msk.f32.gmra.mrb[12].mxu0 %vm475_vm1, %v9751_v34  ;;  %v9780_v34 = vld [vmem:[%s9067_s13 + $0xe8] sm:$0x3]  ;;  %11950 = vst [vmem:[#allocation93_spill] sm:$0xff] %v9791_v30  ;;  %11951 = vst [vmem:[#allocation94_spill] sm:$0xff] %v9795_v42 }
  0x6e   : > { %7544 = vmatprep.mubr.msk.f32.mxu1 %vm475_vm1, %v9250_v0  ;;  %7997 = vmatprep.mubr.msk.f32.mxu0 %vm475_vm1, %v9755_v51  ;;  %v3559_v32 = vrot.slane %v9780_v34, 1  ;;  %v3561_v51 = vrot.slane %v9402_v33, 1 }
  0x70   : > { %v9811_v62 = vsel %vm394_vm2, %v3557_v2, %v3559_v32  ;;  %v9815_v31 = vsel %vm394_vm2, %v3561_v51, %v3562_v39 }
  0x71   : > { %7545 = vmatmul.mubr.msk.f32.gmra.mrb[12].mxu1 %vm475_vm1, %v9253_v1  ;;  %7998 = vmatmul.mubr.msk.f32.gmra.mrb[14].mxu0 %vm475_vm1, %v9771_v59  ;;  %v9800_v59 = vld [vmem:[%s9067_s13 + $0x100] sm:$0x3]  ;;  %11953 = vst [vmem:[#allocation96_spill] sm:$0xff] %v9811_v62  ;;  %11954 = vst [vmem:[#allocation97_spill] sm:$0xff] %v9815_v31 }
  0x72   : > { %7547 = vmatprep.mubr.msk.f32.mxu1 %vm475_vm1, %v9282_v24  ;;  %8000 = vmatprep.mubr.msk.f32.mxu0 %vm475_vm1, %v9775_v48  ;;  %11952 = vst [vmem:[#allocation95_spill] sm:$0xff] %v9800_v59  ;;  %v3564_v26 = vrot.slane %v9800_v59, 1  ;;  %v3566_v48 = vrot.slane %v9434_v63, 1  ;;  %v11965_v59 = vld [vmem:[#allocation33_spill] sm:$0xff] }
  0x74   : > { %v9831_v2 = vsel %vm394_vm2, %v3562_v39, %v3564_v26  ;;  %v9835_v32 = vsel %vm394_vm2, %v3566_v48, %v3567_v7 }
  0x75   : > { %7548 = vmatmul.mubr.msk.f32.gmra.mrb[14].mxu1 %vm475_vm1, %v9285_v25  ;;  %8001 = vmatmul.mubr.msk.f32.gmra.mrb[16].mxu0 %vm475_vm1, %v9791_v30  ;;  %v9820_v30 = vld [vmem:[%s9067_s13 + $0x118] sm:$0x3]  ;;  %11956 = vst [vmem:[#allocation99_spill] sm:$0xff] %v9831_v2  ;;  %11957 = vst [vmem:[#allocation100_spill] sm:$0xff] %v9835_v32 }
  0x76   : > { %7550 = vmatprep.mubr.msk.f32.mxu1 %vm475_vm1, %v9314_v52  ;;  %8003 = vmatprep.mubr.msk.f32.mxu0 %vm475_vm1, %v9795_v42  ;;  %11955 = vst [vmem:[#allocation98_spill] sm:$0xff] %v9820_v30  ;;  %v3569_v51 = vrot.slane %v9820_v30, 1  ;;  %v3571_v42 = vrot.slane %v9469_v19, 1  ;;  %v3576_v19 = vrot.slane %v11962_v61, 1  ;;  %v11963_v30 = vld [vmem:[#allocation63_spill] sm:$0xff]  ;;  %v11969_v61 = vld [vmem:[#allocation70_spill] sm:$0xff] }
  0x77   : > { %v3577_v63 = vrot.slane %v11963_v30, 1  ;;  %v3581_v30 = vrot.slane %v9539_v53, 1  ;;  %v3587_v53 = vrot.slane %v9592_v15, 1  ;;  %v11980_v15 = vld [vmem:[#allocation53_spill] sm:$0xff] }
  0x78   : > { %v9851_v39 = vsel %vm394_vm2, %v3567_v7, %v3569_v51  ;;  %v9855_v26 = vsel %vm394_vm2, %v3571_v42, %v3572_v20 }
  0x79   : > { %7551 = vmatmul.mubr.msk.f32.gmra.mrb[16].mxu1 %vm475_vm1, %v9317_v58  ;;  %8004 = vmatmul.mubr.msk.f32.gmra.mrb[18].mxu0 %vm475_vm1, %v9811_v62  ;;  %v9840_v62 = vld [vmem:[%s9067_s13 + $0x130] sm:$0x3]  ;;  %11961 = vst [vmem:[#allocation102_spill] sm:$0xff] %v9855_v26  ;;  %v9875_v51 = vsel %vm394_vm2, %v3576_v19, %v3577_v63 }
  0x7a   : > { %7553 = vmatprep.mubr.msk.f32.mxu1 %vm475_vm1, %v9346_v36  ;;  %8006 = vmatprep.mubr.msk.f32.mxu0 %vm475_vm1, %v9815_v31  ;;  %11958 = vst [vmem:[#allocation101_spill] sm:$0xff] %v9840_v62  ;;  %v11959_v31 = vld [vmem:[#allocation32_spill] sm:$0xff]  ;;  %v3574_v48 = vrot.slane %v9840_v62, 1  ;;  %11968 = vst [vmem:[#allocation104_spill] sm:$0xff] %v9875_v51  ;;  %v3582_v62 = vrot.slane %v11969_v61, 1  ;;  %v3586_v61 = vrot.slane %v9573_v4, 1 }
  0x7b   : > { %11960 = vst [vmem:[#allocation32_spill] sm:$0xff] %v9851_v39  ;;  %v1063_v4 = vrot.slane %v9083_v9, 2  ;;  %v1068_v9 = vrot.slane %v9111_v18, 2 }
  0x7c   : > { %v9871_v7 = vsel %vm394_vm2, %v3572_v20, %v3574_v48  ;;  %v9895_v48 = vsel %vm394_vm2, %v3581_v30, %v3582_v62 }
  0x7d   : > { %7554 = vmatmul.mubr.msk.f32.gmra.mrb[18].mxu1 %vm475_vm1, %v9349_v12  ;;  %8007 = vmatmul.mubr.msk.f32.gmra.mrb[20].mxu0 %vm475_vm1, %v9831_v2  ;;  %v9860_v2 = vld [vmem:[%s9067_s13 + $0x148] sm:$0x3] }
  0x7e   : > { %7556 = vmatprep.mubr.msk.f32.mxu1 %vm475_vm1, %v11959_v31  ;;  %8009 = vmatprep.mubr.msk.f32.mxu0 %vm475_vm1, %v9835_v32  ;;  %11964 = vst [vmem:[#allocation103_spill] sm:$0xff] %v9860_v2  ;;  %v11966_v32 = vld [vmem:[#allocation38_spill] sm:$0xff]  ;;  %v3579_v42 = vrot.slane %v9860_v2, 1  ;;  %v9900_v2 = vld [vmem:[%s9067_s13 + $0x178] sm:$0x3] }
  0x7f   : > { %11967 = vst [vmem:[#allocation38_spill] sm:$0xff] %v9871_v7  ;;  %11975 = vst [vmem:[#allocation106_spill] sm:$0xff] %v9900_v2  ;;  %v3589_v30 = vrot.slane %v9900_v2, 1  ;;  %v1062_v2 = vrot.slane %v9076_v6, 2  ;;  %v1067_v6 = vrot.slane %v9108_v17, 2 }
  0x80   : > { %v9891_v19 = vsel %vm394_vm2, %v3577_v63, %v3579_v42  ;;  %v9915_v42 = vsel %vm394_vm2, %v3586_v61, %v3587_v53  ;;  %v9958_v17 = vld [vmem:[%s11584_s3 + $0x8] sm:$0x3] }
  0x81   : > { %7557 = vmatmul.mubr.msk.f32.gmra.mrb[20].mxu1 %vm475_vm1, %v11965_v59  ;;  %8010 = vmatmul.mubr.msk.f32.gmra.mrb[22].mxu0 %vm475_vm1, %v9851_v39  ;;  %v9880_v39 = vld [vmem:[%s9067_s13 + $0x160] sm:$0x3]  ;;  %v11971_v59 = vld [vmem:[#allocation39_spill] sm:$0xff] }
  0x82   : > { %7559 = vmatprep.mubr.msk.f32.mxu1 %vm475_vm1, %v11966_v32  ;;  %8012 = vmatprep.mubr.msk.f32.mxu0 %vm475_vm1, %v9855_v26  ;;  %11970 = vst [vmem:[#allocation105_spill] sm:$0xff] %v9880_v39  ;;  %v11972_v26 = vld [vmem:[#allocation45_spill] sm:$0xff]  ;;  %11973 = vst [vmem:[#allocation39_spill] sm:$0xff] %v9891_v19  ;;  %v3584_v20 = vrot.slane %v9880_v39, 1 }
  0x83   : > { %11974 = vst [vmem:[#allocation45_spill] sm:$0xff] %v9895_v48  ;;  %v11984_v39 = vld [vmem:[#allocation61_spill] sm:$0xff] }
  0x84   : > { %v9911_v63 = vsel %vm394_vm2, %v3582_v62, %v3584_v20  ;;  %v9926_v62 = vsel %vm394_vm2, %v3587_v53, %v3589_v30  ;;  %v3920_v20 = vrot.slane %v9086_v10, 2  ;;  %v11987_v53 = vld [vmem:[#allocation4_spill] sm:$0xff]  ;;  %v3923_v10 = vrot.slane %v9603_v49, 2  ;;  %v11990_v49 = vld [vmem:[#allocation5_spill] sm:$0xff] }
  0x85   : > { %7560 = vmatmul.mubr.msk.f32.gmra.mrb[22].mxu1 %vm475_vm1, %v11971_v59  ;;  %8013 = vmatmul.mubr.msk.f32.gmra.mrb[24].mxu0 %vm475_vm1, %v9871_v7  ;;  %v11976_v7 = vld [vmem:[#allocation46_spill] sm:$0xff]  ;;  %11982 = vst [vmem:[#allocation53_spill] sm:$0xff] %v9926_v62 }
  0x86   : > { %7562 = vmatprep.mubr.msk.f32.mxu1 %vm475_vm1, %v11972_v26  ;;  %8015 = vmatprep.mubr.msk.f32.mxu0 %vm475_vm1, %v9875_v51  ;;  %v11977_v51 = vld [vmem:[#allocation52_spill] sm:$0xff]  ;;  %11978 = vst [vmem:[#allocation46_spill] sm:$0xff] %v9911_v63 }
  0x87   : > { %11979 = vst [vmem:[#allocation52_spill] sm:$0xff] %v9915_v42 }
  0x89   : > { %7563 = vmatmul.mubr.msk.f32.gmra.mrb[24].mxu1 %vm475_vm1, %v11976_v7  ;;  %8016 = vmatmul.mubr.msk.f32.gmra.mrb[26].mxu0 %vm475_vm1, %v9891_v19  ;;  %v11981_v19 = vld [vmem:[#allocation60_spill] sm:$0xff] }
  0x8a   : > { %7565 = vmatprep.mubr.msk.f32.mxu1 %vm475_vm1, %v11977_v51  ;;  %8018 = vmatprep.mubr.msk.f32.mxu0 %vm475_vm1, %v9895_v48  ;;  %v11983_v48 = vld [vmem:[#allocation3_spill] sm:$0xff] }
  0x8b   : > { %v3921_v61 = vrot.slane %v11983_v48, 2  ;;  %v1064_v48 = vsel %vm1061_vm3, %v1062_v2, %v1063_v4  ;;  %v3928_v2 = vrot.slane %v9621_v5, 2 }
  0x8d   : > { %7566 = vmatmul.mubr.msk.f32.gmra.mrb[26].mxu1 %vm475_vm1, %v11980_v15  ;;  %8019 = vmatmul.mubr.msk.f32.gmra.mrb[28].mxu0 %vm475_vm1, %v9911_v63  ;;  %v11985_v63 = vld [vmem:[#allocation2_spill] sm:$0xff]  ;;  %v9946_v30 = vsel %vm1061_vm3, %v3920_v20, %v3921_v61  ;;  %v1073_v20 = vrot.slane %v9136_v28, 2 }
  0x8e   : > { %7568 = vmatprep.mubr.msk.f32.mxu1 %vm475_vm1, %v11981_v19  ;;  %8021 = vmatprep.mubr.msk.f32.mxu0 %vm475_vm1, %v9915_v42  ;;  %v1065_v19 = vrot.slane %v11985_v63, 2  ;;  %v11986_v42 = vld [vmem:[#allocation67_spill] sm:$0xff]  ;;  %v3926_v63 = vrot.slane %v9161_v35, 2  ;;  %v9968_v35 = vsel %vm1061_vm3, %v1067_v6, %v1068_v9  ;;  %v3936_v6 = vrot.slane %v9235_v57, 2  ;;  %v11992_v57 = vld [vmem:[#allocation10_spill] sm:$0xff] }
  0x90   : > { %v1066_v18 = vsel %vm1061_vm3, %v1063_v4, %v1065_v19  ;;  %v3930_v4 = vrot.slane %v9176_v40, 2  ;;  %v3931_v19 = vrot.slane %v9203_v47, 2  ;;  %v3933_v40 = vrot.slane %v9646_v46, 2 }
  0x91   : > { %7569 = vmatmul.mubr.msk.f32.gmra.mrb[28].mxu1 %vm475_vm1, %v11984_v39  ;;  %8022 = vmatmul.mubr.msk.f32.gmra.mrb[30].mxu0 %vm475_vm1, %v9926_v62  ;;  %v3925_v62 = vrot.slane %v9124_v23, 2  ;;  %v11988_v39 = vld [vmem:[#allocation68_spill] sm:$0xff]  ;;  %v9965_v23 = vsel %vm1061_vm3, %v3921_v61, %v3923_v10  ;;  %v9983_v61 = vld [vmem:[%s11583_s2 + $0x8] sm:$0x3]  ;;  %v10000_v5 = vsel %vm1061_vm3, %v3926_v63, %v3928_v2  ;;  %v3935_v10 = vrot.slane %v9210_v50, 2 }
  0x92   : > { %7571 = vmatprep.mubr.msk.f32.mxu1 %vm475_vm1, %v11986_v42  ;;  %8026 = vmatprep.mubr.msk.f32.mxu0 %vm475_vm1, %v11987_v53  ;;  %v11989_v42 = vld [vmem:[#allocation54_spill] sm:$0xff]  ;;  %v1070_v53 = vrot.slane %v11990_v49, 2  ;;  %v1082_v49 = vrot.slane %v9186_v44, 2  ;;  %v3940_v2 = vrot.slane %v9242_v60, 2  ;;  %v1087_v60 = vrot.slane %v9218_v54, 2 }
  0x94   : > { %v9997_v47 = vsel %vm1061_vm3, %v1068_v9, %v1070_v53  ;;  %v1080_v9 = vrot.slane %v11992_v57, 2  ;;  %v10037_v53 = vsel %vm1061_vm3, %v3935_v10, %v3936_v6  ;;  %v3948_v10 = vrot.slane %v9720_v16, 2 }
  0x95   : > { %7572 = vmatmul.mubr.msk.f32.gmra.mrb[30].mxu1 %vm475_vm1, %v11988_v39  ;;  %8027 = vmatmul.mubr.msk.f32.vlgmr.msra.gmra.mrb[0].mxu0 %vm475_vm1, %v11989_v42  ;;  %v1072_v42 = vrot.slane %v9133_v27, 2  ;;  %v11991_v27 = vld [vmem:[#allocation6_spill] sm:$0xff]  ;;  %v3953_v16 = vrot.slane %v9740_v22, 2 }
  0x96   : > { %7576 = vmatprep.mubr.msk.f32.mxu1 %vm475_vm1, %v1064_v48  ;;  %8029 = vmatprep.mubr.msk.f32.mxu0 %vm475_vm1, %v9946_v30  ;;  %v9978_v48 = vsel %vm1061_vm3, %v3925_v62, %v3926_v63  ;;  %v1075_v28 = vrot.slane %v11991_v27, 2  ;;  %v1078_v62 = vrot.slane %v9168_v38, 2  ;;  %v10024_v38 = vsel %vm1061_vm3, %v3931_v19, %v3933_v40 }
  0x97   : > { %8075 = vmatpush3.msk.msra.mxu0 %vm540_vm0, %v9631_v14  ;;  %v1077_v14 = vrot.slane %v9165_v37, 2  ;;  %v10007_v46 = vsel %vm1061_vm3, %v1072_v42, %v1073_v20  ;;  %v3938_v63 = vrot.slane %v9678_v29, 2  ;;  %v3941_v42 = vrot.slane %v9267_v3, 2 }
  0x98   : > { %8124 = vmatprep.subr.msk.mxu0 %vm540_vm0, %v9958_v17  ;;  %v10021_v37 = vsel %vm1061_vm3, %v1073_v20, %v1075_v28  ;;  %v11993_v20 = vld [vmem:[#allocation13_spill] sm:$0xff]  ;;  %v3943_v29 = vrot.slane %v9700_v11, 2  ;;  %v10051_v44 = vsel %vm1061_vm3, %v1078_v62, %v1080_v9  ;;  %v1088_v3 = vrot.slane %v9221_v55, 2 }
  0x99   : > { %7577 = vmatmul.mubr.msk.f32.vlgmr.msra.gmra.mrb[0].mxu1 %vm475_vm1, %v1066_v18  ;;  %8030 = vmatmul.mubr.msk.f32.gmra.mrb[2].mxu0 %vm475_vm1, %v9965_v23  ;;  %v10031_v50 = vsel %vm1061_vm3, %v1077_v14, %v1078_v62  ;;  %v1083_v18 = vrot.slane %v9189_v45, 2  ;;  %v10056_v45 = vsel %vm1061_vm3, %v3936_v6, %v3938_v63  ;;  %v10064_v11 = vsel %vm1061_vm3, %v3940_v2, %v3941_v42  ;;  %v11994_v28 = vld [vmem:[#allocation21_spill] sm:$0xff]  ;;  %v11995_v14 = vld [vmem:[#allocation16_spill] sm:$0xff]  ;;  %v11997_v2 = vld [vmem:[#allocation19_spill] sm:$0xff] }
  0x9a   : > { %7625 = vmatpush3.msk.msra.mxu1 %vm540_vm0, %v9654_v21  ;;  %7579 = vmatprep.mubr.msk.f32.mxu1 %vm475_vm1, %v9968_v35  ;;  %v10010_v21 = vsel %vm1061_vm3, %v3930_v4, %v3931_v19  ;;  %v1085_v4 = vrot.slane %v11993_v20, 2  ;;  %v3945_v27 = vrot.slane %v9274_v13, 2  ;;  %v3946_v40 = vrot.slane %v11994_v28, 2 }
  0x9b   : > { %8032 = vmatprep.mubr.msk.f32.mxu0 %vm475_vm1, %v9978_v48  ;;  %7674 = vmatprep.subr.msk.mxu1 %vm540_vm0, %v9983_v61  ;;  %v10061_v19 = vsel %vm1061_vm3, %v1082_v49, %v1083_v18  ;;  %v10076_v55 = vsel %vm1061_vm3, %v3941_v42, %v3943_v29  ;;  %v10083_v13 = vsel %vm1061_vm3, %v1087_v60, %v1088_v3  ;;  %v1090_v62 = vrot.slane %v11995_v14, 2  ;;  %v11996_v49 = vld [vmem:[#allocation25_spill] sm:$0xff] }
  0x9c   : > { %v10073_v54 = vsel %vm1061_vm3, %v1083_v18, %v1085_v4  ;;  %v1092_v6 = vrot.slane %v9250_v0, 2  ;;  %v10089_v57 = vsel %vm1061_vm3, %v3945_v27, %v3946_v40  ;;  %v1093_v9 = vrot.slane %v9253_v1, 2  ;;  %v11998_v60 = vld [vmem:[#allocation29_spill] sm:$0xff]  ;;  %v11999_v27 = vld [vmem:[#allocation23_spill] sm:$0xff] }
  0x9d   : > { %7580 = vmatmul.mubr.msk.f32.gmra.mrb[2].mxu1 %vm475_vm1, %v9997_v47  ;;  %8033 = vmatmul.mubr.msk.f32.gmra.mrb[4].mxu0 %vm475_vm1, %v10000_v5  ;;  %v3950_v63 = vrot.slane %v9306_v41, 2  ;;  %v3951_v18 = vrot.slane %v11996_v49, 2  ;;  %v1095_v42 = vrot.slane %v11997_v2, 2  ;;  %v10103_v0 = vsel %vm1061_vm3, %v1088_v3, %v1090_v62  ;;  %v12001_v49 = vld [vmem:[#allocation27_spill] sm:$0xff] }
  0x9e   : > { %7582 = vmatprep.mubr.msk.f32.mxu1 %vm475_vm1, %v10007_v46  ;;  %8035 = vmatprep.mubr.msk.f32.mxu0 %vm475_vm1, %v10010_v21  ;;  %v10108_v1 = vsel %vm1061_vm3, %v3946_v40, %v3948_v10  ;;  %v1097_v41 = vrot.slane %v9282_v24, 2  ;;  %v1098_v20 = vrot.slane %v9285_v25, 2  ;;  %v10113_v4 = vsel %vm1061_vm3, %v1092_v6, %v1093_v9 }
  0x9f   : > { %v10116_v22 = vsel %vm1061_vm3, %v3950_v63, %v3951_v18  ;;  %v3955_v29 = vrot.slane %v9338_v8, 2  ;;  %v3956_v3 = vrot.slane %v11998_v60, 2  ;;  %v10125_v24 = vsel %vm1061_vm3, %v1093_v9, %v1095_v42  ;;  %v12000_v9 = vld [vmem:[#allocation35_spill] sm:$0xff] }
  0xa0   : > { %v10128_v25 = vsel %vm1061_vm3, %v3951_v18, %v3953_v16  ;;  %v10135_v8 = vsel %vm1061_vm3, %v1097_v41, %v1098_v20  ;;  %v1100_v28 = vrot.slane %v11999_v27, 2  ;;  %v3958_v40 = vrot.slane %v9760_v43, 2  ;;  %v12005_v41 = vld [vmem:[#allocation41_spill] sm:$0xff] }
  0xa1   : > { %7583 = vmatmul.mubr.msk.f32.gmra.mrb[4].mxu1 %vm475_vm1, %v10021_v37  ;;  %8036 = vmatmul.mubr.msk.f32.gmra.mrb[6].mxu0 %vm475_vm1, %v10024_v38  ;;  %v1102_v14 = vrot.slane %v9314_v52, 2  ;;  %v10141_v62 = vsel %vm1061_vm3, %v3955_v29, %v3956_v3  ;;  %v1103_v10 = vrot.slane %v9317_v58, 2  ;;  %v3960_v6 = vrot.slane %v9370_v56, 2  ;;  %v12009_v29 = vld [vmem:[#allocation31_spill] sm:$0xff] }
  0xa2   : > { %7585 = vmatprep.mubr.msk.f32.mxu1 %vm475_vm1, %v10031_v50  ;;  %8038 = vmatprep.mubr.msk.f32.mxu0 %vm475_vm1, %v10037_v53  ;;  %v3961_v63 = vrot.slane %v12000_v9, 2  ;;  %v1105_v18 = vrot.slane %v12001_v49, 2  ;;  %v3963_v43 = vrot.slane %v9780_v34, 2  ;;  %v10155_v52 = vsel %vm1061_vm3, %v1098_v20, %v1100_v28 }
  0xa3   : > { %v10160_v56 = vsel %vm1061_vm3, %v3956_v3, %v3958_v40  ;;  %v1107_v58 = vrot.slane %v9346_v36, 2  ;;  %v1108_v2 = vrot.slane %v9349_v12, 2  ;;  %v10165_v42 = vsel %vm1061_vm3, %v1102_v14, %v1103_v10  ;;  %v12010_v3 = vld [vmem:[#allocation95_spill] sm:$0xff]  ;;  %v12012_v14 = vld [vmem:[#allocation33_spill] sm:$0xff] }
  0xa4   : > { %12002 = vst [vmem:[#allocation3_spill] sm:$0xff] %v10160_v56  ;;  %12003 = vst [vmem:[#allocation2_spill] sm:$0xff] %v10165_v42  ;;  %v10168_v34 = vsel %vm1061_vm3, %v3960_v6, %v3961_v63  ;;  %v3965_v16 = vrot.slane %v9402_v33, 2  ;;  %v3966_v20 = vrot.slane %v12005_v41, 2  ;;  %v10177_v36 = vsel %vm1061_vm3, %v1103_v10, %v1105_v18  ;;  %v12013_v6 = vld [vmem:[#allocation43_spill] sm:$0xff]  ;;  %v12015_v18 = vld [vmem:[#allocation37_spill] sm:$0xff] }
  0xa5   : > { %7586 = vmatmul.mubr.msk.f32.gmra.mrb[6].mxu1 %vm475_vm1, %v10051_v44  ;;  %8039 = vmatmul.mubr.msk.f32.gmra.mrb[8].mxu0 %vm475_vm1, %v10056_v45  ;;  %12004 = vst [vmem:[#allocation4_spill] sm:$0xff] %v10168_v34  ;;  %12006 = vst [vmem:[#allocation68_spill] sm:$0xff] %v10177_v36  ;;  %v10180_v12 = vsel %vm1061_vm3, %v3961_v63, %v3963_v43  ;;  %v10187_v33 = vsel %vm1061_vm3, %v1107_v58, %v1108_v2  ;;  %v1110_v60 = vrot.slane %v12009_v29, 2  ;;  %v12014_v63 = vld [vmem:[#allocation48_spill] sm:$0xff]  ;;  %v12016_v58 = vld [vmem:[#allocation98_spill] sm:$0xff] }
  0xa6   : > { %7588 = vmatprep.mubr.msk.f32.mxu1 %vm475_vm1, %v10061_v19  ;;  %8041 = vmatprep.mubr.msk.f32.mxu0 %vm475_vm1, %v10064_v11  ;;  %12007 = vst [vmem:[#allocation54_spill] sm:$0xff] %v10180_v12  ;;  %12008 = vst [vmem:[#allocation5_spill] sm:$0xff] %v10187_v33  ;;  %v3968_v27 = vrot.slane %v12010_v3, 2  ;;  %v1112_v28 = vrot.slane %v11959_v31, 2  ;;  %v10193_v40 = vsel %vm1061_vm3, %v3965_v16, %v3966_v20  ;;  %v1113_v10 = vrot.slane %v12012_v14, 2 }
  0xa7   : > { %12011 = vst [vmem:[#allocation6_spill] sm:$0xff] %v10193_v40  ;;  %v3970_v9 = vrot.slane %v12013_v6, 2  ;;  %v3971_v49 = vrot.slane %v12014_v63, 2  ;;  %v1115_v43 = vrot.slane %v12015_v18, 2  ;;  %v3973_v41 = vrot.slane %v12016_v58, 2  ;;  %v12021_v58 = vld [vmem:[#allocation50_spill] sm:$0xff] }
  0xa8   : > { %v10207_v31 = vsel %vm1061_vm3, %v1108_v2, %v1110_v60  ;;  %v10212_v16 = vsel %vm1061_vm3, %v3966_v20, %v3968_v27  ;;  %v1117_v29 = vrot.slane %v11966_v32, 2  ;;  %v1118_v3 = vrot.slane %v11971_v59, 2  ;;  %v12022_v2 = vld [vmem:[#allocation56_spill] sm:$0xff] }
  0xa9   : > { %7589 = vmatmul.mubr.msk.f32.gmra.mrb[8].mxu1 %vm475_vm1, %v10073_v54  ;;  %8042 = vmatmul.mubr.msk.f32.gmra.mrb[10].mxu0 %vm475_vm1, %v10076_v55  ;;  %12017 = vst [vmem:[#allocation10_spill] sm:$0xff] %v10207_v31  ;;  %12018 = vst [vmem:[#allocation13_spill] sm:$0xff] %v10212_v16  ;;  %v10217_v14 = vsel %vm1061_vm3, %v1112_v28, %v1113_v10  ;;  %v10220_v18 = vsel %vm1061_vm3, %v3970_v9, %v3971_v49  ;;  %v3976_v60 = vrot.slane %v12022_v2, 2  ;;  %v12026_v27 = vld [vmem:[#allocation44_spill] sm:$0xff]  ;;  %v12027_v9 = vld [vmem:[#allocation101_spill] sm:$0xff] }
  0xaa   : > { %7591 = vmatprep.mubr.msk.f32.mxu1 %vm475_vm1, %v10083_v13  ;;  %8044 = vmatprep.mubr.msk.f32.mxu0 %vm475_vm1, %v10089_v57  ;;  %12019 = vst [vmem:[#allocation21_spill] sm:$0xff] %v10217_v14  ;;  %12020 = vst [vmem:[#allocation16_spill] sm:$0xff] %v10220_v18  ;;  %v10229_v32 = vsel %vm1061_vm3, %v1113_v10, %v1115_v43  ;;  %v10232_v59 = vsel %vm1061_vm3, %v3971_v49, %v3973_v41  ;;  %v1120_v28 = vrot.slane %v12026_v27, 2  ;;  %v12029_v43 = vld [vmem:[#allocation58_spill] sm:$0xff] }
  0xab   : > { %12023 = vst [vmem:[#allocation25_spill] sm:$0xff] %v10229_v32  ;;  %12024 = vst [vmem:[#allocation19_spill] sm:$0xff] %v10232_v59  ;;  %v10239_v20 = vsel %vm1061_vm3, %v1117_v29, %v1118_v3  ;;  %v1123_v49 = vrot.slane %v11976_v7, 2  ;;  %v3980_v41 = vrot.slane %v12029_v43, 2  ;;  %v12031_v29 = vld [vmem:[#allocation51_spill] sm:$0xff] }
  0xac   : > { %12025 = vst [vmem:[#allocation29_spill] sm:$0xff] %v10239_v20  ;;  %v1125_v27 = vrot.slane %v12031_v29, 2 }
  0xad   : > { %7592 = vmatmul.mubr.msk.f32.gmra.mrb[10].mxu1 %vm475_vm1, %v10103_v0  ;;  %8045 = vmatmul.mubr.msk.f32.gmra.mrb[12].mxu0 %vm475_vm1, %v10108_v1 }
  0xae   : > { %7594 = vmatprep.mubr.msk.f32.mxu1 %vm475_vm1, %v10113_v4  ;;  %8047 = vmatprep.mubr.msk.f32.mxu0 %vm475_vm1, %v10116_v22 }
  0xb1   : > { %7595 = vmatmul.mubr.msk.f32.gmra.mrb[12].mxu1 %vm475_vm1, %v10125_v24  ;;  %8048 = vmatmul.mubr.msk.f32.gmra.mrb[14].mxu0 %vm475_vm1, %v10128_v25 }
  0xb2   : > { %7597 = vmatprep.mubr.msk.f32.mxu1 %vm475_vm1, %v10135_v8  ;;  %8050 = vmatprep.mubr.msk.f32.mxu0 %vm475_vm1, %v10141_v62 }
  0xb5   : > { %7598 = vmatmul.mubr.msk.f32.gmra.mrb[14].mxu1 %vm475_vm1, %v10155_v52  ;;  %8051 = vmatmul.mubr.msk.f32.gmra.mrb[16].mxu0 %vm475_vm1, %v10160_v56 }
  0xb6   : > { %7600 = vmatprep.mubr.msk.f32.mxu1 %vm475_vm1, %v10165_v42  ;;  %8053 = vmatprep.mubr.msk.f32.mxu0 %vm475_vm1, %v10168_v34 }
  0xb9   : > { %7601 = vmatmul.mubr.msk.f32.gmra.mrb[16].mxu1 %vm475_vm1, %v10177_v36  ;;  %8054 = vmatmul.mubr.msk.f32.gmra.mrb[18].mxu0 %vm475_vm1, %v10180_v12 }
  0xba   : > { %7603 = vmatprep.mubr.msk.f32.mxu1 %vm475_vm1, %v10187_v33  ;;  %8056 = vmatprep.mubr.msk.f32.mxu0 %vm475_vm1, %v10193_v40  ;;  %v3975_v33 = vrot.slane %v12021_v58, 2 }
  0xbc   : > { %v10245_v10 = vsel %vm1061_vm3, %v3975_v33, %v3976_v60  ;;  %v1127_v33 = vrot.slane %v11977_v51, 2 }
  0xbd   : > { %7604 = vmatmul.mubr.msk.f32.gmra.mrb[18].mxu1 %vm475_vm1, %v10207_v31  ;;  %8057 = vmatmul.mubr.msk.f32.gmra.mrb[20].mxu0 %vm475_vm1, %v10212_v16  ;;  %v3978_v31 = vrot.slane %v12027_v9, 2  ;;  %v1122_v16 = vrot.slane %v11972_v26, 2  ;;  %12028 = vst [vmem:[#allocation23_spill] sm:$0xff] %v10245_v10  ;;  %v12032_v9 = vld [vmem:[#allocation103_spill] sm:$0xff]  ;;  %v10259_v26 = vsel %vm1061_vm3, %v1118_v3, %v1120_v28  ;;  %v12038_v3 = vld [vmem:[#allocation70_spill] sm:$0xff] }
  0xbe   : > { %7606 = vmatprep.mubr.msk.f32.mxu1 %vm475_vm1, %v10217_v14  ;;  %8059 = vmatprep.mubr.msk.f32.mxu0 %vm475_vm1, %v10220_v18  ;;  %v12030_v14 = vld [vmem:[#allocation63_spill] sm:$0xff]  ;;  %v3983_v18 = vrot.slane %v12032_v9, 2  ;;  %12033 = vst [vmem:[#allocation35_spill] sm:$0xff] %v10259_v26  ;;  %v3986_v28 = vrot.slane %v12038_v3, 2 }
  0xbf   : > { %v3981_v40 = vrot.slane %v12030_v14, 2  ;;  %v10264_v7 = vsel %vm1061_vm3, %v3976_v60, %v3978_v31  ;;  %v10269_v29 = vsel %vm1061_vm3, %v1122_v16, %v1123_v49  ;;  %v10281_v31 = vsel %vm1061_vm3, %v1123_v49, %v1125_v27  ;;  %v12047_v27 = vld [vmem:[#allocation72_spill] sm:$0xff] }
  0xc0   : > { %12034 = vst [vmem:[#allocation27_spill] sm:$0xff] %v10264_v7  ;;  %12035 = vst [vmem:[#allocation41_spill] sm:$0xff] %v10269_v29  ;;  %v3990_v34 = vrot.slane %v12047_v27, 2 }
  0xc1   : > { %7607 = vmatmul.mubr.msk.f32.gmra.mrb[20].mxu1 %vm475_vm1, %v10229_v32  ;;  %8060 = vmatmul.mubr.msk.f32.gmra.mrb[22].mxu0 %vm475_vm1, %v10232_v59  ;;  %v1128_v59 = vrot.slane %v11980_v15, 2  ;;  %v10272_v9 = vsel %vm1061_vm3, %v3980_v41, %v3981_v40  ;;  %12039 = vst [vmem:[#allocation95_spill] sm:$0xff] %v10281_v31  ;;  %v10284_v60 = vsel %vm1061_vm3, %v3981_v40, %v3983_v18  ;;  %v12042_v41 = vld [vmem:[#allocation59_spill] sm:$0xff]  ;;  %v12046_v40 = vld [vmem:[#allocation61_spill] sm:$0xff] }
  0xc2   : > { %7609 = vmatprep.mubr.msk.f32.mxu1 %vm475_vm1, %v10239_v20  ;;  %8062 = vmatprep.mubr.msk.f32.mxu0 %vm475_vm1, %v10245_v10  ;;  %12036 = vst [vmem:[#allocation31_spill] sm:$0xff] %v10272_v9  ;;  %v12037_v20 = vld [vmem:[#allocation65_spill] sm:$0xff]  ;;  %12040 = vst [vmem:[#allocation33_spill] sm:$0xff] %v10284_v60  ;;  %v1133_v18 = vrot.slane %v12046_v40, 2 }
  0xc3   : > { %v3985_v32 = vrot.slane %v12037_v20, 2  ;;  %v10291_v16 = vsel %vm1061_vm3, %v1127_v33, %v1128_v59  ;;  %v12043_v10 = vld [vmem:[#allocation105_spill] sm:$0xff]  ;;  %v12049_v33 = vld [vmem:[#allocation66_spill] sm:$0xff] }
  0xc4   : > { %12041 = vst [vmem:[#allocation43_spill] sm:$0xff] %v10291_v16  ;;  %v3988_v12 = vrot.slane %v12043_v10, 2 }
  0xc5   : > { %7610 = vmatmul.mubr.msk.f32.gmra.mrb[22].mxu1 %vm475_vm1, %v10259_v26  ;;  %8063 = vmatmul.mubr.msk.f32.gmra.mrb[24].mxu0 %vm475_vm1, %v10264_v7  ;;  %v1130_v26 = vrot.slane %v12042_v41, 2  ;;  %v12044_v7 = vld [vmem:[#allocation60_spill] sm:$0xff]  ;;  %v10297_v49 = vsel %vm1061_vm3, %v3985_v32, %v3986_v28  ;;  %v1135_v41 = vrot.slane %v12049_v33, 2  ;;  %v10362_v33 = vld [vmem:[%s11584_s3 + $0xa] sm:$0x3] }
  0xc6   : > { %7612 = vmatprep.mubr.msk.f32.mxu1 %vm475_vm1, %v10269_v29  ;;  %8065 = vmatprep.mubr.msk.f32.mxu0 %vm475_vm1, %v10272_v9  ;;  %v1132_v36 = vrot.slane %v12044_v7, 2  ;;  %12045 = vst [vmem:[#allocation48_spill] sm:$0xff] %v10297_v49  ;;  %v12048_v29 = vld [vmem:[#allocation75_spill] sm:$0xff]  ;;  %v10314_v32 = vsel %vm1061_vm3, %v3986_v28, %v3988_v12  ;;  %v12050_v9 = vld [vmem:[#allocation106_spill] sm:$0xff]  ;;  %v12053_v12 = vld [vmem:[#allocation73_spill] sm:$0xff] }
  0xc7   : > { %v3991_v42 = vrot.slane %v12048_v29, 2  ;;  %v10309_v10 = vsel %vm1061_vm3, %v1128_v59, %v1130_v26  ;;  %v3993_v56 = vrot.slane %v12050_v9, 2  ;;  %v1138_v26 = vrot.slane %v11988_v39, 2 }
  0xc8   : > { %v1140_v9 = vrot.slane %v12053_v12, 2  ;;  %v8931_v12 = vld [vmem:[%s9062_s10 + $0x20] sm:$0xff] }
  0xc9   : > { %7613 = vmatmul.mubr.msk.f32.gmra.mrb[24].mxu1 %vm475_vm1, %v10281_v31  ;;  %8066 = vmatmul.mubr.msk.f32.gmra.mrb[26].mxu0 %vm475_vm1, %v10284_v60  ;;  %v10319_v31 = vsel %vm1061_vm3, %v1132_v36, %v1133_v18  ;;  %v10322_v60 = vsel %vm1061_vm3, %v3990_v34, %v3991_v42  ;;  %v10333_v36 = vsel %vm1061_vm3, %v1133_v18, %v1135_v41  ;;  %v8929_v41 = vld [vmem:[%s9062_s10 + $0x18] sm:$0xff] }
  0xca   : > { %7615 = vmatprep.mubr.msk.f32.mxu1 %vm475_vm1, %v10291_v16  ;;  %8068 = vmatprep.mubr.msk.f32.mxu0 %vm475_vm1, %v10297_v49  ;;  %12051 = vst [vmem:[#allocation37_spill] sm:$0xff] %v10322_v60  ;;  %v12052_v16 = vld [vmem:[#allocation67_spill] sm:$0xff]  ;;  %v10338_v34 = vsel %vm1061_vm3, %v3991_v42, %v3993_v56  ;;  %v10351_v18 = vsel %vm1061_vm3, %v1138_v26, %v1140_v9  ;;  %v8927_v56 = vld [vmem:[%s9067_s13 + $0x18] sm:$0xff]  ;;  %v8928_v42 = vld [vmem:[%s9067_s13 + $0x20] sm:$0xff] }
  0xcb   : > { %v1137_v59 = vrot.slane %v12052_v16, 2  ;;  %v10383_v9 = vld [vmem:[%s9067_s13 + $0x38] sm:$0xff] }
  0xcd   : > { %7616 = vmatmul.mubr.msk.f32.gmra.mrb[26].mxu1 %vm475_vm1, %v10309_v10  ;;  %8069 = vmatmul.mubr.msk.f32.gmra.mrb[28].mxu0 %vm475_vm1, %v10314_v32  ;;  %v10342_v28 = vsel %vm1061_vm3, %v1137_v59, %v1138_v26  ;;  %v10367_v59 = vld [vmem:[%s9067_s13 + $0x30] sm:$0xff]  ;;  %v10376_v26 = vld [vmem:[%s11583_s2 + $0xa] sm:$0x3] }
  0xce   : > { %7618 = vmatprep.mubr.msk.f32.mxu1 %vm475_vm1, %v10319_v31  ;;  %8071 = vmatprep.mubr.msk.f32.mxu0 %vm475_vm1, %v10322_v60  ;;  %12054 = vst [vmem:[#allocation98_spill] sm:$0xff] %v10342_v28 }
  0xd1   : > { %7619 = vmatmul.mubr.msk.f32.gmra.mrb[28].mxu1 %vm475_vm1, %v10333_v36  ;;  %8072 = vmatmul.mubr.msk.f32.gmra.mrb[30].mxu0 %vm475_vm1, %v10338_v34 }
  0xd2   : > { %7621 = vmatprep.mubr.msk.f32.mxu1 %vm475_vm1, %v10342_v28  ;;  %8076 = vmatprep.mubr.msk.f32.mxu0 %vm475_vm1, %v8927_v56  ;;  %v10395_v56 = vld [vmem:[%s9067_s13 + $0x48] sm:$0xff] }
  0xd3   : > { %12055 = vst [vmem:[#allocation50_spill] sm:$0xff] %v10395_v56 }
  0xd5   : > { %7622 = vmatmul.mubr.msk.f32.gmra.mrb[30].mxu1 %vm475_vm1, %v10351_v18  ;;  %8077 = vmatmul.mubr.msk.f32.vlgmr.msra.gmra.mrb[0].mxu0 %vm475_vm1, %v8928_v42  ;;  %v10402_v42 = vld [vmem:[%s9062_s10 + $0x38] sm:$0xff] }
  0xd6   : > { %7626 = vmatprep.mubr.msk.f32.mxu1 %vm475_vm1, %v8929_v41  ;;  %8079 = vmatprep.mubr.msk.f32.mxu0 %vm475_vm1, %v10367_v59  ;;  %12056 = vst [vmem:[#allocation56_spill] sm:$0xff] %v10402_v42  ;;  %v10412_v41 = vld [vmem:[%s9062_s10 + $0x48] sm:$0xff] }
  0xd7   : > { %8125 = vmatpush3.msk.msra.mxu0 %vm540_vm0, %v9958_v17  ;;  %v10390_v17 = vld [vmem:[%s9062_s10 + $0x30] sm:$0xff]  ;;  %12058 = vst [vmem:[#allocation101_spill] sm:$0xff] %v10412_v41 }
  0xd8   : > { %8174 = vmatprep.subr.msk.mxu0 %vm540_vm0, %v10362_v33 }
  0xd9   : > { %7627 = vmatmul.mubr.msk.f32.vlgmr.msra.gmra.mrb[0].mxu1 %vm475_vm1, %v8931_v12  ;;  %8080 = vmatmul.mubr.msk.f32.gmra.mrb[2].mxu0 %vm475_vm1, %v10383_v9  ;;  %v10417_v12 = vld [vmem:[%s9067_s13 + $0x60] sm:$0xff] }
  0xda   : > { %7675 = vmatpush3.msk.msra.mxu1 %vm540_vm0, %v9983_v61  ;;  %7629 = vmatprep.mubr.msk.f32.mxu1 %vm475_vm1, %v10390_v17  ;;  %v10407_v61 = vld [vmem:[%s9067_s13 + $0x50] sm:$0xff]  ;;  %12059 = vst [vmem:[#allocation58_spill] sm:$0xff] %v10417_v12 }
  0xdb   : > { %8082 = vmatprep.mubr.msk.f32.mxu0 %vm475_vm1, %v10395_v56  ;;  %7724 = vmatprep.subr.msk.mxu1 %vm540_vm0, %v10376_v26  ;;  %12057 = vst [vmem:[#allocation44_spill] sm:$0xff] %v10407_v61  ;;  %v10422_v56 = vld [vmem:[%s9062_s10 + $0x50] sm:$0xff] }
  0xdc   : > { %12060 = vst [vmem:[#allocation63_spill] sm:$0xff] %v10422_v56 }
  0xdd   : > { %7630 = vmatmul.mubr.msk.f32.gmra.mrb[2].mxu1 %vm475_vm1, %v10402_v42  ;;  %8083 = vmatmul.mubr.msk.f32.gmra.mrb[4].mxu0 %vm475_vm1, %v10407_v61  ;;  %v10427_v42 = vld [vmem:[%s9067_s13 + $0x68] sm:$0xff]  ;;  %v10432_v61 = vld [vmem:[%s9062_s10 + $0x60] sm:$0xff] }
  0xde   : > { %7632 = vmatprep.mubr.msk.f32.mxu1 %vm475_vm1, %v10412_v41  ;;  %8085 = vmatprep.mubr.msk.f32.mxu0 %vm475_vm1, %v10417_v12  ;;  %12061 = vst [vmem:[#allocation51_spill] sm:$0xff] %v10427_v42  ;;  %12062 = vst [vmem:[#allocation103_spill] sm:$0xff] %v10432_v61  ;;  %v10437_v41 = vld [vmem:[%s9067_s13 + $0x78] sm:$0xff]  ;;  %v10442_v12 = vld [vmem:[%s9062_s10 + $0x68] sm:$0xff] }
  0xdf   : > { %12063 = vst [vmem:[#allocation65_spill] sm:$0xff] %v10437_v41  ;;  %12064 = vst [vmem:[#allocation70_spill] sm:$0xff] %v10442_v12 }
  0xe1   : > { %7633 = vmatmul.mubr.msk.f32.gmra.mrb[4].mxu1 %vm475_vm1, %v10422_v56  ;;  %8086 = vmatmul.mubr.msk.f32.gmra.mrb[6].mxu0 %vm475_vm1, %v10427_v42  ;;  %v10447_v56 = vld [vmem:[%s9067_s13 + $0x80] sm:$0xff]  ;;  %v10452_v42 = vld [vmem:[%s9062_s10 + $0x78] sm:$0xff] }
  0xe2   : > { %7635 = vmatprep.mubr.msk.f32.mxu1 %vm475_vm1, %v10432_v61  ;;  %8088 = vmatprep.mubr.msk.f32.mxu0 %vm475_vm1, %v10437_v41  ;;  %12065 = vst [vmem:[#allocation59_spill] sm:$0xff] %v10447_v56  ;;  %12066 = vst [vmem:[#allocation105_spill] sm:$0xff] %v10452_v42  ;;  %v10457_v61 = vld [vmem:[%s9067_s13 + $0x90] sm:$0xff]  ;;  %v10462_v41 = vld [vmem:[%s9062_s10 + $0x80] sm:$0xff] }
  0xe3   : > { %12067 = vst [vmem:[#allocation60_spill] sm:$0xff] %v10457_v61  ;;  %12068 = vst [vmem:[#allocation61_spill] sm:$0xff] %v10462_v41 }
  0xe5   : > { %7636 = vmatmul.mubr.msk.f32.gmra.mrb[6].mxu1 %vm475_vm1, %v10442_v12  ;;  %8089 = vmatmul.mubr.msk.f32.gmra.mrb[8].mxu0 %vm475_vm1, %v10447_v56  ;;  %v10467_v12 = vld [vmem:[%s9067_s13 + $0x98] sm:$0xff]  ;;  %v10472_v56 = vld [vmem:[%s9062_s10 + $0x90] sm:$0xff] }
  0xe6   : > { %7638 = vmatprep.mubr.msk.f32.mxu1 %vm475_vm1, %v10452_v42  ;;  %8091 = vmatprep.mubr.msk.f32.mxu0 %vm475_vm1, %v10457_v61  ;;  %12069 = vst [vmem:[#allocation72_spill] sm:$0xff] %v10467_v12  ;;  %12070 = vst [vmem:[#allocation75_spill] sm:$0xff] %v10472_v56  ;;  %v10477_v42 = vld [vmem:[%s9067_s13 + $0xa8] sm:$0xff]  ;;  %v10482_v61 = vld [vmem:[%s9062_s10 + $0x98] sm:$0xff] }
  0xe7   : > { %12071 = vst [vmem:[#allocation66_spill] sm:$0xff] %v10477_v42  ;;  %12072 = vst [vmem:[#allocation106_spill] sm:$0xff] %v10482_v61 }
  0xe9   : > { %7639 = vmatmul.mubr.msk.f32.gmra.mrb[8].mxu1 %vm475_vm1, %v10462_v41  ;;  %8092 = vmatmul.mubr.msk.f32.gmra.mrb[10].mxu0 %vm475_vm1, %v10467_v12  ;;  %v10487_v41 = vld [vmem:[%s9067_s13 + $0xb0] sm:$0xff]  ;;  %v10492_v12 = vld [vmem:[%s9062_s10 + $0xa8] sm:$0xff] }
  0xea   : > { %7641 = vmatprep.mubr.msk.f32.mxu1 %vm475_vm1, %v10472_v56  ;;  %8094 = vmatprep.mubr.msk.f32.mxu0 %vm475_vm1, %v10477_v42  ;;  %12073 = vst [vmem:[#allocation67_spill] sm:$0xff] %v10487_v41  ;;  %12074 = vst [vmem:[#allocation73_spill] sm:$0xff] %v10492_v12  ;;  %v10497_v56 = vld [vmem:[%s9067_s13 + $0xc0] sm:$0xff]  ;;  %v10502_v42 = vld [vmem:[%s9062_s10 + $0xb0] sm:$0xff] }
  0xeb   : > { %12075 = vst [vmem:[#allocation107_spill] sm:$0xff] %v10497_v56  ;;  %12076 = vst [vmem:[#allocation108_spill] sm:$0xff] %v10502_v42 }
  0xed   : > { %7642 = vmatmul.mubr.msk.f32.gmra.mrb[10].mxu1 %vm475_vm1, %v10482_v61  ;;  %8095 = vmatmul.mubr.msk.f32.gmra.mrb[12].mxu0 %vm475_vm1, %v10487_v41  ;;  %v10507_v61 = vld [vmem:[%s9067_s13 + $0xc8] sm:$0xff]  ;;  %v10512_v41 = vld [vmem:[%s9062_s10 + $0xc0] sm:$0xff] }
  0xee   : > { %7644 = vmatprep.mubr.msk.f32.mxu1 %vm475_vm1, %v10492_v12  ;;  %8097 = vmatprep.mubr.msk.f32.mxu0 %vm475_vm1, %v10497_v56  ;;  %12077 = vst [vmem:[#allocation109_spill] sm:$0xff] %v10507_v61  ;;  %12078 = vst [vmem:[#allocation110_spill] sm:$0xff] %v10512_v41  ;;  %v10517_v12 = vld [vmem:[%s9067_s13 + $0xd8] sm:$0xff]  ;;  %v10522_v56 = vld [vmem:[%s9062_s10 + $0xc8] sm:$0xff] }
  0xef   : > { %12079 = vst [vmem:[#allocation111_spill] sm:$0xff] %v10517_v12  ;;  %12080 = vst [vmem:[#allocation112_spill] sm:$0xff] %v10522_v56 }
  0xf1   : > { %7645 = vmatmul.mubr.msk.f32.gmra.mrb[12].mxu1 %vm475_vm1, %v10502_v42  ;;  %8098 = vmatmul.mubr.msk.f32.gmra.mrb[14].mxu0 %vm475_vm1, %v10507_v61  ;;  %v10527_v42 = vld [vmem:[%s9067_s13 + $0xe0] sm:$0xff]  ;;  %v10532_v61 = vld [vmem:[%s9062_s10 + $0xd8] sm:$0xff] }
  0xf2   : > { %7647 = vmatprep.mubr.msk.f32.mxu1 %vm475_vm1, %v10512_v41  ;;  %8100 = vmatprep.mubr.msk.f32.mxu0 %vm475_vm1, %v10517_v12  ;;  %12081 = vst [vmem:[#allocation113_spill] sm:$0xff] %v10527_v42  ;;  %v10537_v41 = vld [vmem:[%s9067_s13 + $0xf0] sm:$0xff]  ;;  %v10542_v12 = vld [vmem:[%s9062_s10 + $0xe0] sm:$0xff] }
  0xf3   : > { %12082 = vst [vmem:[#allocation114_spill] sm:$0xff] %v10537_v41  ;;  %12083 = vst [vmem:[#allocation115_spill] sm:$0xff] %v10542_v12 }
  0xf5   : > { %7648 = vmatmul.mubr.msk.f32.gmra.mrb[14].mxu1 %vm475_vm1, %v10522_v56  ;;  %8101 = vmatmul.mubr.msk.f32.gmra.mrb[16].mxu0 %vm475_vm1, %v10527_v42  ;;  %v10547_v56 = vld [vmem:[%s9067_s13 + $0xf8] sm:$0xff]  ;;  %v10552_v42 = vld [vmem:[%s9062_s10 + $0xf0] sm:$0xff] }
  0xf6   : > { %7650 = vmatprep.mubr.msk.f32.mxu1 %vm475_vm1, %v10532_v61  ;;  %8103 = vmatprep.mubr.msk.f32.mxu0 %vm475_vm1, %v10537_v41  ;;  %12084 = vst [vmem:[#allocation116_spill] sm:$0xff] %v10552_v42  ;;  %v10559_v41 = vld [vmem:[%s9062_s10 + $0xf8] sm:$0xff] }
  0xf9   : > { %7651 = vmatmul.mubr.msk.f32.gmra.mrb[16].mxu1 %vm475_vm1, %v10542_v12  ;;  %8104 = vmatmul.mubr.msk.f32.gmra.mrb[18].mxu0 %vm475_vm1, %v10547_v56  ;;  %v10566_v12 = vld [vmem:[%s9062_s10 + $0x108] sm:$0xff] }
  0xfa   : > { %7653 = vmatprep.mubr.msk.f32.mxu1 %vm475_vm1, %v10552_v42  ;;  %8106 = vmatprep.mubr.msk.f32.mxu0 %vm475_vm1, %v12013_v6  ;;  %12085 = vst [vmem:[#allocation117_spill] sm:$0xff] %v10566_v12  ;;  %v10573_v42 = vld [vmem:[%s9062_s10 + $0x110] sm:$0xff]  ;;  %v10580_v6 = vld [vmem:[%s9062_s10 + $0x120] sm:$0xff] }
  0xfb   : > { %12086 = vst [vmem:[#allocation118_spill] sm:$0xff] %v10573_v42  ;;  %12087 = vst [vmem:[#allocation119_spill] sm:$0xff] %v10580_v6 }
  0xfd   : > { %7654 = vmatmul.mubr.msk.f32.gmra.mrb[18].mxu1 %vm475_vm1, %v10559_v41  ;;  %8107 = vmatmul.mubr.msk.f32.gmra.mrb[20].mxu0 %vm475_vm1, %v12014_v63  ;;  %v10587_v63 = vld [vmem:[%s9062_s10 + $0x128] sm:$0xff] }
  0xfe   : > { %7656 = vmatprep.mubr.msk.f32.mxu1 %vm475_vm1, %v10566_v12  ;;  %8109 = vmatprep.mubr.msk.f32.mxu0 %vm475_vm1, %v12021_v58  ;;  %12088 = vst [vmem:[#allocation120_spill] sm:$0xff] %v10587_v63  ;;  %v10629_v58 = vld [vmem:[%s9062_s10 + $0x188] sm:$0xff]  ;;  %v12148_v12 = vld [vmem:[#allocation77_spill] sm:$0xff] }
 0x101   : > { %7657 = vmatmul.mubr.msk.f32.gmra.mrb[20].mxu1 %vm475_vm1, %v10573_v42  ;;  %8110 = vmatmul.mubr.msk.f32.gmra.mrb[22].mxu0 %vm475_vm1, %v12022_v2  ;;  %v12089_v2 = vld [vmem:[#allocation78_spill] sm:$0xff] }
 0x102   : > { %7659 = vmatprep.mubr.msk.f32.mxu1 %vm475_vm1, %v10580_v6  ;;  %8112 = vmatprep.mubr.msk.f32.mxu0 %vm475_vm1, %v12029_v43  ;;  %v12091_v43 = vld [vmem:[#allocation7_spill] sm:$0xff]  ;;  %v10775_v6 = vld [vmem:[%s9062_s10 + $0x190] sm:$0x3] }
 0x105   : > { %7660 = vmatmul.mubr.msk.f32.gmra.mrb[22].mxu1 %vm475_vm1, %v10587_v63  ;;  %8113 = vmatmul.mubr.msk.f32.gmra.mrb[24].mxu0 %vm475_vm1, %v12030_v14  ;;  %v10606_v14 = vld [vmem:[%s9067_s13 + $0x180] sm:$0xff] }
 0x106   : > { %7662 = vmatprep.mubr.msk.f32.mxu1 %vm475_vm1, %v11977_v51  ;;  %8115 = vmatprep.mubr.msk.f32.mxu0 %vm475_vm1, %v12037_v20  ;;  %v10620_v51 = vld [vmem:[%s9062_s10 + $0x180] sm:$0xff]  ;;  %v12090_v20 = vld [vmem:[#allocation79_spill] sm:$0xff] }
 0x109   : > { %7663 = vmatmul.mubr.msk.f32.gmra.mrb[24].mxu1 %vm475_vm1, %v11980_v15  ;;  %8116 = vmatmul.mubr.msk.f32.gmra.mrb[26].mxu0 %vm475_vm1, %v12038_v3  ;;  %v10617_v15 = vld [vmem:[%s9067_s13 + $0x188] sm:$0xff]  ;;  %v12093_v3 = vld [vmem:[#allocation8_spill] sm:$0xff] }
 0x10a   : > { %7665 = vmatprep.mubr.msk.f32.mxu1 %vm475_vm1, %v12044_v7  ;;  %8118 = vmatprep.mubr.msk.f32.mxu0 %vm475_vm1, %v12047_v27  ;;  %v12092_v7 = vld [vmem:[#allocation80_spill] sm:$0xff]  ;;  %v12096_v27 = vld [vmem:[#allocation82_spill] sm:$0xff] }
 0x10d   : > { %7666 = vmatmul.mubr.msk.f32.gmra.mrb[26].mxu1 %vm475_vm1, %v12046_v40  ;;  %8119 = vmatmul.mubr.msk.f32.gmra.mrb[28].mxu0 %vm475_vm1, %v12048_v29  ;;  %v10651_v29 = vld [vmem:[%s11583_s2 + $0xc] sm:$0x3]  ;;  %v12095_v40 = vld [vmem:[#allocation9_spill] sm:$0xff] }
 0x10e   : > { %7668 = vmatprep.mubr.msk.f32.mxu1 %vm475_vm1, %v12052_v16  ;;  %8121 = vmatprep.mubr.msk.f32.mxu0 %vm475_vm1, %v10606_v14  ;;  %v12094_v16 = vld [vmem:[#allocation81_spill] sm:$0xff] }
 0x111   : > { %7669 = vmatmul.mubr.msk.f32.gmra.mrb[28].mxu1 %vm475_vm1, %v11988_v39  ;;  %8122 = vmatmul.mubr.msk.f32.gmra.mrb[30].mxu0 %vm475_vm1, %v10617_v15  ;;  %v10640_v39 = vld [vmem:[%s11584_s3 + $0xc] sm:$0x3] }
 0x112   : > { %7671 = vmatprep.mubr.msk.f32.mxu1 %vm475_vm1, %v10620_v51  ;;  %8126 = vmatprep.mubr.msk.f32.mxu0 %vm475_vm1, %v12089_v2  ;;  %v12098_v2 = vld [vmem:[#allocation83_spill] sm:$0xff] }
 0x115   : > { %7672 = vmatmul.mubr.msk.f32.gmra.mrb[30].mxu1 %vm475_vm1, %v10629_v58  ;;  %8127 = vmatmul.mubr.msk.f32.vlgmr.msra.gmra.mrb[0].mxu0 %vm475_vm1, %v12090_v20  ;;  %v12099_v20 = vld [vmem:[#allocation12_spill] sm:$0xff] }
 0x116   : > { %7676 = vmatprep.mubr.msk.f32.mxu1 %vm475_vm1, %v12091_v43  ;;  %8129 = vmatprep.mubr.msk.f32.mxu0 %vm475_vm1, %v12092_v7  ;;  %v12100_v43 = vld [vmem:[#allocation84_spill] sm:$0xff]  ;;  %v1734_v7 = vrot.slane %v10629_v58, 1 }
 0x117   : > { %8175 = vmatpush3.msk.msra.mxu0 %vm540_vm0, %v10362_v33  ;;  %v12097_v33 = vld [vmem:[#allocation11_spill] sm:$0xff] }
 0x118   : > { %8224 = vmatprep.subr.msk.mxu0 %vm540_vm0, %v10640_v39 }
 0x119   : > { %7677 = vmatmul.mubr.msk.f32.vlgmr.msra.gmra.mrb[0].mxu1 %vm475_vm1, %v12093_v3  ;;  %8130 = vmatmul.mubr.msk.f32.gmra.mrb[2].mxu0 %vm475_vm1, %v12094_v16  ;;  %v12102_v3 = vld [vmem:[#allocation85_spill] sm:$0xff]  ;;  %v12142_v16 = vld [vmem:[#allocation46_spill] sm:$0xff] }
 0x11a   : > { %7725 = vmatpush3.msk.msra.mxu1 %vm540_vm0, %v10376_v26  ;;  %7679 = vmatprep.mubr.msk.f32.mxu1 %vm475_vm1, %v12095_v40  ;;  %v12101_v26 = vld [vmem:[#allocation14_spill] sm:$0xff] }
 0x11b   : > { %8132 = vmatprep.mubr.msk.f32.mxu0 %vm475_vm1, %v12096_v27  ;;  %7774 = vmatprep.subr.msk.mxu1 %vm540_vm0, %v10651_v29  ;;  %v12103_v27 = vld [vmem:[#allocation15_spill] sm:$0xff]  ;;  %v12104_v40 = vld [vmem:[#allocation86_spill] sm:$0xff] }
 0x11d   : > { %7680 = vmatmul.mubr.msk.f32.gmra.mrb[2].mxu1 %vm475_vm1, %v12097_v33  ;;  %8133 = vmatmul.mubr.msk.f32.gmra.mrb[4].mxu0 %vm475_vm1, %v12098_v2  ;;  %v12105_v33 = vld [vmem:[#allocation17_spill] sm:$0xff]  ;;  %v12106_v2 = vld [vmem:[#allocation87_spill] sm:$0xff] }
 0x11e   : > { %7682 = vmatprep.mubr.msk.f32.mxu1 %vm475_vm1, %v12099_v20  ;;  %8135 = vmatprep.mubr.msk.f32.mxu0 %vm475_vm1, %v12100_v43  ;;  %v12107_v20 = vld [vmem:[#allocation18_spill] sm:$0xff]  ;;  %v12108_v43 = vld [vmem:[#allocation88_spill] sm:$0xff] }
 0x121   : > { %7683 = vmatmul.mubr.msk.f32.gmra.mrb[4].mxu1 %vm475_vm1, %v12101_v26  ;;  %8136 = vmatmul.mubr.msk.f32.gmra.mrb[6].mxu0 %vm475_vm1, %v12102_v3  ;;  %v12109_v26 = vld [vmem:[#allocation20_spill] sm:$0xff]  ;;  %v12110_v3 = vld [vmem:[#allocation89_spill] sm:$0xff] }
 0x122   : > { %7685 = vmatprep.mubr.msk.f32.mxu1 %vm475_vm1, %v12103_v27  ;;  %8138 = vmatprep.mubr.msk.f32.mxu0 %vm475_vm1, %v12104_v40  ;;  %v12111_v27 = vld [vmem:[#allocation22_spill] sm:$0xff] }
 0x123   : > { %v12112_v40 = vld [vmem:[#allocation90_spill] sm:$0xff] }
 0x125   : > { %7686 = vmatmul.mubr.msk.f32.gmra.mrb[6].mxu1 %vm475_vm1, %v12105_v33  ;;  %8139 = vmatmul.mubr.msk.f32.gmra.mrb[8].mxu0 %vm475_vm1, %v12106_v2  ;;  %v12113_v33 = vld [vmem:[#allocation24_spill] sm:$0xff]  ;;  %v12114_v2 = vld [vmem:[#allocation91_spill] sm:$0xff] }
 0x126   : > { %7688 = vmatprep.mubr.msk.f32.mxu1 %vm475_vm1, %v12107_v20  ;;  %8141 = vmatprep.mubr.msk.f32.mxu0 %vm475_vm1, %v12108_v43  ;;  %v12115_v20 = vld [vmem:[#allocation26_spill] sm:$0xff]  ;;  %v12116_v43 = vld [vmem:[#allocation92_spill] sm:$0xff] }
 0x129   : > { %7689 = vmatmul.mubr.msk.f32.gmra.mrb[8].mxu1 %vm475_vm1, %v12109_v26  ;;  %8142 = vmatmul.mubr.msk.f32.gmra.mrb[10].mxu0 %vm475_vm1, %v12110_v3  ;;  %v12117_v26 = vld [vmem:[#allocation28_spill] sm:$0xff]  ;;  %v12118_v3 = vld [vmem:[#allocation93_spill] sm:$0xff] }
 0x12a   : > { %7691 = vmatprep.mubr.msk.f32.mxu1 %vm475_vm1, %v12111_v27  ;;  %8144 = vmatprep.mubr.msk.f32.mxu0 %vm475_vm1, %v12112_v40  ;;  %v12119_v27 = vld [vmem:[#allocation30_spill] sm:$0xff] }
 0x12b   : > { %v12120_v40 = vld [vmem:[#allocation94_spill] sm:$0xff] }
 0x12d   : > { %7692 = vmatmul.mubr.msk.f32.gmra.mrb[10].mxu1 %vm475_vm1, %v12113_v33  ;;  %8145 = vmatmul.mubr.msk.f32.gmra.mrb[12].mxu0 %vm475_vm1, %v12114_v2  ;;  %v12121_v33 = vld [vmem:[#allocation34_spill] sm:$0xff]  ;;  %v12122_v2 = vld [vmem:[#allocation96_spill] sm:$0xff] }
 0x12e   : > { %7694 = vmatprep.mubr.msk.f32.mxu1 %vm475_vm1, %v12115_v20  ;;  %8147 = vmatprep.mubr.msk.f32.mxu0 %vm475_vm1, %v12116_v43  ;;  %v12123_v20 = vld [vmem:[#allocation36_spill] sm:$0xff]  ;;  %v12124_v43 = vld [vmem:[#allocation97_spill] sm:$0xff] }
 0x131   : > { %7695 = vmatmul.mubr.msk.f32.gmra.mrb[12].mxu1 %vm475_vm1, %v12117_v26  ;;  %8148 = vmatmul.mubr.msk.f32.gmra.mrb[14].mxu0 %vm475_vm1, %v12118_v3  ;;  %v12125_v26 = vld [vmem:[#allocation40_spill] sm:$0xff]  ;;  %v12126_v3 = vld [vmem:[#allocation99_spill] sm:$0xff] }
 0x132   : > { %7697 = vmatprep.mubr.msk.f32.mxu1 %vm475_vm1, %v12119_v27  ;;  %8150 = vmatprep.mubr.msk.f32.mxu0 %vm475_vm1, %v12120_v40  ;;  %v12127_v27 = vld [vmem:[#allocation42_spill] sm:$0xff]  ;;  %v12128_v40 = vld [vmem:[#allocation100_spill] sm:$0xff] }
 0x135   : > { %7698 = vmatmul.mubr.msk.f32.gmra.mrb[14].mxu1 %vm475_vm1, %v12121_v33  ;;  %8151 = vmatmul.mubr.msk.f32.gmra.mrb[16].mxu0 %vm475_vm1, %v12122_v2  ;;  %v12129_v2 = vld [vmem:[#allocation47_spill] sm:$0xff]  ;;  %v12135_v33 = vld [vmem:[#allocation57_spill] sm:$0xff] }
 0x136   : > { %7700 = vmatprep.mubr.msk.f32.mxu1 %vm475_vm1, %v12123_v20  ;;  %8153 = vmatprep.mubr.msk.f32.mxu0 %vm475_vm1, %v12124_v43  ;;  %v12130_v20 = vld [vmem:[#allocation32_spill] sm:$0xff]  ;;  %v12131_v43 = vld [vmem:[#allocation49_spill] sm:$0xff] }
 0x139   : > { %7701 = vmatmul.mubr.msk.f32.gmra.mrb[16].mxu1 %vm475_vm1, %v12125_v26  ;;  %8154 = vmatmul.mubr.msk.f32.gmra.mrb[18].mxu0 %vm475_vm1, %v12126_v3  ;;  %v12132_v26 = vld [vmem:[#allocation102_spill] sm:$0xff]  ;;  %v12133_v3 = vld [vmem:[#allocation55_spill] sm:$0xff] }
 0x13a   : > { %7703 = vmatprep.mubr.msk.f32.mxu1 %vm475_vm1, %v12127_v27  ;;  %8156 = vmatprep.mubr.msk.f32.mxu0 %vm475_vm1, %v12128_v40  ;;  %v12134_v27 = vld [vmem:[#allocation38_spill] sm:$0xff]  ;;  %v12136_v40 = vld [vmem:[#allocation104_spill] sm:$0xff] }
 0x13d   : > { %7704 = vmatmul.mubr.msk.f32.gmra.mrb[18].mxu1 %vm475_vm1, %v12129_v2  ;;  %8157 = vmatmul.mubr.msk.f32.gmra.mrb[20].mxu0 %vm475_vm1, %v12130_v20  ;;  %v12137_v2 = vld [vmem:[#allocation62_spill] sm:$0xff]  ;;  %v10758_v20 = vld [vmem:[%s9067_s13 + $0x190] sm:$0x3] }
 0x13e   : > { %7706 = vmatprep.mubr.msk.f32.mxu1 %vm475_vm1, %v12131_v43  ;;  %8159 = vmatprep.mubr.msk.f32.mxu0 %vm475_vm1, %v12132_v26  ;;  %v12138_v43 = vld [vmem:[#allocation39_spill] sm:$0xff]  ;;  %v12139_v26 = vld [vmem:[#allocation64_spill] sm:$0xff] }
 0x141   : > { %7707 = vmatmul.mubr.msk.f32.gmra.mrb[20].mxu1 %vm475_vm1, %v12133_v3  ;;  %8160 = vmatmul.mubr.msk.f32.gmra.mrb[22].mxu0 %vm475_vm1, %v12134_v27  ;;  %v12140_v3 = vld [vmem:[#allocation45_spill] sm:$0xff]  ;;  %v4586_v27 = vrot.slane %v10606_v14, 1 }
 0x142   : > { %7709 = vmatprep.mubr.msk.f32.mxu1 %vm475_vm1, %v12135_v33  ;;  %8162 = vmatprep.mubr.msk.f32.mxu0 %vm475_vm1, %v12136_v40  ;;  %v4587_v33 = vrot.slane %v10617_v15, 1  ;;  %v12141_v40 = vld [vmem:[#allocation69_spill] sm:$0xff] }
 0x144   : > { %v10772_v63 = vsel %vm394_vm2, %v4586_v27, %v4587_v33  ;;  %v1736_v27 = vrot.slane %v10775_v6, 1 }
 0x145   : > { %7710 = vmatmul.mubr.msk.f32.gmra.mrb[22].mxu1 %vm475_vm1, %v12137_v2  ;;  %8163 = vmatmul.mubr.msk.f32.gmra.mrb[24].mxu0 %vm475_vm1, %v12138_v43  ;;  %v12143_v2 = vld [vmem:[#allocation71_spill] sm:$0xff]  ;;  %v12144_v43 = vld [vmem:[#allocation52_spill] sm:$0xff] }
 0x146   : > { %7712 = vmatprep.mubr.msk.f32.mxu1 %vm475_vm1, %v12139_v26  ;;  %8165 = vmatprep.mubr.msk.f32.mxu0 %vm475_vm1, %v12140_v3  ;;  %v4589_v3 = vrot.slane %v10758_v20, 1  ;;  %v1733_v26 = vrot.slane %v10620_v51, 1 }
 0x148   : > { %v10790_v42 = vsel %vm394_vm2, %v1733_v26, %v1734_v7  ;;  %v12155_v26 = vld [vmem:[#allocation6_spill] sm:$0xff] }
 0x149   : > { %7713 = vmatmul.mubr.msk.f32.gmra.mrb[24].mxu1 %vm475_vm1, %v12141_v40  ;;  %8166 = vmatmul.mubr.msk.f32.gmra.mrb[26].mxu0 %vm475_vm1, %v12142_v16  ;;  %v12145_v40 = vld [vmem:[#allocation74_spill] sm:$0xff]  ;;  %v12146_v16 = vld [vmem:[#allocation53_spill] sm:$0xff] }
 0x14a   : > { %7715 = vmatprep.mubr.msk.f32.mxu1 %vm475_vm1, %v12143_v2  ;;  %8168 = vmatprep.mubr.msk.f32.mxu0 %vm475_vm1, %v12144_v43  ;;  %v12147_v2 = vld [vmem:[#allocation76_spill] sm:$0xff]  ;;  %v10786_v43 = vsel %vm394_vm2, %v4587_v33, %v4589_v3  ;;  %v10810_v33 = vld [vmem:[%s11584_s3 + $0xe] sm:$0x3]  ;;  %v12156_v3 = vld [vmem:[#allocation10_spill] sm:$0xff] }
 0x14d   : > { %7716 = vmatmul.mubr.msk.f32.gmra.mrb[26].mxu1 %vm475_vm1, %v12145_v40  ;;  %8169 = vmatmul.mubr.msk.f32.gmra.mrb[28].mxu0 %vm475_vm1, %v12146_v16 }
 0x14e   : > { %7718 = vmatprep.mubr.msk.f32.mxu1 %vm475_vm1, %v12147_v2  ;;  %8171 = vmatprep.mubr.msk.f32.mxu0 %vm475_vm1, %v10772_v63  ;;  %v10799_v2 = vsel %vm394_vm2, %v1734_v7, %v1736_v27  ;;  %v12153_v7 = vld [vmem:[#allocation54_spill] sm:$0xff]  ;;  %v12157_v27 = vld [vmem:[#allocation13_spill] sm:$0xff] }
 0x151   : > { %7719 = vmatmul.mubr.msk.f32.gmra.mrb[28].mxu1 %vm475_vm1, %v12148_v12  ;;  %8172 = vmatmul.mubr.msk.f32.gmra.mrb[30].mxu0 %vm475_vm1, %v10786_v43 }
 0x152   : > { %7721 = vmatprep.mubr.msk.f32.mxu1 %vm475_vm1, %v10790_v42  ;;  %8176 = vmatprep.mubr.msk.f32.mxu0 %vm475_vm1, %v9946_v30  ;;  %v10821_v30 = vld [vmem:[%s11583_s2 + $0xe] sm:$0x3] }
 0x155   : > { %7722 = vmatmul.mubr.msk.f32.gmra.mrb[30].mxu1 %vm475_vm1, %v10799_v2  ;;  %8177 = vmatmul.mubr.msk.f32.vlgmr.msra.gmra.mrb[0].mxu0 %vm475_vm1, %v9965_v23  ;;  %v12149_v23 = vld [vmem:[#allocation3_spill] sm:$0xff] }
 0x156   : > { %7726 = vmatprep.mubr.msk.f32.mxu1 %vm475_vm1, %v9968_v35  ;;  %8179 = vmatprep.mubr.msk.f32.mxu0 %vm475_vm1, %v9978_v48  ;;  %v12150_v35 = vld [vmem:[#allocation2_spill] sm:$0xff] }
 0x157   : > { %8225 = vmatpush3.msk.msra.mxu0 %vm540_vm0, %v10640_v39  ;;  %v12152_v39 = vld [vmem:[#allocation68_spill] sm:$0xff] }
 0x158   : > { %8274 = vmatprep.subr.msk.mxu0 %vm540_vm0, %v10810_v33 }
 0x159   : > { %7727 = vmatmul.mubr.msk.f32.vlgmr.msra.gmra.mrb[0].mxu1 %vm475_vm1, %v9997_v47  ;;  %8180 = vmatmul.mubr.msk.f32.gmra.mrb[2].mxu0 %vm475_vm1, %v10000_v5  ;;  %v12151_v47 = vld [vmem:[#allocation4_spill] sm:$0xff] }
 0x15a   : > { %7775 = vmatpush3.msk.msra.mxu1 %vm540_vm0, %v10651_v29  ;;  %7729 = vmatprep.mubr.msk.f32.mxu1 %vm475_vm1, %v10007_v46  ;;  %v12154_v29 = vld [vmem:[#allocation5_spill] sm:$0xff] }
 0x15b   : > { %8182 = vmatprep.mubr.msk.f32.mxu0 %vm475_vm1, %v10010_v21  ;;  %7824 = vmatprep.subr.msk.mxu1 %vm540_vm0, %v10821_v30 }
 0x15d   : > { %7730 = vmatmul.mubr.msk.f32.gmra.mrb[2].mxu1 %vm475_vm1, %v10021_v37  ;;  %8183 = vmatmul.mubr.msk.f32.gmra.mrb[4].mxu0 %vm475_vm1, %v10024_v38 }
 0x15e   : > { %7732 = vmatprep.mubr.msk.f32.mxu1 %vm475_vm1, %v10031_v50  ;;  %8185 = vmatprep.mubr.msk.f32.mxu0 %vm475_vm1, %v10037_v53 }
 0x161   : > { %7733 = vmatmul.mubr.msk.f32.gmra.mrb[4].mxu1 %vm475_vm1, %v10051_v44  ;;  %8186 = vmatmul.mubr.msk.f32.gmra.mrb[6].mxu0 %vm475_vm1, %v10056_v45 }
 0x162   : > { %7735 = vmatprep.mubr.msk.f32.mxu1 %vm475_vm1, %v10061_v19  ;;  %8188 = vmatprep.mubr.msk.f32.mxu0 %vm475_vm1, %v10064_v11 }
 0x165   : > { %7736 = vmatmul.mubr.msk.f32.gmra.mrb[6].mxu1 %vm475_vm1, %v10073_v54  ;;  %8189 = vmatmul.mubr.msk.f32.gmra.mrb[8].mxu0 %vm475_vm1, %v10076_v55 }
 0x166   : > { %7738 = vmatprep.mubr.msk.f32.mxu1 %vm475_vm1, %v10083_v13  ;;  %8191 = vmatprep.mubr.msk.f32.mxu0 %vm475_vm1, %v10089_v57 }
 0x169   : > { %7739 = vmatmul.mubr.msk.f32.gmra.mrb[8].mxu1 %vm475_vm1, %v10103_v0  ;;  %8192 = vmatmul.mubr.msk.f32.gmra.mrb[10].mxu0 %vm475_vm1, %v10108_v1 }
 0x16a   : > { %7741 = vmatprep.mubr.msk.f32.mxu1 %vm475_vm1, %v10113_v4  ;;  %8194 = vmatprep.mubr.msk.f32.mxu0 %vm475_vm1, %v10116_v22 }
 0x16d   : > { %7742 = vmatmul.mubr.msk.f32.gmra.mrb[10].mxu1 %vm475_vm1, %v10125_v24  ;;  %8195 = vmatmul.mubr.msk.f32.gmra.mrb[12].mxu0 %vm475_vm1, %v10128_v25 }
 0x16e   : > { %7744 = vmatprep.mubr.msk.f32.mxu1 %vm475_vm1, %v10135_v8  ;;  %8197 = vmatprep.mubr.msk.f32.mxu0 %vm475_vm1, %v10141_v62 }
 0x171   : > { %7745 = vmatmul.mubr.msk.f32.gmra.mrb[12].mxu1 %vm475_vm1, %v10155_v52  ;;  %8198 = vmatmul.mubr.msk.f32.gmra.mrb[14].mxu0 %vm475_vm1, %v12149_v23 }
 0x172   : > { %7747 = vmatprep.mubr.msk.f32.mxu1 %vm475_vm1, %v12150_v35  ;;  %8200 = vmatprep.mubr.msk.f32.mxu0 %vm475_vm1, %v12151_v47  ;;  %v12158_v35 = vld [vmem:[#allocation21_spill] sm:$0xff]  ;;  %v12159_v47 = vld [vmem:[#allocation16_spill] sm:$0xff] }
 0x175   : > { %7748 = vmatmul.mubr.msk.f32.gmra.mrb[14].mxu1 %vm475_vm1, %v12152_v39  ;;  %8201 = vmatmul.mubr.msk.f32.gmra.mrb[16].mxu0 %vm475_vm1, %v12153_v7  ;;  %v12160_v39 = vld [vmem:[#allocation25_spill] sm:$0xff]  ;;  %v12161_v7 = vld [vmem:[#allocation19_spill] sm:$0xff] }
 0x176   : > { %7750 = vmatprep.mubr.msk.f32.mxu1 %vm475_vm1, %v12154_v29  ;;  %8203 = vmatprep.mubr.msk.f32.mxu0 %vm475_vm1, %v12155_v26  ;;  %v12162_v29 = vld [vmem:[#allocation29_spill] sm:$0xff]  ;;  %v12163_v26 = vld [vmem:[#allocation23_spill] sm:$0xff] }
 0x179   : > { %7751 = vmatmul.mubr.msk.f32.gmra.mrb[16].mxu1 %vm475_vm1, %v12156_v3  ;;  %8204 = vmatmul.mubr.msk.f32.gmra.mrb[18].mxu0 %vm475_vm1, %v12157_v27  ;;  %v12164_v3 = vld [vmem:[#allocation35_spill] sm:$0xff] }
 0x17a   : > { %7753 = vmatprep.mubr.msk.f32.mxu1 %vm475_vm1, %v12158_v35  ;;  %8206 = vmatprep.mubr.msk.f32.mxu0 %vm475_vm1, %v12159_v47  ;;  %v12165_v27 = vld [vmem:[#allocation27_spill] sm:$0xff]  ;;  %v12166_v35 = vld [vmem:[#allocation41_spill] sm:$0xff] }
 0x17b   : > { %v12167_v47 = vld [vmem:[#allocation31_spill] sm:$0xff] }
 0x17d   : > { %7754 = vmatmul.mubr.msk.f32.gmra.mrb[18].mxu1 %vm475_vm1, %v12160_v39  ;;  %8207 = vmatmul.mubr.msk.f32.gmra.mrb[20].mxu0 %vm475_vm1, %v12161_v7  ;;  %v12168_v39 = vld [vmem:[#allocation95_spill] sm:$0xff]  ;;  %v12169_v7 = vld [vmem:[#allocation33_spill] sm:$0xff] }
 0x17e   : > { %7756 = vmatprep.mubr.msk.f32.mxu1 %vm475_vm1, %v12162_v29  ;;  %8209 = vmatprep.mubr.msk.f32.mxu0 %vm475_vm1, %v12163_v26  ;;  %v12170_v29 = vld [vmem:[#allocation43_spill] sm:$0xff] }
 0x181   : > { %7757 = vmatmul.mubr.msk.f32.gmra.mrb[20].mxu1 %vm475_vm1, %v12164_v3  ;;  %8210 = vmatmul.mubr.msk.f32.gmra.mrb[22].mxu0 %vm475_vm1, %v12165_v27  ;;  %v4855_v27 = vrot.slane %v10606_v14, 2  ;;  %v4856_v3 = vrot.slane %v10617_v15, 2 }
 0x182   : > { %7759 = vmatprep.mubr.msk.f32.mxu1 %vm475_vm1, %v12166_v35  ;;  %8212 = vmatprep.mubr.msk.f32.mxu0 %vm475_vm1, %v12167_v47 }
 0x185   : > { %7760 = vmatmul.mubr.msk.f32.gmra.mrb[22].mxu1 %vm475_vm1, %v12168_v39  ;;  %8213 = vmatmul.mubr.msk.f32.gmra.mrb[24].mxu0 %vm475_vm1, %v12169_v7  ;;  %v2003_v7 = vrot.slane %v10629_v58, 2  ;;  %v10939_v39 = vsel %vm1061_vm3, %v4855_v27, %v4856_v3 }
 0x186   : > { %7762 = vmatprep.mubr.msk.f32.mxu1 %vm475_vm1, %v12170_v29  ;;  %8215 = vmatprep.mubr.msk.f32.mxu0 %vm475_vm1, %v10297_v49  ;;  %v4858_v29 = vrot.slane %v10758_v20, 2  ;;  %v2002_v49 = vrot.slane %v10620_v51, 2 }
 0x188   : > { %v10950_v20 = vsel %vm1061_vm3, %v4856_v3, %v4858_v29  ;;  %v10954_v27 = vsel %vm1061_vm3, %v2002_v49, %v2003_v7  ;;  %v10974_v49 = vld [vmem:[%s11584_s3 + $0x10] sm:$0x3]  ;;  %v12177_v29 = vld [vmem:[#allocation51_spill] sm:$0xff] }
 0x189   : > { %7763 = vmatmul.mubr.msk.f32.gmra.mrb[24].mxu1 %vm475_vm1, %v10309_v10  ;;  %8216 = vmatmul.mubr.msk.f32.gmra.mrb[26].mxu0 %vm475_vm1, %v10314_v32  ;;  %v12178_v3 = vld [vmem:[#allocation103_spill] sm:$0xff] }
 0x18a   : > { %7765 = vmatprep.mubr.msk.f32.mxu1 %vm475_vm1, %v10319_v31  ;;  %8218 = vmatprep.mubr.msk.f32.mxu0 %vm475_vm1, %v10322_v60  ;;  %v2005_v60 = vrot.slane %v10775_v6, 2  ;;  %v12171_v6 = vld [vmem:[#allocation50_spill] sm:$0xff] }
 0x18d   : > { %7766 = vmatmul.mubr.msk.f32.gmra.mrb[26].mxu1 %vm475_vm1, %v10333_v36  ;;  %8219 = vmatmul.mubr.msk.f32.gmra.mrb[28].mxu0 %vm475_vm1, %v10338_v34 }
 0x18e   : > { %7768 = vmatprep.mubr.msk.f32.mxu1 %vm475_vm1, %v10342_v28  ;;  %8221 = vmatprep.mubr.msk.f32.mxu0 %vm475_vm1, %v10939_v39  ;;  %v10963_v28 = vsel %vm1061_vm3, %v2003_v7, %v2005_v60  ;;  %v10985_v60 = vld [vmem:[%s11583_s2 + $0x10] sm:$0x3]  ;;  %v12176_v7 = vld [vmem:[#allocation63_spill] sm:$0xff] }
 0x191   : > { %7769 = vmatmul.mubr.msk.f32.gmra.mrb[28].mxu1 %vm475_vm1, %v10351_v18  ;;  %8222 = vmatmul.mubr.msk.f32.gmra.mrb[30].mxu0 %vm475_vm1, %v10950_v20 }
 0x192   : > { %7771 = vmatprep.mubr.msk.f32.mxu1 %vm475_vm1, %v10954_v27  ;;  %8226 = vmatprep.mubr.msk.f32.mxu0 %vm475_vm1, %v10367_v59  ;;  %v12172_v59 = vld [vmem:[#allocation56_spill] sm:$0xff] }
 0x195   : > { %7772 = vmatmul.mubr.msk.f32.gmra.mrb[30].mxu1 %vm475_vm1, %v10963_v28  ;;  %8227 = vmatmul.mubr.msk.f32.vlgmr.msra.gmra.mrb[0].mxu0 %vm475_vm1, %v10383_v9  ;;  %v12173_v9 = vld [vmem:[#allocation44_spill] sm:$0xff] }
 0x196   : > { %7776 = vmatprep.mubr.msk.f32.mxu1 %vm475_vm1, %v10390_v17  ;;  %8229 = vmatprep.mubr.msk.f32.mxu0 %vm475_vm1, %v12171_v6  ;;  %v12174_v17 = vld [vmem:[#allocation101_spill] sm:$0xff] }
 0x197   : > { %8275 = vmatpush3.msk.msra.mxu0 %vm540_vm0, %v10810_v33  ;;  %v12175_v33 = vld [vmem:[#allocation58_spill] sm:$0xff]  ;;  %v12179_v6 = vld [vmem:[#allocation65_spill] sm:$0xff] }
 0x198   : > { %8324 = vmatprep.subr.msk.mxu0 %vm540_vm0, %v10974_v49 }
 0x199   : > { %7777 = vmatmul.mubr.msk.f32.vlgmr.msra.gmra.mrb[0].mxu1 %vm475_vm1, %v12172_v59  ;;  %8230 = vmatmul.mubr.msk.f32.gmra.mrb[2].mxu0 %vm475_vm1, %v12173_v9  ;;  %v12181_v59 = vld [vmem:[#allocation59_spill] sm:$0xff]  ;;  %v12182_v9 = vld [vmem:[#allocation105_spill] sm:$0xff] }
 0x19a   : > { %7825 = vmatpush3.msk.msra.mxu1 %vm540_vm0, %v10821_v30  ;;  %7779 = vmatprep.mubr.msk.f32.mxu1 %vm475_vm1, %v12174_v17  ;;  %v12180_v30 = vld [vmem:[#allocation70_spill] sm:$0xff]  ;;  %v12183_v17 = vld [vmem:[#allocation60_spill] sm:$0xff] }
 0x19b   : > { %8232 = vmatprep.mubr.msk.f32.mxu0 %vm475_vm1, %v12175_v33  ;;  %7874 = vmatprep.subr.msk.mxu1 %vm540_vm0, %v10985_v60  ;;  %v12184_v33 = vld [vmem:[#allocation61_spill] sm:$0xff] }
 0x19d   : > { %7780 = vmatmul.mubr.msk.f32.gmra.mrb[2].mxu1 %vm475_vm1, %v12176_v7  ;;  %8233 = vmatmul.mubr.msk.f32.gmra.mrb[4].mxu0 %vm475_vm1, %v12177_v29  ;;  %v12185_v7 = vld [vmem:[#allocation72_spill] sm:$0xff]  ;;  %v12186_v29 = vld [vmem:[#allocation75_spill] sm:$0xff] }
 0x19e   : > { %7782 = vmatprep.mubr.msk.f32.mxu1 %vm475_vm1, %v12178_v3  ;;  %8235 = vmatprep.mubr.msk.f32.mxu0 %vm475_vm1, %v12179_v6  ;;  %v12187_v3 = vld [vmem:[#allocation66_spill] sm:$0xff] }
 0x19f   : > { %v12188_v6 = vld [vmem:[#allocation106_spill] sm:$0xff] }
 0x1a1   : > { %7783 = vmatmul.mubr.msk.f32.gmra.mrb[4].mxu1 %vm475_vm1, %v12180_v30  ;;  %8236 = vmatmul.mubr.msk.f32.gmra.mrb[6].mxu0 %vm475_vm1, %v12181_v59  ;;  %v12189_v30 = vld [vmem:[#allocation67_spill] sm:$0xff]  ;;  %v12190_v59 = vld [vmem:[#allocation73_spill] sm:$0xff] }
 0x1a2   : > { %7785 = vmatprep.mubr.msk.f32.mxu1 %vm475_vm1, %v12182_v9  ;;  %8238 = vmatprep.mubr.msk.f32.mxu0 %vm475_vm1, %v12183_v17  ;;  %v12191_v9 = vld [vmem:[#allocation107_spill] sm:$0xff]  ;;  %v12192_v17 = vld [vmem:[#allocation108_spill] sm:$0xff] }
 0x1a5   : > { %7786 = vmatmul.mubr.msk.f32.gmra.mrb[6].mxu1 %vm475_vm1, %v12184_v33  ;;  %8239 = vmatmul.mubr.msk.f32.gmra.mrb[8].mxu0 %vm475_vm1, %v12185_v7  ;;  %v12193_v33 = vld [vmem:[#allocation109_spill] sm:$0xff]  ;;  %v12194_v7 = vld [vmem:[#allocation110_spill] sm:$0xff] }
 0x1a6   : > { %7788 = vmatprep.mubr.msk.f32.mxu1 %vm475_vm1, %v12186_v29  ;;  %8241 = vmatprep.mubr.msk.f32.mxu0 %vm475_vm1, %v12187_v3  ;;  %v12195_v29 = vld [vmem:[#allocation111_spill] sm:$0xff]  ;;  %v12196_v3 = vld [vmem:[#allocation112_spill] sm:$0xff] }
 0x1a9   : > { %7789 = vmatmul.mubr.msk.f32.gmra.mrb[8].mxu1 %vm475_vm1, %v12188_v6  ;;  %8242 = vmatmul.mubr.msk.f32.gmra.mrb[10].mxu0 %vm475_vm1, %v12189_v30  ;;  %v12197_v6 = vld [vmem:[#allocation113_spill] sm:$0xff]  ;;  %v12198_v30 = vld [vmem:[#allocation114_spill] sm:$0xff] }
 0x1aa   : > { %7791 = vmatprep.mubr.msk.f32.mxu1 %vm475_vm1, %v12190_v59  ;;  %8244 = vmatprep.mubr.msk.f32.mxu0 %vm475_vm1, %v12191_v9  ;;  %v12199_v59 = vld [vmem:[#allocation115_spill] sm:$0xff]  ;;  %v12200_v9 = vld [vmem:[#allocation116_spill] sm:$0xff] }
 0x1ad   : > { %7792 = vmatmul.mubr.msk.f32.gmra.mrb[10].mxu1 %vm475_vm1, %v12192_v17  ;;  %8245 = vmatmul.mubr.msk.f32.gmra.mrb[12].mxu0 %vm475_vm1, %v12193_v33  ;;  %v8971_v17 = vld [vmem:[%s9067_s13 + $0x108] sm:$0xff]  ;;  %v12201_v33 = vld [vmem:[#allocation117_spill] sm:$0xff] }
 0x1ae   : > { %7794 = vmatprep.mubr.msk.f32.mxu1 %vm475_vm1, %v12194_v7  ;;  %8247 = vmatprep.mubr.msk.f32.mxu0 %vm475_vm1, %v12195_v29  ;;  %v12202_v7 = vld [vmem:[#allocation118_spill] sm:$0xff]  ;;  %v8974_v29 = vld [vmem:[%s9067_s13 + $0x128] sm:$0xff] }
 0x1b1   : > { %7795 = vmatmul.mubr.msk.f32.gmra.mrb[12].mxu1 %vm475_vm1, %v12196_v3  ;;  %8248 = vmatmul.mubr.msk.f32.gmra.mrb[14].mxu0 %vm475_vm1, %v12197_v6  ;;  %v8975_v3 = vld [vmem:[%s9067_s13 + $0x138] sm:$0xff]  ;;  %v12204_v6 = vld [vmem:[#allocation120_spill] sm:$0xff] }
 0x1b2   : > { %7797 = vmatprep.mubr.msk.f32.mxu1 %vm475_vm1, %v10532_v61  ;;  %8250 = vmatprep.mubr.msk.f32.mxu0 %vm475_vm1, %v12198_v30  ;;  %v8972_v61 = vld [vmem:[%s9067_s13 + $0x110] sm:$0xff]  ;;  %v8976_v30 = vld [vmem:[%s9067_s13 + $0x140] sm:$0xff] }
 0x1b5   : > { %7798 = vmatmul.mubr.msk.f32.gmra.mrb[14].mxu1 %vm475_vm1, %v12199_v59  ;;  %8251 = vmatmul.mubr.msk.f32.gmra.mrb[16].mxu0 %vm475_vm1, %v10547_v56  ;;  %v8973_v56 = vld [vmem:[%s9067_s13 + $0x120] sm:$0xff]  ;;  %v8977_v59 = vld [vmem:[%s9062_s10 + $0x138] sm:$0xff] }
 0x1b6   : > { %7800 = vmatprep.mubr.msk.f32.mxu1 %vm475_vm1, %v12200_v9  ;;  %8253 = vmatprep.mubr.msk.f32.mxu0 %vm475_vm1, %v8971_v17  ;;  %v8978_v9 = vld [vmem:[%s9067_s13 + $0x150] sm:$0xff]  ;;  %v8979_v17 = vld [vmem:[%s9062_s10 + $0x140] sm:$0xff] }
 0x1b9   : > { %7801 = vmatmul.mubr.msk.f32.gmra.mrb[16].mxu1 %vm475_vm1, %v10559_v41  ;;  %8254 = vmatmul.mubr.msk.f32.gmra.mrb[18].mxu0 %vm475_vm1, %v8972_v61  ;;  %v12203_v41 = vld [vmem:[#allocation119_spill] sm:$0xff]  ;;  %v8980_v61 = vld [vmem:[%s9067_s13 + $0x158] sm:$0xff] }
 0x1ba   : > { %7803 = vmatprep.mubr.msk.f32.mxu1 %vm475_vm1, %v12201_v33  ;;  %8256 = vmatprep.mubr.msk.f32.mxu0 %vm475_vm1, %v8973_v56  ;;  %v8981_v33 = vld [vmem:[%s9062_s10 + $0x150] sm:$0xff]  ;;  %v8982_v56 = vld [vmem:[%s9067_s13 + $0x168] sm:$0xff] }
 0x1bd   : > { %7804 = vmatmul.mubr.msk.f32.gmra.mrb[18].mxu1 %vm475_vm1, %v12202_v7  ;;  %8257 = vmatmul.mubr.msk.f32.gmra.mrb[20].mxu0 %vm475_vm1, %v8974_v29  ;;  %v8983_v7 = vld [vmem:[%s9062_s10 + $0x158] sm:$0xff]  ;;  %v8984_v29 = vld [vmem:[%s9067_s13 + $0x170] sm:$0xff] }
 0x1be   : > { %7806 = vmatprep.mubr.msk.f32.mxu1 %vm475_vm1, %v12203_v41  ;;  %8259 = vmatprep.mubr.msk.f32.mxu0 %vm475_vm1, %v8975_v3  ;;  %v8985_v41 = vld [vmem:[%s9062_s10 + $0x168] sm:$0xff]  ;;  %v11098_v3 = vld [vmem:[%s9067_s13 + $0x198] sm:$0xff] }
 0x1c1   : > { %7807 = vmatmul.mubr.msk.f32.gmra.mrb[20].mxu1 %vm475_vm1, %v12204_v6  ;;  %8260 = vmatmul.mubr.msk.f32.gmra.mrb[22].mxu0 %vm475_vm1, %v8976_v30  ;;  %v8986_v6 = vld [vmem:[%s9062_s10 + $0x170] sm:$0xff]  ;;  %v11109_v30 = vld [vmem:[%s9067_s13 + $0x1a0] sm:$0xff] }
 0x1c2   : > { %7809 = vmatprep.mubr.msk.f32.mxu1 %vm475_vm1, %v8977_v59  ;;  %8262 = vmatprep.mubr.msk.f32.mxu0 %vm475_vm1, %v8978_v9  ;;  %v11112_v59 = vld [vmem:[%s9062_s10 + $0x198] sm:$0xff] }
 0x1c3   : > { %v12207_v9 = vld [vmem:[#allocation9_spill] sm:$0xff] }
 0x1c5   : > { %7810 = vmatmul.mubr.msk.f32.gmra.mrb[22].mxu1 %vm475_vm1, %v8979_v17  ;;  %8263 = vmatmul.mubr.msk.f32.gmra.mrb[24].mxu0 %vm475_vm1, %v8980_v61  ;;  %v12209_v17 = vld [vmem:[#allocation11_spill] sm:$0xff] }
 0x1c6   : > { %7812 = vmatprep.mubr.msk.f32.mxu1 %vm475_vm1, %v8981_v33  ;;  %8265 = vmatprep.mubr.msk.f32.mxu0 %vm475_vm1, %v8982_v56  ;;  %v12210_v61 = vld [vmem:[#allocation83_spill] sm:$0xff]  ;;  %v12211_v33 = vld [vmem:[#allocation12_spill] sm:$0xff] }
 0x1c7   : > { %v12212_v56 = vld [vmem:[#allocation84_spill] sm:$0xff] }
 0x1c9   : > { %7813 = vmatmul.mubr.msk.f32.gmra.mrb[24].mxu1 %vm475_vm1, %v8983_v7  ;;  %8266 = vmatmul.mubr.msk.f32.gmra.mrb[26].mxu0 %vm475_vm1, %v8984_v29  ;;  %v12213_v7 = vld [vmem:[#allocation14_spill] sm:$0xff]  ;;  %v12214_v29 = vld [vmem:[#allocation85_spill] sm:$0xff] }
 0x1ca   : > { %7815 = vmatprep.mubr.msk.f32.mxu1 %vm475_vm1, %v8985_v41  ;;  %8268 = vmatprep.mubr.msk.f32.mxu0 %vm475_vm1, %v10606_v14  ;;  %v11121_v14 = vld [vmem:[%s9062_s10 + $0x1a0] sm:$0xff] }
 0x1cb   : > { %v12216_v41 = vld [vmem:[#allocation86_spill] sm:$0xff] }
 0x1cd   : > { %7816 = vmatmul.mubr.msk.f32.gmra.mrb[26].mxu1 %vm475_vm1, %v8986_v6  ;;  %8269 = vmatmul.mubr.msk.f32.gmra.mrb[28].mxu0 %vm475_vm1, %v10617_v15  ;;  %v12205_v15 = vld [vmem:[#allocation80_spill] sm:$0xff]  ;;  %v12217_v6 = vld [vmem:[#allocation17_spill] sm:$0xff] }
 0x1ce   : > { %7818 = vmatprep.mubr.msk.f32.mxu1 %vm475_vm1, %v10620_v51  ;;  %8271 = vmatprep.mubr.msk.f32.mxu0 %vm475_vm1, %v11098_v3  ;;  %v12206_v51 = vld [vmem:[#allocation81_spill] sm:$0xff] }
 0x1d1   : > { %7819 = vmatmul.mubr.msk.f32.gmra.mrb[28].mxu1 %vm475_vm1, %v10629_v58  ;;  %8272 = vmatmul.mubr.msk.f32.gmra.mrb[30].mxu0 %vm475_vm1, %v11109_v30  ;;  %v12208_v58 = vld [vmem:[#allocation82_spill] sm:$0xff] }
 0x1d2   : > { %7821 = vmatprep.mubr.msk.f32.mxu1 %vm475_vm1, %v11112_v59  ;;  %8276 = vmatprep.mubr.msk.f32.mxu0 %vm475_vm1, %v12205_v15  ;;  %v12219_v15 = vld [vmem:[#allocation18_spill] sm:$0xff] }
 0x1d5   : > { %7822 = vmatmul.mubr.msk.f32.gmra.mrb[30].mxu1 %vm475_vm1, %v11121_v14  ;;  %8277 = vmatmul.mubr.msk.f32.vlgmr.msra.gmra.mrb[0].mxu0 %vm475_vm1, %v12206_v51  ;;  %v12220_v51 = vld [vmem:[#allocation88_spill] sm:$0xff] }
 0x1d6   : > { %7826 = vmatprep.mubr.msk.f32.mxu1 %vm475_vm1, %v12207_v9  ;;  %8279 = vmatprep.mubr.msk.f32.mxu0 %vm475_vm1, %v12208_v58  ;;  %v12221_v9 = vld [vmem:[#allocation20_spill] sm:$0xff]  ;;  %v12222_v58 = vld [vmem:[#allocation89_spill] sm:$0xff] }
 0x1d7   : > { %8325 = vmatpush3.msk.msra.mxu0 %vm540_vm0, %v10974_v49  ;;  %v12215_v49 = vld [vmem:[#allocation15_spill] sm:$0xff] }
 0x1d9   : > { %7827 = vmatmul.mubr.msk.f32.vlgmr.msra.gmra.mrb[0].mxu1 %vm475_vm1, %v12209_v17  ;;  %8280 = vmatmul.mubr.msk.f32.gmra.mrb[2].mxu0 %vm475_vm1, %v12210_v61  ;;  %v12223_v17 = vld [vmem:[#allocation22_spill] sm:$0xff] }
 0x1da   : > { %7875 = vmatpush3.msk.msra.mxu1 %vm540_vm0, %v10985_v60  ;;  %7829 = vmatprep.mubr.msk.f32.mxu1 %vm475_vm1, %v12211_v33  ;;  %v12218_v60 = vld [vmem:[#allocation87_spill] sm:$0xff]  ;;  %v12224_v61 = vld [vmem:[#allocation90_spill] sm:$0xff]  ;;  %v12225_v33 = vld [vmem:[#allocation24_spill] sm:$0xff] }
 0x1db   : > { %8282 = vmatprep.mubr.msk.f32.mxu0 %vm475_vm1, %v12212_v56  ;;  %v12226_v56 = vld [vmem:[#allocation91_spill] sm:$0xff] }
 0x1dd   : > { %7830 = vmatmul.mubr.msk.f32.gmra.mrb[2].mxu1 %vm475_vm1, %v12213_v7  ;;  %8283 = vmatmul.mubr.msk.f32.gmra.mrb[4].mxu0 %vm475_vm1, %v12214_v29  ;;  %v12227_v7 = vld [vmem:[#allocation26_spill] sm:$0xff]  ;;  %v12228_v29 = vld [vmem:[#allocation92_spill] sm:$0xff] }
 0x1de   : > { %7832 = vmatprep.mubr.msk.f32.mxu1 %vm475_vm1, %v12215_v49  ;;  %8285 = vmatprep.mubr.msk.f32.mxu0 %vm475_vm1, %v12216_v41  ;;  %v12229_v49 = vld [vmem:[#allocation28_spill] sm:$0xff]  ;;  %v12230_v41 = vld [vmem:[#allocation93_spill] sm:$0xff] }
 0x1e1   : > { %7833 = vmatmul.mubr.msk.f32.gmra.mrb[4].mxu1 %vm475_vm1, %v12217_v6  ;;  %8286 = vmatmul.mubr.msk.f32.gmra.mrb[6].mxu0 %vm475_vm1, %v12218_v60  ;;  %v12231_v6 = vld [vmem:[#allocation30_spill] sm:$0xff] }
 0x1e2   : > { %7835 = vmatprep.mubr.msk.f32.mxu1 %vm475_vm1, %v12219_v15  ;;  %8288 = vmatprep.mubr.msk.f32.mxu0 %vm475_vm1, %v12220_v51  ;;  %v12232_v60 = vld [vmem:[#allocation94_spill] sm:$0xff]  ;;  %v12234_v51 = vld [vmem:[#allocation96_spill] sm:$0xff] }
 0x1e3   : > { %v12233_v15 = vld [vmem:[#allocation34_spill] sm:$0xff] }
 0x1e5   : > { %7836 = vmatmul.mubr.msk.f32.gmra.mrb[6].mxu1 %vm475_vm1, %v12221_v9  ;;  %8289 = vmatmul.mubr.msk.f32.gmra.mrb[8].mxu0 %vm475_vm1, %v12222_v58  ;;  %v12235_v9 = vld [vmem:[#allocation36_spill] sm:$0xff]  ;;  %v12236_v58 = vld [vmem:[#allocation97_spill] sm:$0xff] }
 0x1e6   : > { %7838 = vmatprep.mubr.msk.f32.mxu1 %vm475_vm1, %v12223_v17  ;;  %8291 = vmatprep.mubr.msk.f32.mxu0 %vm475_vm1, %v12224_v61  ;;  %v12237_v17 = vld [vmem:[#allocation40_spill] sm:$0xff]  ;;  %v12238_v61 = vld [vmem:[#allocation99_spill] sm:$0xff] }
 0x1e9   : > { %7839 = vmatmul.mubr.msk.f32.gmra.mrb[8].mxu1 %vm475_vm1, %v12225_v33  ;;  %8292 = vmatmul.mubr.msk.f32.gmra.mrb[10].mxu0 %vm475_vm1, %v12226_v56  ;;  %v12239_v33 = vld [vmem:[#allocation42_spill] sm:$0xff]  ;;  %v12240_v56 = vld [vmem:[#allocation100_spill] sm:$0xff] }
 0x1ea   : > { %7841 = vmatprep.mubr.msk.f32.mxu1 %vm475_vm1, %v12227_v7  ;;  %8294 = vmatprep.mubr.msk.f32.mxu0 %vm475_vm1, %v12228_v29  ;;  %v12241_v7 = vld [vmem:[#allocation47_spill] sm:$0xff]  ;;  %v12242_v29 = vld [vmem:[#allocation32_spill] sm:$0xff] }
 0x1ed   : > { %7842 = vmatmul.mubr.msk.f32.gmra.mrb[10].mxu1 %vm475_vm1, %v12229_v49  ;;  %8295 = vmatmul.mubr.msk.f32.gmra.mrb[12].mxu0 %vm475_vm1, %v12230_v41  ;;  %v12243_v49 = vld [vmem:[#allocation49_spill] sm:$0xff]  ;;  %v12244_v41 = vld [vmem:[#allocation102_spill] sm:$0xff] }
 0x1ee   : > { %7844 = vmatprep.mubr.msk.f32.mxu1 %vm475_vm1, %v12231_v6  ;;  %8297 = vmatprep.mubr.msk.f32.mxu0 %vm475_vm1, %v12232_v60  ;;  %v12245_v6 = vld [vmem:[#allocation55_spill] sm:$0xff]  ;;  %v12246_v60 = vld [vmem:[#allocation38_spill] sm:$0xff] }
 0x1f1   : > { %7845 = vmatmul.mubr.msk.f32.gmra.mrb[12].mxu1 %vm475_vm1, %v12233_v15  ;;  %8298 = vmatmul.mubr.msk.f32.gmra.mrb[14].mxu0 %vm475_vm1, %v12234_v51  ;;  %v12247_v15 = vld [vmem:[#allocation57_spill] sm:$0xff]  ;;  %v12248_v51 = vld [vmem:[#allocation104_spill] sm:$0xff] }
 0x1f2   : > { %7847 = vmatprep.mubr.msk.f32.mxu1 %vm475_vm1, %v12235_v9  ;;  %8300 = vmatprep.mubr.msk.f32.mxu0 %vm475_vm1, %v12236_v58  ;;  %v12249_v9 = vld [vmem:[#allocation62_spill] sm:$0xff]  ;;  %v12250_v58 = vld [vmem:[#allocation39_spill] sm:$0xff] }
 0x1f5   : > { %7848 = vmatmul.mubr.msk.f32.gmra.mrb[14].mxu1 %vm475_vm1, %v12237_v17  ;;  %8301 = vmatmul.mubr.msk.f32.gmra.mrb[16].mxu0 %vm475_vm1, %v12238_v61  ;;  %v12251_v17 = vld [vmem:[#allocation64_spill] sm:$0xff]  ;;  %v12252_v61 = vld [vmem:[#allocation45_spill] sm:$0xff] }
 0x1f6   : > { %7850 = vmatprep.mubr.msk.f32.mxu1 %vm475_vm1, %v12239_v33  ;;  %8303 = vmatprep.mubr.msk.f32.mxu0 %vm475_vm1, %v12240_v56  ;;  %v12253_v33 = vld [vmem:[#allocation69_spill] sm:$0xff]  ;;  %v12254_v56 = vld [vmem:[#allocation46_spill] sm:$0xff] }
 0x1f9   : > { %7851 = vmatmul.mubr.msk.f32.gmra.mrb[16].mxu1 %vm475_vm1, %v12241_v7  ;;  %8304 = vmatmul.mubr.msk.f32.gmra.mrb[18].mxu0 %vm475_vm1, %v12242_v29  ;;  %v12255_v7 = vld [vmem:[#allocation71_spill] sm:$0xff]  ;;  %v12256_v29 = vld [vmem:[#allocation52_spill] sm:$0xff] }
 0x1fa   : > { %7853 = vmatprep.mubr.msk.f32.mxu1 %vm475_vm1, %v12243_v49  ;;  %8306 = vmatprep.mubr.msk.f32.mxu0 %vm475_vm1, %v12244_v41  ;;  %v5391_v49 = vrot.slane %v11098_v3, 1  ;;  %v5392_v41 = vrot.slane %v11109_v30, 1 }
 0x1fd   : > { %7854 = vmatmul.mubr.msk.f32.gmra.mrb[18].mxu1 %vm475_vm1, %v12245_v6  ;;  %8307 = vmatmul.mubr.msk.f32.gmra.mrb[20].mxu0 %vm475_vm1, %v12246_v60  ;;  %v11236_v6 = vld [vmem:[%s9067_s13 + $0x1a8] sm:$0x3]  ;;  %v12257_v60 = vld [vmem:[#allocation76_spill] sm:$0xff] }
 0x1fe   : > { %7856 = vmatprep.mubr.msk.f32.mxu1 %vm475_vm1, %v12247_v15  ;;  %8309 = vmatprep.mubr.msk.f32.mxu0 %vm475_vm1, %v12248_v51  ;;  %v5394_v15 = vrot.slane %v11236_v6, 1  ;;  %v2538_v51 = vrot.slane %v11112_v59, 1 }
 0x201   : > { %7857 = vmatmul.mubr.msk.f32.gmra.mrb[20].mxu1 %vm475_vm1, %v12249_v9  ;;  %8310 = vmatmul.mubr.msk.f32.gmra.mrb[22].mxu0 %vm475_vm1, %v12250_v58  ;;  %v2539_v9 = vrot.slane %v11121_v14, 1  ;;  %v5393_v58 = vsel %vm394_vm2, %v5391_v49, %v5392_v41 }
 0x202   : > { %7859 = vmatprep.mubr.msk.f32.mxu1 %vm475_vm1, %v12251_v17  ;;  %8312 = vmatprep.mubr.msk.f32.mxu0 %vm475_vm1, %v12252_v61  ;;  %v11251_v17 = vld [vmem:[%s9062_s10 + $0x1a8] sm:$0x3]  ;;  %s6879_s10 = sshll.u32 %s12280_s22, 8 }
 0x203   : > { %s11412_s27 = scalar_lea.vmem %s11586_s5, %s6879_s10 }
 0x205   : > { %7860 = vmatmul.mubr.msk.f32.gmra.mrb[22].mxu1 %vm475_vm1, %v12253_v33  ;;  %8313 = vmatmul.mubr.msk.f32.gmra.mrb[24].mxu0 %vm475_vm1, %v12254_v56 }
 0x206   : > { %7862 = vmatprep.mubr.msk.f32.mxu1 %vm475_vm1, %v12255_v7  ;;  %8315 = vmatprep.mubr.msk.f32.mxu0 %vm475_vm1, %v12256_v29 }
 0x209   : > { %7863 = vmatmul.mubr.msk.f32.gmra.mrb[24].mxu1 %vm475_vm1, %v12145_v40  ;;  %8316 = vmatmul.mubr.msk.f32.gmra.mrb[26].mxu0 %vm475_vm1, %v12146_v16  ;;  %v2541_v16 = vrot.slane %v11251_v17, 1  ;;  %v2540_v40 = vsel %vm394_vm2, %v2538_v51, %v2539_v9 }
 0x20a   : > { %7865 = vmatprep.mubr.msk.f32.mxu1 %vm475_vm1, %v12257_v60  ;;  %8318 = vmatprep.mubr.msk.f32.mxu0 %vm475_vm1, %v10772_v63  ;;  %v5395_v63 = vsel %vm394_vm2, %v5392_v41, %v5394_v15 }
 0x20d   : > { %7866 = vmatmul.mubr.msk.f32.gmra.mrb[26].mxu1 %vm475_vm1, %v12148_v12  ;;  %8319 = vmatmul.mubr.msk.f32.gmra.mrb[28].mxu0 %vm475_vm1, %v10786_v43  ;;  %v2542_v12 = vsel %vm394_vm2, %v2539_v9, %v2541_v16 }
 0x20e   : > { %7868 = vmatprep.mubr.msk.f32.mxu1 %vm475_vm1, %v10790_v42  ;;  %8321 = vmatprep.mubr.msk.f32.mxu0 %vm475_vm1, %v5393_v58 }
 0x211   : > { %7869 = vmatmul.mubr.msk.f32.gmra.mrb[28].mxu1 %vm475_vm1, %v10799_v2  ;;  %8322 = vmatmul.mubr.msk.f32.gmra.mrb[30].mxu0 %vm475_vm1, %v5395_v63 }
 0x212   : > { %7871 = vmatprep.mubr.msk.f32.mxu1 %vm475_vm1, %v2540_v40  ;;  %8326 = vmatprep.mubr.msk.f32.mxu0 %vm475_vm1, %v9978_v48  ;;  %v12258_v48 = vld [vmem:[#allocation2_spill] sm:$0xff] }
 0x215   : > { %7872 = vmatmul.mubr.msk.f32.gmra.mrb[30].mxu1 %vm475_vm1, %v2542_v12  ;;  %8327 = vmatmul.mubr.msk.f32.vlgmr.msra.gmra.mrb[0].mxu0 %vm475_vm1, %v10000_v5  ;;  %v12259_v5 = vld [vmem:[#allocation4_spill] sm:$0xff] }
 0x216   : > { %7876 = vmatprep.mubr.msk.f32.mxu1 %vm475_vm1, %v10007_v46  ;;  %8329 = vmatprep.mubr.msk.f32.mxu0 %vm475_vm1, %v10010_v21  ;;  %v12260_v46 = vld [vmem:[#allocation68_spill] sm:$0xff]  ;;  %v12261_v21 = vld [vmem:[#allocation54_spill] sm:$0xff] }
 0x219   : > { %7877 = vmatmul.mubr.msk.f32.vlgmr.msra.gmra.mrb[0].mxu1 %vm475_vm1, %v10021_v37  ;;  %8330 = vmatmul.mubr.msk.f32.gmra.mrb[2].mxu0 %vm475_vm1, %v10024_v38  ;;  %v12262_v37 = vld [vmem:[#allocation5_spill] sm:$0xff]  ;;  %v12263_v38 = vld [vmem:[#allocation6_spill] sm:$0xff] }
 0x21a   : > { %7879 = vmatprep.mubr.msk.f32.mxu1 %vm475_vm1, %v10031_v50  ;;  %8332 = vmatprep.mubr.msk.f32.mxu0 %vm475_vm1, %v10037_v53  ;;  %v12264_v50 = vld [vmem:[#allocation10_spill] sm:$0xff]  ;;  %v12265_v53 = vld [vmem:[#allocation13_spill] sm:$0xff] }
 0x21d   : > { %7880 = vmatmul.mubr.msk.f32.gmra.mrb[2].mxu1 %vm475_vm1, %v10051_v44  ;;  %8333 = vmatmul.mubr.msk.f32.gmra.mrb[4].mxu0 %vm475_vm1, %v10056_v45  ;;  %v12266_v44 = vld [vmem:[#allocation21_spill] sm:$0xff]  ;;  %v12267_v45 = vld [vmem:[#allocation16_spill] sm:$0xff] }
 0x21e   : > { %7882 = vmatprep.mubr.msk.f32.mxu1 %vm475_vm1, %v10061_v19  ;;  %8335 = vmatprep.mubr.msk.f32.mxu0 %vm475_vm1, %v10064_v11  ;;  %v12268_v19 = vld [vmem:[#allocation25_spill] sm:$0xff]  ;;  %v12269_v11 = vld [vmem:[#allocation19_spill] sm:$0xff] }
 0x221   : > { %7883 = vmatmul.mubr.msk.f32.gmra.mrb[4].mxu1 %vm475_vm1, %v10073_v54  ;;  %8336 = vmatmul.mubr.msk.f32.gmra.mrb[6].mxu0 %vm475_vm1, %v10076_v55  ;;  %v12270_v54 = vld [vmem:[#allocation29_spill] sm:$0xff]  ;;  %v12271_v55 = vld [vmem:[#allocation35_spill] sm:$0xff] }
 0x222   : > { %7885 = vmatprep.mubr.msk.f32.mxu1 %vm475_vm1, %v10083_v13  ;;  %8338 = vmatprep.mubr.msk.f32.mxu0 %vm475_vm1, %v10089_v57  ;;  %v12272_v13 = vld [vmem:[#allocation27_spill] sm:$0xff] }
 0x223   : > { %v12273_v57 = vld [vmem:[#allocation95_spill] sm:$0xff] }
 0x225   : > { %7886 = vmatmul.mubr.msk.f32.gmra.mrb[6].mxu1 %vm475_vm1, %v10103_v0  ;;  %8339 = vmatmul.mubr.msk.f32.gmra.mrb[8].mxu0 %vm475_vm1, %v10108_v1  ;;  %v12274_v0 = vld [vmem:[#allocation33_spill] sm:$0xff]  ;;  %v12275_v1 = vld [vmem:[#allocation43_spill] sm:$0xff] }
 0x226   : > { %7888 = vmatprep.mubr.msk.f32.mxu1 %vm475_vm1, %v10113_v4  ;;  %8341 = vmatprep.mubr.msk.f32.mxu0 %vm475_vm1, %v10116_v22  ;;  %v12276_v4 = vld [vmem:[#allocation48_spill] sm:$0xff]  ;;  %v12277_v22 = vld [vmem:[#allocation37_spill] sm:$0xff] }
 0x229   : > { %7889 = vmatmul.mubr.msk.f32.gmra.mrb[8].mxu1 %vm475_vm1, %v10125_v24  ;;  %8342 = vmatmul.mubr.msk.f32.gmra.mrb[10].mxu0 %vm475_vm1, %v10128_v25  ;;  %v5660_v24 = vrot.slane %v11098_v3, 2  ;;  %v5661_v25 = vrot.slane %v11109_v30, 2 }
 0x22a   : > { %7891 = vmatprep.mubr.msk.f32.mxu1 %vm475_vm1, %v10135_v8  ;;  %8344 = vmatprep.mubr.msk.f32.mxu0 %vm475_vm1, %v10141_v62  ;;  %v12278_v8 = vld [vmem:[#allocation98_spill] sm:$0xff]  ;;  %v5663_v62 = vrot.slane %v11236_v6, 2 }
 0x22d   : > { %7892 = vmatmul.mubr.msk.f32.gmra.mrb[10].mxu1 %vm475_vm1, %v10155_v52  ;;  %8345 = vmatmul.mubr.msk.f32.gmra.mrb[12].mxu0 %vm475_vm1, %v12149_v23  ;;  %v2807_v52 = vrot.slane %v11112_v59, 2  ;;  %v11407_v23 = vld [vmem:[%s11585_s4] ss:$0 sm:$0xff] }
 0x22e   : > { %7894 = vmatprep.mubr.msk.f32.mxu1 %vm475_vm1, %v12258_v48  ;;  %8347 = vmatprep.mubr.msk.f32.mxu0 %vm475_vm1, %v12259_v5 }
 0x231   : > { %7895 = vmatmul.mubr.msk.f32.gmra.mrb[12].mxu1 %vm475_vm1, %v12260_v46  ;;  %8348 = vmatmul.mubr.msk.f32.gmra.mrb[14].mxu0 %vm475_vm1, %v12261_v21 }
 0x232   : > { %7897 = vmatprep.mubr.msk.f32.mxu1 %vm475_vm1, %v12262_v37  ;;  %8350 = vmatprep.mubr.msk.f32.mxu0 %vm475_vm1, %v12263_v38 }
 0x235   : > { %7898 = vmatmul.mubr.msk.f32.gmra.mrb[14].mxu1 %vm475_vm1, %v12264_v50  ;;  %8351 = vmatmul.mubr.msk.f32.gmra.mrb[16].mxu0 %vm475_vm1, %v12265_v53 }
 0x236   : > { %7900 = vmatprep.mubr.msk.f32.mxu1 %vm475_vm1, %v12266_v44  ;;  %8353 = vmatprep.mubr.msk.f32.mxu0 %vm475_vm1, %v12267_v45 }
 0x239   : > { %7901 = vmatmul.mubr.msk.f32.gmra.mrb[16].mxu1 %vm475_vm1, %v12268_v19  ;;  %8354 = vmatmul.mubr.msk.f32.gmra.mrb[18].mxu0 %vm475_vm1, %v12269_v11 }
 0x23a   : > { %7903 = vmatprep.mubr.msk.f32.mxu1 %vm475_vm1, %v12270_v54  ;;  %8356 = vmatprep.mubr.msk.f32.mxu0 %vm475_vm1, %v12163_v26 }
 0x23d   : > { %7904 = vmatmul.mubr.msk.f32.gmra.mrb[18].mxu1 %vm475_vm1, %v12271_v55  ;;  %8357 = vmatmul.mubr.msk.f32.gmra.mrb[20].mxu0 %vm475_vm1, %v12272_v13 }
 0x23e   : > { %7906 = vmatprep.mubr.msk.f32.mxu1 %vm475_vm1, %v12166_v35  ;;  %8359 = vmatprep.mubr.msk.f32.mxu0 %vm475_vm1, %v12167_v47 }
 0x241   : > { %7907 = vmatmul.mubr.msk.f32.gmra.mrb[20].mxu1 %vm475_vm1, %v12273_v57  ;;  %8360 = vmatmul.mubr.msk.f32.gmra.mrb[22].mxu0 %vm475_vm1, %v12274_v0 }
 0x242   : > { %7909 = vmatprep.mubr.msk.f32.mxu1 %vm475_vm1, %v12275_v1  ;;  %8362 = vmatprep.mubr.msk.f32.mxu0 %vm475_vm1, %v12276_v4 }
 0x245   : > { %7910 = vmatmul.mubr.msk.f32.gmra.mrb[22].mxu1 %vm475_vm1, %v10309_v10  ;;  %8363 = vmatmul.mubr.msk.f32.gmra.mrb[24].mxu0 %vm475_vm1, %v10314_v32  ;;  %v5662_v10 = vsel %vm1061_vm3, %v5660_v24, %v5661_v25  ;;  %v5664_v32 = vsel %vm1061_vm3, %v5661_v25, %v5663_v62 }
 0x246   : > { %7912 = vmatprep.mubr.msk.f32.mxu1 %vm475_vm1, %v10319_v31  ;;  %8365 = vmatprep.mubr.msk.f32.mxu0 %vm475_vm1, %v12277_v22  ;;  %v2808_v31 = vrot.slane %v11121_v14, 2 }
 0x249   : > { %7913 = vmatmul.mubr.msk.f32.gmra.mrb[24].mxu1 %vm475_vm1, %v10333_v36  ;;  %8366 = vmatmul.mubr.msk.f32.gmra.mrb[26].mxu0 %vm475_vm1, %v10338_v34  ;;  %v2810_v36 = vrot.slane %v11251_v17, 2  ;;  %v2809_v34 = vsel %vm1061_vm3, %v2807_v52, %v2808_v31 }
 0x24a   : > { %7915 = vmatprep.mubr.msk.f32.mxu1 %vm475_vm1, %v12278_v8  ;;  %8368 = vmatprep.mubr.msk.f32.mxu0 %vm475_vm1, %v10939_v39 }
 0x24d   : > { %7916 = vmatmul.mubr.msk.f32.gmra.mrb[26].mxu1 %vm475_vm1, %v10351_v18  ;;  %8369 = vmatmul.mubr.msk.f32.gmra.mrb[28].mxu0 %vm475_vm1, %v10950_v20  ;;  %v2811_v18 = vsel %vm1061_vm3, %v2808_v31, %v2810_v36 }
 0x24e   : > { %7918 = vmatprep.mubr.msk.f32.mxu1 %vm475_vm1, %v10954_v27  ;;  %8371 = vmatprep.mubr.msk.f32.mxu0 %vm475_vm1, %v5662_v10 }
 0x251   : > { %7919 = vmatmul.mubr.msk.f32.gmra.mrb[28].mxu1 %vm475_vm1, %v10963_v28  ;;  %8372 = vmatmul.mubr.msk.f32.gmra.mrb[30].mxu0 %vm475_vm1, %v5664_v32 }
 0x252   : > { %7921 = vmatprep.mubr.msk.f32.mxu1 %vm475_vm1, %v2809_v34 }
 0x255   : > { %7922 = vmatmul.mubr.msk.f32.gmra.mrb[30].mxu1 %vm475_vm1, %v2811_v18 }
 0x2e8   : > { %v8328_v42 = vpop.f32.mrb[0].mxu0 }
 0x2e9   : > { %v5738_v2 = vpop.f32.mrb[1].mxu0 }
 0x2ec   : > { %v7878_v43 = vpop.f32.mrb[0].mxu1  ;;  %v8331_v35 = vpop.f32.mrb[2].mxu0 }
 0x2ed   : > { %v8374_v47 = vadd.f32 %v8328_v42, %v7878_v43  ;;  %v2885_v28 = vpop.f32.mrb[1].mxu1  ;;  %v5748_v39 = vpop.f32.mrb[3].mxu0 }
 0x2ee   : > { %v8375_v26 = vadd.f32 %v5738_v2, %v2885_v28 }
 0x2ef   : > { %v5937_v20 = vadd.f32 %v8374_v47, %v11407_v23 }
 0x2f0   : > { %v5936_v27 = vadd.f32 %v8375_v26, %v11407_v23  ;;  %v7881_v3 = vpop.f32.mrb[2].mxu1  ;;  %v8334_v30 = vpop.f32.mrb[4].mxu0 }
 0x2f1   : > { %5970 = vst.msk [vmem:[%s11412_s27 + $0x8] sm:$0xff] %vm5968_vm4, %v5937_v20  ;;  %v6002_v59 = vsel %vm5968_vm4, %v5937_v20, 0.0  ;;  %v6073_v14 = vmul.f32 %v5937_v20, %v5937_v20  ;;  %v8376_v61 = vadd.f32 %v8331_v35, %v7881_v3  ;;  %v2895_v33 = vpop.f32.mrb[3].mxu1  ;;  %v5758_v56 = vpop.f32.mrb[5].mxu0 }
 0x2f2   : > { %5969 = vst.msk [vmem:[%s11412_s27] sm:$0xff] %vm5968_vm4, %v5936_v27  ;;  %v6001_v7 = vsel %vm5968_vm4, %v5936_v27, 0.0  ;;  %v6072_v29 = vmul.f32 %v5936_v27, %v5936_v27  ;;  %v8377_v49 = vadd.f32 %v5748_v39, %v2895_v33 }
 0x2f3   : > { %v6105_v41 = vsel %vm5968_vm4, %v6073_v14, 0.0  ;;  %v6003_v6 = vadd.f32 %v6002_v59, %v6001_v7  ;;  %v5939_v60 = vadd.f32 %v8376_v61, %v11407_v23 }
 0x2f4   : > { %v6104_v15 = vsel %vm5968_vm4, %v6072_v29, 0.0  ;;  %v5938_v51 = vadd.f32 %v8377_v49, %v11407_v23  ;;  %v7884_v9 = vpop.f32.mrb[4].mxu1  ;;  %v8337_v58 = vpop.f32.mrb[6].mxu0 }
 0x2f5   : > { %v6106_v17 = vadd.f32 %v6105_v41, %v6104_v15  ;;  %5972 = vst.msk [vmem:[%s11412_s27 + $0x18] sm:$0xff] %vm5968_vm4, %v5939_v60  ;;  %v6075_v63 = vmul.f32 %v5939_v60, %v5939_v60  ;;  %v8378_v16 = vadd.f32 %v8334_v30, %v7884_v9  ;;  %v2905_v40 = vpop.f32.mrb[5].mxu1  ;;  %v5768_v12 = vpop.f32.mrb[7].mxu0  ;;  %v6006_v38 = vsel %vm5968_vm4, %v5939_v60, 0.0 }
 0x2f6   : > { %5971 = vst.msk [vmem:[%s11412_s27 + $0x10] sm:$0xff] %vm5968_vm4, %v5938_v51  ;;  %v6004_v48 = vsel %vm5968_vm4, %v5938_v51, 0.0  ;;  %v6074_v5 = vmul.f32 %v5938_v51, %v5938_v51  ;;  %v8379_v46 = vadd.f32 %v5758_v56, %v2905_v40 }
 0x2f7   : > { %v6005_v21 = vadd.f32 %v6004_v48, %v6003_v6  ;;  %v5941_v37 = vadd.f32 %v8378_v16, %v11407_v23  ;;  %v6109_v19 = vsel %vm5968_vm4, %v6075_v63, 0.0 }
 0x2f8   : > { %v6107_v50 = vsel %vm5968_vm4, %v6074_v5, 0.0  ;;  %v5940_v53 = vadd.f32 %v8379_v46, %v11407_v23  ;;  %v7887_v44 = vpop.f32.mrb[6].mxu1  ;;  %v8340_v45 = vpop.f32.mrb[8].mxu0 }
 0x2f9   : > { %v6108_v11 = vadd.f32 %v6107_v50, %v6106_v17  ;;  %5974 = vst.msk [vmem:[%s11412_s27 + $0x28] sm:$0xff] %vm5968_vm4, %v5941_v37  ;;  %v6077_v54 = vmul.f32 %v5941_v37, %v5941_v37  ;;  %v6007_v55 = vadd.f32 %v6006_v38, %v6005_v21  ;;  %v2915_v13 = vpop.f32.mrb[7].mxu1  ;;  %v5778_v57 = vpop.f32.mrb[9].mxu0  ;;  %v8380_v4 = vadd.f32 %v8337_v58, %v7887_v44 }
 0x2fa   : > { %5973 = vst.msk [vmem:[%s11412_s27 + $0x20] sm:$0xff] %vm5968_vm4, %v5940_v53  ;;  %v6008_v0 = vsel %vm5968_vm4, %v5940_v53, 0.0  ;;  %v6076_v1 = vmul.f32 %v5940_v53, %v5940_v53  ;;  %v8381_v22 = vadd.f32 %v5768_v12, %v2915_v13  ;;  %v6010_v8 = vsel %vm5968_vm4, %v5941_v37, 0.0 }
 0x2fb   : > { %v6009_v24 = vadd.f32 %v6008_v0, %v6007_v55  ;;  %v6110_v25 = vadd.f32 %v6109_v19, %v6108_v11  ;;  %v5943_v52 = vadd.f32 %v8380_v4, %v11407_v23  ;;  %v6113_v43 = vsel %vm5968_vm4, %v6077_v54, 0.0 }
 0x2fc   : > { %v6111_v62 = vsel %vm5968_vm4, %v6076_v1, 0.0  ;;  %v5942_v31 = vadd.f32 %v8381_v22, %v11407_v23  ;;  %v7890_v10 = vpop.f32.mrb[8].mxu1  ;;  %v8343_v32 = vpop.f32.mrb[10].mxu0 }
 0x2fd   : > { %v6112_v36 = vadd.f32 %v6111_v62, %v6110_v25  ;;  %v6011_v34 = vadd.f32 %v6010_v8, %v6009_v24  ;;  %v8382_v18 = vadd.f32 %v8340_v45, %v7890_v10  ;;  %v2925_v42 = vpop.f32.mrb[9].mxu1  ;;  %v5788_v2 = vpop.f32.mrb[11].mxu0  ;;  %5976 = vst.msk [vmem:[%s11412_s27 + $0x38] sm:$0xff] %vm5968_vm4, %v5943_v52  ;;  %v6079_v35 = vmul.f32 %v5943_v52, %v5943_v52 }
 0x2fe   : > { %5975 = vst.msk [vmem:[%s11412_s27 + $0x30] sm:$0xff] %vm5968_vm4, %v5942_v31  ;;  %v6012_v47 = vsel %vm5968_vm4, %v5942_v31, 0.0  ;;  %v6078_v28 = vmul.f32 %v5942_v31, %v5942_v31  ;;  %v8383_v27 = vadd.f32 %v5778_v57, %v2925_v42  ;;  %v6014_v14 = vsel %vm5968_vm4, %v5943_v52, 0.0 }
 0x2ff   : > { %v6013_v39 = vadd.f32 %v6012_v47, %v6011_v34  ;;  %v6114_v26 = vadd.f32 %v6113_v43, %v6112_v36  ;;  %v5945_v20 = vadd.f32 %v8382_v18, %v11407_v23  ;;  %v6117_v61 = vsel %vm5968_vm4, %v6079_v35, 0.0 }
 0x300   : > { %v6115_v3 = vsel %vm5968_vm4, %v6078_v28, 0.0  ;;  %v7893_v30 = vpop.f32.mrb[10].mxu1  ;;  %v8346_v59 = vpop.f32.mrb[12].mxu0  ;;  %v5944_v56 = vadd.f32 %v8383_v27, %v11407_v23 }
 0x301   : > { %v6116_v33 = vadd.f32 %v6115_v3, %v6114_v26  ;;  %5978 = vst.msk [vmem:[%s11412_s27 + $0x48] sm:$0xff] %vm5968_vm4, %v5945_v20  ;;  %v2935_v7 = vpop.f32.mrb[11].mxu1  ;;  %v5798_v29 = vpop.f32.mrb[13].mxu0  ;;  %v6081_v49 = vmul.f32 %v5945_v20, %v5945_v20  ;;  %v6015_v41 = vadd.f32 %v6014_v14, %v6013_v39  ;;  %v8384_v6 = vadd.f32 %v8343_v32, %v7893_v30 }
 0x302   : > { %v8385_v60 = vadd.f32 %v5788_v2, %v2935_v7  ;;  %5977 = vst.msk [vmem:[%s11412_s27 + $0x40] sm:$0xff] %vm5968_vm4, %v5944_v56  ;;  %v6016_v15 = vsel %vm5968_vm4, %v5944_v56, 0.0  ;;  %v6080_v51 = vmul.f32 %v5944_v56, %v5944_v56  ;;  %v6018_v12 = vsel %vm5968_vm4, %v5945_v20, 0.0 }
 0x303   : > { %v6118_v9 = vadd.f32 %v6117_v61, %v6116_v33  ;;  %v6017_v58 = vadd.f32 %v6016_v15, %v6015_v41  ;;  %v5947_v17 = vadd.f32 %v8384_v6, %v11407_v23  ;;  %v6121_v37 = vsel %vm5968_vm4, %v6081_v49, 0.0 }
 0x304   : > { %v5946_v63 = vadd.f32 %v8385_v60, %v11407_v23  ;;  %v7896_v16 = vpop.f32.mrb[12].mxu1  ;;  %v8349_v40 = vpop.f32.mrb[14].mxu0  ;;  %v6119_v48 = vsel %vm5968_vm4, %v6080_v51, 0.0 }
 0x305   : > { %v8386_v5 = vadd.f32 %v8346_v59, %v7896_v16  ;;  %v2945_v46 = vpop.f32.mrb[13].mxu1  ;;  %v5808_v21 = vpop.f32.mrb[15].mxu0  ;;  %v6120_v38 = vadd.f32 %v6119_v48, %v6118_v9  ;;  %5980 = vst.msk [vmem:[%s11412_s27 + $0x58] sm:$0xff] %vm5968_vm4, %v5947_v17  ;;  %v6083_v50 = vmul.f32 %v5947_v17, %v5947_v17  ;;  %v6019_v53 = vadd.f32 %v6018_v12, %v6017_v58 }
 0x306   : > { %5979 = vst.msk [vmem:[%s11412_s27 + $0x50] sm:$0xff] %vm5968_vm4, %v5946_v63  ;;  %v6020_v44 = vsel %vm5968_vm4, %v5946_v63, 0.0  ;;  %v6082_v45 = vmul.f32 %v5946_v63, %v5946_v63  ;;  %v8387_v11 = vadd.f32 %v5798_v29, %v2945_v46  ;;  %v6022_v0 = vsel %vm5968_vm4, %v5947_v17, 0.0 }
 0x307   : > { %v5949_v19 = vadd.f32 %v8386_v5, %v11407_v23  ;;  %v6021_v54 = vadd.f32 %v6020_v44, %v6019_v53  ;;  %v6122_v55 = vadd.f32 %v6121_v37, %v6120_v38  ;;  %v6125_v10 = vsel %vm5968_vm4, %v6083_v50, 0.0 }
 0x308   : > { %v7899_v13 = vpop.f32.mrb[14].mxu1  ;;  %v8352_v57 = vpop.f32.mrb[16].mxu0  ;;  %v6123_v1 = vsel %vm5968_vm4, %v6082_v45, 0.0  ;;  %v5948_v22 = vadd.f32 %v8387_v11, %v11407_v23 }
 0x309   : > { %5982 = vst.msk [vmem:[%s11412_s27 + $0x68] sm:$0xff] %vm5968_vm4, %v5949_v19  ;;  %v6085_v4 = vmul.f32 %v5949_v19, %v5949_v19  ;;  %v2955_v24 = vpop.f32.mrb[15].mxu1  ;;  %v5818_v25 = vpop.f32.mrb[17].mxu0  ;;  %v6124_v8 = vadd.f32 %v6123_v1, %v6122_v55  ;;  %v6023_v62 = vadd.f32 %v6022_v0, %v6021_v54  ;;  %v8388_v52 = vadd.f32 %v8349_v40, %v7899_v13 }
 0x30a   : > { %v8389_v31 = vadd.f32 %v5808_v21, %v2955_v24  ;;  %5981 = vst.msk [vmem:[%s11412_s27 + $0x60] sm:$0xff] %vm5968_vm4, %v5948_v22  ;;  %v6024_v32 = vsel %vm5968_vm4, %v5948_v22, 0.0  ;;  %v6084_v36 = vmul.f32 %v5948_v22, %v5948_v22  ;;  %v6026_v47 = vsel %vm5968_vm4, %v5949_v19, 0.0 }
 0x30b   : > { %v6025_v34 = vadd.f32 %v6024_v32, %v6023_v62  ;;  %v6126_v18 = vadd.f32 %v6125_v10, %v6124_v8  ;;  %v5951_v42 = vadd.f32 %v8388_v52, %v11407_v23  ;;  %v6129_v27 = vsel %vm5968_vm4, %v6085_v4, 0.0 }
 0x30c   : > { %v5950_v2 = vadd.f32 %v8389_v31, %v11407_v23  ;;  %v7902_v43 = vpop.f32.mrb[16].mxu1  ;;  %v8355_v35 = vpop.f32.mrb[18].mxu0  ;;  %v6127_v28 = vsel %vm5968_vm4, %v6084_v36, 0.0 }
 0x30d   : > { %v8390_v39 = vadd.f32 %v8352_v57, %v7902_v43  ;;  %v2965_v26 = vpop.f32.mrb[17].mxu1  ;;  %v5828_v20 = vpop.f32.mrb[19].mxu0  ;;  %v6128_v3 = vadd.f32 %v6127_v28, %v6126_v18  ;;  %5984 = vst.msk [vmem:[%s11412_s27 + $0x78] sm:$0xff] %vm5968_vm4, %v5951_v42  ;;  %v6087_v30 = vmul.f32 %v5951_v42, %v5951_v42  ;;  %v6027_v59 = vadd.f32 %v6026_v47, %v6025_v34 }
 0x30e   : > { %5983 = vst.msk [vmem:[%s11412_s27 + $0x70] sm:$0xff] %vm5968_vm4, %v5950_v2  ;;  %v6028_v14 = vsel %vm5968_vm4, %v5950_v2, 0.0  ;;  %v6086_v61 = vmul.f32 %v5950_v2, %v5950_v2  ;;  %v8391_v56 = vadd.f32 %v5818_v25, %v2965_v26  ;;  %v6030_v6 = vsel %vm5968_vm4, %v5951_v42, 0.0 }
 0x30f   : > { %v5953_v33 = vadd.f32 %v8390_v39, %v11407_v23  ;;  %v6029_v7 = vadd.f32 %v6028_v14, %v6027_v59  ;;  %v6130_v29 = vadd.f32 %v6129_v27, %v6128_v3  ;;  %v6133_v12 = vsel %vm5968_vm4, %v6087_v30, 0.0 }
 0x310   : > { %v7905_v49 = vpop.f32.mrb[18].mxu1  ;;  %v8358_v41 = vpop.f32.mrb[20].mxu0  ;;  %v6131_v60 = vsel %vm5968_vm4, %v6086_v61, 0.0  ;;  %v5952_v51 = vadd.f32 %v8391_v56, %v11407_v23 }
 0x311   : > { %5986 = vst.msk [vmem:[%s11412_s27 + $0x88] sm:$0xff] %vm5968_vm4, %v5953_v33  ;;  %v6089_v15 = vmul.f32 %v5953_v33, %v5953_v33  ;;  %v2975_v9 = vpop.f32.mrb[19].mxu1  ;;  %v5838_v58 = vpop.f32.mrb[21].mxu0  ;;  %v6132_v17 = vadd.f32 %v6131_v60, %v6130_v29  ;;  %v6031_v63 = vadd.f32 %v6030_v6, %v6029_v7  ;;  %v8392_v16 = vadd.f32 %v8355_v35, %v7905_v49 }
 0x312   : > { %v8393_v40 = vadd.f32 %v5828_v20, %v2975_v9  ;;  %5985 = vst.msk [vmem:[%s11412_s27 + $0x80] sm:$0xff] %vm5968_vm4, %v5952_v51  ;;  %v6032_v48 = vsel %vm5968_vm4, %v5952_v51, 0.0  ;;  %v6088_v5 = vmul.f32 %v5952_v51, %v5952_v51  ;;  %v6034_v44 = vsel %vm5968_vm4, %v5953_v33, 0.0 }
 0x313   : > { %v6033_v46 = vadd.f32 %v6032_v48, %v6031_v63  ;;  %v6134_v21 = vadd.f32 %v6133_v12, %v6132_v17  ;;  %v5955_v37 = vadd.f32 %v8392_v16, %v11407_v23  ;;  %v6137_v55 = vsel %vm5968_vm4, %v6089_v15, 0.0 }
 0x314   : > { %v5954_v38 = vadd.f32 %v8393_v40, %v11407_v23  ;;  %v7908_v50 = vpop.f32.mrb[20].mxu1  ;;  %v8361_v53 = vpop.f32.mrb[22].mxu0  ;;  %v6135_v45 = vsel %vm5968_vm4, %v6088_v5, 0.0 }
 0x315   : > { %v8394_v19 = vadd.f32 %v8358_v41, %v7908_v50  ;;  %v2985_v11 = vpop.f32.mrb[21].mxu1  ;;  %v5848_v54 = vpop.f32.mrb[23].mxu0  ;;  %v6136_v13 = vadd.f32 %v6135_v45, %v6134_v21  ;;  %5988 = vst.msk [vmem:[%s11412_s27 + $0x98] sm:$0xff] %vm5968_vm4, %v5955_v37  ;;  %v6091_v57 = vmul.f32 %v5955_v37, %v5955_v37  ;;  %v6035_v0 = vadd.f32 %v6034_v44, %v6033_v46 }
 0x316   : > { %5987 = vst.msk [vmem:[%s11412_s27 + $0x90] sm:$0xff] %vm5968_vm4, %v5954_v38  ;;  %v6036_v1 = vsel %vm5968_vm4, %v5954_v38, 0.0  ;;  %v6090_v4 = vmul.f32 %v5954_v38, %v5954_v38  ;;  %v8395_v24 = vadd.f32 %v5838_v58, %v2985_v11  ;;  %v6038_v31 = vsel %vm5968_vm4, %v5955_v37, 0.0 }
 0x317   : > { %v5957_v22 = vadd.f32 %v8394_v19, %v11407_v23  ;;  %v6037_v25 = vadd.f32 %v6036_v1, %v6035_v0  ;;  %v6138_v8 = vadd.f32 %v6137_v55, %v6136_v13  ;;  %v6141_v47 = vsel %vm5968_vm4, %v6091_v57, 0.0 }
 0x318   : > { %v7911_v62 = vpop.f32.mrb[22].mxu1  ;;  %v8364_v52 = vpop.f32.mrb[24].mxu0  ;;  %v6139_v10 = vsel %vm5968_vm4, %v6090_v4, 0.0  ;;  %v5956_v36 = vadd.f32 %v8395_v24, %v11407_v23 }
 0x319   : > { %5990 = vst.msk [vmem:[%s11412_s27 + $0xa8] sm:$0xff] %vm5968_vm4, %v5957_v22  ;;  %v6093_v32 = vmul.f32 %v5957_v22, %v5957_v22  ;;  %v2995_v34 = vpop.f32.mrb[23].mxu1  ;;  %v5858_v18 = vpop.f32.mrb[25].mxu0  ;;  %v6140_v42 = vadd.f32 %v6139_v10, %v6138_v8  ;;  %v6039_v2 = vadd.f32 %v6038_v31, %v6037_v25  ;;  %v8396_v43 = vadd.f32 %v8361_v53, %v7911_v62 }
 0x31a   : > { %v8397_v35 = vadd.f32 %v5848_v54, %v2995_v34  ;;  %5989 = vst.msk [vmem:[%s11412_s27 + $0xa0] sm:$0xff] %vm5968_vm4, %v5956_v36  ;;  %v6040_v28 = vsel %vm5968_vm4, %v5956_v36, 0.0  ;;  %v6092_v39 = vmul.f32 %v5956_v36, %v5956_v36  ;;  %v6042_v14 = vsel %vm5968_vm4, %v5957_v22, 0.0 }
 0x31b   : > { %v6041_v26 = vadd.f32 %v6040_v28, %v6039_v2  ;;  %v6142_v20 = vadd.f32 %v6141_v47, %v6140_v42  ;;  %v5959_v27 = vadd.f32 %v8396_v43, %v11407_v23  ;;  %v6145_v29 = vsel %vm5968_vm4, %v6093_v32, 0.0 }
 0x31c   : > { %v5958_v3 = vadd.f32 %v8397_v35, %v11407_v23  ;;  %v7914_v30 = vpop.f32.mrb[24].mxu1  ;;  %v8367_v59 = vpop.f32.mrb[26].mxu0  ;;  %v6143_v61 = vsel %vm5968_vm4, %v6092_v39, 0.0 }
 0x31d   : > { %v8398_v33 = vadd.f32 %v8364_v52, %v7914_v30  ;;  %v3005_v56 = vpop.f32.mrb[25].mxu1  ;;  %v5868_v7 = vpop.f32.mrb[27].mxu0  ;;  %v6144_v49 = vadd.f32 %v6143_v61, %v6142_v20  ;;  %5992 = vst.msk [vmem:[%s11412_s27 + $0xb8] sm:$0xff] %vm5968_vm4, %v5959_v27  ;;  %v6095_v41 = vmul.f32 %v5959_v27, %v5959_v27  ;;  %v6043_v6 = vadd.f32 %v6042_v14, %v6041_v26 }
 0x31e   : > { %5991 = vst.msk [vmem:[%s11412_s27 + $0xb0] sm:$0xff] %vm5968_vm4, %v5958_v3  ;;  %v6044_v60 = vsel %vm5968_vm4, %v5958_v3, 0.0  ;;  %v6094_v15 = vmul.f32 %v5958_v3, %v5958_v3  ;;  %v8399_v9 = vadd.f32 %v5858_v18, %v3005_v56  ;;  %v6046_v40 = vsel %vm5968_vm4, %v5959_v27, 0.0 }
 0x31f   : > { %v5961_v51 = vadd.f32 %v8398_v33, %v11407_v23  ;;  %v6045_v58 = vadd.f32 %v6044_v60, %v6043_v6  ;;  %v6146_v17 = vadd.f32 %v6145_v29, %v6144_v49  ;;  %v6149_v44 = vsel %vm5968_vm4, %v6095_v41, 0.0 }
 0x320   : > { %v7917_v63 = vpop.f32.mrb[26].mxu1  ;;  %v8370_v16 = vpop.f32.mrb[28].mxu0  ;;  %v6147_v12 = vsel %vm5968_vm4, %v6094_v15, 0.0  ;;  %v5960_v5 = vadd.f32 %v8399_v9, %v11407_v23 }
 0x321   : > { %5994 = vst.msk [vmem:[%s11412_s27 + $0xc8] sm:$0xff] %vm5968_vm4, %v5961_v51  ;;  %v6097_v48 = vmul.f32 %v5961_v51, %v5961_v51  ;;  %v3015_v46 = vpop.f32.mrb[27].mxu1  ;;  %v5878_v21 = vpop.f32.mrb[29].mxu0  ;;  %v6148_v37 = vadd.f32 %v6147_v12, %v6146_v17  ;;  %v6047_v38 = vadd.f32 %v6046_v40, %v6045_v58  ;;  %v8400_v50 = vadd.f32 %v8367_v59, %v7917_v63 }
 0x322   : > { %v8401_v53 = vadd.f32 %v5868_v7, %v3015_v46  ;;  %5993 = vst.msk [vmem:[%s11412_s27 + $0xc0] sm:$0xff] %vm5968_vm4, %v5960_v5  ;;  %v6048_v45 = vsel %vm5968_vm4, %v5960_v5, 0.0  ;;  %v6096_v19 = vmul.f32 %v5960_v5, %v5960_v5  ;;  %v6050_v1 = vsel %vm5968_vm4, %v5961_v51, 0.0 }
 0x323   : > { %v6049_v11 = vadd.f32 %v6048_v45, %v6047_v38  ;;  %v6150_v54 = vadd.f32 %v6149_v44, %v6148_v37  ;;  %v5963_v55 = vadd.f32 %v8400_v50, %v11407_v23  ;;  %v6153_v8 = vsel %vm5968_vm4, %v6097_v48, 0.0 }
 0x324   : > { %v5962_v13 = vadd.f32 %v8401_v53, %v11407_v23  ;;  %v7920_v57 = vpop.f32.mrb[28].mxu1  ;;  %v8373_v0 = vpop.f32.mrb[30].mxu0  ;;  %v6151_v4 = vsel %vm5968_vm4, %v6096_v19, 0.0 }
 0x325   : > { %v8402_v22 = vadd.f32 %v8370_v16, %v7920_v57  ;;  %v3025_v24 = vpop.f32.mrb[29].mxu1  ;;  %v5888_v25 = vpop.f32.mrb[31].mxu0  ;;  %v6152_v62 = vadd.f32 %v6151_v4, %v6150_v54  ;;  %5996 = vst.msk [vmem:[%s11412_s27 + $0xd8] sm:$0xff] %vm5968_vm4, %v5963_v55  ;;  %v6099_v52 = vmul.f32 %v5963_v55, %v5963_v55  ;;  %v6051_v31 = vadd.f32 %v6050_v1, %v6049_v11 }
 0x326   : > { %5995 = vst.msk [vmem:[%s11412_s27 + $0xd0] sm:$0xff] %vm5968_vm4, %v5962_v13  ;;  %v6052_v10 = vsel %vm5968_vm4, %v5962_v13, 0.0  ;;  %v6098_v32 = vmul.f32 %v5962_v13, %v5962_v13  ;;  %v8403_v34 = vadd.f32 %v5878_v21, %v3025_v24  ;;  %v6054_v43 = vsel %vm5968_vm4, %v5963_v55, 0.0 }
 0x327   : > { %v5965_v36 = vadd.f32 %v8402_v22, %v11407_v23  ;;  %v6053_v18 = vadd.f32 %v6052_v10, %v6051_v31  ;;  %v6154_v42 = vadd.f32 %v6153_v8, %v6152_v62  ;;  %v6157_v3 = vsel %vm5968_vm4, %v6099_v52, 0.0 }
 0x328   : > { %v7923_v2 = vpop.f32.mrb[30].mxu1  ;;  %v6155_v35 = vsel %vm5968_vm4, %v6098_v32, 0.0  ;;  %v5964_v47 = vadd.f32 %v8403_v34, %v11407_v23 }
 0x329   : > { %5998 = vst.msk [vmem:[%s11412_s27 + $0xe8] sm:$0xff] %vm5968_vm4, %v5965_v36  ;;  %v3035_v28 = vpop.f32.mrb[31].mxu1  ;;  %v6156_v39 = vadd.f32 %v6155_v35, %v6154_v42  ;;  %v6055_v26 = vadd.f32 %v6054_v43, %v6053_v18  ;;  %v8404_v20 = vadd.f32 %v8373_v0, %v7923_v2  ;;  %v6101_v30 = vmul.f32 %v5965_v36, %v5965_v36 }
 0x32a   : > { %v8405_v27 = vadd.f32 %v5888_v25, %v3035_v28  ;;  %5997 = vst.msk [vmem:[%s11412_s27 + $0xe0] sm:$0xff] %vm5968_vm4, %v5964_v47  ;;  %v6056_v59 = vsel %vm5968_vm4, %v5964_v47, 0.0  ;;  %v6100_v14 = vmul.f32 %v5964_v47, %v5964_v47  ;;  %v6058_v29 = vsel %vm5968_vm4, %v5965_v36, 0.0 }
 0x32b   : > { %v6057_v61 = vadd.f32 %v6056_v59, %v6055_v26  ;;  %v6158_v33 = vadd.f32 %v6157_v3, %v6156_v39  ;;  %v5967_v56 = vadd.f32 %v8404_v20, %v11407_v23  ;;  %v6161_v51 = vsel %vm5968_vm4, %v6101_v30, 0.0 }
 0x32c   : > { %v5966_v7 = vadd.f32 %v8405_v27, %v11407_v23  ;;  %v6159_v49 = vsel %vm5968_vm4, %v6100_v14, 0.0 }
 0x32d   : > { %v6160_v41 = vadd.f32 %v6159_v49, %v6158_v33  ;;  %6000 = vst.msk [vmem:[%s11412_s27 + $0xf8] sm:$0xff] %vm5968_vm4, %v5967_v56  ;;  %v6062_v6 = vsel %vm5968_vm4, %v5967_v56, 0.0  ;;  %v6103_v60 = vmul.f32 %v5967_v56, %v5967_v56  ;;  %v6059_v15 = vadd.f32 %v6058_v29, %v6057_v61 }
 0x32e   : > { %5999 = vst.msk [vmem:[%s11412_s27 + $0xf0] sm:$0xff] %vm5968_vm4, %v5966_v7  ;;  %v6060_v9 = vsel %vm5968_vm4, %v5966_v7, 0.0  ;;  %v6102_v58 = vmul.f32 %v5966_v7, %v5966_v7 }
 0x32f   : > { %v6165_v23 = vsel %vm5968_vm4, %v6103_v60, 0.0  ;;  %v6061_v17 = vadd.f32 %v6060_v9, %v6059_v15  ;;  %v6162_v63 = vadd.f32 %v6161_v51, %v6160_v41 }
 0x330   : > { %v6163_v16 = vsel %vm5968_vm4, %v6102_v58, 0.0 }
 0x331   : > { %v6063_v40 = vadd.f32 %v6062_v6, %v6061_v17  ;;  %v6164_v12 = vadd.f32 %v6163_v16, %v6162_v63 }
 0x333   : > { %v6064_v48 = vrot.slane %v6063_v40, 4  ;;  %v6166_v5 = vadd.f32 %v6165_v23, %v6164_v12 }
 0x335   : > { %v6065_v46 = vadd.f32 %v6064_v48, %v6063_v40  ;;  %v6167_v21 = vrot.slane %v6166_v5, 4 }
 0x337   : > { %v6066_v37 = vrot.slane %v6065_v46, 2  ;;  %v6168_v38 = vadd.f32 %v6167_v21, %v6166_v5 }
 0x339   : > { %v6067_v50 = vadd.f32 %v6066_v37, %v6065_v46  ;;  %v6169_v53 = vrot.slane %v6168_v38, 2 }
 0x33b   : > { %v6068_v44 = vrot.slane %v6067_v50, 1  ;;  %v6170_v45 = vadd.f32 %v6169_v53, %v6168_v38 }
 0x33d   : > { %v6069_v19 = vadd.f32 %v6068_v44, %v6067_v50  ;;  %v6171_v11 = vrot.slane %v6170_v45, 1 }
 0x33f   : > { %6071 = vst.msk [vmem:[%s282_s7] sm:$0x1] %vm6070_vm5, %v6069_v19  ;;  %v6172_v54 = vadd.f32 %v6171_v11, %v6170_v45 }
 0x341   : > { %6173 = vst.msk [vmem:[%s282_s7 + $0x1] sm:$0x1] %vm6070_vm5, %v6172_v54 }
 0x342 PF: > { %s17_s21 = sadd.s32 1, %s8993_s21  }
 0x343   : > { %p14_p4 = scmp.ge.s32.totalorder %s17_s21, 4  }
 0x345   :  { %16 = sbr.rel (!%p14_p4) target bundleno = 1 (0x1), region = 85 }

</bundles_post_ra>
